<compile_context>
chip_gen: v5e
topology: v5e:2x2
jax: 0.10.0
libtpu: 0.0.40
codegen_flags: <defaults>
</compile_context>

<pallas_src>
import functools

import jax
import jax.numpy as jnp
from jax.experimental import pallas as pl
from jax.experimental.pallas import tpu as pltpu


# ---------------------------------------------------------------------------
# Small helpers
# ---------------------------------------------------------------------------

def _round_up(v, m):
    return ((v + m - 1) // m) * m


@functools.lru_cache(maxsize=None)
def _vmem_limit_bytes():
    """~half of physical VMEM: 32 MiB on v7x, 64 MiB on v5e/v6e."""
    try:
        cap = int(pltpu.get_tpu_info().vmem_capacity_bytes)
    except Exception:
        cap = 128 * 1024 * 1024
    return int(min(cap // 2, 96 * 1024 * 1024))


def _compiler_params(n_grid_dims):
    return pltpu.CompilerParams(
        dimension_semantics=("parallel",) * n_grid_dims,
        vmem_limit_bytes=_vmem_limit_bytes(),
    )


def _pick_row_tile(n, target=2048, mult=16):
    """Large, sublane-aligned row tile; prefer one that divides n (no padding)."""
    if n <= target:
        n_pad = _round_up(n, 8)
        return n_pad, n_pad
    t = (target // mult) * mult
    while t >= mult:
        if n % t == 0:
            return t, n
        t -= mult
    t = (target // mult) * mult
    return t, _round_up(n, t)


# ---------------------------------------------------------------------------
# Pallas kernels
# ---------------------------------------------------------------------------

def _pointwise_ab_kernel(x_ref, wa_ref, wb_ref, sa_ref, ba_ref, sb_ref, bb_ref,
                         a_ref, b_ref, *, fuse_ab):
    """a = relu(bn_a(x@Wa)) ; b = relu(bn_b(x@Wb)), row-tiled over N."""
    x = x_ref[...]
    cf = a_ref.shape[1]
    if fuse_ab:
        # cf % 128 == 0: one 2*cf-wide matmul fills the 256-wide MXU (v6e/v7x),
        # and the split below is lane-tile aligned.
        w = jnp.concatenate([wa_ref[...], wb_ref[...]], axis=1)
        y = jnp.dot(x, w, preferred_element_type=jnp.float32)
        ya, yb = y[:, :cf], y[:, cf:]
    else:
        ya = jnp.dot(x, wa_ref[...], preferred_element_type=jnp.float32)
        yb = jnp.dot(x, wb_ref[...], preferred_element_type=jnp.float32)
    a_ref[...] = jnp.maximum(ya * sa_ref[...] + ba_ref[...], 0.0).astype(a_ref.dtype)
    b_ref[...] = jnp.maximum(yb * sb_ref[...] + bb_ref[...], 0.0).astype(b_ref.dtype)


def _conv3x3_acc(xp_ref, w_ref, H, W):
    """Sum of 9 shifted-tap matmuls over a (1, H+2, W+2, Cin) padded block."""
    cin = xp_ref.shape[3]
    acc = None
    for dy in range(3):
        for dx in range(3):
            tap = xp_ref[0, dy:dy + H, dx:dx + W, :].reshape(H * W, cin)
            p = jnp.dot(tap, w_ref[dy * 3 + dx],
                        preferred_element_type=jnp.float32)
            acc = p if acc is None else acc + p
    return acc  # (H*W, Cout) f32


def _conv3x3_bn_kernel(xp_ref, w_ref, s_ref, sh_ref, o_ref):
    """3x3 conv (9 in-kernel taps) + folded BatchNorm affine."""
    _, H, W, cout = o_ref.shape
    y = _conv3x3_acc(xp_ref, w_ref, H, W) * s_ref[...] + sh_ref[...]
    o_ref[0] = y.reshape(H, W, cout).astype(o_ref.dtype)


def _k3_gate_kernel(ap_ref, x_ref, up_ref, w3_ref, wa_ref, s_ref, sh_ref, o_ref):
    """out = bn(conv3x3(a)) * sigmoid(x@Wa + upsampled_k2), fully fused."""
    _, H, W, cout = o_ref.shape
    y3 = _conv3x3_acc(ap_ref, w3_ref, H, W) * s_ref[...] + sh_ref[...]
    # identity = conv1_a(x) recomputed in-kernel (C_in is tiny vs. storing it).
    x = x_ref[0].reshape(H * W, x_ref.shape[3])
    ident = jnp.dot(x, wa_ref[...], preferred_element_type=jnp.float32)
    z = ident + up_ref[0].reshape(H * W, cout).astype(jnp.float32)
    gate = pl.reciprocal(1.0 + jnp.exp(-z), approx=True)   # EUP slot
    o_ref[0] = (y3 * gate).reshape(H, W, cout).astype(o_ref.dtype)


# ---------------------------------------------------------------------------
# pallas_call wrappers
# ---------------------------------------------------------------------------

def _pointwise_ab(x_rows, wa, wb, sa, ba, sb, bb, c_feat, compute_dtype, fuse_ab):
    n = x_rows.shape[0]
    tile, n_pad = _pick_row_tile(n)
    if n_pad != n:
        x_rows = jnp.pad(x_rows, ((0, n_pad - n), (0, 0)))
    cin_p = x_rows.shape[1]
    kernel = functools.partial(_pointwise_ab_kernel, fuse_ab=fuse_ab)
    a, b = pl.pallas_call(
        kernel,
        out_shape=(jax.ShapeDtypeStruct((n_pad, c_feat), compute_dtype),
                   jax.ShapeDtypeStruct((n_pad, c_feat), compute_dtype)),
        grid_spec=pltpu.PrefetchScalarGridSpec(
            num_scalar_prefetch=0,
            grid=(n_pad // tile,),
            in_specs=[
                pl.BlockSpec((tile, cin_p), lambda i: (i, 0)),
                pl.BlockSpec(wa.shape, lambda i: (0, 0)),
                pl.BlockSpec(wb.shape, lambda i: (0, 0)),
                pl.BlockSpec(sa.shape, lambda i: (0, 0)),
                pl.BlockSpec(ba.shape, lambda i: (0, 0)),
                pl.BlockSpec(sb.shape, lambda i: (0, 0)),
                pl.BlockSpec(bb.shape, lambda i: (0, 0)),
            ],
            out_specs=(pl.BlockSpec((tile, c_feat), lambda i: (i, 0)),
                       pl.BlockSpec((tile, c_feat), lambda i: (i, 0))),
        ),
        compiler_params=_compiler_params(1),
    )(x_rows, wa, wb, sa, ba, sb, bb)
    return a[:n], b[:n]


def _conv3x3_bn(x_img, w_taps, s, sh, out_dtype):
    """x_img: (B, H, W, Cin) NHWC; grid over batch, full image per block."""
    B, H, W, cin = x_img.shape
    cout = w_taps.shape[2]
    xp = jnp.pad(x_img, ((0, 0), (1, 1), (1, 1), (0, 0)))
    return pl.pallas_call(
        _conv3x3_bn_kernel,
        out_shape=jax.ShapeDtypeStruct((B, H, W, cout), out_dtype),
        grid_spec=pltpu.PrefetchScalarGridSpec(
            num_scalar_prefetch=0,
            grid=(B,),
            in_specs=[
                pl.BlockSpec((1, H + 2, W + 2, cin), lambda b: (b, 0, 0, 0)),
                pl.BlockSpec(w_taps.shape, lambda b: (0, 0, 0)),
                pl.BlockSpec(s.shape, lambda b: (0, 0)),
                pl.BlockSpec(sh.shape, lambda b: (0, 0)),
            ],
            out_specs=pl.BlockSpec((1, H, W, cout), lambda b: (b, 0, 0, 0)),
        ),
        compiler_params=_compiler_params(1),
    )(xp, w_taps, s, sh)


def _k3_gate(a_img, x_img, up_img, w_taps, wa, s, sh, out_dtype):
    B, H, W, cf = a_img.shape
    cin_p = x_img.shape[3]
    ap = jnp.pad(a_img, ((0, 0), (1, 1), (1, 1), (0, 0)))
    return pl.pallas_call(
        _k3_gate_kernel,
        out_shape=jax.ShapeDtypeStruct((B, H, W, cf), out_dtype),
        grid_spec=pltpu.PrefetchScalarGridSpec(
            num_scalar_prefetch=0,
            grid=(B,),
            in_specs=[
                pl.BlockSpec((1, H + 2, W + 2, cf), lambda b: (b, 0, 0, 0)),
                pl.BlockSpec((1, H, W, cin_p), lambda b: (b, 0, 0, 0)),
                pl.BlockSpec((1, H, W, cf), lambda b: (b, 0, 0, 0)),
                pl.BlockSpec(w_taps.shape, lambda b: (0, 0, 0)),
                pl.BlockSpec(wa.shape, lambda b: (0, 0)),
                pl.BlockSpec(s.shape, lambda b: (0, 0)),
                pl.BlockSpec(sh.shape, lambda b: (0, 0)),
            ],
            out_specs=pl.BlockSpec((1, H, W, cf), lambda b: (b, 0, 0, 0)),
        ),
        compiler_params=_compiler_params(1),
    )(ap, x_img, up_img, w_taps, wa, s, sh)


# ---------------------------------------------------------------------------
# Parameter re-layout helpers
# ---------------------------------------------------------------------------

def _conv1x1_to_mat(w, c_in_pad, c_out_pad, dtype):
    """(C_out, C_in, 1, 1) OIHW -> (C_in_pad, C_out_pad) matmul weight."""
    c_out, c_in = w.shape[0], w.shape[1]
    m = w.reshape(c_out, c_in).T
    m = jnp.pad(m, ((0, c_in_pad - c_in), (0, c_out_pad - c_out)))
    return m.astype(dtype)


def _conv3x3_to_taps(w, c_in_pad, c_out_pad, dtype):
    """(C_out, C_in, 3, 3) OIHW -> (9, C_in_pad, C_out_pad), tap = ky*3 + kx."""
    c_out, c_in = w.shape[0], w.shape[1]
    wp = jnp.pad(w, ((0, c_out_pad - c_out), (0, c_in_pad - c_in), (0, 0), (0, 0)))
    return jnp.transpose(wp, (2, 3, 1, 0)).reshape(9, c_in_pad, c_out_pad).astype(dtype)


def _bn_affine(gamma, beta, mean, var, eps, c_pad):
    """Fold inference-mode BatchNorm into (scale, shift), padded (1, shift 0)."""
    scale = gamma / jnp.sqrt(var + eps)
    shift = beta - mean * scale
    c = scale.shape[0]
    scale = jnp.pad(scale, (0, c_pad - c), constant_values=1.0)
    shift = jnp.pad(shift, (0, c_pad - c))
    return (scale.reshape(1, c_pad).astype(jnp.float32),
            shift.reshape(1, c_pad).astype(jnp.float32))


# ---------------------------------------------------------------------------
# SCConv forward (Pallas)
# ---------------------------------------------------------------------------

def scconv_forward(x, params, pooling_r=2, eps=1e-5, compute_dtype=jnp.bfloat16):
    """SCConv.forward with inference-mode BatchNorm.

    Args:
      x:      (B, inplanes, H, W) float32, NCHW (PyTorch convention)
      params: dict of conv weights (OIHW) and BN tuples (gamma, beta, mean, var)
    Returns:
      (B, 2*planes, H, W) float32
    """
    B, c_in, H, W = x.shape
    planes = params["conv1_a"].shape[0]
    r = pooling_r
    assert H % r == 0 and W % r == 0, "spatial dims must be divisible by pooling_r"

    # Intermediate feature channels: pad only to the bf16 pack (16), not 128 —
    # this is the contraction dim of every 3x3 conv, so 128-padding would only
    # add zero traffic / zero MXU work.
    c_feat = _round_up(planes, 16)
    cin_p = _round_up(c_in, 8)
    N = B * H * W
    Hs, Ws = H // r, W // r

    # NCHW -> NHWC (bf16 for the MXU), channel-padded.
    x_img = jnp.transpose(x, (0, 2, 3, 1))
    x_img = jnp.pad(x_img, ((0, 0), (0, 0), (0, 0), (0, cin_p - c_in))).astype(compute_dtype)
    x_rows = x_img.reshape(N, cin_p)

    # conv1_a / conv1_b (+ BN + ReLU). identity is NOT stored (recomputed later).
    wa = _conv1x1_to_mat(params["conv1_a"], cin_p, c_feat, compute_dtype)
    wb = _conv1x1_to_mat(params["conv1_b"], cin_p, c_feat, compute_dtype)
    sa, ba = _bn_affine(*params["bn1_a"], eps, c_feat)
    sb, bb = _bn_affine(*params["bn1_b"], eps, c_feat)
    fuse_ab = (c_feat % 128 == 0)
    a_rows, b_rows = _pointwise_ab(x_rows, wa, wb, sa, ba, sb, bb,
                                   c_feat, compute_dtype, fuse_ab)
    a_img = a_rows.reshape(B, H, W, c_feat)
    b_img = b_rows.reshape(B, H, W, c_feat)

    # k2 path: avg-pool (wrapper) -> in-kernel 3x3 conv + BN -> bf16 nearest upsample.
    pooled = a_img.astype(jnp.float32).reshape(B, Hs, r, Ws, r, c_feat).mean(axis=(2, 4))
    pooled = pooled.astype(compute_dtype)
    w2 = _conv3x3_to_taps(params["k2_conv"], c_feat, c_feat, compute_dtype)
    s2, h2 = _bn_affine(*params["k2_bn"], eps, c_feat)
    y2 = _conv3x3_bn(pooled, w2, s2, h2, compute_dtype)           # (B, Hs, Ws, Cf) bf16
    y2_up = jnp.repeat(jnp.repeat(y2, r, axis=1), r, axis=2)      # bf16 nearest upsample

    # k3 conv + BN, identity (x@Wa) recomputed in-kernel, sigmoid gate, multiply.
    w3 = _conv3x3_to_taps(params["k3_conv"], c_feat, c_feat, compute_dtype)
    s3, h3 = _bn_affine(*params["k3_bn"], eps, c_feat)
    mid = _k3_gate(a_img, x_img, y2_up, w3, wa, s3, h3, compute_dtype)

    # k4 on the gated product.
    w4 = _conv3x3_to_taps(params["k4_conv"], c_feat, c_feat, compute_dtype)
    s4, h4 = _bn_affine(*params["k4_bn"], eps, c_feat)
    out1 = _conv3x3_bn(mid, w4, s4, h4, jnp.float32)

    # k1 on out_b.
    w1 = _conv3x3_to_taps(params["k1_conv"], c_feat, c_feat, compute_dtype)
    s1, h1 = _bn_affine(*params["k1_bn"], eps, c_feat)
    out2 = _conv3x3_bn(b_img, w1, s1, h1, jnp.float32)

    out = jnp.concatenate([out1[..., :planes], out2[..., :planes]], axis=-1)
    return jnp.transpose(out, (0, 3, 1, 2))                       # back to NCHW


# ---------------------------------------------------------------------------
# Pure-JAX reference (f32, mirrors the PyTorch module with inference-mode BN)
# ---------------------------------------------------------------------------

def _conv2d_nchw(x, w, padding):
    return jax.lax.conv_general_dilated(
        x, w, window_strides=(1, 1),
        padding=((padding, padding), (padding, padding)),
        dimension_numbers=("NCHW", "OIHW", "NCHW"))


def scconv_reference(x, params, pooling_r=2, eps=1e-5):
    def bn(t, p):
        g, b, m, v = p
        scale = g / jnp.sqrt(v + eps)
        shift = b - m * scale
        return t * scale[None, :, None, None] + shift[None, :, None, None]

    r = pooling_r
    B, _, H, W = x.shape
    out_a = _conv2d_nchw(x, params["conv1_a"], 0)
    identity = out_a
    out_a = jnp.maximum(bn(out_a, params["bn1_a"]), 0.0)
    out_b = jnp.maximum(bn(_conv2d_nchw(x, params["conv1_b"], 0), params["bn1_b"]), 0.0)
    C = out_a.shape[1]
    pooled = out_a.reshape(B, C, H // r, r, W // r, r).mean(axis=(3, 5))
    y2 = bn(_conv2d_nchw(pooled, params["k2_conv"], 1), params["k2_bn"])
    y2_up = jnp.repeat(jnp.repeat(y2, r, axis=2), r, axis=3)
    gate = jax.nn.sigmoid(identity + y2_up)
    y3 = bn(_conv2d_nchw(out_a, params["k3_conv"], 1), params["k3_bn"])
    mid = y3 * gate
    out1 = bn(_conv2d_nchw(mid, params["k4_conv"], 1), params["k4_bn"])
    out2 = bn(_conv2d_nchw(out_b, params["k1_conv"], 1), params["k1_bn"])
    return jnp.concatenate([out1, out2], axis=1)


# ---------------------------------------------------------------------------
# Demo / self-test
# ---------------------------------------------------------------------------

if __name__ == "__main__":
    B, inplanes, planes, H, W = 2, 4, 32, 16, 16
    pooling_r = 2

    key = jax.random.PRNGKey(0)
    ks = jax.random.split(key, 13)

    def conv_w(k, co, ci, kh, kw, std):
        return std * jax.random.normal(k, (co, ci, kh, kw), dtype=jnp.float32)

    def bn_p(k):
        k1, k2, k3, k4 = jax.random.split(k, 4)
        gamma = jax.random.uniform(k1, (planes,), minval=0.5, maxval=1.5)
        beta = 0.1 * jax.random.normal(k2, (planes,))
        mean = 0.1 * jax.random.normal(k3, (planes,))
        var = jax.random.uniform(k4, (planes,), minval=0.5, maxval=1.5)
        return (gamma, beta, mean, var)

    params = {
        "conv1_a": conv_w(ks[0], planes, inplanes, 1, 1, 0.3), "bn1_a": bn_p(ks[1]),
        "conv1_b": conv_w(ks[2], planes, inplanes, 1, 1, 0.3), "bn1_b": bn_p(ks[3]),
        "k1_conv": conv_w(ks[4], planes, planes, 3, 3, 0.03), "k1_bn": bn_p(ks[5]),
        "k2_conv": conv_w(ks[6], planes, planes, 3, 3, 0.03), "k2_bn": bn_p(ks[7]),
        "k3_conv": conv_w(ks[8], planes, planes, 3, 3, 0.03), "k3_bn": bn_p(ks[9]),
        "k4_conv": conv_w(ks[10], planes, planes, 3, 3, 0.03), "k4_bn": bn_p(ks[11]),
    }
    x = jax.random.normal(ks[12], (B, inplanes, H, W), dtype=jnp.float32)

    fwd = jax.jit(functools.partial(scconv_forward, pooling_r=pooling_r))
    out = fwd(x, params)
    jax.block_until_ready(out)

    ref = scconv_reference(x, params, pooling_r=pooling_r)
    assert out.shape == (B, 2 * planes, H, W), out.shape
    max_err = float(jnp.max(jnp.abs(out - ref)))
    assert jnp.allclose(out, ref, atol=5e-2, rtol=5e-2), f"max abs err {max_err}"

    print("KERNEL_OK")
</pallas_src>

<mosaic_0001>
module attributes {stable_mosaic.version = 11 : i64} {
  func.func @_pointwise_ab_kernel(%arg0: i32, %arg1: memref<512x8xbf16, #tpu.memory_space<vmem>>, %arg2: memref<8x32xbf16, #tpu.memory_space<vmem>>, %arg3: memref<8x32xbf16, #tpu.memory_space<vmem>>, %arg4: memref<1x32xf32, #tpu.memory_space<vmem>>, %arg5: memref<1x32xf32, #tpu.memory_space<vmem>>, %arg6: memref<1x32xf32, #tpu.memory_space<vmem>>, %arg7: memref<1x32xf32, #tpu.memory_space<vmem>>, %arg8: memref<512x32xbf16, #tpu.memory_space<vmem>>, %arg9: memref<512x32xbf16, #tpu.memory_space<vmem>>) attributes {dimension_semantics = [#tpu.dimension_semantics<parallel>], iteration_bounds = array<i64: 1>, scalar_prefetch = 0 : i64, scratch_operands = 0 : i64, tpu.core_type = #tpu.core_type<tc>, window_params = [{transform_indices = @transform_0, window_bounds = array<i64: 512, 8>}, {pipeline_mode = #tpu.pipeline_mode<synchronous>, transform_indices = @transform_1, window_bounds = array<i64: 8, 32>}, {pipeline_mode = #tpu.pipeline_mode<synchronous>, transform_indices = @transform_2, window_bounds = array<i64: 8, 32>}, {pipeline_mode = #tpu.pipeline_mode<synchronous>, transform_indices = @transform_3, window_bounds = array<i64: 1, 32>}, {pipeline_mode = #tpu.pipeline_mode<synchronous>, transform_indices = @transform_4, window_bounds = array<i64: 1, 32>}, {pipeline_mode = #tpu.pipeline_mode<synchronous>, transform_indices = @transform_5, window_bounds = array<i64: 1, 32>}, {pipeline_mode = #tpu.pipeline_mode<synchronous>, transform_indices = @transform_6, window_bounds = array<i64: 1, 32>}, {transform_indices = @transform_7, window_bounds = array<i64: 512, 32>}, {transform_indices = @transform_8, window_bounds = array<i64: 512, 32>}]} {
    %c0 = arith.constant 0 : index
    %c0_0 = arith.constant 0 : index
    %0 = vector.load %arg1[%c0, %c0_0] : memref<512x8xbf16, #tpu.memory_space<vmem>>, vector<512x8xbf16>
    %c0_1 = arith.constant 0 : index
    %c0_2 = arith.constant 0 : index
    %1 = vector.load %arg2[%c0_1, %c0_2] : memref<8x32xbf16, #tpu.memory_space<vmem>>, vector<8x32xbf16>
    %cst = arith.constant dense<0.000000e+00> : vector<512x32xf32>
    %2 = tpu.matmul %0, %1, %cst {dimension_numbers = #tpu.dot_dimension_numbers<[1], [0], [0], [1], [0, 0, 1, 1], [], []>} : vector<512x8xbf16>, vector<8x32xbf16>, vector<512x32xf32> -> vector<512x32xf32>
    %c0_3 = arith.constant 0 : index
    %c0_4 = arith.constant 0 : index
    %3 = vector.load %arg3[%c0_3, %c0_4] : memref<8x32xbf16, #tpu.memory_space<vmem>>, vector<8x32xbf16>
    %cst_5 = arith.constant dense<0.000000e+00> : vector<512x32xf32>
    %4 = tpu.matmul %0, %3, %cst_5 {dimension_numbers = #tpu.dot_dimension_numbers<[1], [0], [0], [1], [0, 0, 1, 1], [], []>} : vector<512x8xbf16>, vector<8x32xbf16>, vector<512x32xf32> -> vector<512x32xf32>
    %c0_6 = arith.constant 0 : index
    %c0_7 = arith.constant 0 : index
    %5 = vector.load %arg4[%c0_6, %c0_7] : memref<1x32xf32, #tpu.memory_space<vmem>>, vector<1x32xf32>
    %6 = vector.broadcast %5 : vector<1x32xf32> to vector<512x32xf32>
    %7 = arith.mulf %2, %6 : vector<512x32xf32>
    %c0_8 = arith.constant 0 : index
    %c0_9 = arith.constant 0 : index
    %8 = vector.load %arg5[%c0_8, %c0_9] : memref<1x32xf32, #tpu.memory_space<vmem>>, vector<1x32xf32>
    %9 = vector.broadcast %8 : vector<1x32xf32> to vector<512x32xf32>
    %10 = arith.addf %7, %9 : vector<512x32xf32>
    %cst_10 = arith.constant 0.000000e+00 : f32
    %11 = vector.broadcast %cst_10 : f32 to vector<512x32xf32>
    %12 = arith.maximumf %10, %11 : vector<512x32xf32>
    %13 = arith.truncf %12 : vector<512x32xf32> to vector<512x32xbf16>
    %c0_11 = arith.constant 0 : index
    %c0_12 = arith.constant 0 : index
    %14 = vector.load %arg8[%c0_11, %c0_12] : memref<512x32xbf16, #tpu.memory_space<vmem>>, vector<512x32xbf16>
    tpu.vector_store %arg8[%c0_11, %c0_12], %13 {strides = array<i32>} : memref<512x32xbf16, #tpu.memory_space<vmem>>, vector<512x32xbf16>,
    %c0_13 = arith.constant 0 : index
    %c0_14 = arith.constant 0 : index
    %15 = vector.load %arg6[%c0_13, %c0_14] : memref<1x32xf32, #tpu.memory_space<vmem>>, vector<1x32xf32>
    %16 = vector.broadcast %15 : vector<1x32xf32> to vector<512x32xf32>
    %17 = arith.mulf %4, %16 : vector<512x32xf32>
    %c0_15 = arith.constant 0 : index
    %c0_16 = arith.constant 0 : index
    %18 = vector.load %arg7[%c0_15, %c0_16] : memref<1x32xf32, #tpu.memory_space<vmem>>, vector<1x32xf32>
    %19 = vector.broadcast %18 : vector<1x32xf32> to vector<512x32xf32>
    %20 = arith.addf %17, %19 : vector<512x32xf32>
    %cst_17 = arith.constant 0.000000e+00 : f32
    %21 = vector.broadcast %cst_17 : f32 to vector<512x32xf32>
    %22 = arith.maximumf %20, %21 : vector<512x32xf32>
    %23 = arith.truncf %22 : vector<512x32xf32> to vector<512x32xbf16>
    %c0_18 = arith.constant 0 : index
    %c0_19 = arith.constant 0 : index
    %24 = vector.load %arg9[%c0_18, %c0_19] : memref<512x32xbf16, #tpu.memory_space<vmem>>, vector<512x32xbf16>
    tpu.vector_store %arg9[%c0_18, %c0_19], %23 {strides = array<i32>} : memref<512x32xbf16, #tpu.memory_space<vmem>>, vector<512x32xbf16>,
    return
  }
  func.func @transform_0(%arg0: i32) -> (i32, i32) {
    %c0_i32 = arith.constant 0 : i32
    %c0_i32_0 = arith.constant 0 : i32
    return %arg0, %c0_i32 : i32, i32
  }
  func.func @transform_1(%arg0: i32) -> (i32, i32) {
    %c0_i32 = arith.constant 0 : i32
    %c0_i32_0 = arith.constant 0 : i32
    %c0_i32_1 = arith.constant 0 : i32
    return %c0_i32, %c0_i32_0 : i32, i32
  }
  func.func @transform_2(%arg0: i32) -> (i32, i32) {
    %c0_i32 = arith.constant 0 : i32
    %c0_i32_0 = arith.constant 0 : i32
    %c0_i32_1 = arith.constant 0 : i32
    return %c0_i32, %c0_i32_0 : i32, i32
  }
  func.func @transform_3(%arg0: i32) -> (i32, i32) {
    %c0_i32 = arith.constant 0 : i32
    %c0_i32_0 = arith.constant 0 : i32
    %c0_i32_1 = arith.constant 0 : i32
    return %c0_i32, %c0_i32_0 : i32, i32
  }
  func.func @transform_4(%arg0: i32) -> (i32, i32) {
    %c0_i32 = arith.constant 0 : i32
    %c0_i32_0 = arith.constant 0 : i32
    %c0_i32_1 = arith.constant 0 : i32
    return %c0_i32, %c0_i32_0 : i32, i32
  }
  func.func @transform_5(%arg0: i32) -> (i32, i32) {
    %c0_i32 = arith.constant 0 : i32
    %c0_i32_0 = arith.constant 0 : i32
    %c0_i32_1 = arith.constant 0 : i32
    return %c0_i32, %c0_i32_0 : i32, i32
  }
  func.func @transform_6(%arg0: i32) -> (i32, i32) {
    %c0_i32 = arith.constant 0 : i32
    %c0_i32_0 = arith.constant 0 : i32
    %c0_i32_1 = arith.constant 0 : i32
    return %c0_i32, %c0_i32_0 : i32, i32
  }
  func.func @transform_7(%arg0: i32) -> (i32, i32) {
    %c0_i32 = arith.constant 0 : i32
    %c0_i32_0 = arith.constant 0 : i32
    return %arg0, %c0_i32 : i32, i32
  }
  func.func @transform_8(%arg0: i32) -> (i32, i32) {
    %c0_i32 = arith.constant 0 : i32
    %c0_i32_0 = arith.constant 0 : i32
    return %arg0, %c0_i32 : i32, i32
  }
}

module attributes {stable_mosaic.version = 11 : i64} {
  func.func @_conv3x3_bn_kernel(%arg0: i32, %arg1: memref<1x10x10x32xbf16, #tpu.memory_space<vmem>>, %arg2: memref<9x32x32xbf16, #tpu.memory_space<vmem>>, %arg3: memref<1x32xf32, #tpu.memory_space<vmem>>, %arg4: memref<1x32xf32, #tpu.memory_space<vmem>>, %arg5: memref<1x8x8x32xbf16, #tpu.memory_space<vmem>>) attributes {dimension_semantics = [#tpu.dimension_semantics<parallel>], iteration_bounds = array<i64: 2>, scalar_prefetch = 0 : i64, scratch_operands = 0 : i64, tpu.core_type = #tpu.core_type<tc>, window_params = [{transform_indices = @transform_0, window_bounds = array<i64: 1, 10, 10, 32>}, {pipeline_mode = #tpu.pipeline_mode<synchronous>, transform_indices = @transform_1, window_bounds = array<i64: 9, 32, 32>}, {pipeline_mode = #tpu.pipeline_mode<synchronous>, transform_indices = @transform_2, window_bounds = array<i64: 1, 32>}, {pipeline_mode = #tpu.pipeline_mode<synchronous>, transform_indices = @transform_3, window_bounds = array<i64: 1, 32>}, {transform_indices = @transform_4, window_bounds = array<i64: 1, 8, 8, 32>}]} {
    %c0 = arith.constant 0 : index
    %c0_0 = arith.constant 0 : index
    %c0_1 = arith.constant 0 : index
    %c0_2 = arith.constant 0 : index
    %0 = vector.load %arg1[%c0, %c0_0, %c0_1, %c0_2] : memref<1x10x10x32xbf16, #tpu.memory_space<vmem>>, vector<1x8x8x32xbf16>
    %1 = vector.shape_cast %0 : vector<1x8x8x32xbf16> to vector<8x8x32xbf16>
    %2 = vector.shape_cast %1 : vector<8x8x32xbf16> to vector<64x32xbf16>
    %c0_3 = arith.constant 0 : index
    %c0_4 = arith.constant 0 : index
    %c0_5 = arith.constant 0 : index
    %3 = vector.load %arg2[%c0_3, %c0_4, %c0_5] : memref<9x32x32xbf16, #tpu.memory_space<vmem>>, vector<1x32x32xbf16>
    %4 = vector.shape_cast %3 : vector<1x32x32xbf16> to vector<32x32xbf16>
    %cst = arith.constant dense<0.000000e+00> : vector<64x32xf32>
    %5 = tpu.matmul %2, %4, %cst {dimension_numbers = #tpu.dot_dimension_numbers<[1], [0], [0], [1], [0, 0, 1, 1], [], []>} : vector<64x32xbf16>, vector<32x32xbf16>, vector<64x32xf32> -> vector<64x32xf32>
    %c0_6 = arith.constant 0 : index
    %c0_7 = arith.constant 0 : index
    %c1 = arith.constant 1 : index
    %c0_8 = arith.constant 0 : index
    %6 = vector.load %arg1[%c0_6, %c0_7, %c1, %c0_8] : memref<1x10x10x32xbf16, #tpu.memory_space<vmem>>, vector<1x8x8x32xbf16>
    %7 = vector.shape_cast %6 : vector<1x8x8x32xbf16> to vector<8x8x32xbf16>
    %8 = vector.shape_cast %7 : vector<8x8x32xbf16> to vector<64x32xbf16>
    %c1_9 = arith.constant 1 : index
    %c0_10 = arith.constant 0 : index
    %c0_11 = arith.constant 0 : index
    %9 = vector.load %arg2[%c1_9, %c0_10, %c0_11] : memref<9x32x32xbf16, #tpu.memory_space<vmem>>, vector<1x32x32xbf16>
    %10 = vector.shape_cast %9 : vector<1x32x32xbf16> to vector<32x32xbf16>
    %cst_12 = arith.constant dense<0.000000e+00> : vector<64x32xf32>
    %11 = tpu.matmul %8, %10, %cst_12 {dimension_numbers = #tpu.dot_dimension_numbers<[1], [0], [0], [1], [0, 0, 1, 1], [], []>} : vector<64x32xbf16>, vector<32x32xbf16>, vector<64x32xf32> -> vector<64x32xf32>
    %12 = arith.addf %5, %11 : vector<64x32xf32>
    %c0_13 = arith.constant 0 : index
    %c0_14 = arith.constant 0 : index
    %c2 = arith.constant 2 : index
    %c0_15 = arith.constant 0 : index
    %13 = vector.load %arg1[%c0_13, %c0_14, %c2, %c0_15] : memref<1x10x10x32xbf16, #tpu.memory_space<vmem>>, vector<1x8x8x32xbf16>
    %14 = vector.shape_cast %13 : vector<1x8x8x32xbf16> to vector<8x8x32xbf16>
    %15 = vector.shape_cast %14 : vector<8x8x32xbf16> to vector<64x32xbf16>
    %c2_16 = arith.constant 2 : index
    %c0_17 = arith.constant 0 : index
    %c0_18 = arith.constant 0 : index
    %16 = vector.load %arg2[%c2_16, %c0_17, %c0_18] : memref<9x32x32xbf16, #tpu.memory_space<vmem>>, vector<1x32x32xbf16>
    %17 = vector.shape_cast %16 : vector<1x32x32xbf16> to vector<32x32xbf16>
    %cst_19 = arith.constant dense<0.000000e+00> : vector<64x32xf32>
    %18 = tpu.matmul %15, %17, %cst_19 {dimension_numbers = #tpu.dot_dimension_numbers<[1], [0], [0], [1], [0, 0, 1, 1], [], []>} : vector<64x32xbf16>, vector<32x32xbf16>, vector<64x32xf32> -> vector<64x32xf32>
    %19 = arith.addf %12, %18 : vector<64x32xf32>
    %c0_20 = arith.constant 0 : index
    %c1_21 = arith.constant 1 : index
    %c0_22 = arith.constant 0 : index
    %c0_23 = arith.constant 0 : index
    %20 = vector.load %arg1[%c0_20, %c1_21, %c0_22, %c0_23] : memref<1x10x10x32xbf16, #tpu.memory_space<vmem>>, vector<1x8x8x32xbf16>
    %21 = vector.shape_cast %20 : vector<1x8x8x32xbf16> to vector<8x8x32xbf16>
    %22 = vector.shape_cast %21 : vector<8x8x32xbf16> to vector<64x32xbf16>
    %c3 = arith.constant 3 : index
    %c0_24 = arith.constant 0 : index
    %c0_25 = arith.constant 0 : index
    %23 = vector.load %arg2[%c3, %c0_24, %c0_25] : memref<9x32x32xbf16, #tpu.memory_space<vmem>>, vector<1x32x32xbf16>
    %24 = vector.shape_cast %23 : vector<1x32x32xbf16> to vector<32x32xbf16>
    %cst_26 = arith.constant dense<0.000000e+00> : vector<64x32xf32>
    %25 = tpu.matmul %22, %24, %cst_26 {dimension_numbers = #tpu.dot_dimension_numbers<[1], [0], [0], [1], [0, 0, 1, 1], [], []>} : vector<64x32xbf16>, vector<32x32xbf16>, vector<64x32xf32> -> vector<64x32xf32>
    %26 = arith.addf %19, %25 : vector<64x32xf32>
    %c0_27 = arith.constant 0 : index
    %c1_28 = arith.constant 1 : index
    %c1_29 = arith.constant 1 : index
    %c0_30 = arith.constant 0 : index
    %27 = vector.load %arg1[%c0_27, %c1_28, %c1_29, %c0_30] : memref<1x10x10x32xbf16, #tpu.memory_space<vmem>>, vector<1x8x8x32xbf16>
    %28 = vector.shape_cast %27 : vector<1x8x8x32xbf16> to vector<8x8x32xbf16>
    %29 = vector.shape_cast %28 : vector<8x8x32xbf16> to vector<64x32xbf16>
    %c4 = arith.constant 4 : index
    %c0_31 = arith.constant 0 : index
    %c0_32 = arith.constant 0 : index
    %30 = vector.load %arg2[%c4, %c0_31, %c0_32] : memref<9x32x32xbf16, #tpu.memory_space<vmem>>, vector<1x32x32xbf16>
    %31 = vector.shape_cast %30 : vector<1x32x32xbf16> to vector<32x32xbf16>
    %cst_33 = arith.constant dense<0.000000e+00> : vector<64x32xf32>
    %32 = tpu.matmul %29, %31, %cst_33 {dimension_numbers = #tpu.dot_dimension_numbers<[1], [0], [0], [1], [0, 0, 1, 1], [], []>} : vector<64x32xbf16>, vector<32x32xbf16>, vector<64x32xf32> -> vector<64x32xf32>
    %33 = arith.addf %26, %32 : vector<64x32xf32>
    %c0_34 = arith.constant 0 : index
    %c1_35 = arith.constant 1 : index
    %c2_36 = arith.constant 2 : index
    %c0_37 = arith.constant 0 : index
    %34 = vector.load %arg1[%c0_34, %c1_35, %c2_36, %c0_37] : memref<1x10x10x32xbf16, #tpu.memory_space<vmem>>, vector<1x8x8x32xbf16>
    %35 = vector.shape_cast %34 : vector<1x8x8x32xbf16> to vector<8x8x32xbf16>
    %36 = vector.shape_cast %35 : vector<8x8x32xbf16> to vector<64x32xbf16>
    %c5 = arith.constant 5 : index
    %c0_38 = arith.constant 0 : index
    %c0_39 = arith.constant 0 : index
    %37 = vector.load %arg2[%c5, %c0_38, %c0_39] : memref<9x32x32xbf16, #tpu.memory_space<vmem>>, vector<1x32x32xbf16>
    %38 = vector.shape_cast %37 : vector<1x32x32xbf16> to vector<32x32xbf16>
    %cst_40 = arith.constant dense<0.000000e+00> : vector<64x32xf32>
    %39 = tpu.matmul %36, %38, %cst_40 {dimension_numbers = #tpu.dot_dimension_numbers<[1], [0], [0], [1], [0, 0, 1, 1], [], []>} : vector<64x32xbf16>, vector<32x32xbf16>, vector<64x32xf32> -> vector<64x32xf32>
    %40 = arith.addf %33, %39 : vector<64x32xf32>
    %c0_41 = arith.constant 0 : index
    %c2_42 = arith.constant 2 : index
    %c0_43 = arith.constant 0 : index
    %c0_44 = arith.constant 0 : index
    %41 = vector.load %arg1[%c0_41, %c2_42, %c0_43, %c0_44] : memref<1x10x10x32xbf16, #tpu.memory_space<vmem>>, vector<1x8x8x32xbf16>
    %42 = vector.shape_cast %41 : vector<1x8x8x32xbf16> to vector<8x8x32xbf16>
    %43 = vector.shape_cast %42 : vector<8x8x32xbf16> to vector<64x32xbf16>
    %c6 = arith.constant 6 : index
    %c0_45 = arith.constant 0 : index
    %c0_46 = arith.constant 0 : index
    %44 = vector.load %arg2[%c6, %c0_45, %c0_46] : memref<9x32x32xbf16, #tpu.memory_space<vmem>>, vector<1x32x32xbf16>
    %45 = vector.shape_cast %44 : vector<1x32x32xbf16> to vector<32x32xbf16>
    %cst_47 = arith.constant dense<0.000000e+00> : vector<64x32xf32>
    %46 = tpu.matmul %43, %45, %cst_47 {dimension_numbers = #tpu.dot_dimension_numbers<[1], [0], [0], [1], [0, 0, 1, 1], [], []>} : vector<64x32xbf16>, vector<32x32xbf16>, vector<64x32xf32> -> vector<64x32xf32>
    %47 = arith.addf %40, %46 : vector<64x32xf32>
    %c0_48 = arith.constant 0 : index
    %c2_49 = arith.constant 2 : index
    %c1_50 = arith.constant 1 : index
    %c0_51 = arith.constant 0 : index
    %48 = vector.load %arg1[%c0_48, %c2_49, %c1_50, %c0_51] : memref<1x10x10x32xbf16, #tpu.memory_space<vmem>>, vector<1x8x8x32xbf16>
    %49 = vector.shape_cast %48 : vector<1x8x8x32xbf16> to vector<8x8x32xbf16>
    %50 = vector.shape_cast %49 : vector<8x8x32xbf16> to vector<64x32xbf16>
    %c7 = arith.constant 7 : index
    %c0_52 = arith.constant 0 : index
    %c0_53 = arith.constant 0 : index
    %51 = vector.load %arg2[%c7, %c0_52, %c0_53] : memref<9x32x32xbf16, #tpu.memory_space<vmem>>, vector<1x32x32xbf16>
    %52 = vector.shape_cast %51 : vector<1x32x32xbf16> to vector<32x32xbf16>
    %cst_54 = arith.constant dense<0.000000e+00> : vector<64x32xf32>
    %53 = tpu.matmul %50, %52, %cst_54 {dimension_numbers = #tpu.dot_dimension_numbers<[1], [0], [0], [1], [0, 0, 1, 1], [], []>} : vector<64x32xbf16>, vector<32x32xbf16>, vector<64x32xf32> -> vector<64x32xf32>
    %54 = arith.addf %47, %53 : vector<64x32xf32>
    %c0_55 = arith.constant 0 : index
    %c2_56 = arith.constant 2 : index
    %c2_57 = arith.constant 2 : index
    %c0_58 = arith.constant 0 : index
    %55 = vector.load %arg1[%c0_55, %c2_56, %c2_57, %c0_58] : memref<1x10x10x32xbf16, #tpu.memory_space<vmem>>, vector<1x8x8x32xbf16>
    %56 = vector.shape_cast %55 : vector<1x8x8x32xbf16> to vector<8x8x32xbf16>
    %57 = vector.shape_cast %56 : vector<8x8x32xbf16> to vector<64x32xbf16>
    %c8 = arith.constant 8 : index
    %c0_59 = arith.constant 0 : index
    %c0_60 = arith.constant 0 : index
    %58 = vector.load %arg2[%c8, %c0_59, %c0_60] : memref<9x32x32xbf16, #tpu.memory_space<vmem>>, vector<1x32x32xbf16>
    %59 = vector.shape_cast %58 : vector<1x32x32xbf16> to vector<32x32xbf16>
    %cst_61 = arith.constant dense<0.000000e+00> : vector<64x32xf32>
    %60 = tpu.matmul %57, %59, %cst_61 {dimension_numbers = #tpu.dot_dimension_numbers<[1], [0], [0], [1], [0, 0, 1, 1], [], []>} : vector<64x32xbf16>, vector<32x32xbf16>, vector<64x32xf32> -> vector<64x32xf32>
    %61 = arith.addf %54, %60 : vector<64x32xf32>
    %c0_62 = arith.constant 0 : index
    %c0_63 = arith.constant 0 : index
    %62 = vector.load %arg3[%c0_62, %c0_63] : memref<1x32xf32, #tpu.memory_space<vmem>>, vector<1x32xf32>
    %63 = vector.broadcast %62 : vector<1x32xf32> to vector<64x32xf32>
    %64 = arith.mulf %61, %63 : vector<64x32xf32>
    %c0_64 = arith.constant 0 : index
    %c0_65 = arith.constant 0 : index
    %65 = vector.load %arg4[%c0_64, %c0_65] : memref<1x32xf32, #tpu.memory_space<vmem>>, vector<1x32xf32>
    %66 = vector.broadcast %65 : vector<1x32xf32> to vector<64x32xf32>
    %67 = arith.addf %64, %66 : vector<64x32xf32>
    %68 = vector.shape_cast %67 : vector<64x32xf32> to vector<8x8x32xf32>
    %69 = arith.truncf %68 : vector<8x8x32xf32> to vector<8x8x32xbf16>
    %c0_66 = arith.constant 0 : index
    %c0_67 = arith.constant 0 : index
    %c0_68 = arith.constant 0 : index
    %c0_69 = arith.constant 0 : index
    %70 = vector.load %arg5[%c0_66, %c0_67, %c0_68, %c0_69] : memref<1x8x8x32xbf16, #tpu.memory_space<vmem>>, vector<1x8x8x32xbf16>
    %71 = vector.shape_cast %70 : vector<1x8x8x32xbf16> to vector<8x8x32xbf16>
    %72 = vector.shape_cast %69 : vector<8x8x32xbf16> to vector<1x8x8x32xbf16>
    tpu.vector_store %arg5[%c0_66, %c0_67, %c0_68, %c0_69], %72 {strides = array<i32>} : memref<1x8x8x32xbf16, #tpu.memory_space<vmem>>, vector<1x8x8x32xbf16>,
    return
  }
  func.func @transform_0(%arg0: i32) -> (i32, i32, i32, i32) {
    %c0_i32 = arith.constant 0 : i32
    %c0_i32_0 = arith.constant 0 : i32
    %c0_i32_1 = arith.constant 0 : i32
    %c0_i32_2 = arith.constant 0 : i32
    return %arg0, %c0_i32, %c0_i32_0, %c0_i32_1 : i32, i32, i32, i32
  }
  func.func @transform_1(%arg0: i32) -> (i32, i32, i32) {
    %c0_i32 = arith.constant 0 : i32
    %c0_i32_0 = arith.constant 0 : i32
    %c0_i32_1 = arith.constant 0 : i32
    %c0_i32_2 = arith.constant 0 : i32
    return %c0_i32, %c0_i32_0, %c0_i32_1 : i32, i32, i32
  }
  func.func @transform_2(%arg0: i32) -> (i32, i32) {
    %c0_i32 = arith.constant 0 : i32
    %c0_i32_0 = arith.constant 0 : i32
    %c0_i32_1 = arith.constant 0 : i32
    return %c0_i32, %c0_i32_0 : i32, i32
  }
  func.func @transform_3(%arg0: i32) -> (i32, i32) {
    %c0_i32 = arith.constant 0 : i32
    %c0_i32_0 = arith.constant 0 : i32
    %c0_i32_1 = arith.constant 0 : i32
    return %c0_i32, %c0_i32_0 : i32, i32
  }
  func.func @transform_4(%arg0: i32) -> (i32, i32, i32, i32) {
    %c0_i32 = arith.constant 0 : i32
    %c0_i32_0 = arith.constant 0 : i32
    %c0_i32_1 = arith.constant 0 : i32
    %c0_i32_2 = arith.constant 0 : i32
    return %arg0, %c0_i32, %c0_i32_0, %c0_i32_1 : i32, i32, i32, i32
  }
}

module attributes {stable_mosaic.version = 11 : i64} {
  func.func @_k3_gate_kernel(%arg0: i32, %arg1: memref<1x18x18x32xbf16, #tpu.memory_space<vmem>>, %arg2: memref<1x16x16x8xbf16, #tpu.memory_space<vmem>>, %arg3: memref<1x16x16x32xbf16, #tpu.memory_space<vmem>>, %arg4: memref<9x32x32xbf16, #tpu.memory_space<vmem>>, %arg5: memref<8x32xbf16, #tpu.memory_space<vmem>>, %arg6: memref<1x32xf32, #tpu.memory_space<vmem>>, %arg7: memref<1x32xf32, #tpu.memory_space<vmem>>, %arg8: memref<1x16x16x32xbf16, #tpu.memory_space<vmem>>) attributes {dimension_semantics = [#tpu.dimension_semantics<parallel>], iteration_bounds = array<i64: 2>, scalar_prefetch = 0 : i64, scratch_operands = 0 : i64, tpu.core_type = #tpu.core_type<tc>, window_params = [{transform_indices = @transform_0, window_bounds = array<i64: 1, 18, 18, 32>}, {transform_indices = @transform_1, window_bounds = array<i64: 1, 16, 16, 8>}, {transform_indices = @transform_2, window_bounds = array<i64: 1, 16, 16, 32>}, {pipeline_mode = #tpu.pipeline_mode<synchronous>, transform_indices = @transform_3, window_bounds = array<i64: 9, 32, 32>}, {pipeline_mode = #tpu.pipeline_mode<synchronous>, transform_indices = @transform_4, window_bounds = array<i64: 8, 32>}, {pipeline_mode = #tpu.pipeline_mode<synchronous>, transform_indices = @transform_5, window_bounds = array<i64: 1, 32>}, {pipeline_mode = #tpu.pipeline_mode<synchronous>, transform_indices = @transform_6, window_bounds = array<i64: 1, 32>}, {transform_indices = @transform_7, window_bounds = array<i64: 1, 16, 16, 32>}]} {
    %c0 = arith.constant 0 : index
    %c0_0 = arith.constant 0 : index
    %c0_1 = arith.constant 0 : index
    %c0_2 = arith.constant 0 : index
    %0 = vector.load %arg1[%c0, %c0_0, %c0_1, %c0_2] : memref<1x18x18x32xbf16, #tpu.memory_space<vmem>>, vector<1x16x16x32xbf16>
    %1 = vector.shape_cast %0 : vector<1x16x16x32xbf16> to vector<16x16x32xbf16>
    %2 = vector.shape_cast %1 : vector<16x16x32xbf16> to vector<256x32xbf16>
    %c0_3 = arith.constant 0 : index
    %c0_4 = arith.constant 0 : index
    %c0_5 = arith.constant 0 : index
    %3 = vector.load %arg4[%c0_3, %c0_4, %c0_5] : memref<9x32x32xbf16, #tpu.memory_space<vmem>>, vector<1x32x32xbf16>
    %4 = vector.shape_cast %3 : vector<1x32x32xbf16> to vector<32x32xbf16>
    %cst = arith.constant dense<0.000000e+00> : vector<256x32xf32>
    %5 = tpu.matmul %2, %4, %cst {dimension_numbers = #tpu.dot_dimension_numbers<[1], [0], [0], [1], [0, 0, 1, 1], [], []>} : vector<256x32xbf16>, vector<32x32xbf16>, vector<256x32xf32> -> vector<256x32xf32>
    %c0_6 = arith.constant 0 : index
    %c0_7 = arith.constant 0 : index
    %c1 = arith.constant 1 : index
    %c0_8 = arith.constant 0 : index
    %6 = vector.load %arg1[%c0_6, %c0_7, %c1, %c0_8] : memref<1x18x18x32xbf16, #tpu.memory_space<vmem>>, vector<1x16x16x32xbf16>
    %7 = vector.shape_cast %6 : vector<1x16x16x32xbf16> to vector<16x16x32xbf16>
    %8 = vector.shape_cast %7 : vector<16x16x32xbf16> to vector<256x32xbf16>
    %c1_9 = arith.constant 1 : index
    %c0_10 = arith.constant 0 : index
    %c0_11 = arith.constant 0 : index
    %9 = vector.load %arg4[%c1_9, %c0_10, %c0_11] : memref<9x32x32xbf16, #tpu.memory_space<vmem>>, vector<1x32x32xbf16>
    %10 = vector.shape_cast %9 : vector<1x32x32xbf16> to vector<32x32xbf16>
    %cst_12 = arith.constant dense<0.000000e+00> : vector<256x32xf32>
    %11 = tpu.matmul %8, %10, %cst_12 {dimension_numbers = #tpu.dot_dimension_numbers<[1], [0], [0], [1], [0, 0, 1, 1], [], []>} : vector<256x32xbf16>, vector<32x32xbf16>, vector<256x32xf32> -> vector<256x32xf32>
    %12 = arith.addf %5, %11 : vector<256x32xf32>
    %c0_13 = arith.constant 0 : index
    %c0_14 = arith.constant 0 : index
    %c2 = arith.constant 2 : index
    %c0_15 = arith.constant 0 : index
    %13 = vector.load %arg1[%c0_13, %c0_14, %c2, %c0_15] : memref<1x18x18x32xbf16, #tpu.memory_space<vmem>>, vector<1x16x16x32xbf16>
    %14 = vector.shape_cast %13 : vector<1x16x16x32xbf16> to vector<16x16x32xbf16>
    %15 = vector.shape_cast %14 : vector<16x16x32xbf16> to vector<256x32xbf16>
    %c2_16 = arith.constant 2 : index
    %c0_17 = arith.constant 0 : index
    %c0_18 = arith.constant 0 : index
    %16 = vector.load %arg4[%c2_16, %c0_17, %c0_18] : memref<9x32x32xbf16, #tpu.memory_space<vmem>>, vector<1x32x32xbf16>
    %17 = vector.shape_cast %16 : vector<1x32x32xbf16> to vector<32x32xbf16>
    %cst_19 = arith.constant dense<0.000000e+00> : vector<256x32xf32>
    %18 = tpu.matmul %15, %17, %cst_19 {dimension_numbers = #tpu.dot_dimension_numbers<[1], [0], [0], [1], [0, 0, 1, 1], [], []>} : vector<256x32xbf16>, vector<32x32xbf16>, vector<256x32xf32> -> vector<256x32xf32>
    %19 = arith.addf %12, %18 : vector<256x32xf32>
    %c0_20 = arith.constant 0 : index
    %c1_21 = arith.constant 1 : index
    %c0_22 = arith.constant 0 : index
    %c0_23 = arith.constant 0 : index
    %20 = vector.load %arg1[%c0_20, %c1_21, %c0_22, %c0_23] : memref<1x18x18x32xbf16, #tpu.memory_space<vmem>>, vector<1x16x16x32xbf16>
    %21 = vector.shape_cast %20 : vector<1x16x16x32xbf16> to vector<16x16x32xbf16>
    %22 = vector.shape_cast %21 : vector<16x16x32xbf16> to vector<256x32xbf16>
    %c3 = arith.constant 3 : index
    %c0_24 = arith.constant 0 : index
    %c0_25 = arith.constant 0 : index
    %23 = vector.load %arg4[%c3, %c0_24, %c0_25] : memref<9x32x32xbf16, #tpu.memory_space<vmem>>, vector<1x32x32xbf16>
    %24 = vector.shape_cast %23 : vector<1x32x32xbf16> to vector<32x32xbf16>
    %cst_26 = arith.constant dense<0.000000e+00> : vector<256x32xf32>
    %25 = tpu.matmul %22, %24, %cst_26 {dimension_numbers = #tpu.dot_dimension_numbers<[1], [0], [0], [1], [0, 0, 1, 1], [], []>} : vector<256x32xbf16>, vector<32x32xbf16>, vector<256x32xf32> -> vector<256x32xf32>
    %26 = arith.addf %19, %25 : vector<256x32xf32>
    %c0_27 = arith.constant 0 : index
    %c1_28 = arith.constant 1 : index
    %c1_29 = arith.constant 1 : index
    %c0_30 = arith.constant 0 : index
    %27 = vector.load %arg1[%c0_27, %c1_28, %c1_29, %c0_30] : memref<1x18x18x32xbf16, #tpu.memory_space<vmem>>, vector<1x16x16x32xbf16>
    %28 = vector.shape_cast %27 : vector<1x16x16x32xbf16> to vector<16x16x32xbf16>
    %29 = vector.shape_cast %28 : vector<16x16x32xbf16> to vector<256x32xbf16>
    %c4 = arith.constant 4 : index
    %c0_31 = arith.constant 0 : index
    %c0_32 = arith.constant 0 : index
    %30 = vector.load %arg4[%c4, %c0_31, %c0_32] : memref<9x32x32xbf16, #tpu.memory_space<vmem>>, vector<1x32x32xbf16>
    %31 = vector.shape_cast %30 : vector<1x32x32xbf16> to vector<32x32xbf16>
    %cst_33 = arith.constant dense<0.000000e+00> : vector<256x32xf32>
    %32 = tpu.matmul %29, %31, %cst_33 {dimension_numbers = #tpu.dot_dimension_numbers<[1], [0], [0], [1], [0, 0, 1, 1], [], []>} : vector<256x32xbf16>, vector<32x32xbf16>, vector<256x32xf32> -> vector<256x32xf32>
    %33 = arith.addf %26, %32 : vector<256x32xf32>
    %c0_34 = arith.constant 0 : index
    %c1_35 = arith.constant 1 : index
    %c2_36 = arith.constant 2 : index
    %c0_37 = arith.constant 0 : index
    %34 = vector.load %arg1[%c0_34, %c1_35, %c2_36, %c0_37] : memref<1x18x18x32xbf16, #tpu.memory_space<vmem>>, vector<1x16x16x32xbf16>
    %35 = vector.shape_cast %34 : vector<1x16x16x32xbf16> to vector<16x16x32xbf16>
    %36 = vector.shape_cast %35 : vector<16x16x32xbf16> to vector<256x32xbf16>
    %c5 = arith.constant 5 : index
    %c0_38 = arith.constant 0 : index
    %c0_39 = arith.constant 0 : index
    %37 = vector.load %arg4[%c5, %c0_38, %c0_39] : memref<9x32x32xbf16, #tpu.memory_space<vmem>>, vector<1x32x32xbf16>
    %38 = vector.shape_cast %37 : vector<1x32x32xbf16> to vector<32x32xbf16>
    %cst_40 = arith.constant dense<0.000000e+00> : vector<256x32xf32>
    %39 = tpu.matmul %36, %38, %cst_40 {dimension_numbers = #tpu.dot_dimension_numbers<[1], [0], [0], [1], [0, 0, 1, 1], [], []>} : vector<256x32xbf16>, vector<32x32xbf16>, vector<256x32xf32> -> vector<256x32xf32>
    %40 = arith.addf %33, %39 : vector<256x32xf32>
    %c0_41 = arith.constant 0 : index
    %c2_42 = arith.constant 2 : index
    %c0_43 = arith.constant 0 : index
    %c0_44 = arith.constant 0 : index
    %41 = vector.load %arg1[%c0_41, %c2_42, %c0_43, %c0_44] : memref<1x18x18x32xbf16, #tpu.memory_space<vmem>>, vector<1x16x16x32xbf16>
    %42 = vector.shape_cast %41 : vector<1x16x16x32xbf16> to vector<16x16x32xbf16>
    %43 = vector.shape_cast %42 : vector<16x16x32xbf16> to vector<256x32xbf16>
    %c6 = arith.constant 6 : index
    %c0_45 = arith.constant 0 : index
    %c0_46 = arith.constant 0 : index
    %44 = vector.load %arg4[%c6, %c0_45, %c0_46] : memref<9x32x32xbf16, #tpu.memory_space<vmem>>, vector<1x32x32xbf16>
    %45 = vector.shape_cast %44 : vector<1x32x32xbf16> to vector<32x32xbf16>
    %cst_47 = arith.constant dense<0.000000e+00> : vector<256x32xf32>
    %46 = tpu.matmul %43, %45, %cst_47 {dimension_numbers = #tpu.dot_dimension_numbers<[1], [0], [0], [1], [0, 0, 1, 1], [], []>} : vector<256x32xbf16>, vector<32x32xbf16>, vector<256x32xf32> -> vector<256x32xf32>
    %47 = arith.addf %40, %46 : vector<256x32xf32>
    %c0_48 = arith.constant 0 : index
    %c2_49 = arith.constant 2 : index
    %c1_50 = arith.constant 1 : index
    %c0_51 = arith.constant 0 : index
    %48 = vector.load %arg1[%c0_48, %c2_49, %c1_50, %c0_51] : memref<1x18x18x32xbf16, #tpu.memory_space<vmem>>, vector<1x16x16x32xbf16>
    %49 = vector.shape_cast %48 : vector<1x16x16x32xbf16> to vector<16x16x32xbf16>
    %50 = vector.shape_cast %49 : vector<16x16x32xbf16> to vector<256x32xbf16>
    %c7 = arith.constant 7 : index
    %c0_52 = arith.constant 0 : index
    %c0_53 = arith.constant 0 : index
    %51 = vector.load %arg4[%c7, %c0_52, %c0_53] : memref<9x32x32xbf16, #tpu.memory_space<vmem>>, vector<1x32x32xbf16>
    %52 = vector.shape_cast %51 : vector<1x32x32xbf16> to vector<32x32xbf16>
    %cst_54 = arith.constant dense<0.000000e+00> : vector<256x32xf32>
    %53 = tpu.matmul %50, %52, %cst_54 {dimension_numbers = #tpu.dot_dimension_numbers<[1], [0], [0], [1], [0, 0, 1, 1], [], []>} : vector<256x32xbf16>, vector<32x32xbf16>, vector<256x32xf32> -> vector<256x32xf32>
    %54 = arith.addf %47, %53 : vector<256x32xf32>
    %c0_55 = arith.constant 0 : index
    %c2_56 = arith.constant 2 : index
    %c2_57 = arith.constant 2 : index
    %c0_58 = arith.constant 0 : index
    %55 = vector.load %arg1[%c0_55, %c2_56, %c2_57, %c0_58] : memref<1x18x18x32xbf16, #tpu.memory_space<vmem>>, vector<1x16x16x32xbf16>
    %56 = vector.shape_cast %55 : vector<1x16x16x32xbf16> to vector<16x16x32xbf16>
    %57 = vector.shape_cast %56 : vector<16x16x32xbf16> to vector<256x32xbf16>
    %c8 = arith.constant 8 : index
    %c0_59 = arith.constant 0 : index
    %c0_60 = arith.constant 0 : index
    %58 = vector.load %arg4[%c8, %c0_59, %c0_60] : memref<9x32x32xbf16, #tpu.memory_space<vmem>>, vector<1x32x32xbf16>
    %59 = vector.shape_cast %58 : vector<1x32x32xbf16> to vector<32x32xbf16>
    %cst_61 = arith.constant dense<0.000000e+00> : vector<256x32xf32>
    %60 = tpu.matmul %57, %59, %cst_61 {dimension_numbers = #tpu.dot_dimension_numbers<[1], [0], [0], [1], [0, 0, 1, 1], [], []>} : vector<256x32xbf16>, vector<32x32xbf16>, vector<256x32xf32> -> vector<256x32xf32>
    %61 = arith.addf %54, %60 : vector<256x32xf32>
    %c0_62 = arith.constant 0 : index
    %c0_63 = arith.constant 0 : index
    %62 = vector.load %arg6[%c0_62, %c0_63] : memref<1x32xf32, #tpu.memory_space<vmem>>, vector<1x32xf32>
    %63 = vector.broadcast %62 : vector<1x32xf32> to vector<256x32xf32>
    %64 = arith.mulf %61, %63 : vector<256x32xf32>
    %c0_64 = arith.constant 0 : index
    %c0_65 = arith.constant 0 : index
    %65 = vector.load %arg7[%c0_64, %c0_65] : memref<1x32xf32, #tpu.memory_space<vmem>>, vector<1x32xf32>
    %66 = vector.broadcast %65 : vector<1x32xf32> to vector<256x32xf32>
    %67 = arith.addf %64, %66 : vector<256x32xf32>
    %c0_66 = arith.constant 0 : index
    %c0_67 = arith.constant 0 : index
    %c0_68 = arith.constant 0 : index
    %c0_69 = arith.constant 0 : index
    %68 = vector.load %arg2[%c0_66, %c0_67, %c0_68, %c0_69] : memref<1x16x16x8xbf16, #tpu.memory_space<vmem>>, vector<1x16x16x8xbf16>
    %69 = vector.shape_cast %68 : vector<1x16x16x8xbf16> to vector<16x16x8xbf16>
    %70 = vector.shape_cast %69 : vector<16x16x8xbf16> to vector<256x8xbf16>
    %c0_70 = arith.constant 0 : index
    %c0_71 = arith.constant 0 : index
    %71 = vector.load %arg5[%c0_70, %c0_71] : memref<8x32xbf16, #tpu.memory_space<vmem>>, vector<8x32xbf16>
    %cst_72 = arith.constant dense<0.000000e+00> : vector<256x32xf32>
    %72 = tpu.matmul %70, %71, %cst_72 {dimension_numbers = #tpu.dot_dimension_numbers<[1], [0], [0], [1], [0, 0, 1, 1], [], []>} : vector<256x8xbf16>, vector<8x32xbf16>, vector<256x32xf32> -> vector<256x32xf32>
    %c0_73 = arith.constant 0 : index
    %c0_74 = arith.constant 0 : index
    %c0_75 = arith.constant 0 : index
    %c0_76 = arith.constant 0 : index
    %73 = vector.load %arg3[%c0_73, %c0_74, %c0_75, %c0_76] : memref<1x16x16x32xbf16, #tpu.memory_space<vmem>>, vector<1x16x16x32xbf16>
    %74 = vector.shape_cast %73 : vector<1x16x16x32xbf16> to vector<16x16x32xbf16>
    %75 = vector.shape_cast %74 : vector<16x16x32xbf16> to vector<256x32xbf16>
    %76 = arith.extf %75 : vector<256x32xbf16> to vector<256x32xf32>
    %77 = arith.addf %72, %76 : vector<256x32xf32>
    %cst_77 = arith.constant 0.000000e+00 : f32
    %78 = vector.broadcast %cst_77 : f32 to vector<256x32xf32>
    %79 = arith.subf %78, %77 : vector<256x32xf32>
    %80 = math.exp %79 : vector<256x32xf32>
    %cst_78 = arith.constant 1.000000e+00 : f32
    %81 = vector.broadcast %cst_78 : f32 to vector<256x32xf32>
    %82 = arith.addf %81, %80 : vector<256x32xf32>
    %83 = tpu.reciprocal %82 {approx = true} : vector<256x32xf32> -> vector<256x32xf32>
    %84 = arith.mulf %67, %83 : vector<256x32xf32>
    %85 = vector.shape_cast %84 : vector<256x32xf32> to vector<16x16x32xf32>
    %86 = arith.truncf %85 : vector<16x16x32xf32> to vector<16x16x32xbf16>
    %c0_79 = arith.constant 0 : index
    %c0_80 = arith.constant 0 : index
    %c0_81 = arith.constant 0 : index
    %c0_82 = arith.constant 0 : index
    %87 = vector.load %arg8[%c0_79, %c0_80, %c0_81, %c0_82] : memref<1x16x16x32xbf16, #tpu.memory_space<vmem>>, vector<1x16x16x32xbf16>
    %88 = vector.shape_cast %87 : vector<1x16x16x32xbf16> to vector<16x16x32xbf16>
    %89 = vector.shape_cast %86 : vector<16x16x32xbf16> to vector<1x16x16x32xbf16>
    tpu.vector_store %arg8[%c0_79, %c0_80, %c0_81, %c0_82], %89 {strides = array<i32>} : memref<1x16x16x32xbf16, #tpu.memory_space<vmem>>, vector<1x16x16x32xbf16>,
    return
  }
  func.func @transform_0(%arg0: i32) -> (i32, i32, i32, i32) {
    %c0_i32 = arith.constant 0 : i32
    %c0_i32_0 = arith.constant 0 : i32
    %c0_i32_1 = arith.constant 0 : i32
    %c0_i32_2 = arith.constant 0 : i32
    return %arg0, %c0_i32, %c0_i32_0, %c0_i32_1 : i32, i32, i32, i32
  }
  func.func @transform_1(%arg0: i32) -> (i32, i32, i32, i32) {
    %c0_i32 = arith.constant 0 : i32
    %c0_i32_0 = arith.constant 0 : i32
    %c0_i32_1 = arith.constant 0 : i32
    %c0_i32_2 = arith.constant 0 : i32
    return %arg0, %c0_i32, %c0_i32_0, %c0_i32_1 : i32, i32, i32, i32
  }
  func.func @transform_2(%arg0: i32) -> (i32, i32, i32, i32) {
    %c0_i32 = arith.constant 0 : i32
    %c0_i32_0 = arith.constant 0 : i32
    %c0_i32_1 = arith.constant 0 : i32
    %c0_i32_2 = arith.constant 0 : i32
    return %arg0, %c0_i32, %c0_i32_0, %c0_i32_1 : i32, i32, i32, i32
  }
  func.func @transform_3(%arg0: i32) -> (i32, i32, i32) {
    %c0_i32 = arith.constant 0 : i32
    %c0_i32_0 = arith.constant 0 : i32
    %c0_i32_1 = arith.constant 0 : i32
    %c0_i32_2 = arith.constant 0 : i32
    return %c0_i32, %c0_i32_0, %c0_i32_1 : i32, i32, i32
  }
  func.func @transform_4(%arg0: i32) -> (i32, i32) {
    %c0_i32 = arith.constant 0 : i32
    %c0_i32_0 = arith.constant 0 : i32
    %c0_i32_1 = arith.constant 0 : i32
    return %c0_i32, %c0_i32_0 : i32, i32
  }
  func.func @transform_5(%arg0: i32) -> (i32, i32) {
    %c0_i32 = arith.constant 0 : i32
    %c0_i32_0 = arith.constant 0 : i32
    %c0_i32_1 = arith.constant 0 : i32
    return %c0_i32, %c0_i32_0 : i32, i32
  }
  func.func @transform_6(%arg0: i32) -> (i32, i32) {
    %c0_i32 = arith.constant 0 : i32
    %c0_i32_0 = arith.constant 0 : i32
    %c0_i32_1 = arith.constant 0 : i32
    return %c0_i32, %c0_i32_0 : i32, i32
  }
  func.func @transform_7(%arg0: i32) -> (i32, i32, i32, i32) {
    %c0_i32 = arith.constant 0 : i32
    %c0_i32_0 = arith.constant 0 : i32
    %c0_i32_1 = arith.constant 0 : i32
    %c0_i32_2 = arith.constant 0 : i32
    return %arg0, %c0_i32, %c0_i32_0, %c0_i32_1 : i32, i32, i32, i32
  }
}

module attributes {stable_mosaic.version = 11 : i64} {
  func.func @_conv3x3_bn_kernel(%arg0: i32, %arg1: memref<1x18x18x32xbf16, #tpu.memory_space<vmem>>, %arg2: memref<9x32x32xbf16, #tpu.memory_space<vmem>>, %arg3: memref<1x32xf32, #tpu.memory_space<vmem>>, %arg4: memref<1x32xf32, #tpu.memory_space<vmem>>, %arg5: memref<1x16x16x32xf32, #tpu.memory_space<vmem>>) attributes {dimension_semantics = [#tpu.dimension_semantics<parallel>], iteration_bounds = array<i64: 2>, scalar_prefetch = 0 : i64, scratch_operands = 0 : i64, tpu.core_type = #tpu.core_type<tc>, window_params = [{transform_indices = @transform_0, window_bounds = array<i64: 1, 18, 18, 32>}, {pipeline_mode = #tpu.pipeline_mode<synchronous>, transform_indices = @transform_1, window_bounds = array<i64: 9, 32, 32>}, {pipeline_mode = #tpu.pipeline_mode<synchronous>, transform_indices = @transform_2, window_bounds = array<i64: 1, 32>}, {pipeline_mode = #tpu.pipeline_mode<synchronous>, transform_indices = @transform_3, window_bounds = array<i64: 1, 32>}, {transform_indices = @transform_4, window_bounds = array<i64: 1, 16, 16, 32>}]} {
    %c0 = arith.constant 0 : index
    %c0_0 = arith.constant 0 : index
    %c0_1 = arith.constant 0 : index
    %c0_2 = arith.constant 0 : index
    %0 = vector.load %arg1[%c0, %c0_0, %c0_1, %c0_2] : memref<1x18x18x32xbf16, #tpu.memory_space<vmem>>, vector<1x16x16x32xbf16>
    %1 = vector.shape_cast %0 : vector<1x16x16x32xbf16> to vector<16x16x32xbf16>
    %2 = vector.shape_cast %1 : vector<16x16x32xbf16> to vector<256x32xbf16>
    %c0_3 = arith.constant 0 : index
    %c0_4 = arith.constant 0 : index
    %c0_5 = arith.constant 0 : index
    %3 = vector.load %arg2[%c0_3, %c0_4, %c0_5] : memref<9x32x32xbf16, #tpu.memory_space<vmem>>, vector<1x32x32xbf16>
    %4 = vector.shape_cast %3 : vector<1x32x32xbf16> to vector<32x32xbf16>
    %cst = arith.constant dense<0.000000e+00> : vector<256x32xf32>
    %5 = tpu.matmul %2, %4, %cst {dimension_numbers = #tpu.dot_dimension_numbers<[1], [0], [0], [1], [0, 0, 1, 1], [], []>} : vector<256x32xbf16>, vector<32x32xbf16>, vector<256x32xf32> -> vector<256x32xf32>
    %c0_6 = arith.constant 0 : index
    %c0_7 = arith.constant 0 : index
    %c1 = arith.constant 1 : index
    %c0_8 = arith.constant 0 : index
    %6 = vector.load %arg1[%c0_6, %c0_7, %c1, %c0_8] : memref<1x18x18x32xbf16, #tpu.memory_space<vmem>>, vector<1x16x16x32xbf16>
    %7 = vector.shape_cast %6 : vector<1x16x16x32xbf16> to vector<16x16x32xbf16>
    %8 = vector.shape_cast %7 : vector<16x16x32xbf16> to vector<256x32xbf16>
    %c1_9 = arith.constant 1 : index
    %c0_10 = arith.constant 0 : index
    %c0_11 = arith.constant 0 : index
    %9 = vector.load %arg2[%c1_9, %c0_10, %c0_11] : memref<9x32x32xbf16, #tpu.memory_space<vmem>>, vector<1x32x32xbf16>
    %10 = vector.shape_cast %9 : vector<1x32x32xbf16> to vector<32x32xbf16>
    %cst_12 = arith.constant dense<0.000000e+00> : vector<256x32xf32>
    %11 = tpu.matmul %8, %10, %cst_12 {dimension_numbers = #tpu.dot_dimension_numbers<[1], [0], [0], [1], [0, 0, 1, 1], [], []>} : vector<256x32xbf16>, vector<32x32xbf16>, vector<256x32xf32> -> vector<256x32xf32>
    %12 = arith.addf %5, %11 : vector<256x32xf32>
    %c0_13 = arith.constant 0 : index
    %c0_14 = arith.constant 0 : index
    %c2 = arith.constant 2 : index
    %c0_15 = arith.constant 0 : index
    %13 = vector.load %arg1[%c0_13, %c0_14, %c2, %c0_15] : memref<1x18x18x32xbf16, #tpu.memory_space<vmem>>, vector<1x16x16x32xbf16>
    %14 = vector.shape_cast %13 : vector<1x16x16x32xbf16> to vector<16x16x32xbf16>
    %15 = vector.shape_cast %14 : vector<16x16x32xbf16> to vector<256x32xbf16>
    %c2_16 = arith.constant 2 : index
    %c0_17 = arith.constant 0 : index
    %c0_18 = arith.constant 0 : index
    %16 = vector.load %arg2[%c2_16, %c0_17, %c0_18] : memref<9x32x32xbf16, #tpu.memory_space<vmem>>, vector<1x32x32xbf16>
    %17 = vector.shape_cast %16 : vector<1x32x32xbf16> to vector<32x32xbf16>
    %cst_19 = arith.constant dense<0.000000e+00> : vector<256x32xf32>
    %18 = tpu.matmul %15, %17, %cst_19 {dimension_numbers = #tpu.dot_dimension_numbers<[1], [0], [0], [1], [0, 0, 1, 1], [], []>} : vector<256x32xbf16>, vector<32x32xbf16>, vector<256x32xf32> -> vector<256x32xf32>
    %19 = arith.addf %12, %18 : vector<256x32xf32>
    %c0_20 = arith.constant 0 : index
    %c1_21 = arith.constant 1 : index
    %c0_22 = arith.constant 0 : index
    %c0_23 = arith.constant 0 : index
    %20 = vector.load %arg1[%c0_20, %c1_21, %c0_22, %c0_23] : memref<1x18x18x32xbf16, #tpu.memory_space<vmem>>, vector<1x16x16x32xbf16>
    %21 = vector.shape_cast %20 : vector<1x16x16x32xbf16> to vector<16x16x32xbf16>
    %22 = vector.shape_cast %21 : vector<16x16x32xbf16> to vector<256x32xbf16>
    %c3 = arith.constant 3 : index
    %c0_24 = arith.constant 0 : index
    %c0_25 = arith.constant 0 : index
    %23 = vector.load %arg2[%c3, %c0_24, %c0_25] : memref<9x32x32xbf16, #tpu.memory_space<vmem>>, vector<1x32x32xbf16>
    %24 = vector.shape_cast %23 : vector<1x32x32xbf16> to vector<32x32xbf16>
    %cst_26 = arith.constant dense<0.000000e+00> : vector<256x32xf32>
    %25 = tpu.matmul %22, %24, %cst_26 {dimension_numbers = #tpu.dot_dimension_numbers<[1], [0], [0], [1], [0, 0, 1, 1], [], []>} : vector<256x32xbf16>, vector<32x32xbf16>, vector<256x32xf32> -> vector<256x32xf32>
    %26 = arith.addf %19, %25 : vector<256x32xf32>
    %c0_27 = arith.constant 0 : index
    %c1_28 = arith.constant 1 : index
    %c1_29 = arith.constant 1 : index
    %c0_30 = arith.constant 0 : index
    %27 = vector.load %arg1[%c0_27, %c1_28, %c1_29, %c0_30] : memref<1x18x18x32xbf16, #tpu.memory_space<vmem>>, vector<1x16x16x32xbf16>
    %28 = vector.shape_cast %27 : vector<1x16x16x32xbf16> to vector<16x16x32xbf16>
    %29 = vector.shape_cast %28 : vector<16x16x32xbf16> to vector<256x32xbf16>
    %c4 = arith.constant 4 : index
    %c0_31 = arith.constant 0 : index
    %c0_32 = arith.constant 0 : index
    %30 = vector.load %arg2[%c4, %c0_31, %c0_32] : memref<9x32x32xbf16, #tpu.memory_space<vmem>>, vector<1x32x32xbf16>
    %31 = vector.shape_cast %30 : vector<1x32x32xbf16> to vector<32x32xbf16>
    %cst_33 = arith.constant dense<0.000000e+00> : vector<256x32xf32>
    %32 = tpu.matmul %29, %31, %cst_33 {dimension_numbers = #tpu.dot_dimension_numbers<[1], [0], [0], [1], [0, 0, 1, 1], [], []>} : vector<256x32xbf16>, vector<32x32xbf16>, vector<256x32xf32> -> vector<256x32xf32>
    %33 = arith.addf %26, %32 : vector<256x32xf32>
    %c0_34 = arith.constant 0 : index
    %c1_35 = arith.constant 1 : index
    %c2_36 = arith.constant 2 : index
    %c0_37 = arith.constant 0 : index
    %34 = vector.load %arg1[%c0_34, %c1_35, %c2_36, %c0_37] : memref<1x18x18x32xbf16, #tpu.memory_space<vmem>>, vector<1x16x16x32xbf16>
    %35 = vector.shape_cast %34 : vector<1x16x16x32xbf16> to vector<16x16x32xbf16>
    %36 = vector.shape_cast %35 : vector<16x16x32xbf16> to vector<256x32xbf16>
    %c5 = arith.constant 5 : index
    %c0_38 = arith.constant 0 : index
    %c0_39 = arith.constant 0 : index
    %37 = vector.load %arg2[%c5, %c0_38, %c0_39] : memref<9x32x32xbf16, #tpu.memory_space<vmem>>, vector<1x32x32xbf16>
    %38 = vector.shape_cast %37 : vector<1x32x32xbf16> to vector<32x32xbf16>
    %cst_40 = arith.constant dense<0.000000e+00> : vector<256x32xf32>
    %39 = tpu.matmul %36, %38, %cst_40 {dimension_numbers = #tpu.dot_dimension_numbers<[1], [0], [0], [1], [0, 0, 1, 1], [], []>} : vector<256x32xbf16>, vector<32x32xbf16>, vector<256x32xf32> -> vector<256x32xf32>
    %40 = arith.addf %33, %39 : vector<256x32xf32>
    %c0_41 = arith.constant 0 : index
    %c2_42 = arith.constant 2 : index
    %c0_43 = arith.constant 0 : index
    %c0_44 = arith.constant 0 : index
    %41 = vector.load %arg1[%c0_41, %c2_42, %c0_43, %c0_44] : memref<1x18x18x32xbf16, #tpu.memory_space<vmem>>, vector<1x16x16x32xbf16>
    %42 = vector.shape_cast %41 : vector<1x16x16x32xbf16> to vector<16x16x32xbf16>
    %43 = vector.shape_cast %42 : vector<16x16x32xbf16> to vector<256x32xbf16>
    %c6 = arith.constant 6 : index
    %c0_45 = arith.constant 0 : index
    %c0_46 = arith.constant 0 : index
    %44 = vector.load %arg2[%c6, %c0_45, %c0_46] : memref<9x32x32xbf16, #tpu.memory_space<vmem>>, vector<1x32x32xbf16>
    %45 = vector.shape_cast %44 : vector<1x32x32xbf16> to vector<32x32xbf16>
    %cst_47 = arith.constant dense<0.000000e+00> : vector<256x32xf32>
    %46 = tpu.matmul %43, %45, %cst_47 {dimension_numbers = #tpu.dot_dimension_numbers<[1], [0], [0], [1], [0, 0, 1, 1], [], []>} : vector<256x32xbf16>, vector<32x32xbf16>, vector<256x32xf32> -> vector<256x32xf32>
    %47 = arith.addf %40, %46 : vector<256x32xf32>
    %c0_48 = arith.constant 0 : index
    %c2_49 = arith.constant 2 : index
    %c1_50 = arith.constant 1 : index
    %c0_51 = arith.constant 0 : index
    %48 = vector.load %arg1[%c0_48, %c2_49, %c1_50, %c0_51] : memref<1x18x18x32xbf16, #tpu.memory_space<vmem>>, vector<1x16x16x32xbf16>
    %49 = vector.shape_cast %48 : vector<1x16x16x32xbf16> to vector<16x16x32xbf16>
    %50 = vector.shape_cast %49 : vector<16x16x32xbf16> to vector<256x32xbf16>
    %c7 = arith.constant 7 : index
    %c0_52 = arith.constant 0 : index
    %c0_53 = arith.constant 0 : index
    %51 = vector.load %arg2[%c7, %c0_52, %c0_53] : memref<9x32x32xbf16, #tpu.memory_space<vmem>>, vector<1x32x32xbf16>
    %52 = vector.shape_cast %51 : vector<1x32x32xbf16> to vector<32x32xbf16>
    %cst_54 = arith.constant dense<0.000000e+00> : vector<256x32xf32>
    %53 = tpu.matmul %50, %52, %cst_54 {dimension_numbers = #tpu.dot_dimension_numbers<[1], [0], [0], [1], [0, 0, 1, 1], [], []>} : vector<256x32xbf16>, vector<32x32xbf16>, vector<256x32xf32> -> vector<256x32xf32>
    %54 = arith.addf %47, %53 : vector<256x32xf32>
    %c0_55 = arith.constant 0 : index
    %c2_56 = arith.constant 2 : index
    %c2_57 = arith.constant 2 : index
    %c0_58 = arith.constant 0 : index
    %55 = vector.load %arg1[%c0_55, %c2_56, %c2_57, %c0_58] : memref<1x18x18x32xbf16, #tpu.memory_space<vmem>>, vector<1x16x16x32xbf16>
    %56 = vector.shape_cast %55 : vector<1x16x16x32xbf16> to vector<16x16x32xbf16>
    %57 = vector.shape_cast %56 : vector<16x16x32xbf16> to vector<256x32xbf16>
    %c8 = arith.constant 8 : index
    %c0_59 = arith.constant 0 : index
    %c0_60 = arith.constant 0 : index
    %58 = vector.load %arg2[%c8, %c0_59, %c0_60] : memref<9x32x32xbf16, #tpu.memory_space<vmem>>, vector<1x32x32xbf16>
    %59 = vector.shape_cast %58 : vector<1x32x32xbf16> to vector<32x32xbf16>
    %cst_61 = arith.constant dense<0.000000e+00> : vector<256x32xf32>
    %60 = tpu.matmul %57, %59, %cst_61 {dimension_numbers = #tpu.dot_dimension_numbers<[1], [0], [0], [1], [0, 0, 1, 1], [], []>} : vector<256x32xbf16>, vector<32x32xbf16>, vector<256x32xf32> -> vector<256x32xf32>
    %61 = arith.addf %54, %60 : vector<256x32xf32>
    %c0_62 = arith.constant 0 : index
    %c0_63 = arith.constant 0 : index
    %62 = vector.load %arg3[%c0_62, %c0_63] : memref<1x32xf32, #tpu.memory_space<vmem>>, vector<1x32xf32>
    %63 = vector.broadcast %62 : vector<1x32xf32> to vector<256x32xf32>
    %64 = arith.mulf %61, %63 : vector<256x32xf32>
    %c0_64 = arith.constant 0 : index
    %c0_65 = arith.constant 0 : index
    %65 = vector.load %arg4[%c0_64, %c0_65] : memref<1x32xf32, #tpu.memory_space<vmem>>, vector<1x32xf32>
    %66 = vector.broadcast %65 : vector<1x32xf32> to vector<256x32xf32>
    %67 = arith.addf %64, %66 : vector<256x32xf32>
    %68 = vector.shape_cast %67 : vector<256x32xf32> to vector<16x16x32xf32>
    %c0_66 = arith.constant 0 : index
    %c0_67 = arith.constant 0 : index
    %c0_68 = arith.constant 0 : index
    %c0_69 = arith.constant 0 : index
    %69 = vector.load %arg5[%c0_66, %c0_67, %c0_68, %c0_69] : memref<1x16x16x32xf32, #tpu.memory_space<vmem>>, vector<1x16x16x32xf32>
    %70 = vector.shape_cast %69 : vector<1x16x16x32xf32> to vector<16x16x32xf32>
    %71 = vector.shape_cast %68 : vector<16x16x32xf32> to vector<1x16x16x32xf32>
    tpu.vector_store %arg5[%c0_66, %c0_67, %c0_68, %c0_69], %71 {strides = array<i32>} : memref<1x16x16x32xf32, #tpu.memory_space<vmem>>, vector<1x16x16x32xf32>,
    return
  }
  func.func @transform_0(%arg0: i32) -> (i32, i32, i32, i32) {
    %c0_i32 = arith.constant 0 : i32
    %c0_i32_0 = arith.constant 0 : i32
    %c0_i32_1 = arith.constant 0 : i32
    %c0_i32_2 = arith.constant 0 : i32
    return %arg0, %c0_i32, %c0_i32_0, %c0_i32_1 : i32, i32, i32, i32
  }
  func.func @transform_1(%arg0: i32) -> (i32, i32, i32) {
    %c0_i32 = arith.constant 0 : i32
    %c0_i32_0 = arith.constant 0 : i32
    %c0_i32_1 = arith.constant 0 : i32
    %c0_i32_2 = arith.constant 0 : i32
    return %c0_i32, %c0_i32_0, %c0_i32_1 : i32, i32, i32
  }
  func.func @transform_2(%arg0: i32) -> (i32, i32) {
    %c0_i32 = arith.constant 0 : i32
    %c0_i32_0 = arith.constant 0 : i32
    %c0_i32_1 = arith.constant 0 : i32
    return %c0_i32, %c0_i32_0 : i32, i32
  }
  func.func @transform_3(%arg0: i32) -> (i32, i32) {
    %c0_i32 = arith.constant 0 : i32
    %c0_i32_0 = arith.constant 0 : i32
    %c0_i32_1 = arith.constant 0 : i32
    return %c0_i32, %c0_i32_0 : i32, i32
  }
  func.func @transform_4(%arg0: i32) -> (i32, i32, i32, i32) {
    %c0_i32 = arith.constant 0 : i32
    %c0_i32_0 = arith.constant 0 : i32
    %c0_i32_1 = arith.constant 0 : i32
    %c0_i32_2 = arith.constant 0 : i32
    return %arg0, %c0_i32, %c0_i32_0, %c0_i32_1 : i32, i32, i32, i32
  }
}

</mosaic_0001>

<bundles_post_ra>
// kernel: scconv_forward.5
= control target key start
LH: loop header
LB: loop body
LE: loop exit
PB: predicated region body
PF: predicated region fallthrough
CT: control target
= control target key end

     0   :  { %vm351_vm0 = vcmask 1043456   ;;  %vm254_vm1 = vcmask 64512   ;;  %vm961_vm2 = vcmask 257024   ;;  %s2615_s1 = inlined_call_operand.vmem [shape: bf16[8,32], index: 1, kind: input, shape index: {}]   ;;  %s2616_s2 = inlined_call_operand.vmem [shape: bf16[8,32], index: 2, kind: input, shape index: {}]   ;;  %s2617_s0 = inlined_call_operand.vmem [shape: bf16[512,8], index: 0, kind: input, shape index: {}]   ;;  %s2618_s3 = inlined_call_operand.vmem [shape: f32[1,32], index: 3, kind: input, shape index: {}]   ;;  %s2619_s4 = inlined_call_operand.vmem [shape: f32[1,32], index: 4, kind: input, shape index: {}]   ;;  %s2620_s5 = inlined_call_operand.vmem [shape: f32[1,32], index: 5, kind: input, shape index: {}]   ;;  %s2621_s6 = inlined_call_operand.vmem [shape: f32[1,32], index: 6, kind: input, shape index: {}]   ;;  %s2622_s7 = inlined_call_operand.vmem [shape: bf16[512,32], index: 7, kind: output, shape index: {0}]   ;;  %s2623_s8 = inlined_call_operand.vmem [shape: bf16[512,32], index: 8, kind: output, shape index: {1}]  }
   0x1   :  { %v93_v0 = vld [vmem:[%s2615_s1] sm:$0xf]  ;;  %v1555_v6 = vld [vmem:[%s2617_s0 + $0x8] sm:$0xff]  ;;  %v1556_v8 = vld [vmem:[%s2617_s0 + $0x10] sm:$0xff] }
   0x2   :  { %v524_v1 = vld [vmem:[%s2616_s2] sm:$0xf]  ;;  %v353_v2 = vsel %vm351_vm0, %v93_v0, 0  ;;  %v1571_v7 = vld [vmem:[%s2617_s0 + $0x88] sm:$0xff]  ;;  %v1572_v9 = vld [vmem:[%s2617_s0 + $0x90] sm:$0xff] }
   0x3   :  { %v526_v3 = vsel %vm351_vm0, %v524_v1, 0  ;;  %v1554_v4 = vld [vmem:[%s2617_s0] sm:$0xff]  ;;  %362 = vmatpush.bf16.msra.mxu0 %v353_v2  ;;  %1586 = vmatpush.bf16.msra.mxu2 %v353_v2  ;;  %v1557_v10 = vld [vmem:[%s2617_s0 + $0x18] sm:$0xff]  ;;  %v1559_v14 = vld [vmem:[%s2617_s0 + $0x28] sm:$0xff] }
   0x4   :  { %v1570_v5 = vld [vmem:[%s2617_s0 + $0x80] sm:$0xff]  ;;  %535 = vmatpush.bf16.msra.mxu1 %v526_v3  ;;  %1587 = vmatpush.bf16.msra.mxu3 %v526_v3  ;;  %v1573_v11 = vld [vmem:[%s2617_s0 + $0x98] sm:$0xff]  ;;  %v1575_v15 = vld [vmem:[%s2617_s0 + $0xa8] sm:$0xff] }
   0x5   :  { %v1558_v12 = vld [vmem:[%s2617_s0 + $0x20] sm:$0xff]  ;;  %v1560_v16 = vld [vmem:[%s2617_s0 + $0x30] sm:$0xff]  ;;  %v1561_v18 = vld [vmem:[%s2617_s0 + $0x38] sm:$0xff] }
   0x6   :  { %1490 = vmatmul.msk.bf16.vlgmr.msra.gmra.mxu0 %vm254_vm1, %v1554_v4  ;;  %1506 = vmatmul.msk.bf16.vlgmr.msra.gmra.mxu2 %vm254_vm1, %v1570_v5  ;;  %v1574_v13 = vld [vmem:[%s2617_s0 + $0xa0] sm:$0xff]  ;;  %v1576_v17 = vld [vmem:[%s2617_s0 + $0xb0] sm:$0xff]  ;;  %v1577_v19 = vld [vmem:[%s2617_s0 + $0xb8] sm:$0xff] }
   0x7   :  { %1522 = vmatmul.msk.bf16.vlgmr.msra.gmra.mxu1 %vm254_vm1, %v1554_v4  ;;  %1538 = vmatmul.msk.bf16.vlgmr.msra.gmra.mxu3 %vm254_vm1, %v1570_v5  ;;  %v1730_v20 = vld [vmem:[%s2618_s3] ss:$0 sm:$0xff]  ;;  %v1563_v58 = vld [vmem:[%s2617_s0 + $0x48] sm:$0xff] }
   0x8   :  { %v1735_v21 = vld [vmem:[%s2620_s5] ss:$0 sm:$0xff]  ;;  %v1579_v59 = vld [vmem:[%s2617_s0 + $0xc8] sm:$0xff] }
   0x9   :  { %v1740_v22 = vld [vmem:[%s2619_s4] ss:$0 sm:$0xff] }
   0xa   :  { %v1562_v23 = vld [vmem:[%s2617_s0 + $0x40] sm:$0xff] }
   0xb   :  { %v1578_v24 = vld [vmem:[%s2617_s0 + $0xc0] sm:$0xff] }
   0xc   :  { %v1751_v26 = vld [vmem:[%s2621_s6] ss:$0 sm:$0xff] }
  0x16   :  { %1491 = vmatmul.msk.bf16.gmra.mxu0 %vm254_vm1, %v1555_v6  ;;  %1507 = vmatmul.msk.bf16.gmra.mxu2 %vm254_vm1, %v1571_v7 }
  0x17   :  { %1523 = vmatmul.msk.bf16.gmra.mxu1 %vm254_vm1, %v1555_v6  ;;  %1539 = vmatmul.msk.bf16.gmra.mxu3 %vm254_vm1, %v1571_v7 }
  0x26   :  { %1492 = vmatmul.msk.bf16.gmra.mxu0 %vm254_vm1, %v1556_v8  ;;  %1508 = vmatmul.msk.bf16.gmra.mxu2 %vm254_vm1, %v1572_v9 }
  0x27   :  { %1524 = vmatmul.msk.bf16.gmra.mxu1 %vm254_vm1, %v1556_v8  ;;  %1540 = vmatmul.msk.bf16.gmra.mxu3 %vm254_vm1, %v1572_v9 }
  0x36   :  { %1493 = vmatmul.msk.bf16.gmra.mxu0 %vm254_vm1, %v1557_v10  ;;  %1509 = vmatmul.msk.bf16.gmra.mxu2 %vm254_vm1, %v1573_v11 }
  0x37   :  { %1525 = vmatmul.msk.bf16.gmra.mxu1 %vm254_vm1, %v1557_v10  ;;  %1541 = vmatmul.msk.bf16.gmra.mxu3 %vm254_vm1, %v1573_v11 }
  0x46   :  { %1494 = vmatmul.msk.bf16.gmra.mxu0 %vm254_vm1, %v1558_v12  ;;  %1510 = vmatmul.msk.bf16.gmra.mxu2 %vm254_vm1, %v1574_v13 }
  0x47   :  { %1526 = vmatmul.msk.bf16.gmra.mxu1 %vm254_vm1, %v1558_v12  ;;  %1542 = vmatmul.msk.bf16.gmra.mxu3 %vm254_vm1, %v1574_v13 }
  0x56   :  { %1495 = vmatmul.msk.bf16.gmra.mxu0 %vm254_vm1, %v1559_v14  ;;  %1511 = vmatmul.msk.bf16.gmra.mxu2 %vm254_vm1, %v1575_v15 }
  0x57   :  { %1527 = vmatmul.msk.bf16.gmra.mxu1 %vm254_vm1, %v1559_v14  ;;  %1543 = vmatmul.msk.bf16.gmra.mxu3 %vm254_vm1, %v1575_v15 }
  0x66   :  { %1496 = vmatmul.msk.bf16.gmra.mxu0 %vm254_vm1, %v1560_v16  ;;  %1512 = vmatmul.msk.bf16.gmra.mxu2 %vm254_vm1, %v1576_v17 }
  0x67   :  { %1528 = vmatmul.msk.bf16.gmra.mxu1 %vm254_vm1, %v1560_v16  ;;  %1544 = vmatmul.msk.bf16.gmra.mxu3 %vm254_vm1, %v1576_v17 }
  0x76   :  { %1497 = vmatmul.msk.bf16.gmra.mxu0 %vm254_vm1, %v1561_v18  ;;  %1513 = vmatmul.msk.bf16.gmra.mxu2 %vm254_vm1, %v1577_v19 }
  0x77   :  { %1529 = vmatmul.msk.bf16.gmra.mxu1 %vm254_vm1, %v1561_v18  ;;  %1545 = vmatmul.msk.bf16.gmra.mxu3 %vm254_vm1, %v1577_v19 }
  0x83   :  { %v364_v25 = vpop.f32.mrf.mxu0 }
  0x84   :  { %v701_v27 = vmul.f32 %v1730_v20, %v364_v25  ;;  %v537_v28 = vpop.f32.mrf.mxu1 }
  0x85   :  { %v1030_v29 = vmul.f32 %v1735_v21, %v537_v28 }
  0x86   :  { %v769_v30 = vadd.f32 %v1740_v22, %v701_v27  ;;  %1498 = vmatmul.msk.bf16.gmra.mxu0 %vm254_vm1, %v1562_v23  ;;  %1514 = vmatmul.msk.bf16.gmra.mxu2 %vm254_vm1, %v1578_v24 }
  0x87   :  { %v1098_v31 = vadd.f32 %v1751_v26, %v1030_v29  ;;  %1530 = vmatmul.msk.bf16.gmra.mxu1 %vm254_vm1, %v1562_v23  ;;  %1546 = vmatmul.msk.bf16.gmra.mxu3 %vm254_vm1, %v1578_v24 }
  0x88   :  { %v833_v32 = vmax.f32 %v769_v30, 0.0 }
  0x89   :  { %v1162_v33 = vmax.f32 %v1098_v31, 0.0  ;;  %v444_v34 = vpop.f32.mrf.mxu2 }
  0x8a   :  { %v897_v35 = vpack.c.bf16 %v833_v32, %v833_v32  ;;  %v733_v36 = vmul.f32 %v1730_v20, %v444_v34  ;;  %v617_v37 = vpop.f32.mrf.mxu3 }
  0x8b   :  { %v1226_v38 = vpack.c.bf16 %v1162_v33, %v1162_v33  ;;  %v1062_v39 = vmul.f32 %v1735_v21, %v617_v37  ;;  %v366_v40 = vpop.f32.mrf.mxu0 }
  0x8c   :  { %962 = vst.msk [vmem:[%s2622_s7] sm:$0xf] %vm961_vm2, %v897_v35  ;;  %v801_v41 = vadd.f32 %v1740_v22, %v733_v36  ;;  %v702_v42 = vmul.f32 %v1730_v20, %v366_v40  ;;  %v539_v43 = vpop.f32.mrf.mxu1  ;;  %v1564_v40 = vld [vmem:[%s2617_s0 + $0x50] sm:$0xff] }
  0x8d   :  { %1290 = vst.msk [vmem:[%s2623_s8] sm:$0xf] %vm961_vm2, %v1226_v38  ;;  %v1130_v44 = vadd.f32 %v1751_v26, %v1062_v39  ;;  %v1031_v45 = vmul.f32 %v1735_v21, %v539_v43 }
  0x8e   :  { %v865_v46 = vmax.f32 %v801_v41, 0.0  ;;  %v770_v47 = vadd.f32 %v1740_v22, %v702_v42  ;;  %v1580_v41 = vld [vmem:[%s2617_s0 + $0xd0] sm:$0xff] }
  0x8f   :  { %v1194_v48 = vmax.f32 %v1130_v44, 0.0  ;;  %v1099_v49 = vadd.f32 %v1751_v26, %v1031_v45 }
  0x90   :  { %v929_v50 = vpack.c.bf16 %v865_v46, %v865_v46  ;;  %v834_v51 = vmax.f32 %v770_v47, 0.0 }
  0x91   :  { %v1258_v52 = vpack.c.bf16 %v1194_v48, %v1194_v48  ;;  %v1163_v53 = vmax.f32 %v1099_v49, 0.0  ;;  %v446_v54 = vpop.f32.mrf.mxu2 }
  0x92   :  { %994 = vst.msk [vmem:[%s2622_s7 + $0x80] sm:$0xf] %vm961_vm2, %v929_v50  ;;  %v898_v55 = vpack.c.bf16 %v834_v51, %v834_v51  ;;  %v734_v56 = vmul.f32 %v1730_v20, %v446_v54  ;;  %v619_v57 = vpop.f32.mrf.mxu3 }
  0x93   :  { %1322 = vst.msk [vmem:[%s2623_s8 + $0x80] sm:$0xf] %vm961_vm2, %v1258_v52  ;;  %v1227_v60 = vpack.c.bf16 %v1163_v53, %v1163_v53  ;;  %v1063_v61 = vmul.f32 %v1735_v21, %v619_v57  ;;  %v369_v62 = vpop.f32.mrf.mxu0 }
  0x94   :  { %963 = vst.msk [vmem:[%s2622_s7 + $0x4] sm:$0xf] %vm961_vm2, %v898_v55  ;;  %v802_v63 = vadd.f32 %v1740_v22, %v734_v56  ;;  %v703_v0 = vmul.f32 %v1730_v20, %v369_v62  ;;  %v542_v1 = vpop.f32.mrf.mxu1 }
  0x95   :  { %1291 = vst.msk [vmem:[%s2623_s8 + $0x4] sm:$0xf] %vm961_vm2, %v1227_v60  ;;  %v1131_v2 = vadd.f32 %v1751_v26, %v1063_v61  ;;  %v1032_v3 = vmul.f32 %v1735_v21, %v542_v1 }
  0x96   :  { %v866_v4 = vmax.f32 %v802_v63, 0.0  ;;  %v771_v5 = vadd.f32 %v1740_v22, %v703_v0  ;;  %1499 = vmatmul.msk.bf16.gmra.mxu0 %vm254_vm1, %v1563_v58  ;;  %1515 = vmatmul.msk.bf16.gmra.mxu2 %vm254_vm1, %v1579_v59 }
  0x97   :  { %v1195_v6 = vmax.f32 %v1131_v2, 0.0  ;;  %v1100_v7 = vadd.f32 %v1751_v26, %v1032_v3  ;;  %1531 = vmatmul.msk.bf16.gmra.mxu1 %vm254_vm1, %v1563_v58  ;;  %1547 = vmatmul.msk.bf16.gmra.mxu3 %vm254_vm1, %v1579_v59 }
  0x98   :  { %v930_v8 = vpack.c.bf16 %v866_v4, %v866_v4  ;;  %v835_v9 = vmax.f32 %v771_v5, 0.0 }
  0x99   :  { %v1259_v10 = vpack.c.bf16 %v1195_v6, %v1195_v6  ;;  %v1164_v11 = vmax.f32 %v1100_v7, 0.0  ;;  %v449_v12 = vpop.f32.mrf.mxu2 }
  0x9a   :  { %995 = vst.msk [vmem:[%s2622_s7 + $0x84] sm:$0xf] %vm961_vm2, %v930_v8  ;;  %v899_v13 = vpack.c.bf16 %v835_v9, %v835_v9  ;;  %v735_v14 = vmul.f32 %v1730_v20, %v449_v12  ;;  %v622_v15 = vpop.f32.mrf.mxu3 }
  0x9b   :  { %1323 = vst.msk [vmem:[%s2623_s8 + $0x84] sm:$0xf] %vm961_vm2, %v1259_v10  ;;  %v1228_v16 = vpack.c.bf16 %v1164_v11, %v1164_v11  ;;  %v1064_v17 = vmul.f32 %v1735_v21, %v622_v15  ;;  %v371_v18 = vpop.f32.mrf.mxu0 }
  0x9c   :  { %964 = vst.msk [vmem:[%s2622_s7 + $0x8] sm:$0xf] %vm961_vm2, %v899_v13  ;;  %v803_v19 = vadd.f32 %v1740_v22, %v735_v14  ;;  %v704_v23 = vmul.f32 %v1730_v20, %v371_v18  ;;  %v544_v24 = vpop.f32.mrf.mxu1  ;;  %v1565_v18 = vld [vmem:[%s2617_s0 + $0x58] sm:$0xff] }
  0x9d   :  { %1292 = vst.msk [vmem:[%s2623_s8 + $0x8] sm:$0xf] %vm961_vm2, %v1228_v16  ;;  %v1132_v25 = vadd.f32 %v1751_v26, %v1064_v17  ;;  %v1033_v27 = vmul.f32 %v1735_v21, %v544_v24 }
  0x9e   :  { %v867_v28 = vmax.f32 %v803_v19, 0.0  ;;  %v772_v29 = vadd.f32 %v1740_v22, %v704_v23  ;;  %v1581_v19 = vld [vmem:[%s2617_s0 + $0xd8] sm:$0xff] }
  0x9f   :  { %v1196_v30 = vmax.f32 %v1132_v25, 0.0  ;;  %v1101_v31 = vadd.f32 %v1751_v26, %v1033_v27 }
  0xa0   :  { %v931_v32 = vpack.c.bf16 %v867_v28, %v867_v28  ;;  %v836_v33 = vmax.f32 %v772_v29, 0.0 }
  0xa1   :  { %v1260_v34 = vpack.c.bf16 %v1196_v30, %v1196_v30  ;;  %v1165_v35 = vmax.f32 %v1101_v31, 0.0  ;;  %v451_v36 = vpop.f32.mrf.mxu2 }
  0xa2   :  { %996 = vst.msk [vmem:[%s2622_s7 + $0x88] sm:$0xf] %vm961_vm2, %v931_v32  ;;  %v900_v37 = vpack.c.bf16 %v836_v33, %v836_v33  ;;  %v736_v38 = vmul.f32 %v1730_v20, %v451_v36  ;;  %v624_v39 = vpop.f32.mrf.mxu3 }
  0xa3   :  { %1324 = vst.msk [vmem:[%s2623_s8 + $0x88] sm:$0xf] %vm961_vm2, %v1260_v34  ;;  %v1229_v42 = vpack.c.bf16 %v1165_v35, %v1165_v35  ;;  %v1065_v43 = vmul.f32 %v1735_v21, %v624_v39  ;;  %v374_v44 = vpop.f32.mrf.mxu0 }
  0xa4   :  { %965 = vst.msk [vmem:[%s2622_s7 + $0xc] sm:$0xf] %vm961_vm2, %v900_v37  ;;  %v804_v45 = vadd.f32 %v1740_v22, %v736_v38  ;;  %v705_v46 = vmul.f32 %v1730_v20, %v374_v44  ;;  %v547_v47 = vpop.f32.mrf.mxu1 }
  0xa5   :  { %1293 = vst.msk [vmem:[%s2623_s8 + $0xc] sm:$0xf] %vm961_vm2, %v1229_v42  ;;  %v1133_v48 = vadd.f32 %v1751_v26, %v1065_v43  ;;  %v1034_v49 = vmul.f32 %v1735_v21, %v547_v47 }
  0xa6   :  { %v868_v50 = vmax.f32 %v804_v45, 0.0  ;;  %v773_v51 = vadd.f32 %v1740_v22, %v705_v46  ;;  %1500 = vmatmul.msk.bf16.gmra.mxu0 %vm254_vm1, %v1564_v40  ;;  %1516 = vmatmul.msk.bf16.gmra.mxu2 %vm254_vm1, %v1580_v41 }
  0xa7   :  { %v1197_v52 = vmax.f32 %v1133_v48, 0.0  ;;  %v1102_v53 = vadd.f32 %v1751_v26, %v1034_v49  ;;  %1532 = vmatmul.msk.bf16.gmra.mxu1 %vm254_vm1, %v1564_v40  ;;  %1548 = vmatmul.msk.bf16.gmra.mxu3 %vm254_vm1, %v1580_v41 }
  0xa8   :  { %v932_v54 = vpack.c.bf16 %v868_v50, %v868_v50  ;;  %v837_v55 = vmax.f32 %v773_v51, 0.0 }
  0xa9   :  { %v1261_v56 = vpack.c.bf16 %v1197_v52, %v1197_v52  ;;  %v1166_v57 = vmax.f32 %v1102_v53, 0.0  ;;  %v454_v58 = vpop.f32.mrf.mxu2 }
  0xaa   :  { %997 = vst.msk [vmem:[%s2622_s7 + $0x8c] sm:$0xf] %vm961_vm2, %v932_v54  ;;  %v901_v59 = vpack.c.bf16 %v837_v55, %v837_v55  ;;  %v737_v60 = vmul.f32 %v1730_v20, %v454_v58  ;;  %v627_v61 = vpop.f32.mrf.mxu3 }
  0xab   :  { %1325 = vst.msk [vmem:[%s2623_s8 + $0x8c] sm:$0xf] %vm961_vm2, %v1261_v56  ;;  %v1230_v62 = vpack.c.bf16 %v1166_v57, %v1166_v57  ;;  %v1066_v63 = vmul.f32 %v1735_v21, %v627_v61  ;;  %v376_v0 = vpop.f32.mrf.mxu0 }
  0xac   :  { %966 = vst.msk [vmem:[%s2622_s7 + $0x10] sm:$0xf] %vm961_vm2, %v901_v59  ;;  %v805_v1 = vadd.f32 %v1740_v22, %v737_v60  ;;  %v706_v2 = vmul.f32 %v1730_v20, %v376_v0  ;;  %v549_v3 = vpop.f32.mrf.mxu1  ;;  %v1566_v0 = vld [vmem:[%s2617_s0 + $0x60] sm:$0xff] }
  0xad   :  { %1294 = vst.msk [vmem:[%s2623_s8 + $0x10] sm:$0xf] %vm961_vm2, %v1230_v62  ;;  %v1134_v4 = vadd.f32 %v1751_v26, %v1066_v63  ;;  %v1035_v5 = vmul.f32 %v1735_v21, %v549_v3 }
  0xae   :  { %v869_v6 = vmax.f32 %v805_v1, 0.0  ;;  %v774_v7 = vadd.f32 %v1740_v22, %v706_v2  ;;  %v1582_v1 = vld [vmem:[%s2617_s0 + $0xe0] sm:$0xff] }
  0xaf   :  { %v1198_v8 = vmax.f32 %v1134_v4, 0.0  ;;  %v1103_v9 = vadd.f32 %v1751_v26, %v1035_v5 }
  0xb0   :  { %v933_v10 = vpack.c.bf16 %v869_v6, %v869_v6  ;;  %v838_v11 = vmax.f32 %v774_v7, 0.0 }
  0xb1   :  { %v1262_v12 = vpack.c.bf16 %v1198_v8, %v1198_v8  ;;  %v1167_v13 = vmax.f32 %v1103_v9, 0.0  ;;  %v456_v14 = vpop.f32.mrf.mxu2 }
  0xb2   :  { %998 = vst.msk [vmem:[%s2622_s7 + $0x90] sm:$0xf] %vm961_vm2, %v933_v10  ;;  %v902_v15 = vpack.c.bf16 %v838_v11, %v838_v11  ;;  %v738_v16 = vmul.f32 %v1730_v20, %v456_v14  ;;  %v629_v17 = vpop.f32.mrf.mxu3 }
  0xb3   :  { %1326 = vst.msk [vmem:[%s2623_s8 + $0x90] sm:$0xf] %vm961_vm2, %v1262_v12  ;;  %v1231_v23 = vpack.c.bf16 %v1167_v13, %v1167_v13  ;;  %v1067_v24 = vmul.f32 %v1735_v21, %v629_v17  ;;  %v379_v25 = vpop.f32.mrf.mxu0 }
  0xb4   :  { %967 = vst.msk [vmem:[%s2622_s7 + $0x14] sm:$0xf] %vm961_vm2, %v902_v15  ;;  %v806_v27 = vadd.f32 %v1740_v22, %v738_v16  ;;  %v707_v28 = vmul.f32 %v1730_v20, %v379_v25  ;;  %v552_v29 = vpop.f32.mrf.mxu1 }
  0xb5   :  { %1295 = vst.msk [vmem:[%s2623_s8 + $0x14] sm:$0xf] %vm961_vm2, %v1231_v23  ;;  %v1135_v30 = vadd.f32 %v1751_v26, %v1067_v24  ;;  %v1036_v31 = vmul.f32 %v1735_v21, %v552_v29 }
  0xb6   :  { %v870_v32 = vmax.f32 %v806_v27, 0.0  ;;  %v775_v33 = vadd.f32 %v1740_v22, %v707_v28  ;;  %1501 = vmatmul.msk.bf16.gmra.mxu0 %vm254_vm1, %v1565_v18  ;;  %1517 = vmatmul.msk.bf16.gmra.mxu2 %vm254_vm1, %v1581_v19 }
  0xb7   :  { %v1199_v34 = vmax.f32 %v1135_v30, 0.0  ;;  %v1104_v35 = vadd.f32 %v1751_v26, %v1036_v31  ;;  %1533 = vmatmul.msk.bf16.gmra.mxu1 %vm254_vm1, %v1565_v18  ;;  %1549 = vmatmul.msk.bf16.gmra.mxu3 %vm254_vm1, %v1581_v19 }
  0xb8   :  { %v934_v36 = vpack.c.bf16 %v870_v32, %v870_v32  ;;  %v839_v37 = vmax.f32 %v775_v33, 0.0 }
  0xb9   :  { %v1263_v38 = vpack.c.bf16 %v1199_v34, %v1199_v34  ;;  %v1168_v39 = vmax.f32 %v1104_v35, 0.0  ;;  %v459_v40 = vpop.f32.mrf.mxu2 }
  0xba   :  { %999 = vst.msk [vmem:[%s2622_s7 + $0x94] sm:$0xf] %vm961_vm2, %v934_v36  ;;  %v903_v41 = vpack.c.bf16 %v839_v37, %v839_v37  ;;  %v739_v42 = vmul.f32 %v1730_v20, %v459_v40  ;;  %v632_v43 = vpop.f32.mrf.mxu3 }
  0xbb   :  { %1327 = vst.msk [vmem:[%s2623_s8 + $0x94] sm:$0xf] %vm961_vm2, %v1263_v38  ;;  %v1232_v44 = vpack.c.bf16 %v1168_v39, %v1168_v39  ;;  %v1068_v45 = vmul.f32 %v1735_v21, %v632_v43  ;;  %v381_v46 = vpop.f32.mrf.mxu0 }
  0xbc   :  { %968 = vst.msk [vmem:[%s2622_s7 + $0x18] sm:$0xf] %vm961_vm2, %v903_v41  ;;  %v807_v47 = vadd.f32 %v1740_v22, %v739_v42  ;;  %v708_v48 = vmul.f32 %v1730_v20, %v381_v46  ;;  %v554_v49 = vpop.f32.mrf.mxu1  ;;  %v1567_v46 = vld [vmem:[%s2617_s0 + $0x68] sm:$0xff] }
  0xbd   :  { %1296 = vst.msk [vmem:[%s2623_s8 + $0x18] sm:$0xf] %vm961_vm2, %v1232_v44  ;;  %v1136_v50 = vadd.f32 %v1751_v26, %v1068_v45  ;;  %v1037_v51 = vmul.f32 %v1735_v21, %v554_v49 }
  0xbe   :  { %v871_v52 = vmax.f32 %v807_v47, 0.0  ;;  %v776_v53 = vadd.f32 %v1740_v22, %v708_v48  ;;  %v1583_v47 = vld [vmem:[%s2617_s0 + $0xe8] sm:$0xff] }
  0xbf   :  { %v1200_v54 = vmax.f32 %v1136_v50, 0.0  ;;  %v1105_v55 = vadd.f32 %v1751_v26, %v1037_v51 }
  0xc0   :  { %v935_v56 = vpack.c.bf16 %v871_v52, %v871_v52  ;;  %v840_v57 = vmax.f32 %v776_v53, 0.0 }
  0xc1   :  { %v1264_v58 = vpack.c.bf16 %v1200_v54, %v1200_v54  ;;  %v1169_v59 = vmax.f32 %v1105_v55, 0.0  ;;  %v461_v60 = vpop.f32.mrf.mxu2 }
  0xc2   :  { %1000 = vst.msk [vmem:[%s2622_s7 + $0x98] sm:$0xf] %vm961_vm2, %v935_v56  ;;  %v904_v61 = vpack.c.bf16 %v840_v57, %v840_v57  ;;  %v740_v62 = vmul.f32 %v1730_v20, %v461_v60  ;;  %v634_v63 = vpop.f32.mrf.mxu3 }
  0xc3   :  { %1328 = vst.msk [vmem:[%s2623_s8 + $0x98] sm:$0xf] %vm961_vm2, %v1264_v58  ;;  %v1233_v2 = vpack.c.bf16 %v1169_v59, %v1169_v59  ;;  %v1069_v3 = vmul.f32 %v1735_v21, %v634_v63  ;;  %v384_v4 = vpop.f32.mrf.mxu0 }
  0xc4   :  { %969 = vst.msk [vmem:[%s2622_s7 + $0x1c] sm:$0xf] %vm961_vm2, %v904_v61  ;;  %v808_v5 = vadd.f32 %v1740_v22, %v740_v62  ;;  %v709_v6 = vmul.f32 %v1730_v20, %v384_v4  ;;  %v557_v7 = vpop.f32.mrf.mxu1 }
  0xc5   :  { %1297 = vst.msk [vmem:[%s2623_s8 + $0x1c] sm:$0xf] %vm961_vm2, %v1233_v2  ;;  %v1137_v8 = vadd.f32 %v1751_v26, %v1069_v3  ;;  %v1038_v9 = vmul.f32 %v1735_v21, %v557_v7 }
  0xc6   :  { %v872_v10 = vmax.f32 %v808_v5, 0.0  ;;  %v777_v11 = vadd.f32 %v1740_v22, %v709_v6  ;;  %1502 = vmatmul.msk.bf16.gmra.mxu0 %vm254_vm1, %v1566_v0  ;;  %1518 = vmatmul.msk.bf16.gmra.mxu2 %vm254_vm1, %v1582_v1 }
  0xc7   :  { %v1201_v12 = vmax.f32 %v1137_v8, 0.0  ;;  %v1106_v13 = vadd.f32 %v1751_v26, %v1038_v9  ;;  %1534 = vmatmul.msk.bf16.gmra.mxu1 %vm254_vm1, %v1566_v0  ;;  %1550 = vmatmul.msk.bf16.gmra.mxu3 %vm254_vm1, %v1582_v1 }
  0xc8   :  { %v936_v14 = vpack.c.bf16 %v872_v10, %v872_v10  ;;  %v841_v15 = vmax.f32 %v777_v11, 0.0 }
  0xc9   :  { %v1265_v16 = vpack.c.bf16 %v1201_v12, %v1201_v12  ;;  %v1170_v17 = vmax.f32 %v1106_v13, 0.0  ;;  %v464_v18 = vpop.f32.mrf.mxu2 }
  0xca   :  { %1001 = vst.msk [vmem:[%s2622_s7 + $0x9c] sm:$0xf] %vm961_vm2, %v936_v14  ;;  %v905_v19 = vpack.c.bf16 %v841_v15, %v841_v15  ;;  %v741_v23 = vmul.f32 %v1730_v20, %v464_v18  ;;  %v637_v24 = vpop.f32.mrf.mxu3 }
  0xcb   :  { %1329 = vst.msk [vmem:[%s2623_s8 + $0x9c] sm:$0xf] %vm961_vm2, %v1265_v16  ;;  %v1234_v25 = vpack.c.bf16 %v1170_v17, %v1170_v17  ;;  %v1070_v27 = vmul.f32 %v1735_v21, %v637_v24  ;;  %v386_v28 = vpop.f32.mrf.mxu0 }
  0xcc   :  { %970 = vst.msk [vmem:[%s2622_s7 + $0x20] sm:$0xf] %vm961_vm2, %v905_v19  ;;  %v809_v29 = vadd.f32 %v1740_v22, %v741_v23  ;;  %v710_v30 = vmul.f32 %v1730_v20, %v386_v28  ;;  %v559_v31 = vpop.f32.mrf.mxu1  ;;  %v1568_v28 = vld [vmem:[%s2617_s0 + $0x70] sm:$0xff] }
  0xcd   :  { %1298 = vst.msk [vmem:[%s2623_s8 + $0x20] sm:$0xf] %vm961_vm2, %v1234_v25  ;;  %v1138_v32 = vadd.f32 %v1751_v26, %v1070_v27  ;;  %v1039_v33 = vmul.f32 %v1735_v21, %v559_v31 }
  0xce   :  { %v873_v34 = vmax.f32 %v809_v29, 0.0  ;;  %v778_v35 = vadd.f32 %v1740_v22, %v710_v30  ;;  %v1584_v29 = vld [vmem:[%s2617_s0 + $0xf0] sm:$0xff] }
  0xcf   :  { %v1202_v36 = vmax.f32 %v1138_v32, 0.0  ;;  %v1107_v37 = vadd.f32 %v1751_v26, %v1039_v33 }
  0xd0   :  { %v937_v38 = vpack.c.bf16 %v873_v34, %v873_v34  ;;  %v842_v39 = vmax.f32 %v778_v35, 0.0 }
  0xd1   :  { %v1266_v40 = vpack.c.bf16 %v1202_v36, %v1202_v36  ;;  %v1171_v41 = vmax.f32 %v1107_v37, 0.0  ;;  %v466_v42 = vpop.f32.mrf.mxu2 }
  0xd2   :  { %1002 = vst.msk [vmem:[%s2622_s7 + $0xa0] sm:$0xf] %vm961_vm2, %v937_v38  ;;  %v906_v43 = vpack.c.bf16 %v842_v39, %v842_v39  ;;  %v742_v44 = vmul.f32 %v1730_v20, %v466_v42  ;;  %v639_v45 = vpop.f32.mrf.mxu3 }
  0xd3   :  { %1330 = vst.msk [vmem:[%s2623_s8 + $0xa0] sm:$0xf] %vm961_vm2, %v1266_v40  ;;  %v1235_v48 = vpack.c.bf16 %v1171_v41, %v1171_v41  ;;  %v1071_v49 = vmul.f32 %v1735_v21, %v639_v45  ;;  %v389_v50 = vpop.f32.mrf.mxu0 }
  0xd4   :  { %971 = vst.msk [vmem:[%s2622_s7 + $0x24] sm:$0xf] %vm961_vm2, %v906_v43  ;;  %v810_v51 = vadd.f32 %v1740_v22, %v742_v44  ;;  %v711_v52 = vmul.f32 %v1730_v20, %v389_v50  ;;  %v562_v53 = vpop.f32.mrf.mxu1 }
  0xd5   :  { %1299 = vst.msk [vmem:[%s2623_s8 + $0x24] sm:$0xf] %vm961_vm2, %v1235_v48  ;;  %v1139_v54 = vadd.f32 %v1751_v26, %v1071_v49  ;;  %v1040_v55 = vmul.f32 %v1735_v21, %v562_v53 }
  0xd6   :  { %v874_v56 = vmax.f32 %v810_v51, 0.0  ;;  %v779_v57 = vadd.f32 %v1740_v22, %v711_v52  ;;  %1503 = vmatmul.msk.bf16.gmra.mxu0 %vm254_vm1, %v1567_v46  ;;  %1519 = vmatmul.msk.bf16.gmra.mxu2 %vm254_vm1, %v1583_v47 }
  0xd7   :  { %v1203_v58 = vmax.f32 %v1139_v54, 0.0  ;;  %v1108_v59 = vadd.f32 %v1751_v26, %v1040_v55  ;;  %1535 = vmatmul.msk.bf16.gmra.mxu1 %vm254_vm1, %v1567_v46  ;;  %1551 = vmatmul.msk.bf16.gmra.mxu3 %vm254_vm1, %v1583_v47 }
  0xd8   :  { %v938_v60 = vpack.c.bf16 %v874_v56, %v874_v56  ;;  %v843_v61 = vmax.f32 %v779_v57, 0.0 }
  0xd9   :  { %v1267_v62 = vpack.c.bf16 %v1203_v58, %v1203_v58  ;;  %v1172_v63 = vmax.f32 %v1108_v59, 0.0  ;;  %v469_v0 = vpop.f32.mrf.mxu2 }
  0xda   :  { %1003 = vst.msk [vmem:[%s2622_s7 + $0xa4] sm:$0xf] %vm961_vm2, %v938_v60  ;;  %v907_v1 = vpack.c.bf16 %v843_v61, %v843_v61  ;;  %v743_v2 = vmul.f32 %v1730_v20, %v469_v0  ;;  %v642_v3 = vpop.f32.mrf.mxu3 }
  0xdb   :  { %1331 = vst.msk [vmem:[%s2623_s8 + $0xa4] sm:$0xf] %vm961_vm2, %v1267_v62  ;;  %v1236_v4 = vpack.c.bf16 %v1172_v63, %v1172_v63  ;;  %v1072_v5 = vmul.f32 %v1735_v21, %v642_v3  ;;  %v391_v6 = vpop.f32.mrf.mxu0 }
  0xdc   :  { %972 = vst.msk [vmem:[%s2622_s7 + $0x28] sm:$0xf] %vm961_vm2, %v907_v1  ;;  %v811_v7 = vadd.f32 %v1740_v22, %v743_v2  ;;  %v712_v8 = vmul.f32 %v1730_v20, %v391_v6  ;;  %v564_v9 = vpop.f32.mrf.mxu1  ;;  %v1569_v6 = vld [vmem:[%s2617_s0 + $0x78] sm:$0xff] }
  0xdd   :  { %1300 = vst.msk [vmem:[%s2623_s8 + $0x28] sm:$0xf] %vm961_vm2, %v1236_v4  ;;  %v1140_v10 = vadd.f32 %v1751_v26, %v1072_v5  ;;  %v1041_v11 = vmul.f32 %v1735_v21, %v564_v9 }
  0xde   :  { %v875_v12 = vmax.f32 %v811_v7, 0.0  ;;  %v780_v13 = vadd.f32 %v1740_v22, %v712_v8  ;;  %v1585_v7 = vld [vmem:[%s2617_s0 + $0xf8] sm:$0xff] }
  0xdf   :  { %v1204_v14 = vmax.f32 %v1140_v10, 0.0  ;;  %v1109_v15 = vadd.f32 %v1751_v26, %v1041_v11 }
  0xe0   :  { %v939_v16 = vpack.c.bf16 %v875_v12, %v875_v12  ;;  %v844_v17 = vmax.f32 %v780_v13, 0.0 }
  0xe1   :  { %v1268_v18 = vpack.c.bf16 %v1204_v14, %v1204_v14  ;;  %v1173_v19 = vmax.f32 %v1109_v15, 0.0  ;;  %v471_v23 = vpop.f32.mrf.mxu2 }
  0xe2   :  { %1004 = vst.msk [vmem:[%s2622_s7 + $0xa8] sm:$0xf] %vm961_vm2, %v939_v16  ;;  %v908_v24 = vpack.c.bf16 %v844_v17, %v844_v17  ;;  %v744_v25 = vmul.f32 %v1730_v20, %v471_v23  ;;  %v644_v27 = vpop.f32.mrf.mxu3 }
  0xe3   :  { %1332 = vst.msk [vmem:[%s2623_s8 + $0xa8] sm:$0xf] %vm961_vm2, %v1268_v18  ;;  %v1237_v30 = vpack.c.bf16 %v1173_v19, %v1173_v19  ;;  %v1073_v31 = vmul.f32 %v1735_v21, %v644_v27  ;;  %v394_v32 = vpop.f32.mrf.mxu0 }
  0xe4   :  { %973 = vst.msk [vmem:[%s2622_s7 + $0x2c] sm:$0xf] %vm961_vm2, %v908_v24  ;;  %v812_v33 = vadd.f32 %v1740_v22, %v744_v25  ;;  %v713_v34 = vmul.f32 %v1730_v20, %v394_v32  ;;  %v567_v35 = vpop.f32.mrf.mxu1 }
  0xe5   :  { %1301 = vst.msk [vmem:[%s2623_s8 + $0x2c] sm:$0xf] %vm961_vm2, %v1237_v30  ;;  %v1141_v36 = vadd.f32 %v1751_v26, %v1073_v31  ;;  %v1042_v37 = vmul.f32 %v1735_v21, %v567_v35 }
  0xe6   :  { %v876_v38 = vmax.f32 %v812_v33, 0.0  ;;  %v781_v39 = vadd.f32 %v1740_v22, %v713_v34  ;;  %1504 = vmatmul.msk.bf16.gmra.mxu0 %vm254_vm1, %v1568_v28  ;;  %1520 = vmatmul.msk.bf16.gmra.mxu2 %vm254_vm1, %v1584_v29 }
  0xe7   :  { %v1205_v40 = vmax.f32 %v1141_v36, 0.0  ;;  %v1110_v41 = vadd.f32 %v1751_v26, %v1042_v37  ;;  %1536 = vmatmul.msk.bf16.gmra.mxu1 %vm254_vm1, %v1568_v28  ;;  %1552 = vmatmul.msk.bf16.gmra.mxu3 %vm254_vm1, %v1584_v29 }
  0xe8   :  { %v940_v42 = vpack.c.bf16 %v876_v38, %v876_v38  ;;  %v845_v43 = vmax.f32 %v781_v39, 0.0 }
  0xe9   :  { %v1269_v44 = vpack.c.bf16 %v1205_v40, %v1205_v40  ;;  %v1174_v45 = vmax.f32 %v1110_v41, 0.0  ;;  %v474_v46 = vpop.f32.mrf.mxu2 }
  0xea   :  { %1005 = vst.msk [vmem:[%s2622_s7 + $0xac] sm:$0xf] %vm961_vm2, %v940_v42  ;;  %v909_v47 = vpack.c.bf16 %v845_v43, %v845_v43  ;;  %v745_v48 = vmul.f32 %v1730_v20, %v474_v46  ;;  %v647_v49 = vpop.f32.mrf.mxu3 }
  0xeb   :  { %1333 = vst.msk [vmem:[%s2623_s8 + $0xac] sm:$0xf] %vm961_vm2, %v1269_v44  ;;  %v1238_v50 = vpack.c.bf16 %v1174_v45, %v1174_v45  ;;  %v1074_v51 = vmul.f32 %v1735_v21, %v647_v49  ;;  %v396_v52 = vpop.f32.mrf.mxu0 }
  0xec   :  { %974 = vst.msk [vmem:[%s2622_s7 + $0x30] sm:$0xf] %vm961_vm2, %v909_v47  ;;  %v813_v53 = vadd.f32 %v1740_v22, %v745_v48  ;;  %v714_v54 = vmul.f32 %v1730_v20, %v396_v52  ;;  %v569_v55 = vpop.f32.mrf.mxu1 }
  0xed   :  { %1302 = vst.msk [vmem:[%s2623_s8 + $0x30] sm:$0xf] %vm961_vm2, %v1238_v50  ;;  %v1142_v56 = vadd.f32 %v1751_v26, %v1074_v51  ;;  %v1043_v57 = vmul.f32 %v1735_v21, %v569_v55 }
  0xee   :  { %v877_v58 = vmax.f32 %v813_v53, 0.0  ;;  %v782_v59 = vadd.f32 %v1740_v22, %v714_v54 }
  0xef   :  { %v1206_v60 = vmax.f32 %v1142_v56, 0.0  ;;  %v1111_v61 = vadd.f32 %v1751_v26, %v1043_v57 }
  0xf0   :  { %v941_v62 = vpack.c.bf16 %v877_v58, %v877_v58  ;;  %v846_v63 = vmax.f32 %v782_v59, 0.0 }
  0xf1   :  { %v1270_v0 = vpack.c.bf16 %v1206_v60, %v1206_v60  ;;  %v1175_v1 = vmax.f32 %v1111_v61, 0.0  ;;  %v476_v2 = vpop.f32.mrf.mxu2 }
  0xf2   :  { %1006 = vst.msk [vmem:[%s2622_s7 + $0xb0] sm:$0xf] %vm961_vm2, %v941_v62  ;;  %v910_v3 = vpack.c.bf16 %v846_v63, %v846_v63  ;;  %v746_v4 = vmul.f32 %v1730_v20, %v476_v2  ;;  %v649_v5 = vpop.f32.mrf.mxu3 }
  0xf3   :  { %1334 = vst.msk [vmem:[%s2623_s8 + $0xb0] sm:$0xf] %vm961_vm2, %v1270_v0  ;;  %v1239_v8 = vpack.c.bf16 %v1175_v1, %v1175_v1  ;;  %v1075_v9 = vmul.f32 %v1735_v21, %v649_v5  ;;  %v399_v10 = vpop.f32.mrf.mxu0 }
  0xf4   :  { %975 = vst.msk [vmem:[%s2622_s7 + $0x34] sm:$0xf] %vm961_vm2, %v910_v3  ;;  %v814_v11 = vadd.f32 %v1740_v22, %v746_v4  ;;  %v715_v12 = vmul.f32 %v1730_v20, %v399_v10  ;;  %v572_v13 = vpop.f32.mrf.mxu1 }
  0xf5   :  { %1303 = vst.msk [vmem:[%s2623_s8 + $0x34] sm:$0xf] %vm961_vm2, %v1239_v8  ;;  %v1143_v14 = vadd.f32 %v1751_v26, %v1075_v9  ;;  %v1044_v15 = vmul.f32 %v1735_v21, %v572_v13 }
  0xf6   :  { %v878_v16 = vmax.f32 %v814_v11, 0.0  ;;  %v783_v17 = vadd.f32 %v1740_v22, %v715_v12  ;;  %1505 = vmatmul.msk.bf16.gmra.mxu0 %vm254_vm1, %v1569_v6  ;;  %1521 = vmatmul.msk.bf16.gmra.mxu2 %vm254_vm1, %v1585_v7 }
  0xf7   :  { %v1207_v18 = vmax.f32 %v1143_v14, 0.0  ;;  %v1112_v19 = vadd.f32 %v1751_v26, %v1044_v15  ;;  %1537 = vmatmul.msk.bf16.gmra.mxu1 %vm254_vm1, %v1569_v6  ;;  %1553 = vmatmul.msk.bf16.gmra.mxu3 %vm254_vm1, %v1585_v7 }
  0xf8   :  { %v942_v23 = vpack.c.bf16 %v878_v16, %v878_v16  ;;  %v847_v24 = vmax.f32 %v783_v17, 0.0 }
  0xf9   :  { %v1271_v25 = vpack.c.bf16 %v1207_v18, %v1207_v18  ;;  %v1176_v27 = vmax.f32 %v1112_v19, 0.0  ;;  %v479_v28 = vpop.f32.mrf.mxu2 }
  0xfa   :  { %1007 = vst.msk [vmem:[%s2622_s7 + $0xb4] sm:$0xf] %vm961_vm2, %v942_v23  ;;  %v911_v29 = vpack.c.bf16 %v847_v24, %v847_v24  ;;  %v747_v30 = vmul.f32 %v1730_v20, %v479_v28  ;;  %v652_v31 = vpop.f32.mrf.mxu3 }
  0xfb   :  { %1335 = vst.msk [vmem:[%s2623_s8 + $0xb4] sm:$0xf] %vm961_vm2, %v1271_v25  ;;  %v1240_v32 = vpack.c.bf16 %v1176_v27, %v1176_v27  ;;  %v1076_v33 = vmul.f32 %v1735_v21, %v652_v31  ;;  %v401_v34 = vpop.f32.mrf.mxu0 }
  0xfc   :  { %976 = vst.msk [vmem:[%s2622_s7 + $0x38] sm:$0xf] %vm961_vm2, %v911_v29  ;;  %v815_v35 = vadd.f32 %v1740_v22, %v747_v30  ;;  %v716_v36 = vmul.f32 %v1730_v20, %v401_v34  ;;  %v574_v37 = vpop.f32.mrf.mxu1 }
  0xfd   :  { %1304 = vst.msk [vmem:[%s2623_s8 + $0x38] sm:$0xf] %vm961_vm2, %v1240_v32  ;;  %v1144_v38 = vadd.f32 %v1751_v26, %v1076_v33  ;;  %v1045_v39 = vmul.f32 %v1735_v21, %v574_v37 }
  0xfe   :  { %v879_v40 = vmax.f32 %v815_v35, 0.0  ;;  %v784_v41 = vadd.f32 %v1740_v22, %v716_v36 }
  0xff   :  { %v1208_v42 = vmax.f32 %v1144_v38, 0.0  ;;  %v1113_v43 = vadd.f32 %v1751_v26, %v1045_v39 }
 0x100   :  { %v943_v44 = vpack.c.bf16 %v879_v40, %v879_v40  ;;  %v848_v45 = vmax.f32 %v784_v41, 0.0 }
 0x101   :  { %v1272_v46 = vpack.c.bf16 %v1208_v42, %v1208_v42  ;;  %v1177_v47 = vmax.f32 %v1113_v43, 0.0  ;;  %v481_v48 = vpop.f32.mrf.mxu2 }
 0x102   :  { %1008 = vst.msk [vmem:[%s2622_s7 + $0xb8] sm:$0xf] %vm961_vm2, %v943_v44  ;;  %v912_v49 = vpack.c.bf16 %v848_v45, %v848_v45  ;;  %v748_v50 = vmul.f32 %v1730_v20, %v481_v48  ;;  %v654_v51 = vpop.f32.mrf.mxu3 }
 0x103   :  { %1336 = vst.msk [vmem:[%s2623_s8 + $0xb8] sm:$0xf] %vm961_vm2, %v1272_v46  ;;  %v1241_v52 = vpack.c.bf16 %v1177_v47, %v1177_v47  ;;  %v1077_v53 = vmul.f32 %v1735_v21, %v654_v51  ;;  %v404_v54 = vpop.f32.mrf.mxu0 }
 0x104   :  { %977 = vst.msk [vmem:[%s2622_s7 + $0x3c] sm:$0xf] %vm961_vm2, %v912_v49  ;;  %v816_v55 = vadd.f32 %v1740_v22, %v748_v50  ;;  %v717_v56 = vmul.f32 %v1730_v20, %v404_v54  ;;  %v577_v57 = vpop.f32.mrf.mxu1 }
 0x105   :  { %1305 = vst.msk [vmem:[%s2623_s8 + $0x3c] sm:$0xf] %vm961_vm2, %v1241_v52  ;;  %v1145_v58 = vadd.f32 %v1751_v26, %v1077_v53  ;;  %v1046_v59 = vmul.f32 %v1735_v21, %v577_v57 }
 0x106   :  { %v880_v60 = vmax.f32 %v816_v55, 0.0  ;;  %v785_v61 = vadd.f32 %v1740_v22, %v717_v56 }
 0x107   :  { %v1209_v62 = vmax.f32 %v1145_v58, 0.0  ;;  %v1114_v63 = vadd.f32 %v1751_v26, %v1046_v59 }
 0x108   :  { %v944_v0 = vpack.c.bf16 %v880_v60, %v880_v60  ;;  %v849_v1 = vmax.f32 %v785_v61, 0.0 }
 0x109   :  { %v1273_v2 = vpack.c.bf16 %v1209_v62, %v1209_v62  ;;  %v1178_v3 = vmax.f32 %v1114_v63, 0.0  ;;  %v484_v4 = vpop.f32.mrf.mxu2 }
 0x10a   :  { %1009 = vst.msk [vmem:[%s2622_s7 + $0xbc] sm:$0xf] %vm961_vm2, %v944_v0  ;;  %v913_v5 = vpack.c.bf16 %v849_v1, %v849_v1  ;;  %v749_v6 = vmul.f32 %v1730_v20, %v484_v4  ;;  %v657_v7 = vpop.f32.mrf.mxu3 }
 0x10b   :  { %1337 = vst.msk [vmem:[%s2623_s8 + $0xbc] sm:$0xf] %vm961_vm2, %v1273_v2  ;;  %v1242_v8 = vpack.c.bf16 %v1178_v3, %v1178_v3  ;;  %v1078_v9 = vmul.f32 %v1735_v21, %v657_v7  ;;  %v406_v10 = vpop.f32.mrf.mxu0 }
 0x10c   :  { %978 = vst.msk [vmem:[%s2622_s7 + $0x40] sm:$0xf] %vm961_vm2, %v913_v5  ;;  %v817_v11 = vadd.f32 %v1740_v22, %v749_v6  ;;  %v718_v12 = vmul.f32 %v1730_v20, %v406_v10  ;;  %v579_v13 = vpop.f32.mrf.mxu1  ;;  %v2296_v6 = vld [vmem:[%s2620_s5] ss:$0 sm:$0xff] }
 0x10d   :  { %1306 = vst.msk [vmem:[%s2623_s8 + $0x40] sm:$0xf] %vm961_vm2, %v1242_v8  ;;  %v1146_v14 = vadd.f32 %v1751_v26, %v1078_v9  ;;  %v1047_v15 = vmul.f32 %v1735_v21, %v579_v13  ;;  %v2306_v9 = vld [vmem:[%s2619_s4] ss:$0 sm:$0xff] }
 0x10e   :  { %v881_v16 = vmax.f32 %v817_v11, 0.0  ;;  %v786_v17 = vadd.f32 %v1740_v22, %v718_v12  ;;  %v2317_v13 = vld [vmem:[%s2621_s6] ss:$0 sm:$0xff] }
 0x10f   :  { %v1210_v18 = vmax.f32 %v1146_v14, 0.0  ;;  %v1115_v19 = vadd.f32 %v1751_v26, %v1047_v15 }
 0x110   :  { %v945_v23 = vpack.c.bf16 %v881_v16, %v881_v16  ;;  %v850_v24 = vmax.f32 %v786_v17, 0.0 }
 0x111   :  { %v1274_v25 = vpack.c.bf16 %v1210_v18, %v1210_v18  ;;  %v1179_v27 = vmax.f32 %v1115_v19, 0.0  ;;  %v486_v28 = vpop.f32.mrf.mxu2 }
 0x112   :  { %1010 = vst.msk [vmem:[%s2622_s7 + $0xc0] sm:$0xf] %vm961_vm2, %v945_v23  ;;  %v914_v29 = vpack.c.bf16 %v850_v24, %v850_v24  ;;  %v750_v30 = vmul.f32 %v1730_v20, %v486_v28  ;;  %v659_v31 = vpop.f32.mrf.mxu3 }
 0x113   :  { %1338 = vst.msk [vmem:[%s2623_s8 + $0xc0] sm:$0xf] %vm961_vm2, %v1274_v25  ;;  %v1243_v32 = vpack.c.bf16 %v1179_v27, %v1179_v27  ;;  %v1079_v33 = vmul.f32 %v1735_v21, %v659_v31  ;;  %v409_v34 = vpop.f32.mrf.mxu0 }
 0x114   :  { %979 = vst.msk [vmem:[%s2622_s7 + $0x44] sm:$0xf] %vm961_vm2, %v914_v29  ;;  %v818_v35 = vadd.f32 %v1740_v22, %v750_v30  ;;  %v719_v36 = vmul.f32 %v1730_v20, %v409_v34  ;;  %v582_v37 = vpop.f32.mrf.mxu1 }
 0x115   :  { %1307 = vst.msk [vmem:[%s2623_s8 + $0x44] sm:$0xf] %vm961_vm2, %v1243_v32  ;;  %v1147_v38 = vadd.f32 %v1751_v26, %v1079_v33  ;;  %v1048_v39 = vmul.f32 %v1735_v21, %v582_v37 }
 0x116   :  { %v882_v40 = vmax.f32 %v818_v35, 0.0  ;;  %v787_v41 = vadd.f32 %v1740_v22, %v719_v36 }
 0x117   :  { %v1211_v42 = vmax.f32 %v1147_v38, 0.0  ;;  %v1116_v43 = vadd.f32 %v1751_v26, %v1048_v39 }
 0x118   :  { %v946_v44 = vpack.c.bf16 %v882_v40, %v882_v40  ;;  %v851_v45 = vmax.f32 %v787_v41, 0.0 }
 0x119   :  { %v1275_v46 = vpack.c.bf16 %v1211_v42, %v1211_v42  ;;  %v1180_v47 = vmax.f32 %v1116_v43, 0.0  ;;  %v489_v48 = vpop.f32.mrf.mxu2 }
 0x11a   :  { %1011 = vst.msk [vmem:[%s2622_s7 + $0xc4] sm:$0xf] %vm961_vm2, %v946_v44  ;;  %v915_v49 = vpack.c.bf16 %v851_v45, %v851_v45  ;;  %v751_v50 = vmul.f32 %v1730_v20, %v489_v48  ;;  %v662_v51 = vpop.f32.mrf.mxu3 }
 0x11b   :  { %1339 = vst.msk [vmem:[%s2623_s8 + $0xc4] sm:$0xf] %vm961_vm2, %v1275_v46  ;;  %v1244_v52 = vpack.c.bf16 %v1180_v47, %v1180_v47  ;;  %v1080_v53 = vmul.f32 %v1735_v21, %v662_v51  ;;  %v411_v54 = vpop.f32.mrf.mxu0 }
 0x11c   :  { %980 = vst.msk [vmem:[%s2622_s7 + $0x48] sm:$0xf] %vm961_vm2, %v915_v49  ;;  %v819_v55 = vadd.f32 %v1740_v22, %v751_v50  ;;  %v720_v56 = vmul.f32 %v1730_v20, %v411_v54  ;;  %v584_v57 = vpop.f32.mrf.mxu1 }
 0x11d   :  { %1308 = vst.msk [vmem:[%s2623_s8 + $0x48] sm:$0xf] %vm961_vm2, %v1244_v52  ;;  %v1148_v58 = vadd.f32 %v1751_v26, %v1080_v53  ;;  %v1049_v59 = vmul.f32 %v1735_v21, %v584_v57  ;;  %v2286_v21 = vld [vmem:[%s2618_s3] ss:$0 sm:$0xff] }
 0x11e   :  { %v883_v60 = vmax.f32 %v819_v55, 0.0  ;;  %v788_v61 = vadd.f32 %v1740_v22, %v720_v56 }
 0x11f   :  { %v1212_v62 = vmax.f32 %v1148_v58, 0.0  ;;  %v1117_v63 = vadd.f32 %v1751_v26, %v1049_v59 }
 0x120   :  { %v947_v0 = vpack.c.bf16 %v883_v60, %v883_v60  ;;  %v852_v1 = vmax.f32 %v788_v61, 0.0 }
 0x121   :  { %v1276_v2 = vpack.c.bf16 %v1212_v62, %v1212_v62  ;;  %v1181_v20 = vmax.f32 %v1117_v63, 0.0  ;;  %v491_v3 = vpop.f32.mrf.mxu2 }
 0x122   :  { %1012 = vst.msk [vmem:[%s2622_s7 + $0xc8] sm:$0xf] %vm961_vm2, %v947_v0  ;;  %v916_v4 = vpack.c.bf16 %v852_v1, %v852_v1  ;;  %v752_v22 = vmul.f32 %v2286_v21, %v491_v3  ;;  %v664_v5 = vpop.f32.mrf.mxu3 }
 0x123   :  { %1340 = vst.msk [vmem:[%s2623_s8 + $0xc8] sm:$0xf] %vm961_vm2, %v1276_v2  ;;  %v1245_v26 = vpack.c.bf16 %v1181_v20, %v1181_v20  ;;  %v1081_v7 = vmul.f32 %v2296_v6, %v664_v5  ;;  %v414_v8 = vpop.f32.mrf.mxu0 }
 0x124   :  { %981 = vst.msk [vmem:[%s2622_s7 + $0x4c] sm:$0xf] %vm961_vm2, %v916_v4  ;;  %v820_v10 = vadd.f32 %v2306_v9, %v752_v22  ;;  %v721_v11 = vmul.f32 %v2286_v21, %v414_v8  ;;  %v587_v12 = vpop.f32.mrf.mxu1 }
 0x125   :  { %1309 = vst.msk [vmem:[%s2623_s8 + $0x4c] sm:$0xf] %vm961_vm2, %v1245_v26  ;;  %v1149_v14 = vadd.f32 %v2317_v13, %v1081_v7  ;;  %v1050_v15 = vmul.f32 %v2296_v6, %v587_v12 }
 0x126   :  { %v884_v16 = vmax.f32 %v820_v10, 0.0  ;;  %v789_v17 = vadd.f32 %v2306_v9, %v721_v11 }
 0x127   :  { %v1213_v18 = vmax.f32 %v1149_v14, 0.0  ;;  %v1118_v19 = vadd.f32 %v2317_v13, %v1050_v15 }
 0x128   :  { %v948_v23 = vpack.c.bf16 %v884_v16, %v884_v16  ;;  %v853_v24 = vmax.f32 %v789_v17, 0.0 }
 0x129   :  { %v1277_v25 = vpack.c.bf16 %v1213_v18, %v1213_v18  ;;  %v1182_v27 = vmax.f32 %v1118_v19, 0.0  ;;  %v494_v28 = vpop.f32.mrf.mxu2 }
 0x12a   :  { %1013 = vst.msk [vmem:[%s2622_s7 + $0xcc] sm:$0xf] %vm961_vm2, %v948_v23  ;;  %v917_v29 = vpack.c.bf16 %v853_v24, %v853_v24  ;;  %v753_v30 = vmul.f32 %v2286_v21, %v494_v28  ;;  %v667_v31 = vpop.f32.mrf.mxu3 }
 0x12b   :  { %1341 = vst.msk [vmem:[%s2623_s8 + $0xcc] sm:$0xf] %vm961_vm2, %v1277_v25  ;;  %v1246_v32 = vpack.c.bf16 %v1182_v27, %v1182_v27  ;;  %v1082_v33 = vmul.f32 %v2296_v6, %v667_v31  ;;  %v416_v34 = vpop.f32.mrf.mxu0 }
 0x12c   :  { %982 = vst.msk [vmem:[%s2622_s7 + $0x50] sm:$0xf] %vm961_vm2, %v917_v29  ;;  %v821_v35 = vadd.f32 %v2306_v9, %v753_v30  ;;  %v722_v36 = vmul.f32 %v2286_v21, %v416_v34  ;;  %v589_v37 = vpop.f32.mrf.mxu1 }
 0x12d   :  { %1310 = vst.msk [vmem:[%s2623_s8 + $0x50] sm:$0xf] %vm961_vm2, %v1246_v32  ;;  %v1150_v38 = vadd.f32 %v2317_v13, %v1082_v33  ;;  %v1051_v39 = vmul.f32 %v2296_v6, %v589_v37 }
 0x12e   :  { %v885_v40 = vmax.f32 %v821_v35, 0.0  ;;  %v790_v41 = vadd.f32 %v2306_v9, %v722_v36 }
 0x12f   :  { %v1214_v42 = vmax.f32 %v1150_v38, 0.0  ;;  %v1119_v43 = vadd.f32 %v2317_v13, %v1051_v39 }
 0x130   :  { %v949_v44 = vpack.c.bf16 %v885_v40, %v885_v40  ;;  %v854_v45 = vmax.f32 %v790_v41, 0.0 }
 0x131   :  { %v1278_v46 = vpack.c.bf16 %v1214_v42, %v1214_v42  ;;  %v1183_v47 = vmax.f32 %v1119_v43, 0.0  ;;  %v496_v48 = vpop.f32.mrf.mxu2 }
 0x132   :  { %1014 = vst.msk [vmem:[%s2622_s7 + $0xd0] sm:$0xf] %vm961_vm2, %v949_v44  ;;  %v918_v49 = vpack.c.bf16 %v854_v45, %v854_v45  ;;  %v754_v50 = vmul.f32 %v2286_v21, %v496_v48  ;;  %v669_v51 = vpop.f32.mrf.mxu3 }
 0x133   :  { %1342 = vst.msk [vmem:[%s2623_s8 + $0xd0] sm:$0xf] %vm961_vm2, %v1278_v46  ;;  %v1247_v52 = vpack.c.bf16 %v1183_v47, %v1183_v47  ;;  %v1083_v53 = vmul.f32 %v2296_v6, %v669_v51  ;;  %v419_v54 = vpop.f32.mrf.mxu0 }
 0x134   :  { %983 = vst.msk [vmem:[%s2622_s7 + $0x54] sm:$0xf] %vm961_vm2, %v918_v49  ;;  %v822_v55 = vadd.f32 %v2306_v9, %v754_v50  ;;  %v723_v56 = vmul.f32 %v2286_v21, %v419_v54  ;;  %v592_v57 = vpop.f32.mrf.mxu1 }
 0x135   :  { %1311 = vst.msk [vmem:[%s2623_s8 + $0x54] sm:$0xf] %vm961_vm2, %v1247_v52  ;;  %v1151_v58 = vadd.f32 %v2317_v13, %v1083_v53  ;;  %v1052_v59 = vmul.f32 %v2296_v6, %v592_v57 }
 0x136   :  { %v886_v60 = vmax.f32 %v822_v55, 0.0  ;;  %v791_v61 = vadd.f32 %v2306_v9, %v723_v56 }
 0x137   :  { %v1215_v62 = vmax.f32 %v1151_v58, 0.0  ;;  %v1120_v63 = vadd.f32 %v2317_v13, %v1052_v59 }
 0x138   :  { %v950_v0 = vpack.c.bf16 %v886_v60, %v886_v60  ;;  %v855_v1 = vmax.f32 %v791_v61, 0.0 }
 0x139   :  { %v1279_v2 = vpack.c.bf16 %v1215_v62, %v1215_v62  ;;  %v1184_v20 = vmax.f32 %v1120_v63, 0.0  ;;  %v499_v3 = vpop.f32.mrf.mxu2 }
 0x13a   :  { %1015 = vst.msk [vmem:[%s2622_s7 + $0xd4] sm:$0xf] %vm961_vm2, %v950_v0  ;;  %v919_v4 = vpack.c.bf16 %v855_v1, %v855_v1  ;;  %v755_v22 = vmul.f32 %v2286_v21, %v499_v3  ;;  %v672_v5 = vpop.f32.mrf.mxu3 }
 0x13b   :  { %1343 = vst.msk [vmem:[%s2623_s8 + $0xd4] sm:$0xf] %vm961_vm2, %v1279_v2  ;;  %v1248_v26 = vpack.c.bf16 %v1184_v20, %v1184_v20  ;;  %v1084_v7 = vmul.f32 %v2296_v6, %v672_v5  ;;  %v421_v8 = vpop.f32.mrf.mxu0 }
 0x13c   :  { %984 = vst.msk [vmem:[%s2622_s7 + $0x58] sm:$0xf] %vm961_vm2, %v919_v4  ;;  %v823_v10 = vadd.f32 %v2306_v9, %v755_v22  ;;  %v724_v11 = vmul.f32 %v2286_v21, %v421_v8  ;;  %v594_v12 = vpop.f32.mrf.mxu1 }
 0x13d   :  { %1312 = vst.msk [vmem:[%s2623_s8 + $0x58] sm:$0xf] %vm961_vm2, %v1248_v26  ;;  %v1152_v14 = vadd.f32 %v2317_v13, %v1084_v7  ;;  %v1053_v15 = vmul.f32 %v2296_v6, %v594_v12 }
 0x13e   :  { %v887_v16 = vmax.f32 %v823_v10, 0.0  ;;  %v792_v17 = vadd.f32 %v2306_v9, %v724_v11 }
 0x13f   :  { %v1216_v18 = vmax.f32 %v1152_v14, 0.0  ;;  %v1121_v19 = vadd.f32 %v2317_v13, %v1053_v15 }
 0x140   :  { %v951_v23 = vpack.c.bf16 %v887_v16, %v887_v16  ;;  %v856_v24 = vmax.f32 %v792_v17, 0.0 }
 0x141   :  { %v1280_v25 = vpack.c.bf16 %v1216_v18, %v1216_v18  ;;  %v1185_v27 = vmax.f32 %v1121_v19, 0.0  ;;  %v501_v28 = vpop.f32.mrf.mxu2 }
 0x142   :  { %1016 = vst.msk [vmem:[%s2622_s7 + $0xd8] sm:$0xf] %vm961_vm2, %v951_v23  ;;  %v920_v29 = vpack.c.bf16 %v856_v24, %v856_v24  ;;  %v756_v30 = vmul.f32 %v2286_v21, %v501_v28  ;;  %v674_v31 = vpop.f32.mrf.mxu3 }
 0x143   :  { %1344 = vst.msk [vmem:[%s2623_s8 + $0xd8] sm:$0xf] %vm961_vm2, %v1280_v25  ;;  %v1249_v32 = vpack.c.bf16 %v1185_v27, %v1185_v27  ;;  %v1085_v33 = vmul.f32 %v2296_v6, %v674_v31  ;;  %v424_v34 = vpop.f32.mrf.mxu0 }
 0x144   :  { %985 = vst.msk [vmem:[%s2622_s7 + $0x5c] sm:$0xf] %vm961_vm2, %v920_v29  ;;  %v824_v35 = vadd.f32 %v2306_v9, %v756_v30  ;;  %v725_v36 = vmul.f32 %v2286_v21, %v424_v34  ;;  %v597_v37 = vpop.f32.mrf.mxu1 }
 0x145   :  { %1313 = vst.msk [vmem:[%s2623_s8 + $0x5c] sm:$0xf] %vm961_vm2, %v1249_v32  ;;  %v1153_v38 = vadd.f32 %v2317_v13, %v1085_v33  ;;  %v1054_v39 = vmul.f32 %v2296_v6, %v597_v37 }
 0x146   :  { %v888_v40 = vmax.f32 %v824_v35, 0.0  ;;  %v793_v41 = vadd.f32 %v2306_v9, %v725_v36 }
 0x147   :  { %v1217_v42 = vmax.f32 %v1153_v38, 0.0  ;;  %v1122_v43 = vadd.f32 %v2317_v13, %v1054_v39 }
 0x148   :  { %v952_v44 = vpack.c.bf16 %v888_v40, %v888_v40  ;;  %v857_v45 = vmax.f32 %v793_v41, 0.0 }
 0x149   :  { %v1281_v46 = vpack.c.bf16 %v1217_v42, %v1217_v42  ;;  %v1186_v47 = vmax.f32 %v1122_v43, 0.0  ;;  %v504_v48 = vpop.f32.mrf.mxu2 }
 0x14a   :  { %1017 = vst.msk [vmem:[%s2622_s7 + $0xdc] sm:$0xf] %vm961_vm2, %v952_v44  ;;  %v921_v49 = vpack.c.bf16 %v857_v45, %v857_v45  ;;  %v757_v50 = vmul.f32 %v2286_v21, %v504_v48  ;;  %v677_v51 = vpop.f32.mrf.mxu3 }
 0x14b   :  { %1345 = vst.msk [vmem:[%s2623_s8 + $0xdc] sm:$0xf] %vm961_vm2, %v1281_v46  ;;  %v1250_v52 = vpack.c.bf16 %v1186_v47, %v1186_v47  ;;  %v1086_v53 = vmul.f32 %v2296_v6, %v677_v51  ;;  %v426_v54 = vpop.f32.mrf.mxu0 }
 0x14c   :  { %986 = vst.msk [vmem:[%s2622_s7 + $0x60] sm:$0xf] %vm961_vm2, %v921_v49  ;;  %v825_v55 = vadd.f32 %v2306_v9, %v757_v50  ;;  %v726_v56 = vmul.f32 %v2286_v21, %v426_v54  ;;  %v599_v57 = vpop.f32.mrf.mxu1 }
 0x14d   :  { %1314 = vst.msk [vmem:[%s2623_s8 + $0x60] sm:$0xf] %vm961_vm2, %v1250_v52  ;;  %v1154_v58 = vadd.f32 %v2317_v13, %v1086_v53  ;;  %v1055_v59 = vmul.f32 %v2296_v6, %v599_v57 }
 0x14e   :  { %v889_v60 = vmax.f32 %v825_v55, 0.0  ;;  %v794_v61 = vadd.f32 %v2306_v9, %v726_v56 }
 0x14f   :  { %v1218_v62 = vmax.f32 %v1154_v58, 0.0  ;;  %v1123_v63 = vadd.f32 %v2317_v13, %v1055_v59 }
 0x150   :  { %v953_v0 = vpack.c.bf16 %v889_v60, %v889_v60  ;;  %v858_v1 = vmax.f32 %v794_v61, 0.0 }
 0x151   :  { %v1282_v2 = vpack.c.bf16 %v1218_v62, %v1218_v62  ;;  %v1187_v20 = vmax.f32 %v1123_v63, 0.0  ;;  %v506_v3 = vpop.f32.mrf.mxu2 }
 0x152   :  { %1018 = vst.msk [vmem:[%s2622_s7 + $0xe0] sm:$0xf] %vm961_vm2, %v953_v0  ;;  %v922_v4 = vpack.c.bf16 %v858_v1, %v858_v1  ;;  %v758_v22 = vmul.f32 %v2286_v21, %v506_v3  ;;  %v679_v5 = vpop.f32.mrf.mxu3 }
 0x153   :  { %1346 = vst.msk [vmem:[%s2623_s8 + $0xe0] sm:$0xf] %vm961_vm2, %v1282_v2  ;;  %v1251_v26 = vpack.c.bf16 %v1187_v20, %v1187_v20  ;;  %v1087_v7 = vmul.f32 %v2296_v6, %v679_v5  ;;  %v429_v8 = vpop.f32.mrf.mxu0 }
 0x154   :  { %987 = vst.msk [vmem:[%s2622_s7 + $0x64] sm:$0xf] %vm961_vm2, %v922_v4  ;;  %v826_v10 = vadd.f32 %v2306_v9, %v758_v22  ;;  %v727_v11 = vmul.f32 %v2286_v21, %v429_v8  ;;  %v602_v12 = vpop.f32.mrf.mxu1 }
 0x155   :  { %1315 = vst.msk [vmem:[%s2623_s8 + $0x64] sm:$0xf] %vm961_vm2, %v1251_v26  ;;  %v1155_v14 = vadd.f32 %v2317_v13, %v1087_v7  ;;  %v1056_v15 = vmul.f32 %v2296_v6, %v602_v12 }
 0x156   :  { %v890_v16 = vmax.f32 %v826_v10, 0.0  ;;  %v795_v17 = vadd.f32 %v2306_v9, %v727_v11 }
 0x157   :  { %v1219_v18 = vmax.f32 %v1155_v14, 0.0  ;;  %v1124_v19 = vadd.f32 %v2317_v13, %v1056_v15 }
 0x158   :  { %v954_v23 = vpack.c.bf16 %v890_v16, %v890_v16  ;;  %v859_v24 = vmax.f32 %v795_v17, 0.0 }
 0x159   :  { %v1283_v25 = vpack.c.bf16 %v1219_v18, %v1219_v18  ;;  %v1188_v27 = vmax.f32 %v1124_v19, 0.0  ;;  %v509_v28 = vpop.f32.mrf.mxu2 }
 0x15a   :  { %1019 = vst.msk [vmem:[%s2622_s7 + $0xe4] sm:$0xf] %vm961_vm2, %v954_v23  ;;  %v923_v29 = vpack.c.bf16 %v859_v24, %v859_v24  ;;  %v759_v30 = vmul.f32 %v2286_v21, %v509_v28  ;;  %v682_v31 = vpop.f32.mrf.mxu3 }
 0x15b   :  { %1347 = vst.msk [vmem:[%s2623_s8 + $0xe4] sm:$0xf] %vm961_vm2, %v1283_v25  ;;  %v1252_v32 = vpack.c.bf16 %v1188_v27, %v1188_v27  ;;  %v1088_v33 = vmul.f32 %v2296_v6, %v682_v31  ;;  %v431_v34 = vpop.f32.mrf.mxu0 }
 0x15c   :  { %988 = vst.msk [vmem:[%s2622_s7 + $0x68] sm:$0xf] %vm961_vm2, %v923_v29  ;;  %v827_v35 = vadd.f32 %v2306_v9, %v759_v30  ;;  %v728_v36 = vmul.f32 %v2286_v21, %v431_v34  ;;  %v604_v37 = vpop.f32.mrf.mxu1 }
 0x15d   :  { %1316 = vst.msk [vmem:[%s2623_s8 + $0x68] sm:$0xf] %vm961_vm2, %v1252_v32  ;;  %v1156_v38 = vadd.f32 %v2317_v13, %v1088_v33  ;;  %v1057_v39 = vmul.f32 %v2296_v6, %v604_v37 }
 0x15e   :  { %v891_v40 = vmax.f32 %v827_v35, 0.0  ;;  %v796_v41 = vadd.f32 %v2306_v9, %v728_v36 }
 0x15f   :  { %v1220_v42 = vmax.f32 %v1156_v38, 0.0  ;;  %v1125_v43 = vadd.f32 %v2317_v13, %v1057_v39 }
 0x160   :  { %v955_v44 = vpack.c.bf16 %v891_v40, %v891_v40  ;;  %v860_v45 = vmax.f32 %v796_v41, 0.0 }
 0x161   :  { %v1284_v46 = vpack.c.bf16 %v1220_v42, %v1220_v42  ;;  %v1189_v47 = vmax.f32 %v1125_v43, 0.0  ;;  %v511_v48 = vpop.f32.mrf.mxu2 }
 0x162   :  { %1020 = vst.msk [vmem:[%s2622_s7 + $0xe8] sm:$0xf] %vm961_vm2, %v955_v44  ;;  %v924_v49 = vpack.c.bf16 %v860_v45, %v860_v45  ;;  %v760_v50 = vmul.f32 %v2286_v21, %v511_v48  ;;  %v684_v51 = vpop.f32.mrf.mxu3 }
 0x163   :  { %1348 = vst.msk [vmem:[%s2623_s8 + $0xe8] sm:$0xf] %vm961_vm2, %v1284_v46  ;;  %v1253_v52 = vpack.c.bf16 %v1189_v47, %v1189_v47  ;;  %v1089_v53 = vmul.f32 %v2296_v6, %v684_v51  ;;  %v434_v54 = vpop.f32.mrf.mxu0 }
 0x164   :  { %989 = vst.msk [vmem:[%s2622_s7 + $0x6c] sm:$0xf] %vm961_vm2, %v924_v49  ;;  %v828_v55 = vadd.f32 %v2306_v9, %v760_v50  ;;  %v729_v56 = vmul.f32 %v2286_v21, %v434_v54  ;;  %v607_v57 = vpop.f32.mrf.mxu1 }
 0x165   :  { %1317 = vst.msk [vmem:[%s2623_s8 + $0x6c] sm:$0xf] %vm961_vm2, %v1253_v52  ;;  %v1157_v58 = vadd.f32 %v2317_v13, %v1089_v53  ;;  %v1058_v59 = vmul.f32 %v2296_v6, %v607_v57 }
 0x166   :  { %v892_v60 = vmax.f32 %v828_v55, 0.0  ;;  %v797_v61 = vadd.f32 %v2306_v9, %v729_v56 }
 0x167   :  { %v1221_v62 = vmax.f32 %v1157_v58, 0.0  ;;  %v1126_v63 = vadd.f32 %v2317_v13, %v1058_v59 }
 0x168   :  { %v956_v0 = vpack.c.bf16 %v892_v60, %v892_v60  ;;  %v861_v1 = vmax.f32 %v797_v61, 0.0 }
 0x169   :  { %v1285_v2 = vpack.c.bf16 %v1221_v62, %v1221_v62  ;;  %v1190_v20 = vmax.f32 %v1126_v63, 0.0  ;;  %v514_v3 = vpop.f32.mrf.mxu2 }
 0x16a   :  { %1021 = vst.msk [vmem:[%s2622_s7 + $0xec] sm:$0xf] %vm961_vm2, %v956_v0  ;;  %v925_v4 = vpack.c.bf16 %v861_v1, %v861_v1  ;;  %v761_v22 = vmul.f32 %v2286_v21, %v514_v3  ;;  %v687_v5 = vpop.f32.mrf.mxu3 }
 0x16b   :  { %1349 = vst.msk [vmem:[%s2623_s8 + $0xec] sm:$0xf] %vm961_vm2, %v1285_v2  ;;  %v1254_v26 = vpack.c.bf16 %v1190_v20, %v1190_v20  ;;  %v1090_v7 = vmul.f32 %v2296_v6, %v687_v5  ;;  %v436_v8 = vpop.f32.mrf.mxu0 }
 0x16c   :  { %990 = vst.msk [vmem:[%s2622_s7 + $0x70] sm:$0xf] %vm961_vm2, %v925_v4  ;;  %v829_v10 = vadd.f32 %v2306_v9, %v761_v22  ;;  %v730_v11 = vmul.f32 %v2286_v21, %v436_v8  ;;  %v609_v12 = vpop.f32.mrf.mxu1 }
 0x16d   :  { %1318 = vst.msk [vmem:[%s2623_s8 + $0x70] sm:$0xf] %vm961_vm2, %v1254_v26  ;;  %v1158_v14 = vadd.f32 %v2317_v13, %v1090_v7  ;;  %v1059_v15 = vmul.f32 %v2296_v6, %v609_v12 }
 0x16e   :  { %v893_v16 = vmax.f32 %v829_v10, 0.0  ;;  %v798_v17 = vadd.f32 %v2306_v9, %v730_v11 }
 0x16f   :  { %v1222_v18 = vmax.f32 %v1158_v14, 0.0  ;;  %v1127_v19 = vadd.f32 %v2317_v13, %v1059_v15 }
 0x170   :  { %v957_v23 = vpack.c.bf16 %v893_v16, %v893_v16  ;;  %v862_v24 = vmax.f32 %v798_v17, 0.0 }
 0x171   :  { %v1286_v25 = vpack.c.bf16 %v1222_v18, %v1222_v18  ;;  %v1191_v27 = vmax.f32 %v1127_v19, 0.0  ;;  %v516_v28 = vpop.f32.mrf.mxu2 }
 0x172   :  { %1022 = vst.msk [vmem:[%s2622_s7 + $0xf0] sm:$0xf] %vm961_vm2, %v957_v23  ;;  %v926_v29 = vpack.c.bf16 %v862_v24, %v862_v24  ;;  %v762_v30 = vmul.f32 %v2286_v21, %v516_v28  ;;  %v689_v31 = vpop.f32.mrf.mxu3 }
 0x173   :  { %1350 = vst.msk [vmem:[%s2623_s8 + $0xf0] sm:$0xf] %vm961_vm2, %v1286_v25  ;;  %v1255_v32 = vpack.c.bf16 %v1191_v27, %v1191_v27  ;;  %v1091_v33 = vmul.f32 %v2296_v6, %v689_v31  ;;  %v439_v34 = vpop.f32.mrf.mxu0 }
 0x174   :  { %991 = vst.msk [vmem:[%s2622_s7 + $0x74] sm:$0xf] %vm961_vm2, %v926_v29  ;;  %v830_v35 = vadd.f32 %v2306_v9, %v762_v30  ;;  %v731_v36 = vmul.f32 %v2286_v21, %v439_v34  ;;  %v612_v37 = vpop.f32.mrf.mxu1 }
 0x175   :  { %1319 = vst.msk [vmem:[%s2623_s8 + $0x74] sm:$0xf] %vm961_vm2, %v1255_v32  ;;  %v1159_v38 = vadd.f32 %v2317_v13, %v1091_v33  ;;  %v1060_v39 = vmul.f32 %v2296_v6, %v612_v37 }
 0x176   :  { %v894_v40 = vmax.f32 %v830_v35, 0.0  ;;  %v799_v41 = vadd.f32 %v2306_v9, %v731_v36 }
 0x177   :  { %v1223_v42 = vmax.f32 %v1159_v38, 0.0  ;;  %v1128_v43 = vadd.f32 %v2317_v13, %v1060_v39 }
 0x178   :  { %v958_v44 = vpack.c.bf16 %v894_v40, %v894_v40  ;;  %v863_v45 = vmax.f32 %v799_v41, 0.0 }
 0x179   :  { %v1287_v46 = vpack.c.bf16 %v1223_v42, %v1223_v42  ;;  %v1192_v47 = vmax.f32 %v1128_v43, 0.0  ;;  %v519_v48 = vpop.f32.mrf.mxu2 }
 0x17a   :  { %1023 = vst.msk [vmem:[%s2622_s7 + $0xf4] sm:$0xf] %vm961_vm2, %v958_v44  ;;  %v927_v49 = vpack.c.bf16 %v863_v45, %v863_v45  ;;  %v763_v50 = vmul.f32 %v2286_v21, %v519_v48  ;;  %v692_v51 = vpop.f32.mrf.mxu3 }
 0x17b   :  { %1351 = vst.msk [vmem:[%s2623_s8 + $0xf4] sm:$0xf] %vm961_vm2, %v1287_v46  ;;  %v1256_v52 = vpack.c.bf16 %v1192_v47, %v1192_v47  ;;  %v1092_v53 = vmul.f32 %v2296_v6, %v692_v51  ;;  %v441_v54 = vpop.f32.mrf.mxu0 }
 0x17c   :  { %992 = vst.msk [vmem:[%s2622_s7 + $0x78] sm:$0xf] %vm961_vm2, %v927_v49  ;;  %v831_v55 = vadd.f32 %v2306_v9, %v763_v50  ;;  %v732_v56 = vmul.f32 %v2286_v21, %v441_v54  ;;  %v614_v57 = vpop.f32.mrf.mxu1 }
 0x17d   :  { %1320 = vst.msk [vmem:[%s2623_s8 + $0x78] sm:$0xf] %vm961_vm2, %v1256_v52  ;;  %v1160_v58 = vadd.f32 %v2317_v13, %v1092_v53  ;;  %v1061_v59 = vmul.f32 %v2296_v6, %v614_v57 }
 0x17e   :  { %v895_v60 = vmax.f32 %v831_v55, 0.0  ;;  %v800_v61 = vadd.f32 %v2306_v9, %v732_v56 }
 0x17f   :  { %v1224_v62 = vmax.f32 %v1160_v58, 0.0  ;;  %v1129_v63 = vadd.f32 %v2317_v13, %v1061_v59 }
 0x180   :  { %v959_v0 = vpack.c.bf16 %v895_v60, %v895_v60  ;;  %v864_v1 = vmax.f32 %v800_v61, 0.0 }
 0x181   :  { %v1288_v2 = vpack.c.bf16 %v1224_v62, %v1224_v62  ;;  %v1193_v20 = vmax.f32 %v1129_v63, 0.0  ;;  %v521_v3 = vpop.f32.mrf.mxu2 }
 0x182   :  { %1024 = vst.msk [vmem:[%s2622_s7 + $0xf8] sm:$0xf] %vm961_vm2, %v959_v0  ;;  %v928_v4 = vpack.c.bf16 %v864_v1, %v864_v1  ;;  %v764_v22 = vmul.f32 %v2286_v21, %v521_v3  ;;  %v694_v5 = vpop.f32.mrf.mxu3 }
 0x183   :  { %1352 = vst.msk [vmem:[%s2623_s8 + $0xf8] sm:$0xf] %vm961_vm2, %v1288_v2  ;;  %v1257_v26 = vpack.c.bf16 %v1193_v20, %v1193_v20  ;;  %v1093_v7 = vmul.f32 %v2296_v6, %v694_v5 }
 0x184   :  { %993 = vst.msk [vmem:[%s2622_s7 + $0x7c] sm:$0xf] %vm961_vm2, %v928_v4  ;;  %v832_v8 = vadd.f32 %v2306_v9, %v764_v22 }
 0x185   :  { %1321 = vst.msk [vmem:[%s2623_s8 + $0x7c] sm:$0xf] %vm961_vm2, %v1257_v26  ;;  %v1161_v21 = vadd.f32 %v2317_v13, %v1093_v7 }
 0x186   :  { %v896_v10 = vmax.f32 %v832_v8, 0.0 }
 0x187   :  { %v1225_v11 = vmax.f32 %v1161_v21, 0.0 }
 0x188   :  { %v960_v12 = vpack.c.bf16 %v896_v10, %v896_v10 }
 0x189   :  { %v1289_v14 = vpack.c.bf16 %v1225_v11, %v1225_v11 }
 0x18a   :  { %1025 = vst.msk [vmem:[%s2622_s7 + $0xfc] sm:$0xf] %vm961_vm2, %v960_v12 }
 0x18b   :  { %1353 = vst.msk [vmem:[%s2623_s8 + $0xfc] sm:$0xf] %vm961_vm2, %v1289_v14 }

// kernel: scconv_forward.6
= control target key start
LH: loop header
LB: loop body
LE: loop exit
PB: predicated region body
PF: predicated region fallthrough
CT: control target
= control target key end

     0   :  { %s1948_s15 = smov 0   ;;  %s2434_s0 = inlined_call_operand.vmem [shape: bf16[2,10,10,32], index: 0, kind: input, shape index: {}]   ;;  %s2435_s1 = inlined_call_operand.vmem [shape: bf16[9,32,32], index: 1, kind: input, shape index: {}]   ;;  %s2436_s2 = inlined_call_operand.vmem [shape: f32[1,32], index: 2, kind: input, shape index: {}]   ;;  %s2437_s3 = inlined_call_operand.vmem [shape: f32[1,32], index: 3, kind: input, shape index: {}]   ;;  %s2438_s4 = inlined_call_operand.vmem [shape: bf16[2,8,8,32], index: 4, kind: output, shape index: {}]  }
   0x1 LB: > { %s1581_s16 = sadd.s32 4294967295, %s1921_s15   ;;  %p1585_p0 = scmp.ge.s32.totalorder %s1921_s15, 1  ;;  %s1921_s15 = sphi %s1948_s15, %s14_s15  }
   0x2   : > { %p162_p1 = scmp.lt.s32.totalorder %s1921_s15, 3 }
   0x4   : > { %p163_p2 = pnand %p1585_p0, %p162_p1 }
   0x5   : > { %p188_p3 = scmp.lt.s32.totalorder (!%p163_p2), %s1581_s16, 1 }
   0x6   : > { %166 = sbr.rel (%p163_p2) target bundleno = 319 (0x13f), region = 36 }
   0xb   : > { %v1875_v0 = vld [vmem:[%s2435_s1 + $0x18] sm:$0xff]  ;;  %v1874_v1 = vld [vmem:[%s2435_s1 + $0x10] sm:$0xff]  ;;  %s2444_s16 = smov (!%p188_p3, %s1581_s16), 1  ;;  %v1877_v2 = vld [vmem:[%s2435_s1 + $0x28] sm:$0xff]  ;;  %vm219_vm0 = vsmask.f32 3328 }
   0xc   : > { %1898 = vmatpush.bf16.msra.mxu1 %v1875_v0  ;;  %1899 = vmatpush.bf16.msra.mxu2 %v1875_v0  ;;  %s1904_s21 = smul.u32 80, %s2444_s16  ;;  %v1883_v3 = vld [vmem:[%s2435_s1 + $0x38] sm:$0xff]  ;;  %v1873_v4 = vld [vmem:[%s2435_s1 + $0x8] sm:$0xff]  ;;  %vm220_vm1 = vsmask.f32 7440  ;;  %v1876_v6 = vld [vmem:[%s2435_s1 + $0x20] sm:$0xff] }
   0xd   : > { %1900 = vmatpush.bf16.msra.mxu3 %v1875_v0  ;;  %382 = vmatpush.bf16.msra.mxu0 %v1875_v0  ;;  %v1885_v5 = vld [vmem:[%s2435_s1 + $0x48] sm:$0xff]  ;;  %v1882_v7 = vld [vmem:[%s2435_s1 + $0x30] sm:$0xff]  ;;  %v1872_v11 = vld [vmem:[%s2435_s1] sm:$0xff]  ;;  %vm363_vm2 = vcmask 261120   ;;  %vm502_vm4 = vcmask 1042432   ;;  %vm503_vm5 = vcmask 1046532  }
   0xe   : > { %s1980_s6 = scalar_lea.vmem %s2434_s0, %s1904_s21  ;;  %v1884_v12 = vld [vmem:[%s2435_s1 + $0x40] sm:$0xff]  ;;  %vm2016_vm3 = vmor %vm219_vm0, %vm220_vm1  ;;  %s1867_s11 = sshll.u32 %s2444_s16, 5  ;;  %vm1517_vm7 = vcmask 257024  }
   0xf   : > { %v201_v8 = vld [vmem:[%s1980_s6 + $0x10] sm:$0xf]  ;;  %v202_v9 = vld [vmem:[%s1980_s6 + $0x18] sm:$0xf]  ;;  %v1991_v10 = vld [vmem:[%s1980_s6 + $0x14] sm:$0x1]  ;;  %s2378_s14 = scalar_lea.vmem %s2438_s4, %s1867_s11 }
  0x10   : > { %1901 = vmatpush.bf16.msra.mxu1 %v1874_v1  ;;  %1902 = vmatpush.bf16.msra.mxu2 %v1874_v1  ;;  %v2000_v13 = vld [vmem:[%s1980_s6 + $0x1c] sm:$0x1]  ;;  %v251_v14 = vshrl.u32 %v201_v8, 16  ;;  %v254_v15 = vshll.u32 %v201_v8, 16  ;;  %v260_v16 = vshll.u32 %v1991_v10, 16  ;;  %v265_v17 = vshrl.u32 %v202_v9, 16  ;;  %vm2056_vm6 = vmor %vm502_vm4, %vm503_vm5 }
  0x11   : > { %1903 = vmatpush.bf16.msra.mxu3 %v1874_v1  ;;  %383 = vmatpush.bf16.msra.mxu0 %v1874_v1  ;;  %v268_v18 = vshll.u32 %v202_v9, 16  ;;  %v274_v19 = vshll.u32 %v2000_v13, 16  ;;  %v203_v20 = vld [vmem:[%s1980_s6 + $0x20] sm:$0xf]  ;;  %v204_v21 = vld [vmem:[%s1980_s6 + $0x28] sm:$0xf] }
  0x12   : > { %v253_v22 = vrot.slane %v251_v14, 4  ;;  %v256_v23 = vrot.slane %v254_v15, 5  ;;  %v262_v24 = vrot.slane %v260_v16, 5  ;;  %v267_v25 = vrot.slane %v265_v17, 4  ;;  %v2007_v26 = vld [vmem:[%s1980_s6 + $0x24] sm:$0x1] }
  0x13   : > { %v270_v27 = vrot.slane %v268_v18, 5  ;;  %v276_v28 = vrot.slane %v274_v19, 5  ;;  %v2010_v29 = vld [vmem:[%s1980_s6 + $0x2c] sm:$0x1]  ;;  %v279_v30 = vshrl.u32 %v203_v20, 16  ;;  %v282_v31 = vshll.u32 %v203_v20, 16 }
  0x14   : > { %584 = vmatpush.bf16.msrb.mxu2 %v1877_v2  ;;  %455 = vmatpush.bf16.msrb.mxu1 %v1873_v4  ;;  %v257_v32 = vor.u32 %v256_v23, %v253_v22  ;;  %v288_v33 = vshll.u32 %v2007_v26, 16  ;;  %v293_v34 = vshrl.u32 %v204_v21, 16  ;;  %v296_v35 = vshll.u32 %v204_v21, 16  ;;  %v205_v36 = vld [vmem:[%s1980_s6 + $0x30] sm:$0xf]  ;;  %v1893_v22 = vld [vmem:[%s2435_s1 + $0x68] sm:$0xff] }
  0x15   : > { %679 = vmatpush.bf16.msrb.mxu3 %v1883_v3  ;;  %885 = vmatpush.bf16.msrb.mxu0 %v1885_v5  ;;  %v271_v38 = vor.u32 %v270_v27, %v267_v25  ;;  %v281_v39 = vrot.slane %v279_v30, 4  ;;  %v284_v40 = vrot.slane %v282_v31, 5  ;;  %v302_v41 = vshll.u32 %v2010_v29, 16  ;;  %v2022_v46 = vld [vmem:[%s1980_s6 + $0x34] sm:$0x1] }
  0x16   : > { %v258_v42 = vrot.slane %v257_v32, 4  ;;  %v290_v43 = vrot.slane %v288_v33, 5  ;;  %v295_v44 = vrot.slane %v293_v34, 4  ;;  %v298_v45 = vrot.slane %v296_v35, 5  ;;  %v206_v53 = vld [vmem:[%s1980_s6 + $0x38] sm:$0xf] }
  0x17   : > { %v272_v47 = vrot.slane %v271_v38, 4  ;;  %v285_v48 = vor.u32 %v284_v40, %v281_v39  ;;  %v304_v49 = vrot.slane %v302_v41, 5  ;;  %v307_v50 = vshrl.u32 %v205_v36, 16  ;;  %v2028_v54 = vld [vmem:[%s1980_s6 + $0x3c] sm:$0x1] }
  0x18   : > { %585 = vmatpush.bf16.msrb.mxu2 %v1876_v6  ;;  %456 = vmatpush.bf16.msrb.mxu1 %v1872_v11  ;;  %v263_v51 = vsel %vm2016_vm3, %v258_v42, %v262_v24  ;;  %v299_v52 = vor.u32 %v298_v45, %v295_v44  ;;  %v310_v55 = vshll.u32 %v205_v36, 16  ;;  %v316_v56 = vshll.u32 %v2022_v46, 16  ;;  %v199_v1 = vld [vmem:[%s1980_s6] sm:$0xf]  ;;  %v211_v6 = vld [vmem:[%s1980_s6 + $0x4] sm:$0x1] }
  0x19   : > { %680 = vmatpush.bf16.msrb.mxu3 %v1882_v7  ;;  %886 = vmatpush.bf16.msrb.mxu0 %v1884_v12  ;;  %v277_v57 = vsel %vm2016_vm3, %v272_v47, %v276_v28  ;;  %v341_v58 = vunpack.c.l.b16 %v263_v51  ;;  %v286_v59 = vrot.slane %v285_v48, 4  ;;  %v309_v60 = vrot.slane %v307_v50, 4  ;;  %v200_v12 = vld [vmem:[%s1980_s6 + $0x8] sm:$0xf]  ;;  %v212_v25 = vld [vmem:[%s1980_s6 + $0xc] sm:$0x1] }
  0x1a   : > { %v342_v61 = vunpack.c.l.b16 %v277_v57  ;;  %v300_v62 = vrot.slane %v299_v52, 4  ;;  %v312_v63 = vrot.slane %v310_v55, 5  ;;  %v318_v0 = vrot.slane %v316_v56, 5  ;;  %v478_v34 = vld [vmem:[%s1980_s6] sm:$0xe]  ;;  %v1887_v35 = vld [vmem:[%s2435_s1 + $0x58] sm:$0xff] }
  0x1b   : > { %v291_v2 = vsel %vm2016_vm3, %v286_v59, %v290_v43  ;;  %v321_v3 = vshrl.u32 %v206_v53, 16  ;;  %v324_v4 = vshll.u32 %v206_v53, 16  ;;  %v330_v5 = vshll.u32 %v2028_v54, 16  ;;  %v479_v41 = vld [vmem:[%s1980_s6 + $0x8] sm:$0xe] }
  0x1c   : > { %v348_v7 = vpack.c.b16 %v342_v61, %v341_v58  ;;  %v305_v8 = vsel %vm2016_vm3, %v300_v62, %v304_v49  ;;  %v343_v9 = vunpack.c.l.b16 %v291_v2  ;;  %v313_v11 = vor.u32 %v312_v63, %v309_v60  ;;  %v1697_v48 = vld [vmem:[%s1980_s6 + $0x8] sm:$0xf]  ;;  %v1699_v59 = vld [vmem:[%s1980_s6 + $0x10] sm:$0xf]  ;;  %v1895_v61 = vld [vmem:[%s2435_s1 + $0x78] sm:$0xff] }
  0x1d   : > { %v344_v14 = vunpack.c.l.b16 %v305_v8  ;;  %v323_v15 = vrot.slane %v321_v3, 4  ;;  %v326_v16 = vrot.slane %v324_v4, 5  ;;  %v332_v17 = vrot.slane %v330_v5, 5  ;;  %v2077_v2 = vld [vmem:[%s1980_s6 + $0x14] sm:$0x1] }
  0x1e   : > { %1602 = vmatmul.msk.bf16.vlgmr.msra.gmra.mxu1 %vm363_vm2, %v348_v7  ;;  %v314_v18 = vrot.slane %v313_v11, 4  ;;  %v223_v19 = vshrl.u32 %v199_v1, 16  ;;  %v226_v20 = vshll.u32 %v199_v1, 16  ;;  %v232_v21 = vshll.u32 %v211_v6, 16  ;;  %v2074_v1 = vld [vmem:[%s1980_s6 + $0xc] sm:$0x1] }
  0x1f   : > { %v349_v23 = vpack.c.b16 %v344_v14, %v343_v9  ;;  %v327_v24 = vor.u32 %v326_v16, %v323_v15  ;;  %v237_v27 = vshrl.u32 %v200_v12, 16  ;;  %v240_v28 = vshll.u32 %v200_v12, 16  ;;  %1019 = vmatpush.bf16.msra.mxu1 %v1887_v35  ;;  %v1607_v5 = vld [vmem:[%s1980_s6] sm:$0xf] }
  0x20   : > { %v319_v30 = vsel %vm2016_vm3, %v314_v18, %v318_v0  ;;  %v225_v31 = vrot.slane %v223_v19, 4  ;;  %v228_v32 = vrot.slane %v226_v20, 5  ;;  %v234_v33 = vrot.slane %v232_v21, 5  ;;  %v1897_v18 = vld [vmem:[%s2435_s1 + $0x88] sm:$0xff] }
  0x21   : > { %1603 = vmatmul.msk.bf16.vlgmr.msra.gmra.mxu2 %vm363_vm2, %v349_v23  ;;  %v328_v36 = vrot.slane %v327_v24, 4  ;;  %v345_v38 = vunpack.c.l.b16 %v319_v30  ;;  %v239_v39 = vrot.slane %v237_v27, 4  ;;  %v242_v40 = vrot.slane %v240_v28, 5 }
  0x22   : > { %v229_v42 = vor.u32 %v228_v32, %v225_v31  ;;  %v246_v43 = vshll.u32 %v212_v25, 16  ;;  %v507_v44 = vrot.slane %v211_v6, 5  ;;  %v511_v45 = vrot.slane %v212_v25, 5  ;;  %1114 = vmatpush.bf16.msra.mxu2 %v1893_v22  ;;  %v1868_v6 = vld [vmem:[%s1980_s6 + $0x4] sm:$0xf0] }
  0x23   : > { %v333_v49 = vsel %vm2016_vm3, %v328_v36, %v332_v17  ;;  %v243_v50 = vor.u32 %v242_v40, %v239_v39  ;;  %v1633_v51 = vrot.slane %v478_v34, 9  ;;  %v1634_v56 = vrot.slane %v479_v41, 9  ;;  %v480_v31 = vld [vmem:[%s1980_s6 + $0x10] sm:$0xe]  ;;  %v1701_v32 = vld [vmem:[%s1980_s6 + $0x18] sm:$0xf] }
  0x24   : > { %v346_v52 = vunpack.c.l.b16 %v333_v49  ;;  %v230_v53 = vrot.slane %v229_v42, 4  ;;  %v248_v55 = vrot.slane %v246_v43, 5  ;;  %v727_v60 = vshrl.u32 %v1697_v48, 16  ;;  %v1703_v34 = vld [vmem:[%s1980_s6 + $0x20] sm:$0xf] }
  0x25   : > { %v244_v57 = vrot.slane %v243_v50, 4  ;;  %v508_v58 = vsel %vm2056_vm6, %v1633_v51, %v507_v44  ;;  %v512_v0 = vsel %vm2056_vm6, %v1634_v56, %v511_v45  ;;  %v730_v11 = vshll.u32 %v1697_v48, 16  ;;  %v481_v36 = vld [vmem:[%s1980_s6 + $0x18] sm:$0xe]  ;;  %v1671_v42 = vld [vmem:[%s1980_s6 + $0x8] sm:$0xf] }
  0x26   : > { %v350_v62 = vpack.c.b16 %v346_v52, %v345_v38  ;;  %v235_v63 = vsel %vm2016_vm3, %v230_v53, %v234_v33  ;;  %v542_v7 = vunpack.c.l.b16 %v508_v58  ;;  %v729_v9 = vrot.slane %v727_v60, 4  ;;  %v1878_v43 = vld [vmem:[%s1980_s6 + $0xc] sm:$0xf0]  ;;  %v2107_v56 = vld [vmem:[%s1980_s6 + $0x1c] sm:$0x1] }
  0x27   : > { %v249_v3 = vsel %vm2016_vm3, %v244_v57, %v248_v55  ;;  %v339_v4 = vunpack.c.l.b16 %v235_v63  ;;  %v741_v12 = vshrl.u32 %v1699_v59, 16  ;;  %v543_v14 = vunpack.c.l.b16 %v512_v0  ;;  %v1611_v63 = vld [vmem:[%s1980_s6 + $0x10] sm:$0xf] }
  0x28   : > { %1604 = vmatmul.msk.bf16.vlgmr.msra.gmra.mxu3 %vm363_vm2, %v350_v62  ;;  %v340_v8 = vunpack.c.l.b16 %v249_v3  ;;  %v736_v15 = vshll.u32 %v2074_v1, 16  ;;  %v744_v16 = vshll.u32 %v1699_v59, 16  ;;  %v750_v17 = vshll.u32 %v2077_v2, 16  ;;  %v2112_v62 = vld [vmem:[%s1980_s6 + $0x24] sm:$0x1] }
  0x29   : > { %1320 = vmatpush.bf16.msra.mxu3 %v1895_v61  ;;  %v1608_v20 = vor.u32 %v1868_v6, %v1607_v5  ;;  %v732_v21 = vrot.slane %v730_v11, 5  ;;  %v743_v22 = vrot.slane %v741_v12, 4  ;;  %v550_v25 = vpack.c.b16 %v543_v14, %v542_v7  ;;  %v1892_v5 = vld [vmem:[%s2435_s1 + $0x60] sm:$0xff]  ;;  %v1705_v12 = vld [vmem:[%s1980_s6 + $0x28] sm:$0xf] }
  0x2a   : > { %v347_v19 = vpack.c.b16 %v340_v8, %v339_v4  ;;  %v746_v23 = vrot.slane %v744_v16, 5  ;;  %v738_v27 = vrot.slane %v736_v15, 5  ;;  %v752_v30 = vrot.slane %v750_v17, 5  ;;  %1115 = vmatpush.bf16.msra.mxu2 %v1892_v5  ;;  %v1894_v15 = vld [vmem:[%s2435_s1 + $0x70] sm:$0xff]  ;;  %v1896_v17 = vld [vmem:[%s2435_s1 + $0x80] sm:$0xff] }
  0x2b   : > { %v733_v24 = vor.u32 %v732_v21, %v729_v9  ;;  %v1635_v38 = vrot.slane %v480_v31, 9  ;;  %v515_v39 = vrot.slane %v1991_v10, 5  ;;  %v755_v40 = vshrl.u32 %v1701_v32, 16  ;;  %v1886_v16 = vld [vmem:[%s2435_s1 + $0x50] sm:$0xff] }
  0x2c   : > { %1601 = vmatmul.msk.bf16.vlgmr.msra.gmra.mxu0 %vm363_vm2, %v347_v19  ;;  %v747_v28 = vor.u32 %v746_v23, %v743_v22  ;;  %v758_v41 = vshll.u32 %v1701_v32, 16  ;;  %v769_v48 = vshrl.u32 %v1703_v34, 16  ;;  %v772_v49 = vshll.u32 %v1703_v34, 16  ;;  %v1707_v22 = vld [vmem:[%s1980_s6 + $0x30] sm:$0xf]  ;;  %1020 = vmatpush.bf16.msra.mxu1 %v1886_v16 }
  0x2d   : > { %1454 = vmatpush.bf16.msra.mxu0 %v1897_v18  ;;  %v734_v33 = vrot.slane %v733_v24, 4  ;;  %v1636_v50 = vrot.slane %v481_v36, 9  ;;  %v519_v10 = vrot.slane %v2000_v13, 5  ;;  %v1672_v51 = vor.u32 %v1878_v43, %v1671_v42  ;;  %v1869_v13 = vld [vmem:[%s1980_s6 + $0x14] sm:$0xf0]  ;;  %1321 = vmatpush.bf16.msra.mxu3 %v1894_v15 }
  0x2e   : > { %1629 = vmatmul.msk.bf16.vlgmr.msrb.gmra.mxu1 %vm363_vm2, %v1608_v20  ;;  %v748_v35 = vrot.slane %v747_v28, 4  ;;  %v516_v55 = vsel %vm2056_vm6, %v1635_v38, %v515_v39  ;;  %v757_v57 = vrot.slane %v755_v40, 4  ;;  %v760_v58 = vrot.slane %v758_v41, 5  ;;  %v482_v23 = vld [vmem:[%s1980_s6 + $0x20] sm:$0xe] }
  0x2f   : > { %v739_v44 = vsel %vm2016_vm3, %v734_v33, %v738_v27  ;;  %v771_v59 = vrot.slane %v769_v48, 4  ;;  %v774_v60 = vrot.slane %v772_v49, 5  ;;  %v520_v61 = vsel %vm2056_vm6, %v1636_v50, %v519_v10  ;;  %v483_v24 = vld [vmem:[%s1980_s6 + $0x28] sm:$0xe]  ;;  %v1675_v28 = vld [vmem:[%s1980_s6 + $0x18] sm:$0xf] }
  0x30   : > { %v753_v45 = vsel %vm2016_vm3, %v748_v35, %v752_v30  ;;  %v843_v52 = vunpack.c.l.b16 %v739_v44  ;;  %v544_v3 = vunpack.c.l.b16 %v516_v55  ;;  %v764_v4 = vshll.u32 %v2107_v56, 16  ;;  %v1879_v30 = vld [vmem:[%s1980_s6 + $0x1c] sm:$0xf0] }
  0x31   : > { %1653 = vmatmul.msk.bf16.vlgmr.msrb.gmra.mxu2 %vm363_vm2, %v550_v25  ;;  %v844_v53 = vunpack.c.l.b16 %v753_v45  ;;  %v545_v6 = vunpack.c.l.b16 %v520_v61  ;;  %v761_v7 = vor.u32 %v760_v58, %v757_v57  ;;  %v775_v8 = vor.u32 %v774_v60, %v771_v59  ;;  %1455 = vmatpush.bf16.msra.mxu0 %v1896_v17  ;;  %v2147_v45 = vld [vmem:[%s1980_s6 + $0x2c] sm:$0x1] }
  0x32   : > { %v778_v9 = vshll.u32 %v2112_v62, 16  ;;  %v1612_v11 = vor.u32 %v1869_v13, %v1611_v63  ;;  %v766_v14 = vrot.slane %v764_v4, 5  ;;  %v783_v25 = vshrl.u32 %v1705_v12, 16 }
  0x33   : > { %v851_v0 = vpack.c.b16 %v844_v53, %v843_v52  ;;  %v551_v18 = vpack.c.b16 %v545_v6, %v544_v3  ;;  %v762_v19 = vrot.slane %v761_v7, 4  ;;  %v776_v20 = vrot.slane %v775_v8, 4  ;;  %v485_v6 = vld [vmem:[%s1980_s6 + $0x38] sm:$0xe]  ;;  %v1711_v8 = vld [vmem:[%s1980_s6 + $0x40] sm:$0xf] }
  0x34   : > { %v780_v21 = vrot.slane %v778_v9, 5  ;;  %v786_v27 = vshll.u32 %v1705_v12, 16  ;;  %v797_v33 = vshrl.u32 %v1707_v22, 16  ;;  %v800_v34 = vshll.u32 %v1707_v22, 16  ;;  %v1709_v7 = vld [vmem:[%s1980_s6 + $0x38] sm:$0xf] }
  0x35   : > { %v767_v31 = vsel %vm2016_vm3, %v762_v19, %v766_v14  ;;  %v1637_v35 = vrot.slane %v482_v23, 9  ;;  %v523_v36 = vrot.slane %v2007_v26, 5  ;;  %v1638_v38 = vrot.slane %v483_v24, 9  ;;  %v2154_v26 = vld [vmem:[%s1980_s6 + $0x34] sm:$0x1] }
  0x36   : > { %v781_v32 = vsel %vm2016_vm3, %v776_v20, %v780_v21  ;;  %v527_v39 = vrot.slane %v2010_v29, 5  ;;  %v785_v40 = vrot.slane %v783_v25, 4  ;;  %v788_v41 = vrot.slane %v786_v27, 5  ;;  %v1870_v29 = vld [vmem:[%s1980_s6 + $0x24] sm:$0xf0] }
  0x37   : > { %v1676_v42 = vor.u32 %v1879_v30, %v1675_v28  ;;  %v845_v43 = vunpack.c.l.b16 %v767_v31  ;;  %v846_v44 = vunpack.c.l.b16 %v781_v32  ;;  %v799_v48 = vrot.slane %v797_v33, 4  ;;  %v1679_v9 = vld [vmem:[%s1980_s6 + $0x28] sm:$0xf]  ;;  %v1880_v14 = vld [vmem:[%s1980_s6 + $0x2c] sm:$0xf0] }
  0x38   : > { %1693 = vmatmul.msk.bf16.vlgmr.msrb.gmra.mxu3 %vm363_vm2, %v1672_v51  ;;  %v802_v49 = vrot.slane %v800_v34, 5  ;;  %v524_v50 = vsel %vm2056_vm6, %v1637_v35, %v523_v36  ;;  %v528_v10 = vsel %vm2056_vm6, %v1638_v38, %v527_v39  ;;  %v1615_v51 = vld [vmem:[%s1980_s6 + $0x20] sm:$0xf]  ;;  %v789_v52 = vor.u32 %v788_v41, %v785_v40  ;;  %v2181_v27 = vld [vmem:[%s1980_s6 + $0x3c] sm:$0x1] }
  0x39   : > { %v792_v53 = vshll.u32 %v2147_v45, 16  ;;  %v852_v55 = vpack.c.b16 %v846_v44, %v845_v43  ;;  %v546_v57 = vunpack.c.l.b16 %v524_v50  ;;  %v547_v58 = vunpack.c.l.b16 %v528_v10  ;;  %v2184_v28 = vld [vmem:[%s1980_s6 + $0x44] sm:$0x1]  ;;  %v1619_v34 = vld [vmem:[%s1980_s6 + $0x30] sm:$0xf] }
  0x3a   : > { %v803_v59 = vor.u32 %v802_v49, %v799_v48  ;;  %v806_v60 = vshll.u32 %v2154_v26, 16  ;;  %v1616_v61 = vor.u32 %v1870_v29, %v1615_v51  ;;  %v790_v63 = vrot.slane %v789_v52, 4  ;;  %v1871_v35 = vld [vmem:[%s1980_s6 + $0x34] sm:$0xf0] }
  0x3b   : > { %v794_v13 = vrot.slane %v792_v53, 5  ;;  %v552_v3 = vpack.c.b16 %v547_v58, %v546_v57  ;;  %v531_v12 = vrot.slane %v2022_v46, 5  ;;  %v1640_v16 = vrot.slane %v485_v6, 9  ;;  %v1803_v49 = vld [vmem:[%s1980_s6 + $0x18] sm:$0xf] }
  0x3c   : > { %1725 = vmatmul.msk.bf16.vlgmr.msrb.gmra.mxu0 %vm363_vm2, %v851_v0  ;;  %v484_v0 = vld [vmem:[%s1980_s6 + $0x30] sm:$0xe]  ;;  %v804_v4 = vrot.slane %v803_v59, 4  ;;  %v808_v5 = vrot.slane %v806_v60, 5  ;;  %v535_v17 = vrot.slane %v2028_v54, 5  ;;  %v814_v20 = vshll.u32 %v1709_v7, 16 }
  0x3d   : > { %v1639_v15 = vrot.slane %v484_v0, 9  ;;  %v825_v21 = vshrl.u32 %v1711_v8, 16  ;;  %v828_v22 = vshll.u32 %v1711_v8, 16  ;;  %v1680_v23 = vor.u32 %v1880_v14, %v1679_v9  ;;  %v1729_v53 = vld [vmem:[%s1980_s6 + $0x8] sm:$0xe] }
  0x3e   : > { %1630 = vmatmul.msk.bf16.gmra.mxu1 %vm363_vm2, %v1612_v11  ;;  %v795_v11 = vsel %vm2016_vm3, %v790_v63, %v794_v13  ;;  %v809_v19 = vsel %vm2016_vm3, %v804_v4, %v808_v5  ;;  %v536_v54 = vsel %vm2056_vm6, %v1640_v16, %v535_v17  ;;  %v816_v31 = vrot.slane %v814_v20, 5  ;;  %v1802_v5 = vld [vmem:[%s1980_s6 + $0x14] sm:$0x1]  ;;  %v1683_v6 = vld [vmem:[%s1980_s6 + $0x38] sm:$0xf] }
  0x3f   : > { %v847_v46 = vunpack.c.l.b16 %v795_v11  ;;  %v848_v24 = vunpack.c.l.b16 %v809_v19  ;;  %v532_v25 = vsel %vm2056_vm6, %v1639_v15, %v531_v12  ;;  %v827_v32 = vrot.slane %v825_v21, 4 }
  0x40   : > { %v830_v33 = vrot.slane %v828_v22, 5  ;;  %v548_v36 = vunpack.c.l.b16 %v532_v25  ;;  %v549_v39 = vunpack.c.l.b16 %v536_v54  ;;  %v820_v40 = vshll.u32 %v2181_v27, 16  ;;  %v1775_v54 = vld [vmem:[%s1980_s6 + $0x10] sm:$0xf] }
  0x41   : > { %1654 = vmatmul.msk.bf16.gmra.mxu2 %vm363_vm2, %v551_v18  ;;  %v811_v18 = vshrl.u32 %v1709_v7, 16  ;;  %v853_v38 = vpack.c.b16 %v848_v24, %v847_v46  ;;  %v834_v41 = vshll.u32 %v2184_v28, 16  ;;  %v1620_v48 = vor.u32 %v1871_v35, %v1619_v34  ;;  %v1881_v7 = vld [vmem:[%s1980_s6 + $0x3c] sm:$0xf0] }
  0x42   : > { %v831_v44 = vor.u32 %v830_v33, %v827_v32  ;;  %v553_v51 = vpack.c.b16 %v549_v39, %v548_v36  ;;  %v822_v29 = vrot.slane %v820_v40, 5  ;;  %v1176_v59 = vshrl.u32 %v1803_v49, 16  ;;  %v1888_v32 = vld [vmem:[%s1980_s6 + $0x14] sm:$0xf0]  ;;  %v1805_v35 = vld [vmem:[%s1980_s6 + $0x20] sm:$0xf] }
  0x43   : > { %v813_v30 = vrot.slane %v811_v18, 4  ;;  %v836_v52 = vrot.slane %v834_v41, 5  ;;  %v1179_v60 = vshll.u32 %v1803_v49, 16  ;;  %v946_v63 = vrot.slane %v2077_v2, 5  ;;  %v1804_v2 = vld [vmem:[%s1980_s6 + $0x1c] sm:$0x1] }
  0x44   : > { %v832_v58 = vrot.slane %v831_v44, 4  ;;  %v1737_v13 = vrot.slane %v1729_v53, 9  ;;  %v1171_v16 = vshll.u32 %v1802_v5, 16  ;;  %v1684_v17 = vor.u32 %v1881_v7, %v1683_v6  ;;  %v1731_v44 = vld [vmem:[%s1980_s6 + $0x18] sm:$0xe] }
  0x45   : > { %v817_v43 = vor.u32 %v816_v31, %v813_v30  ;;  %v1181_v11 = vrot.slane %v1179_v60, 5  ;;  %v1185_v21 = vshll.u32 %v1804_v2, 16  ;;  %v1833_v30 = vld [vmem:[%s1980_s6 + $0x10] sm:$0xe]  ;;  %v1834_v31 = vld [vmem:[%s1980_s6 + $0x18] sm:$0xe] }
  0x46   : > { %v837_v9 = vsel %vm2016_vm3, %v832_v58, %v836_v52  ;;  %v1173_v24 = vrot.slane %v1171_v16, 5  ;;  %v1841_v40 = vrot.slane %v1833_v30, 9  ;;  %v1377_v41 = vrot.slane %v1802_v5, 5  ;;  %v1808_v6 = vld [vmem:[%s1980_s6 + $0x2c] sm:$0x1] }
  0x47   : > { %v818_v57 = vrot.slane %v817_v43, 4  ;;  %v850_v19 = vunpack.c.l.b16 %v837_v9  ;;  %v1187_v34 = vrot.slane %v1185_v21, 5  ;;  %v1776_v43 = vor.u32 %v1888_v32, %v1775_v54  ;;  %v1779_v16 = vld [vmem:[%s1980_s6 + $0x20] sm:$0xf]  ;;  %v1809_v21 = vld [vmem:[%s1980_s6 + $0x30] sm:$0xf] }
  0x48   : > { %1694 = vmatmul.msk.bf16.gmra.mxu3 %vm363_vm2, %v1676_v42  ;;  %v1801_v42 = vld [vmem:[%s1980_s6 + $0x10] sm:$0xf]  ;;  %v1190_v49 = vshrl.u32 %v1805_v35, 16  ;;  %v1811_v54 = vld [vmem:[%s1980_s6 + $0x38] sm:$0xf]  ;;  %v1221_v32 = vshll.u32 %v1809_v21, 16 }
  0x49   : > { %v1162_v50 = vshrl.u32 %v1801_v42, 16  ;;  %v1165_v10 = vshll.u32 %v1801_v42, 16  ;;  %v823_v8 = vsel %vm2016_vm3, %v818_v57, %v822_v29  ;;  %v1842_v42 = vrot.slane %v1834_v31, 9 }
  0x4a   : > { %v849_v18 = vunpack.c.l.b16 %v823_v8  ;;  %v950_v57 = vrot.slane %v2107_v56, 5  ;;  %v1218_v31 = vshrl.u32 %v1809_v21, 16 }
  0x4b   : > { %v1167_v4 = vrot.slane %v1165_v10, 5 }
  0x4c   : > { %1726 = vmatmul.msk.bf16.gmra.mxu0 %vm363_vm2, %v852_v55  ;;  %v1730_v55 = vld [vmem:[%s1980_s6 + $0x10] sm:$0xe]  ;;  %v854_v25 = vpack.c.b16 %v850_v19, %v849_v18 }
  0x4d   : > { %v1738_v0 = vrot.slane %v1730_v55, 9  ;;  %v1739_v55 = vrot.slane %v1731_v44, 9  ;;  %v958_v44 = vrot.slane %v2147_v45, 5  ;;  %v1812_v45 = vld [vmem:[%s1980_s6 + $0x3c] sm:$0x1] }
  0x4e   : > { %1631 = vmatmul.msk.bf16.gmra.mxu1 %vm363_vm2, %v1616_v61  ;;  %v942_v61 = vrot.slane %v2074_v1, 5  ;;  %v1178_v1 = vrot.slane %v1176_v59, 4  ;;  %v954_v59 = vrot.slane %v2112_v62, 5 }
  0x4f   : > { %v947_v14 = vsel %vm2056_vm6, %v1738_v0, %v946_v63  ;;  %v1192_v63 = vrot.slane %v1190_v49, 4  ;;  %v951_v62 = vsel %vm2056_vm6, %v1739_v55, %v950_v57 }
  0x50   : > { %v943_v12 = vsel %vm2056_vm6, %v1737_v13, %v942_v61  ;;  %v1182_v20 = vor.u32 %v1181_v11, %v1178_v1  ;;  %v1378_v61 = vsel %vm2056_vm6, %v1841_v40, %v1377_v41  ;;  %v1389_v41 = vrot.slane %v1808_v6, 5 }
  0x51   : > { %1655 = vmatmul.msk.bf16.gmra.mxu2 %vm363_vm2, %v552_v3  ;;  %v1164_v3 = vrot.slane %v1162_v50, 4  ;;  %v977_v22 = vunpack.c.l.b16 %v943_v12  ;;  %v1193_v50 = vshll.u32 %v1805_v35, 16  ;;  %v1412_v56 = vunpack.c.l.b16 %v1378_v61 }
  0x52   : > { %v1183_v33 = vrot.slane %v1182_v20, 4  ;;  %v1213_v12 = vshll.u32 %v1808_v6, 16  ;;  %v1835_v20 = vld [vmem:[%s1980_s6 + $0x20] sm:$0xe] }
  0x53   : > { %v1168_v15 = vor.u32 %v1167_v4, %v1164_v3  ;;  %v1195_v13 = vrot.slane %v1193_v50, 5  ;;  %v1806_v3 = vld [vmem:[%s1980_s6 + $0x24] sm:$0x1]  ;;  %v1843_v30 = vrot.slane %v1835_v20, 9 }
  0x54   : > { %v1188_v10 = vsel %vm2016_vm3, %v1183_v33, %v1187_v34  ;;  %v1199_v11 = vshll.u32 %v1806_v3, 16  ;;  %v1385_v35 = vrot.slane %v1806_v3, 5 }
  0x55   : > { %v1169_v46 = vrot.slane %v1168_v15, 4  ;;  %v1279_v60 = vunpack.c.l.b16 %v1188_v10  ;;  %v1196_v1 = vor.u32 %v1195_v13, %v1192_v63  ;;  %v1220_v10 = vrot.slane %v1218_v31, 4 }
  0x56   : > { %v1201_v19 = vrot.slane %v1199_v11, 5  ;;  %v1386_v55 = vsel %vm2056_vm6, %v1843_v30, %v1385_v35  ;;  %v1838_v11 = vld [vmem:[%s1980_s6 + $0x38] sm:$0xe]  ;;  %v1397_v30 = vrot.slane %v1812_v45, 5  ;;  %v966_v35 = vrot.slane %v2181_v27, 5 }
  0x57   : > { %v1174_v39 = vsel %vm2016_vm3, %v1169_v46, %v1173_v24  ;;  %v1197_v18 = vrot.slane %v1196_v1, 4  ;;  %v1215_v46 = vrot.slane %v1213_v12, 5  ;;  %v1836_v24 = vld [vmem:[%s1980_s6 + $0x28] sm:$0xe]  ;;  %v1837_v1 = vld [vmem:[%s1980_s6 + $0x30] sm:$0xe] }
  0x58   : > { %1695 = vmatmul.msk.bf16.gmra.mxu3 %vm363_vm2, %v1680_v23  ;;  %v978_v23 = vunpack.c.l.b16 %v947_v14  ;;  %v1278_v53 = vunpack.c.l.b16 %v1174_v39  ;;  %v979_v14 = vunpack.c.l.b16 %v951_v62  ;;  %v1734_v39 = vld [vmem:[%s1980_s6 + $0x30] sm:$0xe]  ;;  %v1846_v21 = vrot.slane %v1838_v11, 9 }
  0x59   : > { %v1202_v34 = vsel %vm2016_vm3, %v1197_v18, %v1201_v19  ;;  %v1742_v50 = vrot.slane %v1734_v39, 9  ;;  %v1845_v19 = vrot.slane %v1837_v1, 9 }
  0x5a   : > { %v985_v36 = vpack.c.b16 %v978_v23, %v977_v22  ;;  %v1286_v8 = vpack.c.b16 %v1279_v60, %v1278_v53  ;;  %v1889_v22 = vld [vmem:[%s1980_s6 + $0x24] sm:$0xf0]  ;;  %v1810_v53 = vld [vmem:[%s1980_s6 + $0x34] sm:$0x1] }
  0x5b   : > { %v1780_v33 = vor.u32 %v1889_v22, %v1779_v16  ;;  %v1227_v63 = vshll.u32 %v1810_v53, 16  ;;  %v1393_v20 = vrot.slane %v1810_v53, 5 }
  0x5c   : > { %1727 = vmatmul.msk.bf16.gmra.mxu0 %vm363_vm2, %v853_v38  ;;  %v1807_v38 = vld [vmem:[%s1980_s6 + $0x28] sm:$0xf] }
  0x5d   : > { %v1204_v29 = vshrl.u32 %v1807_v38, 16  ;;  %v1207_v52 = vshll.u32 %v1807_v38, 16  ;;  %v1733_v38 = vld [vmem:[%s1980_s6 + $0x28] sm:$0xe] }
  0x5e   : > { %1632 = vmatmul.msk.bf16.gmra.mxu1 %vm363_vm2, %v1620_v48  ;;  %v1732_v48 = vld [vmem:[%s1980_s6 + $0x20] sm:$0xe]  ;;  %v1741_v49 = vrot.slane %v1733_v38, 9  ;;  %v970_v38 = vrot.slane %v2184_v28, 5 }
  0x5f   : > { %v1740_v58 = vrot.slane %v1732_v48, 9  ;;  %v1206_v4 = vrot.slane %v1204_v29, 4  ;;  %v1209_v5 = vrot.slane %v1207_v52, 5  ;;  %v962_v48 = vrot.slane %v2154_v26, 5 }
  0x60   : > { %v1280_v29 = vunpack.c.l.b16 %v1202_v34  ;;  %v959_v26 = vsel %vm2056_vm6, %v1741_v49, %v958_v44  ;;  %v1814_v44 = vld [vmem:[%s1980_s6 + $0x44] sm:$0x1] }
  0x61   : > { %1656 = vmatmul.msk.bf16.gmra.mxu2 %vm363_vm2, %v553_v51  ;;  %v1381_v51 = vrot.slane %v1804_v2, 5  ;;  %v955_v7 = vsel %vm2056_vm6, %v1740_v58, %v954_v59  ;;  %v1210_v2 = vor.u32 %v1209_v5, %v1206_v4  ;;  %v963_v60 = vsel %vm2056_vm6, %v1742_v50, %v962_v48  ;;  %v1816_v50 = vld [vmem:[%s1980_s6 + $0x4c] sm:$0x1] }
  0x62   : > { %v980_v15 = vunpack.c.l.b16 %v955_v7  ;;  %v1241_v5 = vshll.u32 %v1812_v45, 16  ;;  %v981_v6 = vunpack.c.l.b16 %v959_v26  ;;  %v1229_v7 = vrot.slane %v1227_v63, 5 }
  0x63   : > { %v1382_v0 = vsel %vm2056_vm6, %v1842_v42, %v1381_v51  ;;  %v1211_v23 = vrot.slane %v1210_v2, 4  ;;  %v1232_v42 = vshrl.u32 %v1811_v54, 16  ;;  %v1223_v51 = vrot.slane %v1221_v32, 5  ;;  %v1890_v2 = vld [vmem:[%s1980_s6 + $0x34] sm:$0xf0] }
  0x64   : > { %v1413_v9 = vunpack.c.l.b16 %v1382_v0  ;;  %v1414_v0 = vunpack.c.l.b16 %v1386_v55  ;;  %v1255_v53 = vshll.u32 %v1814_v44, 16  ;;  %v1405_v11 = vrot.slane %v1816_v50, 5 }
  0x65   : > { %v1216_v40 = vsel %vm2016_vm3, %v1211_v23, %v1215_v46  ;;  %v1234_v58 = vrot.slane %v1232_v42, 4  ;;  %v1224_v61 = vor.u32 %v1223_v51, %v1220_v10  ;;  %v1735_v23 = vld [vmem:[%s1980_s6 + $0x38] sm:$0xe]  ;;  %v1736_v46 = vld [vmem:[%s1980_s6 + $0x40] sm:$0xe] }
  0x66   : > { %v1281_v52 = vunpack.c.l.b16 %v1216_v40  ;;  %v1743_v34 = vrot.slane %v1735_v23, 9  ;;  %v1394_v40 = vsel %vm2056_vm6, %v1845_v19, %v1393_v20 }
  0x67   : > { %v1225_v62 = vrot.slane %v1224_v61, 4  ;;  %v1416_v10 = vunpack.c.l.b16 %v1394_v40 }
  0x68   : > { %1696 = vmatmul.msk.bf16.gmra.mxu3 %vm363_vm2, %v1684_v17  ;;  %v1420_v17 = vpack.c.b16 %v1413_v9, %v1412_v56  ;;  %v1287_v13 = vpack.c.b16 %v1281_v52, %v1280_v29  ;;  %v982_v56 = vunpack.c.l.b16 %v963_v60  ;;  %v1783_v9 = vld [vmem:[%s1980_s6 + $0x30] sm:$0xf]  ;;  %v967_v27 = vsel %vm2056_vm6, %v1743_v34, %v966_v35 }
  0x69   : > { %v1230_v18 = vsel %vm2016_vm3, %v1225_v62, %v1229_v7  ;;  %v1784_v22 = vor.u32 %v1890_v2, %v1783_v9  ;;  %v1257_v60 = vrot.slane %v1255_v53, 5  ;;  %v1401_v7 = vrot.slane %v1814_v44, 5 }
  0x6a   : > { %v987_v16 = vpack.c.b16 %v982_v56, %v981_v6 }
  0x6c   : > { %1728 = vmatmul.msk.bf16.gmra.mxu0 %vm363_vm2, %v854_v25  ;;  %v986_v25 = vpack.c.b16 %v980_v15, %v979_v14  ;;  %v1243_v14 = vrot.slane %v1241_v5, 5  ;;  %v1813_v15 = vld [vmem:[%s1980_s6 + $0x40] sm:$0xf]  ;;  %v1840_v5 = vld [vmem:[%s1980_s6 + $0x48] sm:$0xe] }
  0x6d   : > { %v1848_v1 = vrot.slane %v1840_v5, 9 }
  0x6e   : > { %1757 = vmatmul.msk.bf16.vlgmr.msra.gmra.mxu1 %vm363_vm2, %v985_v36  ;;  %v1844_v36 = vrot.slane %v1836_v24, 9  ;;  %v1246_v24 = vshrl.u32 %v1813_v15, 16 }
  0x70   : > { %v1390_v57 = vsel %vm2056_vm6, %v1844_v36, %v1389_v41  ;;  %v1744_v36 = vrot.slane %v1736_v46, 9  ;;  %v1248_v41 = vrot.slane %v1246_v24, 4 }
  0x71   : > { %1797 = vmatmul.msk.bf16.vlgmr.msra.gmra.mxu2 %vm363_vm2, %v1776_v43  ;;  %v1235_v43 = vshll.u32 %v1811_v54, 16  ;;  %v1415_v3 = vunpack.c.l.b16 %v1390_v57  ;;  %v1269_v57 = vshll.u32 %v1816_v50, 16 }
  0x72   : > { %v971_v28 = vsel %vm2056_vm6, %v1744_v36, %v970_v38 }
  0x73   : > { %v1237_v59 = vrot.slane %v1235_v43, 5  ;;  %v1398_v43 = vsel %vm2056_vm6, %v1846_v21, %v1397_v30  ;;  %v1271_v63 = vrot.slane %v1269_v57, 5 }
  0x74   : > { %v1417_v29 = vunpack.c.l.b16 %v1398_v43 }
  0x75   : > { %v1238_v4 = vor.u32 %v1237_v59, %v1234_v58  ;;  %v983_v58 = vunpack.c.l.b16 %v967_v27  ;;  %v984_v59 = vunpack.c.l.b16 %v971_v28 }
  0x76   : > { %v1422_v45 = vpack.c.b16 %v1417_v29, %v1416_v10 }
  0x77   : > { %v1239_v12 = vrot.slane %v1238_v4, 4  ;;  %v1891_v4 = vld [vmem:[%s1980_s6 + $0x44] sm:$0xf0] }
  0x78   : > { %1829 = vmatmul.msk.bf16.vlgmr.msra.gmra.mxu3 %vm363_vm2, %v1286_v8  ;;  %v1421_v8 = vpack.c.b16 %v1415_v3, %v1414_v0  ;;  %v988_v0 = vpack.c.b16 %v984_v59, %v983_v58  ;;  %v1787_v3 = vld [vmem:[%s1980_s6 + $0x40] sm:$0xf] }
  0x79   : > { %v1244_v54 = vsel %vm2016_vm3, %v1239_v12, %v1243_v14 }
  0x7a   : > { %v1283_v39 = vunpack.c.l.b16 %v1244_v54 }
  0x7c   : > { %1861 = vmatmul.msk.bf16.vlgmr.msra.gmra.mxu0 %vm363_vm2, %v1420_v17  ;;  %v1815_v17 = vld [vmem:[%s1980_s6 + $0x48] sm:$0xf] }
  0x7d   : > { %v1260_v31 = vshrl.u32 %v1815_v17, 16  ;;  %v1263_v32 = vshll.u32 %v1815_v17, 16 }
  0x7e   : > { %1758 = vmatmul.msk.bf16.gmra.mxu1 %vm363_vm2, %v986_v25  ;;  %v1249_v25 = vshll.u32 %v1813_v15, 16  ;;  %v1406_v15 = vsel %vm2056_vm6, %v1848_v1, %v1405_v11 }
  0x7f   : > { %v1262_v48 = vrot.slane %v1260_v31, 4  ;;  %v1265_v49 = vrot.slane %v1263_v32, 5  ;;  %v1419_v37 = vunpack.c.l.b16 %v1406_v15 }
  0x80   : > { %v1251_v42 = vrot.slane %v1249_v25, 5 }
  0x81   : > { %1798 = vmatmul.msk.bf16.gmra.mxu2 %vm363_vm2, %v1780_v33  ;;  %v1282_v33 = vunpack.c.l.b16 %v1230_v18  ;;  %v1266_v55 = vor.u32 %v1265_v49, %v1262_v48 }
  0x82   : > { %v1252_v52 = vor.u32 %v1251_v42, %v1248_v41 }
  0x83   : > { %v1288_v51 = vpack.c.b16 %v1283_v39, %v1282_v33  ;;  %v1267_v61 = vrot.slane %v1266_v55, 4 }
  0x84   : > { %v1253_v26 = vrot.slane %v1252_v52, 4 }
  0x85   : > { %v1272_v9 = vsel %vm2016_vm3, %v1267_v61, %v1271_v63 }
  0x86   : > { %v1258_v56 = vsel %vm2016_vm3, %v1253_v26, %v1257_v60  ;;  %v1285_v12 = vunpack.c.l.b16 %v1272_v9 }
  0x87   : > { %v1284_v2 = vunpack.c.l.b16 %v1258_v56 }
  0x88   : > { %1830 = vmatmul.msk.bf16.gmra.mxu3 %vm363_vm2, %v1287_v13  ;;  %v1839_v13 = vld [vmem:[%s1980_s6 + $0x40] sm:$0xe] }
  0x89   : > { %v1847_v62 = vrot.slane %v1839_v13, 9  ;;  %v1289_v17 = vpack.c.b16 %v1285_v12, %v1284_v2 }
  0x8b   : > { %v1402_v14 = vsel %vm2056_vm6, %v1847_v62, %v1401_v7 }
  0x8c   : > { %1862 = vmatmul.msk.bf16.gmra.mxu0 %vm363_vm2, %v1421_v8  ;;  %v1788_v8 = vor.u32 %v1891_v4, %v1787_v3  ;;  %v1418_v18 = vunpack.c.l.b16 %v1402_v14  ;;  %v2364_v14 = vld [vmem:[%s2436_s2] ss:$0 sm:$0xff] }
  0x8e   : > { %1759 = vmatmul.msk.bf16.gmra.mxu1 %vm363_vm2, %v987_v16  ;;  %v1423_v20 = vpack.c.b16 %v1419_v37, %v1418_v18  ;;  %v2369_v37 = vld [vmem:[%s2437_s3] ss:$0 sm:$0xff] }
  0x91   : > { %1799 = vmatmul.msk.bf16.gmra.mxu2 %vm363_vm2, %v1784_v22 }
  0x98   : > { %1831 = vmatmul.msk.bf16.gmra.mxu3 %vm363_vm2, %v1288_v51 }
  0x9b   : > { %v2301_v6 = vpop.f32.mrf.mxu1 }
  0x9c   : > { %1863 = vmatmul.msk.bf16.gmra.mxu0 %vm363_vm2, %v1422_v45 }
  0x9e   : > { %1760 = vmatmul.msk.bf16.gmra.mxu1 %vm363_vm2, %v988_v0 }
  0xa1   : > { %1800 = vmatmul.msk.bf16.gmra.mxu2 %vm363_vm2, %v1788_v8 }
  0xa3   : > { %v2314_v16 = vpop.f32.mrf.mxu1 }
  0xa4   : > { %v2316_v19 = vpop.f32.mrf.mxu2 }
  0xa8   : > { %1832 = vmatmul.msk.bf16.gmra.mxu3 %vm363_vm2, %v1289_v17 }
  0xa9   : > { %v385_v21 = vpop.f32.mrf.mxu0 }
  0xab   : > { %v2319_v22 = vpop.f32.mrf.mxu3  ;;  %v458_v23 = vpop.f32.mrf.mxu1 }
  0xac   : > { %1864 = vmatmul.msk.bf16.gmra.mxu0 %vm363_vm2, %v1423_v20  ;;  %v2322_v46 = vpop.f32.mrf.mxu2  ;;  %v459_v57 = vadd.f32 %v458_v23, %v385_v21 }
  0xb1   : > { %v387_v47 = vpop.f32.mrf.mxu0 }
  0xb3   : > { %v2324_v24 = vpop.f32.mrf.mxu3  ;;  %v460_v25 = vpop.f32.mrf.mxu1 }
  0xb4   : > { %v587_v54 = vpop.f32.mrf.mxu2  ;;  %v461_v63 = vadd.f32 %v460_v25, %v387_v47 }
  0xb5   : > { %v607_v45 = vadd.f32 %v587_v54, %v459_v57 }
  0xb9   : > { %v888_v30 = vpop.f32.mrf.mxu0 }
  0xbb   : > { %v682_v31 = vpop.f32.mrf.mxu3  ;;  %v463_v32 = vpop.f32.mrf.mxu1 }
  0xbc   : > { %v589_v33 = vpop.f32.mrf.mxu2  ;;  %v702_v60 = vadd.f32 %v682_v31, %v607_v45  ;;  %v464_v9 = vadd.f32 %v463_v32, %v2301_v6 }
  0xbd   : > { %v608_v3 = vadd.f32 %v589_v33, %v461_v63 }
  0xbe   : > { %v908_v4 = vadd.f32 %v888_v30, %v702_v60 }
  0xc1   : > { %v890_v34 = vpop.f32.mrf.mxu0 }
  0xc3   : > { %v684_v35 = vpop.f32.mrf.mxu3  ;;  %v465_v36 = vpop.f32.mrf.mxu1 }
  0xc4   : > { %v592_v38 = vpop.f32.mrf.mxu2  ;;  %v703_v62 = vadd.f32 %v684_v35, %v608_v3  ;;  %v466_v25 = vadd.f32 %v465_v36, %v2314_v16 }
  0xc5   : > { %v609_v2 = vadd.f32 %v592_v38, %v464_v9 }
  0xc6   : > { %v909_v15 = vadd.f32 %v890_v34, %v703_v62 }
  0xc9   : > { %v893_v39 = vpop.f32.mrf.mxu0 }
  0xcb   : > { %v687_v40 = vpop.f32.mrf.mxu3  ;;  %v2326_v41 = vpop.f32.mrf.mxu1 }
  0xcc   : > { %v594_v42 = vpop.f32.mrf.mxu2  ;;  %v704_v21 = vadd.f32 %v687_v40, %v609_v2  ;;  %v469_v60 = vadd.f32 %v2326_v41, %v2316_v19 }
  0xcd   : > { %v610_v32 = vadd.f32 %v594_v42, %v466_v25 }
  0xce   : > { %v910_v35 = vadd.f32 %v893_v39, %v704_v21 }
  0xd1   : > { %v2328_v43 = vpop.f32.mrf.mxu0 }
  0xd3   : > { %v689_v44 = vpop.f32.mrf.mxu3  ;;  %v2330_v48 = vpop.f32.mrf.mxu1 }
  0xd4   : > { %v2332_v49 = vpop.f32.mrf.mxu2  ;;  %v705_v40 = vadd.f32 %v689_v44, %v610_v32 }
  0xd9   : > { %v2334_v50 = vpop.f32.mrf.mxu0 }
  0xdb   : > { %v2336_v10 = vpop.f32.mrf.mxu3  ;;  %v2338_v27 = vpop.f32.mrf.mxu1 }
  0xdc   : > { %v2340_v28 = vpop.f32.mrf.mxu2 }
  0xe1   : > { %v2342_v51 = vpop.f32.mrf.mxu0 }
  0xe3   : > { %v2344_v29 = vpop.f32.mrf.mxu3  ;;  %v2346_v52 = vpop.f32.mrf.mxu1 }
  0xe4   : > { %v2348_v53 = vpop.f32.mrf.mxu2 }
  0xe9   : > { %v2350_v55 = vpop.f32.mrf.mxu0 }
  0xeb   : > { %v2352_v58 = vpop.f32.mrf.mxu3  ;;  %v1022_v59 = vpop.f32.mrf.mxu1 }
  0xec   : > { %v2354_v26 = vpop.f32.mrf.mxu2  ;;  %v1042_v56 = vadd.f32 %v1022_v59, %v908_v4  ;;  %v911_v4 = vadd.f32 %v2328_v43, %v705_v40 }
  0xf1   : > { %v2356_v61 = vpop.f32.mrf.mxu0 }
  0xf3   : > { %v2358_v13 = vpop.f32.mrf.mxu3  ;;  %v1024_v0 = vpop.f32.mrf.mxu1 }
  0xf4   : > { %v1117_v5 = vpop.f32.mrf.mxu2  ;;  %v1043_v20 = vadd.f32 %v1024_v0, %v909_v15  ;;  %v611_v0 = vadd.f32 %v2332_v49, %v469_v60  ;;  %v471_v49 = vadd.f32 %v2330_v48, %v2322_v46 }
  0xf5   : > { %v1137_v7 = vadd.f32 %v1117_v5, %v1042_v56 }
  0xf6   : > { %v612_v43 = vadd.f32 %v2340_v28, %v471_v49  ;;  %v474_v28 = vadd.f32 %v2338_v27, %v2319_v22 }
  0xf9   : > { %v1457_v8 = vpop.f32.mrf.mxu0 }
  0xfb   : > { %v1323_v1 = vpop.f32.mrf.mxu3  ;;  %v1027_v11 = vpop.f32.mrf.mxu1 }
  0xfc   : > { %v1343_v12 = vadd.f32 %v1323_v1, %v1137_v7  ;;  %v1119_v17 = vpop.f32.mrf.mxu2  ;;  %v1044_v36 = vadd.f32 %v1027_v11, %v910_v35  ;;  %v706_v7 = vadd.f32 %v2336_v10, %v611_v0 }
  0xfd   : > { %v1138_v23 = vadd.f32 %v1119_v17, %v1043_v20  ;;  %v707_v20 = vadd.f32 %v2344_v29, %v612_v43 }
  0xfe   : > { %v1477_v18 = vadd.f32 %v1457_v8, %v1343_v12  ;;  %v912_v12 = vadd.f32 %v2334_v50, %v706_v7  ;;  %v613_v50 = vadd.f32 %v2348_v53, %v474_v28  ;;  %v476_v53 = vadd.f32 %v2346_v52, %v2324_v24 }
 0x100   : > { %v1489_v6 = vmul.f32 %v2364_v14, %v1477_v18  ;;  %v708_v32 = vadd.f32 %v2352_v58, %v613_v50 }
 0x101   : > { %v1459_v47 = vpop.f32.mrf.mxu0 }
 0x102   : > { %v1501_v54 = vadd.f32 %v2369_v37, %v1489_v6  ;;  %v914_v40 = vadd.f32 %v2350_v55, %v708_v32 }
 0x103   : > { %v1325_v30 = vpop.f32.mrf.mxu3  ;;  %v1029_v31 = vpop.f32.mrf.mxu1 }
 0x104   : > { %v1509_v33 = vpack.c.bf16 %v1501_v54, %v1501_v54  ;;  %v1344_v34 = vadd.f32 %v1325_v30, %v1138_v23  ;;  %v1122_v38 = vpop.f32.mrf.mxu2  ;;  %v1045_v62 = vadd.f32 %v1029_v31, %v911_v4  ;;  %v913_v54 = vadd.f32 %v2342_v51, %v707_v20 }
 0x105   : > { %v1139_v59 = vadd.f32 %v1122_v38, %v1044_v36  ;;  %v614_v51 = vadd.f32 %v2354_v26, %v476_v53 }
 0x106   : > { %1518 = vst.msk [vmem:[%s2378_s14] sm:$0xf] %vm1517_vm7, %v1509_v33  ;;  %v1478_v16 = vadd.f32 %v1459_v47, %v1344_v34 }
 0x108   : > { %v1490_v57 = vmul.f32 %v2364_v14, %v1478_v16 }
 0x109   : > { %v1462_v45 = vpop.f32.mrf.mxu0 }
 0x10a   : > { %v1502_v63 = vadd.f32 %v2369_v37, %v1490_v57 }
 0x10b   : > { %v1328_v42 = vpop.f32.mrf.mxu3  ;;  %v1032_v56 = vpop.f32.mrf.mxu1 }
 0x10c   : > { %v1510_v39 = vpack.c.bf16 %v1502_v63, %v1502_v63  ;;  %v1345_v3 = vadd.f32 %v1328_v42, %v1139_v59  ;;  %v1124_v5 = vpop.f32.mrf.mxu2  ;;  %v1046_v17 = vadd.f32 %v1032_v56, %v912_v12 }
 0x10d   : > { %v1140_v41 = vadd.f32 %v1124_v5, %v1045_v62 }
 0x10e   : > { %1519 = vst.msk [vmem:[%s2378_s14 + $0x4] sm:$0xf] %vm1517_vm7, %v1510_v39  ;;  %v1479_v44 = vadd.f32 %v1462_v45, %v1345_v3  ;;  %v709_v45 = vadd.f32 %v2358_v13, %v614_v51 }
 0x110   : > { %v1491_v19 = vmul.f32 %v2364_v14, %v1479_v44  ;;  %v915_v55 = vadd.f32 %v2356_v61, %v709_v45 }
 0x111   : > { %v1464_v8 = vpop.f32.mrf.mxu0 }
 0x112   : > { %v1503_v9 = vadd.f32 %v2369_v37, %v1491_v19 }
 0x113   : > { %v1330_v1 = vpop.f32.mrf.mxu3  ;;  %v1034_v18 = vpop.f32.mrf.mxu1 }
 0x114   : > { %v1511_v11 = vpack.c.bf16 %v1503_v9, %v1503_v9  ;;  %v1346_v2 = vadd.f32 %v1330_v1, %v1140_v41  ;;  %v1127_v15 = vpop.f32.mrf.mxu2  ;;  %v1047_v31 = vadd.f32 %v1034_v18, %v913_v54 }
 0x115   : > { %v1141_v48 = vadd.f32 %v1127_v15, %v1046_v17 }
 0x116   : > { %1520 = vst.msk [vmem:[%s2378_s14 + $0x8] sm:$0xf] %vm1517_vm7, %v1511_v11  ;;  %v1480_v10 = vadd.f32 %v1464_v8, %v1346_v2 }
 0x118   : > { %v1492_v46 = vmul.f32 %v2364_v14, %v1480_v10 }
 0x119   : > { %v1467_v21 = vpop.f32.mrf.mxu0 }
 0x11a   : > { %v1504_v6 = vadd.f32 %v2369_v37, %v1492_v46 }
 0x11b   : > { %v1333_v23 = vpop.f32.mrf.mxu3  ;;  %v1037_v27 = vpop.f32.mrf.mxu1 }
 0x11c   : > { %v1512_v47 = vpack.c.bf16 %v1504_v6, %v1504_v6  ;;  %v1347_v25 = vadd.f32 %v1333_v23, %v1141_v48  ;;  %v1129_v30 = vpop.f32.mrf.mxu2  ;;  %v1048_v59 = vadd.f32 %v1037_v27, %v914_v40 }
 0x11d   : > { %v1142_v22 = vadd.f32 %v1129_v30, %v1047_v31 }
 0x11e   : > { %1521 = vst.msk [vmem:[%s2378_s14 + $0xc] sm:$0xf] %vm1517_vm7, %v1512_v47  ;;  %v1481_v29 = vadd.f32 %v1467_v21, %v1347_v25 }
 0x120   : > { %v1493_v33 = vmul.f32 %v2364_v14, %v1481_v29 }
 0x121   : > { %v1469_v34 = vpop.f32.mrf.mxu0 }
 0x122   : > { %v1505_v35 = vadd.f32 %v2369_v37, %v1493_v33 }
 0x123   : > { %v1335_v38 = vpop.f32.mrf.mxu3  ;;  %v1039_v63 = vpop.f32.mrf.mxu1 }
 0x124   : > { %v1513_v16 = vpack.c.bf16 %v1505_v35, %v1505_v35  ;;  %v1348_v36 = vadd.f32 %v1335_v38, %v1142_v22  ;;  %v1132_v57 = vpop.f32.mrf.mxu2  ;;  %v1049_v5 = vadd.f32 %v1039_v63, %v915_v55 }
 0x125   : > { %v1143_v24 = vadd.f32 %v1132_v57, %v1048_v59 }
 0x126   : > { %1522 = vst.msk [vmem:[%s2378_s14 + $0x10] sm:$0xf] %vm1517_vm7, %v1513_v16  ;;  %v1482_v58 = vadd.f32 %v1469_v34, %v1348_v36 }
 0x128   : > { %v1494_v60 = vmul.f32 %v2364_v14, %v1482_v58 }
 0x129   : > { %v1472_v42 = vpop.f32.mrf.mxu0 }
 0x12a   : > { %v1506_v52 = vadd.f32 %v2369_v37, %v1494_v60 }
 0x12b   : > { %v1338_v26 = vpop.f32.mrf.mxu3 }
 0x12c   : > { %v1514_v0 = vpack.c.bf16 %v1506_v52, %v1506_v52  ;;  %v1349_v39 = vadd.f32 %v1338_v26, %v1143_v24  ;;  %v1134_v3 = vpop.f32.mrf.mxu2 }
 0x12d   : > { %v1144_v56 = vadd.f32 %v1134_v3, %v1049_v5 }
 0x12e   : > { %1523 = vst.msk [vmem:[%s2378_s14 + $0x14] sm:$0xf] %vm1517_vm7, %v1514_v0  ;;  %v1483_v4 = vadd.f32 %v1472_v42, %v1349_v39 }
 0x130   : > { %v1495_v13 = vmul.f32 %v2364_v14, %v1483_v4 }
 0x131   : > { %v1474_v41 = vpop.f32.mrf.mxu0 }
 0x132   : > { %v1507_v44 = vadd.f32 %v2369_v37, %v1495_v13 }
 0x133   : > { %v1340_v62 = vpop.f32.mrf.mxu3 }
 0x134   : > { %v1515_v7 = vpack.c.bf16 %v1507_v44, %v1507_v44  ;;  %v1350_v19 = vadd.f32 %v1340_v62, %v1144_v56 }
 0x136   : > { %1524 = vst.msk [vmem:[%s2378_s14 + $0x18] sm:$0xf] %vm1517_vm7, %v1515_v7  ;;  %v1484_v8 = vadd.f32 %v1474_v41, %v1350_v19 }
 0x138   : > { %v1496_v61 = vmul.f32 %v2364_v14, %v1484_v8 }
 0x13a   : > { %v1508_v49 = vadd.f32 %v2369_v37, %v1496_v61 }
 0x13c   : > { %v1516_v9 = vpack.c.bf16 %v1508_v49, %v1508_v49 }
 0x13e   : > { %1525 = vst.msk [vmem:[%s2378_s14 + $0x1c] sm:$0xf] %vm1517_vm7, %v1516_v9 }
 0x13f PF: > { %s14_s15 = sadd.s32 1, %s1921_s15  }
 0x140   : > { %p11_p4 = scmp.ge.s32.totalorder %s14_s15, 4  }
 0x142   :  { %13 = sbr.rel (!%p11_p4) target bundleno = 1 (0x1), region = 76 }

// kernel: scconv_forward.7
= control target key start
LH: loop header
LB: loop body
LE: loop exit
PB: predicated region body
PF: predicated region fallthrough
CT: control target
= control target key end

     0   :  { %s6213_s24 = smov 0   ;;  %s8046_s0 = inlined_call_operand.vmem [shape: bf16[2,18,18,32], index: 0, kind: input, shape index: {}]   ;;  %s8047_s1 = inlined_call_operand.vmem [shape: bf16[2,16,16,8], index: 1, kind: input, shape index: {}]   ;;  %s8048_s2 = inlined_call_operand.vmem [shape: bf16[2,16,16,32], index: 2, kind: input, shape index: {}]   ;;  %s8049_s3 = inlined_call_operand.vmem [shape: bf16[9,32,32], index: 3, kind: input, shape index: {}]   ;;  %s8050_s4 = inlined_call_operand.vmem [shape: bf16[8,32], index: 4, kind: input, shape index: {}]   ;;  %s8051_s5 = inlined_call_operand.vmem [shape: f32[1,32], index: 5, kind: input, shape index: {}]   ;;  %s8052_s6 = inlined_call_operand.vmem [shape: f32[1,32], index: 6, kind: input, shape index: {}]   ;;  %s8053_s7 = inlined_call_operand.vmem [shape: bf16[2,16,16,32], index: 7, kind: output, shape index: {}]  }
   0x1 LB: > { %s5065_s25 = sadd.s32 4294967295, %s6171_s24   ;;  %p5069_p0 = scmp.ge.s32.totalorder %s6171_s24, 1  ;;  %s6171_s24 = sphi %s6213_s24, %s17_s24  }
   0x2   : > { %p257_p1 = scmp.lt.s32.totalorder %s6171_s24, 3 }
   0x4   : > { %p258_p2 = pnand %p5069_p0, %p257_p1 }
   0x6   : > { %261 = sbr.rel (%p258_p2) target bundleno = 815 (0x32f), region = 48 }
   0xb   : > { %v5859_v0 = vld [vmem:[%s8049_s3 + $0x8] sm:$0xff]  ;;  %p299_p3 = scmp.lt.s32.totalorder %s5065_s25, 1  ;;  %v5861_v1 = vld [vmem:[%s8049_s3 + $0x18] sm:$0xff]  ;;  %v5858_v2 = vld [vmem:[%s8049_s3] sm:$0xff]  ;;  %vm824_vm0 = vcmask 261120   ;;  %vm4636_vm4 = vcmask 1043456  }
   0xc   : > { %1108 = vmatpush.bf16.msra.mxu1 %v5859_v0  ;;  %6005 = vmatpush.bf16.msra.mxu3 %v5859_v0  ;;  %v5885_v3 = vld [vmem:[%s8049_s3 + $0x58] sm:$0xff]  ;;  %v5860_v4 = vld [vmem:[%s8049_s3 + $0x10] sm:$0xff]  ;;  %vm372_vm1 = vsmask.f32 3328  ;;  %v5863_v6 = vld [vmem:[%s8049_s3 + $0x28] sm:$0xff]  ;;  %vm1239_vm5 = vcmask 1042432  }
   0xd   : > { %s8085_s25 = smov (!%p299_p3, %s5065_s25), 1  ;;  %879 = vmatpush.bf16.msra.mxu0 %v5861_v1  ;;  %6003 = vmatpush.bf16.msra.mxu2 %v5861_v1  ;;  %v5881_v5 = vld [vmem:[%s8049_s3 + $0x38] sm:$0xff]  ;;  %v5883_v7 = vld [vmem:[%s8049_s3 + $0x48] sm:$0xff]  ;;  %vm373_vm2 = vsmask.f32 7440  ;;  %vm1240_vm6 = vcmask 1046532  }
   0xe   : > { %s6007_s13 = smul.u32 216, %s8085_s25  ;;  %vm6273_vm3 = vmor %vm372_vm1, %vm373_vm2  ;;  %s7150_s27 = sshll.u32 %s8085_s25, 7  ;;  %vm4587_vm8 = vcmask 64512   ;;  %vm4953_vm9 = vcmask 257024  }
   0xf   : > { %vm6492_vm7 = vmor %vm1239_vm5, %vm1240_vm6  ;;  %s7164_s29 = scalar_lea.vmem %s8047_s1, %s7150_s27  ;;  %s7492_s9 = scalar_lea.vmem %s8048_s2, %s7150_s27 }
  0x10   : > { %1109 = vmatpush.bf16.msra.mxu1 %v5858_v2  ;;  %s6245_s18 = scalar_lea.vmem %s8046_s0, %s6007_s13  ;;  %6006 = vmatpush.bf16.msra.mxu3 %v5858_v2  ;;  %s7638_s16 = scalar_lea.vmem %s8053_s7, %s7150_s27 }
  0x11   : > { %v5842_v8 = vld [vmem:[%s6245_s18] sm:$0xff]  ;;  %880 = vmatpush.bf16.msra.mxu0 %v5860_v4  ;;  %6004 = vmatpush.bf16.msra.mxu2 %v5860_v4  ;;  %v6260_v12 = vld [vmem:[%s6245_s18 + $0x8] sm:$0x1]  ;;  %v322_v30 = vld [vmem:[%s6245_s18 + $0xc] sm:$0xf] }
  0x12   : > { %v5850_v9 = vld [vmem:[%s6245_s18 + $0x60] sm:$0xff]  ;;  %v395_v17 = vshll.u32 %v6260_v12, 16  ;;  %v364_v22 = vld [vmem:[%s6245_s18 + $0x68] sm:$0x1]  ;;  %v6278_v36 = vld [vmem:[%s6245_s18 + $0x10] sm:$0xf] }
  0x13   : > { %v320_v10 = vld [vmem:[%s6245_s18] sm:$0xf]  ;;  %v6257_v11 = vld [vmem:[%s6245_s18 + $0x4] sm:$0xf]  ;;  %5177 = vmatmul.msk.bf16.vlgmr.msra.gmra.mxu1 %vm824_vm0, %v5842_v8  ;;  %5185 = vmatmul.msk.bf16.vlgmr.msra.gmra.mxu3 %vm824_vm0, %v5850_v9  ;;  %v587_v35 = vshll.u32 %v364_v22, 16  ;;  %v400_v43 = vshrl.u32 %v322_v30, 16 }
  0x14   : > { %2848 = vmatpush.bf16.msrb.mxu1 %v5885_v3  ;;  %v376_v13 = vshrl.u32 %v320_v10, 16  ;;  %v379_v14 = vshll.u32 %v320_v10, 16  ;;  %1772 = vmatpush.bf16.msrb.mxu3 %v5881_v5  ;;  %v385_v15 = vshll.u32 %v6257_v11, 16  ;;  %v389_v16 = vshrl.u32 %v6257_v11, 16  ;;  %v336_v18 = vld [vmem:[%s6245_s18 + $0x60] sm:$0xf] }
  0x15   : > { %v337_v21 = vld [vmem:[%s6245_s18 + $0x64] sm:$0xf]  ;;  %1473 = vmatpush.bf16.msrb.mxu2 %v5863_v6  ;;  %2438 = vmatpush.bf16.msrb.mxu0 %v5883_v7  ;;  %v568_v25 = vshrl.u32 %v336_v18, 16  ;;  %v571_v27 = vshll.u32 %v336_v18, 16  ;;  %v397_v33 = vrot.slane %v395_v17, 5  ;;  %v589_v42 = vrot.slane %v587_v35, 5 }
  0x16   : > { %v378_v19 = vrot.slane %v376_v13, 4  ;;  %v381_v20 = vrot.slane %v379_v14, 5  ;;  %v387_v23 = vrot.slane %v385_v15, 5  ;;  %v391_v24 = vrot.slane %v389_v16, 4  ;;  %v6283_v48 = vld [vmem:[%s6245_s18 + $0x14] sm:$0x1] }
  0x17   : > { %v577_v28 = vshll.u32 %v337_v21, 16  ;;  %v581_v29 = vshrl.u32 %v337_v21, 16  ;;  %v570_v34 = vrot.slane %v568_v25, 4  ;;  %v573_v38 = vrot.slane %v571_v27, 5  ;;  %v338_v50 = vld [vmem:[%s6245_s18 + $0x6c] sm:$0xf] }
  0x18   : > { %v382_v26 = vor.u32 %v381_v20, %v378_v19  ;;  %v392_v32 = vor.u32 %v391_v24, %v387_v23  ;;  %v403_v44 = vshll.u32 %v322_v30, 16  ;;  %v409_v49 = vshll.u32 %v6278_v36, 16  ;;  %v339_v62 = vld [vmem:[%s6245_s18 + $0x70] sm:$0xf]  ;;  %v365_v9 = vld [vmem:[%s6245_s18 + $0x74] sm:$0x1] }
  0x19   : > { %v579_v39 = vrot.slane %v577_v28, 5  ;;  %v583_v40 = vrot.slane %v581_v29, 4  ;;  %v574_v46 = vor.u32 %v573_v38, %v570_v34  ;;  %v402_v53 = vrot.slane %v400_v43, 4  ;;  %v5843_v6 = vld [vmem:[%s6245_s18 + $0xc] sm:$0xff]  ;;  %v324_v16 = vld [vmem:[%s6245_s18 + $0x18] sm:$0xf] }
  0x1a   : > { %v383_v37 = vrot.slane %v382_v26, 4  ;;  %v393_v41 = vrot.slane %v392_v32, 4  ;;  %v405_v54 = vrot.slane %v403_v44, 5  ;;  %v411_v58 = vrot.slane %v409_v49, 5  ;;  %v5851_v7 = vld [vmem:[%s6245_s18 + $0x6c] sm:$0xff] }
  0x1b   : > { %v584_v47 = vor.u32 %v583_v40, %v579_v39  ;;  %v575_v56 = vrot.slane %v574_v46, 4  ;;  %v413_v60 = vshrl.u32 %v6278_v36, 16  ;;  %v419_v61 = vshll.u32 %v6283_v48, 16  ;;  %v6302_v21 = vld [vmem:[%s6245_s18 + $0x1c] sm:$0xf] }
  0x1c   : > { %v388_v45 = vsel %vm6273_vm3, %v383_v37, %v387_v23  ;;  %v398_v51 = vsel %vm6273_vm3, %v393_v41, %v397_v33  ;;  %v406_v59 = vor.u32 %v405_v54, %v402_v53  ;;  %v592_v63 = vshrl.u32 %v338_v50, 16  ;;  %v340_v38 = vld [vmem:[%s6245_s18 + $0x78] sm:$0xf]  ;;  %v341_v41 = vld [vmem:[%s6245_s18 + $0x7c] sm:$0xf] }
  0x1d   : > { %v764_v52 = vunpack.c.l.b16 %v388_v45  ;;  %v765_v55 = vunpack.c.l.b16 %v398_v51  ;;  %v585_v57 = vrot.slane %v584_v47, 4  ;;  %v580_v1 = vsel %vm6273_vm3, %v575_v56, %v579_v39  ;;  %v6318_v49 = vld [vmem:[%s6245_s18 + $0x20] sm:$0x1] }
  0x1e   : > { %v595_v3 = vshll.u32 %v338_v50, 16  ;;  %v780_v4 = vunpack.c.l.b16 %v580_v1  ;;  %v415_v8 = vrot.slane %v413_v60, 4  ;;  %v407_v10 = vrot.slane %v406_v59, 4 }
  0x1f   : > { %v796_v0 = vpack.c.b16 %v765_v55, %v764_v52  ;;  %v590_v2 = vsel %vm6273_vm3, %v585_v57, %v589_v42  ;;  %v594_v13 = vrot.slane %v592_v63, 4  ;;  %v601_v15 = vshll.u32 %v339_v62, 16 }
  0x20   : > { %v781_v5 = vunpack.c.l.b16 %v590_v2  ;;  %v597_v14 = vrot.slane %v595_v3, 5  ;;  %v416_v18 = vor.u32 %v415_v8, %v411_v58  ;;  %v421_v19 = vrot.slane %v419_v61, 5  ;;  %v326_v8 = vld [vmem:[%s6245_s18 + $0x24] sm:$0xf] }
  0x21   : > { %5089 = vmatmul.msk.bf16.vlgmr.msra.gmra.mxu0 %vm824_vm0, %v796_v0  ;;  %v605_v20 = vshrl.u32 %v339_v62, 16  ;;  %v603_v23 = vrot.slane %v601_v15, 5  ;;  %v611_v24 = vshll.u32 %v365_v9, 16  ;;  %v424_v27 = vshrl.u32 %v324_v16, 16  ;;  %v366_v0 = vld [vmem:[%s6245_s18 + $0x80] sm:$0x1] }
  0x22   : > { %v804_v17 = vpack.c.b16 %v781_v5, %v780_v4  ;;  %v598_v22 = vor.u32 %v597_v14, %v594_v13  ;;  %v417_v25 = vrot.slane %v416_v18, 4  ;;  %v412_v28 = vsel %vm6273_vm3, %v407_v10, %v411_v58  ;;  %v5844_v5 = vld [vmem:[%s6245_s18 + $0x18] sm:$0xff]  ;;  %v6329_v14 = vld [vmem:[%s6245_s18 + $0x28] sm:$0xf] }
  0x23   : > { %5178 = vmatmul.msk.bf16.gmra.mxu1 %vm824_vm0, %v5843_v6  ;;  %v607_v26 = vrot.slane %v605_v20, 4  ;;  %5186 = vmatmul.msk.bf16.gmra.mxu3 %vm824_vm0, %v5851_v7  ;;  %v427_v30 = vshll.u32 %v324_v16, 16  ;;  %v433_v32 = vshll.u32 %v6302_v21, 16  ;;  %v613_v35 = vrot.slane %v611_v24, 5  ;;  %v5852_v9 = vld [vmem:[%s6245_s18 + $0x78] sm:$0xff] }
  0x24   : > { %5097 = vmatmul.msk.bf16.vlgmr.msra.gmra.mxu2 %vm824_vm0, %v804_v17  ;;  %v599_v29 = vrot.slane %v598_v22, 4  ;;  %v422_v33 = vsel %vm6273_vm3, %v417_v25, %v421_v19  ;;  %v437_v37 = vshrl.u32 %v6302_v21, 16  ;;  %v426_v39 = vrot.slane %v424_v27, 4  ;;  %v342_v25 = vld [vmem:[%s6245_s18 + $0x84] sm:$0xf] }
  0x25   : > { %v608_v34 = vor.u32 %v607_v26, %v603_v23  ;;  %v429_v40 = vrot.slane %v427_v30, 5  ;;  %v435_v44 = vrot.slane %v433_v32, 5  ;;  %v766_v46 = vunpack.c.l.b16 %v412_v28  ;;  %v5884_v26 = vld [vmem:[%s8049_s3 + $0x50] sm:$0xff]  ;;  %v343_v27 = vld [vmem:[%s6245_s18 + $0x88] sm:$0xf] }
  0x26   : > { %v604_v42 = vsel %vm6273_vm3, %v599_v29, %v603_v23  ;;  %v439_v45 = vrot.slane %v437_v37, 4  ;;  %v767_v47 = vunpack.c.l.b16 %v422_v33  ;;  %v616_v50 = vshrl.u32 %v340_v38, 16  ;;  %2849 = vmatpush.bf16.msrb.mxu1 %v5884_v26  ;;  %v6348_v33 = vld [vmem:[%s6245_s18 + $0x2c] sm:$0x1] }
  0x27   : > { %v609_v43 = vrot.slane %v608_v34, 4  ;;  %v619_v51 = vshll.u32 %v340_v38, 16  ;;  %v625_v53 = vshll.u32 %v341_v41, 16  ;;  %v782_v54 = vunpack.c.l.b16 %v604_v42 }
  0x28   : > { %v430_v55 = vor.u32 %v429_v40, %v426_v39  ;;  %v618_v56 = vrot.slane %v616_v50, 4  ;;  %v440_v59 = vor.u32 %v439_v45, %v435_v44  ;;  %v443_v60 = vshll.u32 %v6318_v49, 16 }
  0x29   : > { %v614_v52 = vsel %vm6273_vm3, %v609_v43, %v613_v35  ;;  %v621_v57 = vrot.slane %v619_v51, 5  ;;  %v629_v61 = vshrl.u32 %v341_v41, 16  ;;  %v797_v62 = vpack.c.b16 %v767_v47, %v766_v46 }
  0x2a   : > { %v783_v58 = vunpack.c.l.b16 %v614_v52  ;;  %v627_v63 = vrot.slane %v625_v53, 5  ;;  %v431_v2 = vrot.slane %v430_v55, 4  ;;  %v441_v6 = vrot.slane %v440_v59, 4  ;;  %v367_v55 = vld [vmem:[%s6245_s18 + $0x8c] sm:$0x1]  ;;  %v5845_v59 = vld [vmem:[%s6245_s18 + $0x24] sm:$0xff] }
  0x2b   : > { %v631_v1 = vrot.slane %v629_v61, 4  ;;  %v622_v3 = vor.u32 %v621_v57, %v618_v56  ;;  %v445_v7 = vrot.slane %v443_v60, 5  ;;  %v635_v13 = vshll.u32 %v366_v0, 16  ;;  %v328_v56 = vld [vmem:[%s6245_s18 + $0x30] sm:$0xf] }
  0x2c   : > { %v805_v4 = vpack.c.b16 %v783_v58, %v782_v54  ;;  %v436_v15 = vsel %vm6273_vm3, %v431_v2, %v435_v44  ;;  %v448_v17 = vshrl.u32 %v326_v8, 16  ;;  %v451_v19 = vshll.u32 %v326_v8, 16  ;;  %v6356_v57 = vld [vmem:[%s6245_s18 + $0x34] sm:$0xf] }
  0x2d   : > { %v632_v10 = vor.u32 %v631_v1, %v627_v63  ;;  %v623_v16 = vrot.slane %v622_v3, 4  ;;  %v446_v18 = vsel %vm6273_vm3, %v441_v6, %v445_v7  ;;  %v457_v20 = vshll.u32 %v6329_v14, 16  ;;  %v344_v7 = vld [vmem:[%s6245_s18 + $0x90] sm:$0xf] }
  0x2e   : > { %v461_v22 = vshrl.u32 %v6329_v14, 16  ;;  %v637_v24 = vrot.slane %v635_v13, 5  ;;  %v768_v28 = vunpack.c.l.b16 %v436_v15  ;;  %v769_v29 = vunpack.c.l.b16 %v446_v18  ;;  %v5880_v13 = vld [vmem:[%s8049_s3 + $0x30] sm:$0xff] }
  0x2f   : > { %v633_v23 = vrot.slane %v632_v10, 4  ;;  %v628_v30 = vsel %vm6273_vm3, %v623_v16, %v627_v63  ;;  %v450_v32 = vrot.slane %v448_v17, 4  ;;  %v453_v34 = vrot.slane %v451_v19, 5  ;;  %v5862_v10 = vld [vmem:[%s8049_s3 + $0x20] sm:$0xff]  ;;  %1773 = vmatpush.bf16.msrb.mxu3 %v5880_v13 }
  0x30   : > { %v459_v35 = vrot.slane %v457_v20, 5  ;;  %v463_v37 = vrot.slane %v461_v22, 4  ;;  %v640_v38 = vshrl.u32 %v342_v25, 16  ;;  %v643_v40 = vshll.u32 %v342_v25, 16  ;;  %v5882_v19 = vld [vmem:[%s8049_s3 + $0x40] sm:$0xff]  ;;  %1474 = vmatpush.bf16.msrb.mxu2 %v5862_v10 }
  0x31   : > { %5090 = vmatmul.msk.bf16.gmra.mxu0 %vm824_vm0, %v797_v62  ;;  %v638_v39 = vsel %vm6273_vm3, %v633_v23, %v637_v24  ;;  %v649_v41 = vshll.u32 %v343_v27, 16  ;;  %v653_v42 = vshrl.u32 %v343_v27, 16  ;;  %v798_v43 = vpack.c.b16 %v769_v29, %v768_v28  ;;  %v5853_v62 = vld [vmem:[%s6245_s18 + $0x84] sm:$0xff]  ;;  %v6382_v25 = vld [vmem:[%s6245_s18 + $0x38] sm:$0x1] }
  0x32   : > { %v467_v44 = vshll.u32 %v6348_v33, 16  ;;  %v784_v45 = vunpack.c.l.b16 %v628_v30  ;;  %v785_v46 = vunpack.c.l.b16 %v638_v39  ;;  %v454_v47 = vor.u32 %v453_v34, %v450_v32  ;;  %2439 = vmatpush.bf16.msrb.mxu0 %v5882_v19 }
  0x33   : > { %5179 = vmatmul.msk.bf16.gmra.mxu1 %vm824_vm0, %v5844_v5  ;;  %5187 = vmatmul.msk.bf16.gmra.mxu3 %vm824_vm0, %v5852_v9  ;;  %v464_v50 = vor.u32 %v463_v37, %v459_v35  ;;  %v642_v51 = vrot.slane %v640_v38, 4  ;;  %v645_v52 = vrot.slane %v643_v40, 5  ;;  %v651_v53 = vrot.slane %v649_v41, 5  ;;  %v345_v9 = vld [vmem:[%s6245_s18 + $0x94] sm:$0xf] }
  0x34   : > { %5098 = vmatmul.msk.bf16.gmra.mxu2 %vm824_vm0, %v805_v4  ;;  %v655_v54 = vrot.slane %v653_v42, 4  ;;  %v806_v58 = vpack.c.b16 %v785_v46, %v784_v45  ;;  %v455_v60 = vrot.slane %v454_v47, 4  ;;  %v469_v61 = vrot.slane %v467_v44, 5  ;;  %v368_v46 = vld [vmem:[%s6245_s18 + $0x98] sm:$0x1] }
  0x35   : > { %v465_v63 = vrot.slane %v464_v50, 4  ;;  %v646_v0 = vor.u32 %v645_v52, %v642_v51  ;;  %v659_v2 = vshll.u32 %v367_v55, 16  ;;  %v472_v3 = vshrl.u32 %v328_v56, 16 }
  0x36   : > { %v656_v1 = vor.u32 %v655_v54, %v651_v53  ;;  %v475_v4 = vshll.u32 %v328_v56, 16  ;;  %v481_v5 = vshll.u32 %v6356_v57, 16  ;;  %v485_v6 = vshrl.u32 %v6356_v57, 16 }
  0x37   : > { %v460_v8 = vsel %vm6273_vm3, %v455_v60, %v459_v35  ;;  %v470_v15 = vsel %vm6273_vm3, %v465_v63, %v469_v61  ;;  %v647_v16 = vrot.slane %v646_v0, 4  ;;  %v661_v18 = vrot.slane %v659_v2, 5  ;;  %v330_v60 = vld [vmem:[%s6245_s18 + $0x3c] sm:$0xf]  ;;  %v6395_v61 = vld [vmem:[%s6245_s18 + $0x40] sm:$0xf] }
  0x38   : > { %v657_v17 = vrot.slane %v656_v1, 4  ;;  %v474_v20 = vrot.slane %v472_v3, 4  ;;  %v477_v22 = vrot.slane %v475_v4, 5  ;;  %v483_v23 = vrot.slane %v481_v5, 5 }
  0x39   : > { %v487_v24 = vrot.slane %v485_v6, 4  ;;  %v664_v26 = vshrl.u32 %v344_v7, 16  ;;  %v667_v27 = vshll.u32 %v344_v7, 16  ;;  %v673_v28 = vshll.u32 %v345_v9, 16  ;;  %v346_v7 = vld [vmem:[%s6245_s18 + $0x9c] sm:$0xf] }
  0x3a   : > { %v677_v29 = vshrl.u32 %v345_v9, 16  ;;  %v770_v30 = vunpack.c.l.b16 %v460_v8  ;;  %v771_v32 = vunpack.c.l.b16 %v470_v15  ;;  %v652_v34 = vsel %vm6273_vm3, %v647_v16, %v651_v53  ;;  %v347_v8 = vld [vmem:[%s6245_s18 + $0xa0] sm:$0xf] }
  0x3b   : > { %v662_v35 = vsel %vm6273_vm3, %v657_v17, %v661_v18  ;;  %v478_v37 = vor.u32 %v477_v22, %v474_v20  ;;  %v488_v38 = vor.u32 %v487_v24, %v483_v23  ;;  %v491_v39 = vshll.u32 %v6382_v25, 16  ;;  %v6413_v20 = vld [vmem:[%s6245_s18 + $0x44] sm:$0x1] }
  0x3c   : > { %v666_v40 = vrot.slane %v664_v26, 4  ;;  %v669_v41 = vrot.slane %v667_v27, 5  ;;  %v675_v42 = vrot.slane %v673_v28, 5  ;;  %v786_v44 = vunpack.c.l.b16 %v652_v34 }
  0x3d   : > { %v787_v45 = vunpack.c.l.b16 %v662_v35  ;;  %v799_v47 = vpack.c.b16 %v771_v32, %v770_v30  ;;  %v479_v50 = vrot.slane %v478_v37, 4  ;;  %v493_v51 = vrot.slane %v491_v39, 5  ;;  %v369_v35 = vld [vmem:[%s6245_s18 + $0xa4] sm:$0x1] }
  0x3e   : > { %v489_v52 = vrot.slane %v488_v38, 4  ;;  %v670_v53 = vor.u32 %v669_v41, %v666_v40  ;;  %v683_v55 = vshll.u32 %v368_v46, 16  ;;  %v496_v3 = vshrl.u32 %v330_v60, 16 }
  0x3f   : > { %v807_v56 = vpack.c.b16 %v787_v45, %v786_v44  ;;  %v499_v4 = vshll.u32 %v330_v60, 16  ;;  %v505_v5 = vshll.u32 %v6395_v61, 16  ;;  %v509_v6 = vshrl.u32 %v6395_v61, 16 }
  0x40   : > { %v494_v63 = vsel %vm6273_vm3, %v489_v52, %v493_v51  ;;  %v671_v0 = vrot.slane %v670_v53, 4  ;;  %v685_v2 = vrot.slane %v683_v55, 5  ;;  %v498_v16 = vrot.slane %v496_v3, 4  ;;  %v332_v52 = vld [vmem:[%s6245_s18 + $0x48] sm:$0xf] }
  0x41   : > { %5091 = vmatmul.msk.bf16.gmra.mxu0 %vm824_vm0, %v798_v43  ;;  %v679_v43 = vrot.slane %v677_v29, 4  ;;  %v773_v10 = vunpack.c.l.b16 %v494_v63  ;;  %v501_v17 = vrot.slane %v499_v4, 5  ;;  %v507_v18 = vrot.slane %v505_v5, 5  ;;  %v6422_v53 = vld [vmem:[%s6245_s18 + $0x4c] sm:$0xf] }
  0x42   : > { %v676_v13 = vsel %vm6273_vm3, %v671_v0, %v675_v42  ;;  %v511_v19 = vrot.slane %v509_v6, 4  ;;  %v688_v22 = vshrl.u32 %v346_v7, 16  ;;  %v697_v24 = vshll.u32 %v347_v8, 16 }
  0x43   : > { %5180 = vmatmul.msk.bf16.gmra.mxu1 %vm824_vm0, %v5845_v59  ;;  %5188 = vmatmul.msk.bf16.gmra.mxu3 %vm824_vm0, %v5853_v62  ;;  %v680_v54 = vor.u32 %v679_v43, %v675_v42  ;;  %v5854_v59 = vld [vmem:[%s6245_s18 + $0x90] sm:$0xff]  ;;  %v484_v62 = vsel %vm6273_vm3, %v479_v50, %v483_v23  ;;  %v691_v23 = vshll.u32 %v346_v7, 16  ;;  %v701_v26 = vshrl.u32 %v347_v8, 16  ;;  %v5847_v42 = vld [vmem:[%s6245_s18 + $0x3c] sm:$0xff] }
  0x44   : > { %5099 = vmatmul.msk.bf16.gmra.mxu2 %vm824_vm0, %v806_v58  ;;  %v5846_v58 = vld [vmem:[%s6245_s18 + $0x30] sm:$0xff]  ;;  %v772_v9 = vunpack.c.l.b16 %v484_v62  ;;  %v788_v27 = vunpack.c.l.b16 %v676_v13  ;;  %v502_v30 = vor.u32 %v501_v17, %v498_v16  ;;  %v512_v32 = vor.u32 %v511_v19, %v507_v18 }
  0x45   : > { %v681_v1 = vrot.slane %v680_v54, 4  ;;  %v515_v34 = vshll.u32 %v6413_v20, 16  ;;  %v690_v37 = vrot.slane %v688_v22, 4  ;;  %v693_v38 = vrot.slane %v691_v23, 5  ;;  %v348_v54 = vld [vmem:[%s6245_s18 + $0xa8] sm:$0xf] }
  0x46   : > { %v800_v29 = vpack.c.b16 %v773_v10, %v772_v9  ;;  %v699_v39 = vrot.slane %v697_v24, 5  ;;  %v703_v40 = vrot.slane %v701_v26, 4  ;;  %v503_v43 = vrot.slane %v502_v30, 4  ;;  %v6440_v22 = vld [vmem:[%s6245_s18 + $0x50] sm:$0x1] }
  0x47   : > { %v686_v15 = vsel %vm6273_vm3, %v681_v1, %v685_v2  ;;  %v513_v44 = vrot.slane %v512_v32, 4  ;;  %v517_v45 = vrot.slane %v515_v34, 5  ;;  %v707_v46 = vshll.u32 %v369_v35, 16 }
  0x48   : > { %v789_v28 = vunpack.c.l.b16 %v686_v15  ;;  %v694_v50 = vor.u32 %v693_v38, %v690_v37  ;;  %v704_v51 = vor.u32 %v703_v40, %v699_v39  ;;  %v508_v55 = vsel %vm6273_vm3, %v503_v43, %v507_v18  ;;  %v5848_v40 = vld [vmem:[%s6245_s18 + $0x48] sm:$0xff]  ;;  %v335_v43 = vld [vmem:[%s6245_s18 + $0x58] sm:$0xf] }
  0x49   : > { %v520_v63 = vshrl.u32 %v332_v52, 16  ;;  %v523_v0 = vshll.u32 %v332_v52, 16  ;;  %v529_v1 = vshll.u32 %v6422_v53, 16  ;;  %v533_v2 = vshrl.u32 %v6422_v53, 16 }
  0x4a   : > { %v808_v41 = vpack.c.b16 %v789_v28, %v788_v27  ;;  %v695_v60 = vrot.slane %v694_v50, 4  ;;  %v705_v62 = vrot.slane %v704_v51, 4  ;;  %v712_v3 = vshrl.u32 %v348_v54, 16  ;;  %v370_v28 = vld [vmem:[%s6245_s18 + $0xb0] sm:$0x1] }
  0x4b   : > { %v715_v4 = vshll.u32 %v348_v54, 16  ;;  %v774_v7 = vunpack.c.l.b16 %v508_v55  ;;  %v522_v13 = vrot.slane %v520_v63, 4  ;;  %v525_v15 = vrot.slane %v523_v0, 5  ;;  %v350_v55 = vld [vmem:[%s6245_s18 + $0xb4] sm:$0xf] }
  0x4c   : > { %v700_v9 = vsel %vm6273_vm3, %v695_v60, %v699_v39  ;;  %v531_v16 = vrot.slane %v529_v1, 5  ;;  %v535_v17 = vrot.slane %v533_v2, 4  ;;  %v714_v18 = vrot.slane %v712_v3, 4 }
  0x4d   : > { %v717_v19 = vrot.slane %v715_v4, 5  ;;  %v790_v26 = vunpack.c.l.b16 %v700_v9  ;;  %v526_v30 = vor.u32 %v525_v15, %v522_v13  ;;  %v539_v34 = vshll.u32 %v6440_v22, 16  ;;  %v4442_v15 = vld [vmem:[%s8050_s4] sm:$0xf] }
  0x4e   : > { %v536_v32 = vor.u32 %v535_v17, %v531_v16  ;;  %v731_v38 = vshll.u32 %v370_v28, 16  ;;  %v736_v63 = vshrl.u32 %v350_v55, 16  ;;  %v739_v0 = vshll.u32 %v350_v55, 16 }
  0x4f   : > { %v718_v35 = vor.u32 %v717_v19, %v714_v18  ;;  %v4638_v18 = vsel %vm4636_vm4, %v4442_v15, 0 }
  0x50   : > { %v733_v51 = vrot.slane %v731_v38, 5  ;;  %v741_v17 = vrot.slane %v739_v0, 5  ;;  %4647 = vmatpush.bf16.msra.mxu1 %v4638_v18 }
  0x51   : > { %5092 = vmatmul.msk.bf16.gmra.mxu0 %vm824_vm0, %v799_v47  ;;  %v5855_v47 = vld [vmem:[%s6245_s18 + $0x9c] sm:$0xff] }
  0x53   : > { %5181 = vmatmul.msk.bf16.gmra.mxu1 %vm824_vm0, %v5846_v58  ;;  %5189 = vmatmul.msk.bf16.gmra.mxu3 %vm824_vm0, %v5854_v59  ;;  %v709_v58 = vrot.slane %v707_v46, 5  ;;  %v349_v59 = vld [vmem:[%s6245_s18 + $0xac] sm:$0xf]  ;;  %v541_v46 = vrot.slane %v539_v34, 5 }
  0x54   : > { %5100 = vmatmul.msk.bf16.gmra.mxu2 %vm824_vm0, %v807_v56  ;;  %v518_v56 = vsel %vm6273_vm3, %v513_v44, %v517_v45  ;;  %v721_v5 = vshll.u32 %v349_v59, 16  ;;  %v725_v6 = vshrl.u32 %v349_v59, 16  ;;  %v527_v44 = vrot.slane %v526_v30, 4  ;;  %v351_v59 = vld [vmem:[%s6245_s18 + $0xb8] sm:$0xf] }
  0x55   : > { %v775_v8 = vunpack.c.l.b16 %v518_v56  ;;  %v710_v10 = vsel %vm6273_vm3, %v705_v62, %v709_v58  ;;  %v537_v45 = vrot.slane %v536_v32, 4  ;;  %v553_v56 = vshll.u32 %v335_v43, 16 }
  0x56   : > { %v723_v23 = vrot.slane %v721_v5, 5  ;;  %v727_v24 = vrot.slane %v725_v6, 4  ;;  %v791_v27 = vunpack.c.l.b16 %v710_v10  ;;  %v557_v58 = vshrl.u32 %v335_v43, 16  ;;  %v6463_v5 = vld [vmem:[%s6245_s18 + $0x5c] sm:$0x1] }
  0x57   : > { %v532_v60 = vsel %vm6273_vm3, %v527_v44, %v531_v16  ;;  %v542_v62 = vsel %vm6273_vm3, %v537_v45, %v541_v46  ;;  %v555_v6 = vrot.slane %v553_v56, 5  ;;  %v749_v9 = vshrl.u32 %v351_v59, 16  ;;  %v5361_v44 = vld [vmem:[%s6245_s18 + $0xc] sm:$0xf]  ;;  %v5857_v45 = vld [vmem:[%s6245_s18 + $0xb4] sm:$0xff] }
  0x58   : > { %v728_v37 = vor.u32 %v727_v24, %v723_v23  ;;  %v809_v39 = vpack.c.b16 %v791_v27, %v790_v26  ;;  %v776_v10 = vunpack.c.l.b16 %v532_v60  ;;  %v777_v13 = vunpack.c.l.b16 %v542_v62  ;;  %v371_v26 = vld [vmem:[%s6245_s18 + $0xbc] sm:$0x1]  ;;  %v5437_v46 = vld [vmem:[%s6245_s18 + $0xc] sm:$0xe] }
  0x59   : > { %v738_v16 = vrot.slane %v736_v63, 4  ;;  %v563_v24 = vshll.u32 %v6463_v5, 16  ;;  %v751_v30 = vrot.slane %v749_v9, 4  ;;  %v1939_v55 = vshll.u32 %v5361_v44, 16  ;;  %v5903_v62 = vld [vmem:[%s8049_s3 + $0x68] sm:$0xff]  ;;  %v5905_v63 = vld [vmem:[%s8049_s3 + $0x78] sm:$0xff] }
  0x5a   : > { %v729_v50 = vrot.slane %v728_v37, 4  ;;  %v802_v32 = vpack.c.b16 %v777_v13, %v776_v10  ;;  %v5362_v37 = vld [vmem:[%s6245_s18 + $0x10] sm:$0xf]  ;;  %v5453_v60 = vrot.slane %v5437_v46, 9  ;;  %3147 = vmatpush.bf16.msra.mxu2 %v5903_v62  ;;  %3813 = vmatpush.bf16.msra.mxu3 %v5905_v63  ;;  %v5438_v46 = vld [vmem:[%s6245_s18 + $0x18] sm:$0xe] }
  0x5b   : > { %v742_v34 = vor.u32 %v741_v17, %v738_v16 }
  0x5c   : > { %v734_v2 = vsel %vm6273_vm3, %v729_v50, %v733_v51 }
  0x5d   : > { %v743_v50 = vrot.slane %v742_v34, 4  ;;  %v5365_v34 = vld [vmem:[%s6245_s18 + $0x1c] sm:$0xf] }
  0x5e   : > { %v1973_v63 = vshrl.u32 %v5365_v34, 16 }
  0x61   : > { %5093 = vmatmul.msk.bf16.gmra.mxu0 %vm824_vm0, %v800_v29  ;;  %v801_v29 = vpack.c.b16 %v775_v8, %v774_v7  ;;  %v559_v7 = vrot.slane %v557_v58, 4  ;;  %v745_v8 = vshll.u32 %v351_v59, 16 }
  0x63   : > { %5182 = vmatmul.msk.bf16.gmra.mxu1 %vm824_vm0, %v5847_v42  ;;  %5190 = vmatmul.msk.bf16.gmra.mxu3 %vm824_vm0, %v5855_v47  ;;  %v5856_v42 = vld [vmem:[%s6245_s18 + $0xa8] sm:$0xff]  ;;  %v719_v47 = vrot.slane %v718_v35, 4  ;;  %v560_v28 = vor.u32 %v559_v7, %v555_v6  ;;  %v755_v35 = vshll.u32 %v371_v26, 16  ;;  %v1941_v7 = vrot.slane %v1939_v55, 5 }
  0x64   : > { %5101 = vmatmul.msk.bf16.gmra.mxu2 %vm824_vm0, %v808_v41  ;;  %v334_v41 = vld [vmem:[%s6245_s18 + $0x54] sm:$0xf]  ;;  %v5454_v55 = vrot.slane %v5438_v46, 9 }
  0x65   : > { %v544_v52 = vshrl.u32 %v334_v41, 16  ;;  %v547_v54 = vshll.u32 %v334_v41, 16  ;;  %v724_v1 = vsel %vm6273_vm3, %v719_v47, %v723_v23  ;;  %v793_v23 = vunpack.c.l.b16 %v734_v2 }
  0x66   : > { %v792_v19 = vunpack.c.l.b16 %v724_v1  ;;  %v561_v41 = vrot.slane %v560_v28, 4  ;;  %v2619_v47 = vrot.slane %v5362_v37, 5  ;;  %v757_v51 = vrot.slane %v755_v35, 5 }
  0x67   : > { %v546_v3 = vrot.slane %v544_v52, 4  ;;  %v549_v4 = vrot.slane %v547_v54, 5  ;;  %v5363_v52 = vld [vmem:[%s6245_s18 + $0x14] sm:$0x1]  ;;  %v1936_v54 = vshrl.u32 %v5361_v44, 16  ;;  %v1945_v2 = vshll.u32 %v5362_v37, 16 }
  0x68   : > { %v810_v38 = vpack.c.b16 %v793_v23, %v792_v19  ;;  %v2621_v0 = vrot.slane %v2619_v47, 4  ;;  %v2622_v1 = vrot.slane %v5363_v52, 5  ;;  %v2620_v15 = vsel %vm6492_vm7, %v5453_v60, %v2619_v47  ;;  %v5907_v19 = vld [vmem:[%s8049_s3 + $0x88] sm:$0xff] }
  0x69   : > { %v550_v27 = vor.u32 %v549_v4, %v546_v3  ;;  %v1949_v3 = vshrl.u32 %v5362_v37, 16  ;;  %v1947_v17 = vrot.slane %v1945_v2, 5  ;;  %4223 = vmatpush.bf16.msra.mxu0 %v5907_v19  ;;  %v1244_v35 = vrot.slane %v6257_v11, 5 }
  0x6a   : > { %v2623_v16 = vsel %vm6492_vm7, %v2621_v0, %v2622_v1  ;;  %v2626_v47 = vrot.slane %v5365_v34, 5 }
  0x6b   : > { %v1951_v18 = vrot.slane %v1949_v3, 4  ;;  %v2735_v28 = vunpack.c.l.b16 %v2623_v16  ;;  %v1975_v16 = vrot.slane %v1973_v63, 4 }
  0x6c   : > { %v2628_v62 = vrot.slane %v2626_v47, 4 }
  0x71   : > { %5094 = vmatmul.msk.bf16.gmra.mxu0 %vm824_vm0, %v801_v29  ;;  %v747_v29 = vrot.slane %v745_v8, 5 }
  0x73   : > { %5183 = vmatmul.msk.bf16.gmra.mxu1 %vm824_vm0, %v5848_v40  ;;  %5191 = vmatmul.msk.bf16.gmra.mxu3 %vm824_vm0, %v5856_v42  ;;  %v551_v40 = vrot.slane %v550_v27, 4  ;;  %v565_v42 = vrot.slane %v563_v24, 5  ;;  %v752_v43 = vor.u32 %v751_v30, %v747_v29  ;;  %v748_v10 = vsel %vm6273_vm3, %v743_v50, %v747_v29  ;;  %v5364_v50 = vld [vmem:[%s6245_s18 + $0x18] sm:$0xf] }
  0x74   : > { %5102 = vmatmul.msk.bf16.gmra.mxu2 %vm824_vm0, %v809_v39  ;;  %v5849_v39 = vld [vmem:[%s6245_s18 + $0x54] sm:$0xff]  ;;  %v794_v23 = vunpack.c.l.b16 %v748_v10  ;;  %v2734_v27 = vunpack.c.l.b16 %v2620_v15  ;;  %v1955_v29 = vshll.u32 %v5363_v52, 16  ;;  %v2627_v10 = vsel %vm6492_vm7, %v5454_v55, %v2626_v47  ;;  %v5439_v47 = vld [vmem:[%s6245_s18 + $0x24] sm:$0xe] }
  0x75   : > { %v556_v56 = vsel %vm6273_vm3, %v551_v40, %v555_v6  ;;  %v566_v58 = vsel %vm6273_vm3, %v561_v41, %v565_v42  ;;  %v753_v59 = vrot.slane %v752_v43, 4  ;;  %v1938_v6 = vrot.slane %v1936_v54, 4  ;;  %v5864_v40 = vld [vmem:[%s6245_s18 + $0xc] sm:$0xff]  ;;  %v1191_v41 = vld [vmem:[%s6245_s18] sm:$0xe] }
  0x76   : > { %v778_v8 = vunpack.c.l.b16 %v556_v56  ;;  %v779_v9 = vunpack.c.l.b16 %v566_v58  ;;  %v1957_v42 = vrot.slane %v1955_v29, 5  ;;  %v5366_v43 = vld [vmem:[%s6245_s18 + $0x20] sm:$0x1]  ;;  %v5193_v52 = vrot.slane %v1191_v41, 9  ;;  %v5368_v29 = vld [vmem:[%s6245_s18 + $0x28] sm:$0xf] }
  0x77   : > { %v758_v13 = vsel %vm6273_vm3, %v753_v59, %v757_v51  ;;  %v1942_v24 = vor.u32 %v1941_v7, %v1938_v6  ;;  %v1247_v51 = vrot.slane %v6260_v12, 5  ;;  %v1246_v54 = vrot.slane %v1244_v35, 4 }
  0x78   : > { %v795_v26 = vunpack.c.l.b16 %v758_v13  ;;  %v803_v30 = vpack.c.b16 %v779_v9, %v778_v8  ;;  %v2629_v56 = vrot.slane %v5366_v43, 5  ;;  %v1960_v58 = vshrl.u32 %v5364_v50, 16 }
  0x79   : > { %v1943_v37 = vrot.slane %v1942_v24, 4  ;;  %v1963_v59 = vshll.u32 %v5364_v50, 16  ;;  %v1969_v12 = vshll.u32 %v5365_v34, 16  ;;  %v1245_v1 = vsel %vm6492_vm7, %v5193_v52, %v1244_v35  ;;  %v5369_v50 = vld [vmem:[%s6245_s18 + $0x2c] sm:$0x1] }
  0x7a   : > { %v1248_v2 = vsel %vm6492_vm7, %v1246_v54, %v1247_v51  ;;  %v1962_v7 = vrot.slane %v1960_v58, 4  ;;  %v2630_v13 = vsel %vm6492_vm7, %v2628_v62, %v2629_v56  ;;  %v2736_v19 = vunpack.c.l.b16 %v2627_v10  ;;  %v5367_v51 = vld [vmem:[%s6245_s18 + $0x24] sm:$0xf] }
  0x7b   : > { %v1948_v11 = vsel %vm6273_vm3, %v1943_v37, %v1947_v17  ;;  %v1965_v8 = vrot.slane %v1963_v59, 5  ;;  %v1971_v15 = vrot.slane %v1969_v12, 5  ;;  %v1251_v35 = vrot.slane %v6278_v36, 5 }
  0x7c   : > { %v2324_v3 = vunpack.c.l.b16 %v1948_v11  ;;  %v2633_v41 = vrot.slane %v5368_v29, 5  ;;  %v1254_v36 = vrot.slane %v6283_v48, 5  ;;  %v5455_v11 = vrot.slane %v5439_v47, 9 }
  0x7d   : > { %v1966_v24 = vor.u32 %v1965_v8, %v1962_v7  ;;  %v2636_v58 = vrot.slane %v5369_v50, 5  ;;  %v1984_v59 = vshrl.u32 %v5367_v51, 16  ;;  %v1993_v12 = vshll.u32 %v5368_v29, 16 }
  0x7e   : > { %v2635_v55 = vrot.slane %v2633_v41, 4  ;;  %v1997_v63 = vshrl.u32 %v5368_v29, 16  ;;  %v1258_v47 = vrot.slane %v6302_v21, 5 }
  0x81   : > { %5095 = vmatmul.msk.bf16.gmra.mxu0 %vm824_vm0, %v802_v32  ;;  %v1952_v32 = vor.u32 %v1951_v18, %v1947_v17  ;;  %v1359_v17 = vunpack.c.l.b16 %v1245_v1  ;;  %v1360_v18 = vunpack.c.l.b16 %v1248_v2 }
  0x83   : > { %5184 = vmatmul.msk.bf16.gmra.mxu1 %vm824_vm0, %v5849_v39  ;;  %5192 = vmatmul.msk.bf16.gmra.mxu3 %vm824_vm0, %v5857_v45  ;;  %v2766_v39 = vpack.c.b16 %v2735_v28, %v2734_v27  ;;  %v1953_v45 = vrot.slane %v1952_v32, 4  ;;  %v1976_v27 = vor.u32 %v1975_v16, %v1971_v15  ;;  %v1979_v28 = vshll.u32 %v5366_v43, 16 }
  0x84   : > { %5103 = vmatmul.msk.bf16.gmra.mxu2 %vm824_vm0, %v810_v38  ;;  %v811_v38 = vpack.c.b16 %v795_v26, %v794_v23  ;;  %v2737_v23 = vunpack.c.l.b16 %v2630_v13  ;;  %v1391_v37 = vpack.c.b16 %v1360_v18, %v1359_v17  ;;  %v1986_v16 = vrot.slane %v1984_v59, 4 }
  0x85   : > { %v1958_v60 = vsel %vm6273_vm3, %v1953_v45, %v1957_v42  ;;  %v5865_v45 = vld [vmem:[%s6245_s18 + $0x18] sm:$0xff]  ;;  %v1977_v43 = vrot.slane %v1976_v27, 4  ;;  %v1981_v46 = vrot.slane %v1979_v28, 5  ;;  %v1995_v18 = vrot.slane %v1993_v12, 5 }
  0x86   : > { %v2325_v6 = vunpack.c.l.b16 %v1958_v60  ;;  %v1987_v60 = vshll.u32 %v5367_v51, 16 }
  0x87   : > { %v1982_v56 = vsel %vm6273_vm3, %v1977_v43, %v1981_v46  ;;  %v1193_v46 = vld [vmem:[%s6245_s18 + $0x18] sm:$0xe] }
  0x88   : > { %v2356_v26 = vpack.c.b16 %v2325_v6, %v2324_v3  ;;  %v2327_v10 = vunpack.c.l.b16 %v1982_v56  ;;  %v1989_v17 = vrot.slane %v1987_v60, 5  ;;  %v5195_v56 = vrot.slane %v1193_v46, 9 }
  0x8a   : > { %v1990_v28 = vor.u32 %v1989_v17, %v1986_v16 }
  0x90   : > { %v1111_v44 = vpop.f32.mrf.mxu1 }
  0x91   : > { %5096 = vmatmul.msk.bf16.gmra.mxu0 %vm824_vm0, %v803_v30 }
  0x93   : > { %5481 = vmatmul.msk.bf16.vlgmr.msrb.gmra.mxu1 %vm824_vm0, %v2766_v39  ;;  %5345 = vmatmul.msk.bf16.vlgmr.msrb.gmra.mxu3 %vm824_vm0, %v5864_v40  ;;  %v1192_v39 = vld [vmem:[%s6245_s18 + $0xc] sm:$0xe]  ;;  %v1967_v40 = vrot.slane %v1966_v24, 4 }
  0x94   : > { %5104 = vmatmul.msk.bf16.gmra.mxu2 %vm824_vm0, %v811_v38  ;;  %v2767_v38 = vpack.c.b16 %v2737_v23, %v2736_v19  ;;  %v5194_v52 = vrot.slane %v1192_v39, 9  ;;  %v1999_v19 = vrot.slane %v1997_v63, 4 }
  0x95   : > { %v1972_v54 = vsel %vm6273_vm3, %v1967_v40, %v1971_v15  ;;  %v2634_v15 = vsel %vm6492_vm7, %v5455_v11, %v2633_v41 }
  0x96   : > { %v1151_v0 = vpop.f32.mrf.mxu3  ;;  %v1252_v48 = vsel %vm6492_vm7, %v5194_v52, %v1251_v35  ;;  %v2326_v8 = vunpack.c.l.b16 %v1972_v54  ;;  %v2738_v24 = vunpack.c.l.b16 %v2634_v15  ;;  %v5866_v52 = vld [vmem:[%s6245_s18 + $0x24] sm:$0xff] }
  0x98   : > { %v1113_v9 = vpop.f32.mrf.mxu1  ;;  %v2357_v27 = vpack.c.b16 %v2327_v10, %v2326_v8 }
  0x9e   : > { %v882_v30 = vpop.f32.mrf.mxu0  ;;  %v1153_v34 = vpop.f32.mrf.mxu3 }
  0x9f   : > { %v6532_v32 = vadd.f32 %v1111_v44, %v882_v30  ;;  %v1253_v44 = vrot.slane %v1251_v35, 4  ;;  %v2000_v30 = vor.u32 %v1999_v19, %v1995_v18  ;;  %v2003_v35 = vshll.u32 %v5369_v50, 16 }
  0xa0   : > { %v1116_v42 = vpop.f32.mrf.mxu1 }
  0xa1   : > { %5421 = vmatmul.msk.bf16.vlgmr.msrb.gmra.mxu0 %vm824_vm0, %v2356_v26  ;;  %v1255_v7 = vsel %vm6492_vm7, %v1253_v44, %v1254_v36  ;;  %v1991_v44 = vrot.slane %v1990_v28, 4  ;;  %v5370_v36 = vld [vmem:[%s6245_s18 + $0x30] sm:$0xf]  ;;  %v2001_v54 = vrot.slane %v2000_v30, 4  ;;  %v2005_v11 = vrot.slane %v2003_v35, 5 }
  0xa2   : > { %v1362_v23 = vunpack.c.l.b16 %v1255_v7  ;;  %v2008_v21 = vshrl.u32 %v5370_v36, 16  ;;  %v2011_v59 = vshll.u32 %v5370_v36, 16 }
  0xa3   : > { %5482 = vmatmul.msk.bf16.gmra.mxu1 %vm824_vm0, %v2767_v38  ;;  %5346 = vmatmul.msk.bf16.gmra.mxu3 %vm824_vm0, %v5865_v45 }
  0xa4   : > { %5221 = vmatmul.msk.bf16.vlgmr.msrb.gmra.mxu2 %vm824_vm0, %v1391_v37  ;;  %v5371_v37 = vld [vmem:[%s6245_s18 + $0x34] sm:$0xf]  ;;  %v2010_v19 = vrot.slane %v2008_v21, 4 }
  0xa5   : > { %v2640_v50 = vrot.slane %v5371_v37, 5  ;;  %v2017_v7 = vshll.u32 %v5371_v37, 16  ;;  %v2021_v8 = vshrl.u32 %v5371_v37, 16  ;;  %v5867_v21 = vld [vmem:[%s6245_s18 + $0x30] sm:$0xff] }
  0xa6   : > { %v884_v62 = vpop.f32.mrf.mxu0  ;;  %v1156_v6 = vpop.f32.mrf.mxu3 }
  0xa7   : > { %v922_v1 = vpop.f32.mrf.mxu2  ;;  %v6549_v2 = vadd.f32 %v1113_v9, %v884_v62  ;;  %v2637_v9 = vsel %vm6492_vm7, %v2635_v55, %v2636_v58  ;;  %v5440_v55 = vld [vmem:[%s6245_s18 + $0x30] sm:$0xe]  ;;  %v1261_v58 = vrot.slane %v6318_v49, 5  ;;  %v2642_v62 = vrot.slane %v2640_v50, 4 }
  0xa8   : > { %v6553_v3 = vadd.f32 %v1151_v0, %v922_v1  ;;  %v1118_v13 = vpop.f32.mrf.mxu1  ;;  %v1361_v0 = vunpack.c.l.b16 %v1252_v48  ;;  %v2739_v26 = vunpack.c.l.b16 %v2637_v9  ;;  %v5456_v60 = vrot.slane %v5440_v55, 9  ;;  %v1194_v55 = vld [vmem:[%s6245_s18 + $0x24] sm:$0xe] }
  0xa9   : > { %v1996_v1 = vsel %vm6273_vm3, %v1991_v44, %v1995_v18  ;;  %v2006_v48 = vsel %vm6273_vm3, %v2001_v54, %v2005_v11  ;;  %v1259_v49 = vsel %vm6492_vm7, %v5195_v56, %v1258_v47  ;;  %v2023_v28 = vrot.slane %v2021_v8, 4 }
  0xaa   : > { %v1392_v41 = vpack.c.b16 %v1362_v23, %v1361_v0  ;;  %v2768_v43 = vpack.c.b16 %v2739_v26, %v2738_v24  ;;  %v2013_v0 = vrot.slane %v2011_v59, 5  ;;  %v2328_v23 = vunpack.c.l.b16 %v1996_v1 }
  0xab   : > { %v2329_v24 = vunpack.c.l.b16 %v2006_v48  ;;  %v2641_v26 = vsel %vm6492_vm7, %v5456_v60, %v2640_v50  ;;  %v1265_v56 = vrot.slane %v6329_v14, 5  ;;  %v1268_v1 = vrot.slane %v6348_v33, 5 }
  0xac   : > { %v2740_v30 = vunpack.c.l.b16 %v2641_v26  ;;  %v2014_v37 = vor.u32 %v2013_v0, %v2010_v19 }
  0xae   : > { %v887_v29 = vpop.f32.mrf.mxu0  ;;  %v1158_v45 = vpop.f32.mrf.mxu3 }
  0xaf   : > { %v924_v38 = vpop.f32.mrf.mxu2  ;;  %v6562_v39 = vadd.f32 %v1116_v42, %v887_v29  ;;  %v5372_v42 = vld [vmem:[%s6245_s18 + $0x38] sm:$0x1] }
  0xb0   : > { %v6564_v40 = vadd.f32 %v1153_v34, %v924_v38  ;;  %v1121_v51 = vpop.f32.mrf.mxu1  ;;  %v1260_v34 = vrot.slane %v1258_v47, 4  ;;  %v2643_v12 = vrot.slane %v5372_v42, 5  ;;  %v2358_v38 = vpack.c.b16 %v2329_v24, %v2328_v23  ;;  %v5374_v47 = vld [vmem:[%s6245_s18 + $0x40] sm:$0xf] }
  0xb1   : > { %5422 = vmatmul.msk.bf16.gmra.mxu0 %vm824_vm0, %v2357_v27  ;;  %v2019_v27 = vrot.slane %v2017_v7, 5  ;;  %v2027_v46 = vshll.u32 %v5372_v42, 16  ;;  %v5441_v42 = vld [vmem:[%s6245_s18 + $0x3c] sm:$0xe]  ;;  %v2647_v59 = vrot.slane %v5374_v47, 5  ;;  %v2041_v0 = vshll.u32 %v5374_v47, 16 }
  0xb2   : > { %v1262_v17 = vsel %vm6492_vm7, %v1260_v34, %v1261_v58  ;;  %v2015_v34 = vrot.slane %v2014_v37, 4  ;;  %v5457_v48 = vrot.slane %v5441_v42, 9  ;;  %v2045_v23 = vshrl.u32 %v5374_v47, 16 }
  0xb3   : > { %5483 = vmatmul.msk.bf16.gmra.mxu1 %vm824_vm0, %v2768_v43  ;;  %5347 = vmatmul.msk.bf16.gmra.mxu3 %vm824_vm0, %v5866_v52  ;;  %v1364_v29 = vunpack.c.l.b16 %v1262_v17  ;;  %v2024_v43 = vor.u32 %v2023_v28, %v2019_v27  ;;  %v2649_v7 = vrot.slane %v2647_v59, 4 }
  0xb4   : > { %5222 = vmatmul.msk.bf16.gmra.mxu2 %vm824_vm0, %v1392_v41  ;;  %v2020_v14 = vsel %vm6273_vm3, %v2015_v34, %v2019_v27 }
  0xb5   : > { %v2025_v60 = vrot.slane %v2024_v43, 4  ;;  %v2047_v43 = vrot.slane %v2045_v23, 4 }
  0xb6   : > { %v889_v63 = vpop.f32.mrf.mxu0  ;;  %v1161_v16 = vpop.f32.mrf.mxu3 }
  0xb7   : > { %v927_v10 = vpop.f32.mrf.mxu2  ;;  %v6581_v15 = vadd.f32 %v1118_v13, %v889_v63  ;;  %v2644_v13 = vsel %vm6492_vm7, %v2642_v62, %v2643_v12  ;;  %v2029_v62 = vrot.slane %v2027_v46, 5  ;;  %v5373_v12 = vld [vmem:[%s6245_s18 + $0x3c] sm:$0xf]  ;;  %v5196_v63 = vrot.slane %v1194_v55, 9 }
  0xb8   : > { %v6585_v9 = vadd.f32 %v1156_v6, %v927_v10  ;;  %v1123_v18 = vpop.f32.mrf.mxu1  ;;  %v1363_v6 = vunpack.c.l.b16 %v1259_v49  ;;  %v2741_v35 = vunpack.c.l.b16 %v2644_v13  ;;  %v2032_v10 = vshrl.u32 %v5373_v12, 16 }
  0xb9   : > { %v2035_v49 = vshll.u32 %v5373_v12, 16  ;;  %v2030_v19 = vsel %vm6273_vm3, %v2025_v60, %v2029_v62  ;;  %v1266_v33 = vsel %vm6492_vm7, %v5196_v63, %v1265_v56 }
  0xba   : > { %v1393_v50 = vpack.c.b16 %v1364_v29, %v1363_v6  ;;  %v2769_v11 = vpack.c.b16 %v2741_v35, %v2740_v30  ;;  %v2330_v6 = vunpack.c.l.b16 %v2020_v14  ;;  %v2648_v29 = vsel %vm6492_vm7, %v5457_v48, %v2647_v59  ;;  %v5868_v48 = vld [vmem:[%s6245_s18 + $0x3c] sm:$0xff] }
  0xbb   : > { %v2331_v35 = vunpack.c.l.b16 %v2030_v19  ;;  %v2034_v37 = vrot.slane %v2032_v10, 4  ;;  %v2742_v47 = vunpack.c.l.b16 %v2648_v29 }
  0xbe   : > { %v892_v41 = vpop.f32.mrf.mxu0  ;;  %v1163_v54 = vpop.f32.mrf.mxu3 }
  0xbf   : > { %v929_v52 = vpop.f32.mrf.mxu2  ;;  %v6594_v44 = vadd.f32 %v1121_v51, %v892_v41  ;;  %v5375_v51 = vld [vmem:[%s6245_s18 + $0x44] sm:$0x1]  ;;  %v2043_v41 = vrot.slane %v2041_v0, 5 }
  0xc0   : > { %v6596_v36 = vadd.f32 %v1158_v45, %v929_v52  ;;  %v1126_v58 = vpop.f32.mrf.mxu1  ;;  %v1267_v45 = vrot.slane %v1265_v56, 4  ;;  %v2650_v8 = vrot.slane %v5375_v51, 5  ;;  %v2051_v34 = vshll.u32 %v5375_v51, 16 }
  0xc1   : > { %5423 = vmatmul.msk.bf16.gmra.mxu0 %vm824_vm0, %v2358_v38  ;;  %v2037_v38 = vrot.slane %v2035_v49, 5  ;;  %v2048_v56 = vor.u32 %v2047_v43, %v2043_v41 }
  0xc2   : > { %v1269_v28 = vsel %vm6492_vm7, %v1267_v45, %v1268_v1  ;;  %v1195_v45 = vld [vmem:[%s6245_s18 + $0x30] sm:$0xe]  ;;  %v1272_v1 = vrot.slane %v6356_v57, 5  ;;  %v2053_v49 = vrot.slane %v2051_v34, 5 }
  0xc3   : > { %5484 = vmatmul.msk.bf16.gmra.mxu1 %vm824_vm0, %v2769_v11  ;;  %5348 = vmatmul.msk.bf16.gmra.mxu3 %vm824_vm0, %v5867_v21  ;;  %v1366_v46 = vunpack.c.l.b16 %v1269_v28  ;;  %v2038_v11 = vor.u32 %v2037_v38, %v2034_v37  ;;  %v5377_v21 = vld [vmem:[%s6245_s18 + $0x4c] sm:$0xf]  ;;  %v2049_v10 = vrot.slane %v2048_v56, 4  ;;  %v5197_v19 = vrot.slane %v1195_v45, 9 }
  0xc4   : > { %5223 = vmatmul.msk.bf16.gmra.mxu2 %vm824_vm0, %v1393_v50  ;;  %v2359_v50 = vpack.c.b16 %v2331_v35, %v2330_v6  ;;  %v2654_v51 = vrot.slane %v5377_v21, 5  ;;  %v1274_v0 = vrot.slane %v1272_v1, 4 }
  0xc5   : > { %v2054_v35 = vsel %vm6273_vm3, %v2049_v10, %v2053_v49  ;;  %v1273_v43 = vsel %vm6492_vm7, %v5197_v19, %v1272_v1  ;;  %v5380_v10 = vld [vmem:[%s6245_s18 + $0x58] sm:$0xf] }
  0xc6   : > { %v894_v17 = vpop.f32.mrf.mxu0  ;;  %v1166_v27 = vpop.f32.mrf.mxu3 }
  0xc7   : > { %v932_v24 = vpop.f32.mrf.mxu2  ;;  %v6613_v26 = vadd.f32 %v1123_v18, %v894_v17  ;;  %v2651_v18 = vsel %vm6492_vm7, %v2649_v7, %v2650_v8  ;;  %v2039_v7 = vrot.slane %v2038_v11, 4  ;;  %v5376_v8 = vld [vmem:[%s6245_s18 + $0x48] sm:$0xf] }
  0xc8   : > { %v6617_v13 = vadd.f32 %v1161_v16, %v932_v24  ;;  %v1128_v30 = vpop.f32.mrf.mxu1  ;;  %v1365_v16 = vunpack.c.l.b16 %v1266_v33  ;;  %v2743_v52 = vunpack.c.l.b16 %v2651_v18  ;;  %v5442_v17 = vld [vmem:[%s6245_s18 + $0x48] sm:$0xe]  ;;  %v2056_v57 = vshrl.u32 %v5376_v8, 16 }
  0xc9   : > { %v2059_v23 = vshll.u32 %v5376_v8, 16  ;;  %v5458_v24 = vrot.slane %v5442_v17, 9  ;;  %v2656_v33 = vrot.slane %v2654_v51, 4  ;;  %v2044_v29 = vsel %vm6273_vm3, %v2039_v7, %v2043_v41 }
  0xca   : > { %v1394_v62 = vpack.c.b16 %v1366_v46, %v1365_v16  ;;  %v2770_v63 = vpack.c.b16 %v2743_v52, %v2742_v47  ;;  %v2069_v18 = vshrl.u32 %v5377_v21, 16  ;;  %v2058_v52 = vrot.slane %v2056_v57, 4  ;;  %v1196_v57 = vld [vmem:[%s6245_s18 + $0x3c] sm:$0xe] }
  0xcb   : > { %v2332_v11 = vunpack.c.l.b16 %v2044_v29  ;;  %v2655_v56 = vsel %vm6492_vm7, %v5458_v24, %v2654_v51 }
  0xce   : > { %v897_v55 = vpop.f32.mrf.mxu0  ;;  %v1168_v12 = vpop.f32.mrf.mxu3 }
  0xcf   : > { %v934_v42 = vpop.f32.mrf.mxu2  ;;  %v6626_v59 = vadd.f32 %v1126_v58, %v897_v55  ;;  %v5378_v58 = vld [vmem:[%s6245_s18 + $0x50] sm:$0x1]  ;;  %v2333_v55 = vunpack.c.l.b16 %v2054_v35 }
  0xd0   : > { %v6628_v60 = vadd.f32 %v1163_v54, %v934_v42  ;;  %v1131_v14 = vpop.f32.mrf.mxu1  ;;  %v1275_v54 = vrot.slane %v6382_v25, 5  ;;  %v2657_v28 = vrot.slane %v5378_v58, 5  ;;  %v2065_v25 = vshll.u32 %v5377_v21, 16 }
  0xd1   : > { %5424 = vmatmul.msk.bf16.gmra.mxu0 %vm824_vm0, %v2359_v50  ;;  %v2061_v50 = vrot.slane %v2059_v23, 5  ;;  %v2071_v21 = vrot.slane %v2069_v18, 4  ;;  %v2360_v1 = vpack.c.b16 %v2333_v55, %v2332_v11  ;;  %v2075_v8 = vshll.u32 %v5378_v58, 16  ;;  %v5443_v58 = vld [vmem:[%s6245_s18 + $0x54] sm:$0xe] }
  0xd2   : > { %v1276_v47 = vsel %vm6492_vm7, %v1274_v0, %v1275_v54  ;;  %v2067_v34 = vrot.slane %v2065_v25, 5  ;;  %v1279_v23 = vrot.slane %v6395_v61, 5  ;;  %v5379_v25 = vld [vmem:[%s6245_s18 + $0x54] sm:$0xf]  ;;  %v5198_v18 = vrot.slane %v1196_v57, 9 }
  0xd3   : > { %5485 = vmatmul.msk.bf16.gmra.mxu1 %vm824_vm0, %v2770_v63  ;;  %5349 = vmatmul.msk.bf16.gmra.mxu3 %vm824_vm0, %v5868_v48  ;;  %v1368_v42 = vunpack.c.l.b16 %v1276_v47  ;;  %v2062_v45 = vor.u32 %v2061_v50, %v2058_v52  ;;  %v2077_v35 = vrot.slane %v2075_v8, 5  ;;  %v2080_v50 = vshrl.u32 %v5379_v25, 16 }
  0xd4   : > { %5224 = vmatmul.msk.bf16.gmra.mxu2 %vm824_vm0, %v1394_v62  ;;  %v2744_v62 = vunpack.c.l.b16 %v2655_v56  ;;  %v2072_v7 = vor.u32 %v2071_v21, %v2067_v34  ;;  %v2083_v11 = vshll.u32 %v5379_v25, 16 }
  0xd5   : > { %v2063_v24 = vrot.slane %v2062_v45, 4  ;;  %v2082_v8 = vrot.slane %v2080_v50, 4 }
  0xd6   : > { %v899_v6 = vpop.f32.mrf.mxu0  ;;  %v1171_v46 = vpop.f32.mrf.mxu3  ;;  %v2073_v29 = vrot.slane %v2072_v7, 4 }
  0xd7   : > { %v937_v37 = vpop.f32.mrf.mxu2  ;;  %v6645_v38 = vadd.f32 %v1128_v30, %v899_v6  ;;  %v2658_v30 = vsel %vm6492_vm7, %v2656_v33, %v2657_v28  ;;  %v5869_v28 = vld [vmem:[%s6245_s18 + $0x48] sm:$0xff]  ;;  %v2661_v6 = vrot.slane %v5380_v10, 5  ;;  %v2068_v61 = vsel %vm6273_vm3, %v2063_v24, %v2067_v34 }
  0xd8   : > { %v6649_v16 = vadd.f32 %v1166_v27, %v937_v37  ;;  %v1133_v41 = vpop.f32.mrf.mxu1  ;;  %v1367_v27 = vunpack.c.l.b16 %v1273_v43  ;;  %v2745_v63 = vunpack.c.l.b16 %v2658_v30  ;;  %v1281_v37 = vrot.slane %v1279_v23, 4 }
  0xd9   : > { %v5459_v43 = vrot.slane %v5443_v58, 9  ;;  %v2663_v47 = vrot.slane %v2661_v6, 4  ;;  %v2078_v56 = vsel %vm6273_vm3, %v2073_v29, %v2077_v35  ;;  %v2093_v30 = vshrl.u32 %v5380_v10, 16  ;;  %v5383_v35 = vld [vmem:[%s6245_s18 + $0x64] sm:$0xf] }
  0xda   : > { %v1395_v17 = vpack.c.b16 %v1368_v42, %v1367_v27  ;;  %v2771_v0 = vpack.c.b16 %v2745_v63, %v2744_v62  ;;  %v1280_v42 = vsel %vm6492_vm7, %v5198_v18, %v1279_v23  ;;  %v2334_v45 = vunpack.c.l.b16 %v2068_v61 }
  0xdb   : > { %v2335_v7 = vunpack.c.l.b16 %v2078_v56  ;;  %v5382_v56 = vld [vmem:[%s6245_s18 + $0x60] sm:$0xf] }
  0xdd   : > { %v2361_v24 = vpack.c.b16 %v2335_v7, %v2334_v45  ;;  %v2107_v45 = vshll.u32 %v5382_v56, 16 }
  0xde   : > { %v902_v48 = vpop.f32.mrf.mxu0  ;;  %v1173_v54 = vpop.f32.mrf.mxu3 }
  0xdf   : > { %v939_v49 = vpop.f32.mrf.mxu2  ;;  %v6658_v51 = vadd.f32 %v1131_v14, %v902_v48  ;;  %v5381_v14 = vld [vmem:[%s6245_s18 + $0x5c] sm:$0x1] }
  0xe0   : > { %v6660_v19 = vadd.f32 %v1168_v12, %v939_v49  ;;  %v1136_v33 = vpop.f32.mrf.mxu1  ;;  %v1282_v12 = vrot.slane %v6413_v20, 5  ;;  %v2664_v52 = vrot.slane %v5381_v14, 5  ;;  %v2089_v20 = vshll.u32 %v5380_v10, 16 }
  0xe1   : > { %5425 = vmatmul.msk.bf16.gmra.mxu0 %vm824_vm0, %v2360_v1  ;;  %v2662_v1 = vsel %vm6492_vm7, %v5459_v43, %v2661_v6  ;;  %v2085_v10 = vrot.slane %v2083_v11, 5  ;;  %v2099_v29 = vshll.u32 %v5381_v14, 16  ;;  %v5870_v11 = vld [vmem:[%s6245_s18 + $0x54] sm:$0xff]  ;;  %v2668_v14 = vrot.slane %v5383_v35, 5 }
  0xe2   : > { %v1283_v63 = vsel %vm6492_vm7, %v1281_v37, %v1282_v12  ;;  %v2091_v49 = vrot.slane %v2089_v20, 5  ;;  %v2746_v57 = vunpack.c.l.b16 %v2662_v1 }
  0xe3   : > { %5486 = vmatmul.msk.bf16.gmra.mxu1 %vm824_vm0, %v2771_v0  ;;  %5350 = vmatmul.msk.bf16.gmra.mxu3 %vm824_vm0, %v5869_v28  ;;  %v1370_v0 = vunpack.c.l.b16 %v1283_v63  ;;  %v2086_v28 = vor.u32 %v2085_v10, %v2082_v8  ;;  %v2670_v7 = vrot.slane %v2668_v14, 4 }
  0xe4   : > { %5225 = vmatmul.msk.bf16.gmra.mxu2 %vm824_vm0, %v1395_v17  ;;  %v2095_v17 = vrot.slane %v2093_v30, 4  ;;  %v2101_v30 = vrot.slane %v2099_v29, 5 }
  0xe6   : > { %v904_v55 = vpop.f32.mrf.mxu0  ;;  %v1176_v62 = vpop.f32.mrf.mxu3  ;;  %v2096_v6 = vor.u32 %v2095_v17, %v2091_v49 }
  0xe7   : > { %v942_v21 = vpop.f32.mrf.mxu2  ;;  %v6677_v27 = vadd.f32 %v1133_v41, %v904_v55  ;;  %v2665_v41 = vsel %vm6492_vm7, %v2663_v47, %v2664_v52  ;;  %v1197_v47 = vld [vmem:[%s6245_s18 + $0x48] sm:$0xe]  ;;  %v1286_v52 = vrot.slane %v6422_v53, 5  ;;  %v2087_v55 = vrot.slane %v2086_v28, 4 }
  0xe8   : > { %v6681_v34 = vadd.f32 %v1171_v46, %v942_v21  ;;  %v1138_v48 = vpop.f32.mrf.mxu1  ;;  %v1369_v46 = vunpack.c.l.b16 %v1280_v42  ;;  %v2747_v23 = vunpack.c.l.b16 %v2665_v41  ;;  %v2097_v20 = vrot.slane %v2096_v6, 4  ;;  %v5444_v21 = vld [vmem:[%s6245_s18 + $0x60] sm:$0xe] }
  0xe9   : > { %v5199_v42 = vrot.slane %v1197_v47, 9  ;;  %v1288_v63 = vrot.slane %v1286_v52, 4  ;;  %v2104_v53 = vshrl.u32 %v5382_v56, 16  ;;  %v5460_v1 = vrot.slane %v5444_v21, 9 }
  0xea   : > { %v1396_v37 = vpack.c.b16 %v1370_v0, %v1369_v46  ;;  %v2772_v43 = vpack.c.b16 %v2747_v23, %v2746_v57  ;;  %v2092_v10 = vsel %vm6273_vm3, %v2087_v55, %v2091_v49  ;;  %v2102_v17 = vsel %vm6273_vm3, %v2097_v20, %v2101_v30 }
  0xeb   : > { %v2117_v46 = vshrl.u32 %v5383_v35, 16  ;;  %v1287_v23 = vsel %vm6492_vm7, %v5199_v42, %v1286_v52  ;;  %v2106_v6 = vrot.slane %v2104_v53, 4  ;;  %v2109_v49 = vrot.slane %v2107_v45, 5 }
  0xec   : > { %v1371_v47 = vunpack.c.l.b16 %v1287_v23 }
  0xed   : > { %v2110_v56 = vor.u32 %v2109_v49, %v2106_v6  ;;  %v5385_v6 = vld [vmem:[%s6245_s18 + $0x6c] sm:$0xf]  ;;  %v1296_v49 = vrot.slane %v6463_v5, 5 }
  0xee   : > { %v907_v58 = vpop.f32.mrf.mxu0  ;;  %v1178_v61 = vpop.f32.mrf.mxu3 }
  0xef   : > { %v944_v25 = vpop.f32.mrf.mxu2  ;;  %v6690_v18 = vadd.f32 %v1136_v33, %v907_v58  ;;  %v5384_v33 = vld [vmem:[%s6245_s18 + $0x68] sm:$0x1] }
  0xf0   : > { %v6692_v12 = vadd.f32 %v1173_v54, %v944_v25  ;;  %v1141_v50 = vpop.f32.mrf.mxu1  ;;  %v1289_v54 = vrot.slane %v6440_v22, 5  ;;  %v2671_v41 = vrot.slane %v5384_v33, 5  ;;  %v2113_v22 = vshll.u32 %v5383_v35, 16 }
  0xf1   : > { %5426 = vmatmul.msk.bf16.gmra.mxu0 %vm824_vm0, %v2361_v24  ;;  %v2336_v25 = vunpack.c.l.b16 %v2092_v10  ;;  %v2123_v42 = vshll.u32 %v5384_v33, 16  ;;  %v5871_v33 = vld [vmem:[%s6245_s18 + $0x60] sm:$0xff] }
  0xf2   : > { %v1290_v58 = vsel %vm6492_vm7, %v1288_v63, %v1289_v54  ;;  %v2672_v35 = vsel %vm6492_vm7, %v2670_v7, %v2671_v41  ;;  %v5386_v54 = vld [vmem:[%s6245_s18 + $0x70] sm:$0xf]  ;;  %v1198_v41 = vld [vmem:[%s6245_s18 + $0x54] sm:$0xe] }
  0xf3   : > { %5487 = vmatmul.msk.bf16.gmra.mxu1 %vm824_vm0, %v2772_v43  ;;  %5351 = vmatmul.msk.bf16.gmra.mxu3 %vm824_vm0, %v5870_v11  ;;  %v2115_v43 = vrot.slane %v2113_v22, 5  ;;  %v1372_v52 = vunpack.c.l.b16 %v1290_v58  ;;  %v2749_v55 = vunpack.c.l.b16 %v2672_v35  ;;  %v2125_v23 = vrot.slane %v2123_v42, 5  ;;  %v6736_v58 = vld [vmem:[%s6245_s18 + $0x74] sm:$0x1]  ;;  %v5902_v35 = vld [vmem:[%s8049_s3 + $0x60] sm:$0xff] }
  0xf4   : > { %5226 = vmatmul.msk.bf16.gmra.mxu2 %vm824_vm0, %v1396_v37  ;;  %v2337_v37 = vunpack.c.l.b16 %v2102_v17  ;;  %v2111_v17 = vrot.slane %v2110_v56, 4  ;;  %v2137_v56 = vshll.u32 %v5386_v54, 16 }
  0xf5   : > { %v1397_v53 = vpack.c.b16 %v1372_v52, %v1371_v47  ;;  %v2678_v47 = vrot.slane %v6736_v58, 5  ;;  %v2128_v52 = vshrl.u32 %v5385_v6, 16  ;;  %3148 = vmatpush.bf16.msra.mxu2 %v5902_v35  ;;  %v2147_v35 = vshll.u32 %v6736_v58, 16 }
  0xf6   : > { %v909_v8 = vpop.f32.mrf.mxu0  ;;  %v6715_v28 = vpop.f32.mrf.mxu3  ;;  %v2362_v20 = vpack.c.b16 %v2337_v37, %v2336_v25  ;;  %v2116_v37 = vsel %vm6273_vm3, %v2111_v17, %v2115_v43 }
  0xf7   : > { %v947_v0 = vpop.f32.mrf.mxu2  ;;  %v6709_v57 = vadd.f32 %v1138_v48, %v909_v8  ;;  %v2669_v48 = vsel %vm6492_vm7, %v5460_v1, %v2668_v14  ;;  %v6146_v8 = vld [vmem:[%s6245_s18 + $0x58] sm:$0xf] }
  0xf8   : > { %v6713_v24 = vadd.f32 %v1176_v62, %v947_v0  ;;  %v1143_v29 = vpop.f32.mrf.mxu1  ;;  %v2119_v62 = vrot.slane %v2117_v46, 4  ;;  %v2748_v11 = vunpack.c.l.b16 %v2669_v48  ;;  %v1293_v10 = vrot.slane %v6146_v8, 5  ;;  %v5445_v46 = vld [vmem:[%s6245_s18 + $0x6c] sm:$0xe] }
  0xf9   : > { %v2675_v0 = vrot.slane %v5386_v54, 5  ;;  %v5461_v48 = vrot.slane %v5445_v46, 9  ;;  %v2139_v46 = vrot.slane %v2137_v56, 5  ;;  %v1199_v56 = vld [vmem:[%s6245_s18 + $0x60] sm:$0xe] }
  0xfa   : > { %v2120_v21 = vor.u32 %v2119_v62, %v2115_v43  ;;  %v2773_v7 = vpack.c.b16 %v2749_v55, %v2748_v11  ;;  %v1295_v25 = vrot.slane %v1293_v10, 4  ;;  %v5904_v62 = vld [vmem:[%s8049_s3 + $0x70] sm:$0xff]  ;;  %v2131_v11 = vshll.u32 %v5385_v6, 16 }
  0xfb   : > { %v2677_v5 = vrot.slane %v2675_v0, 4  ;;  %3814 = vmatpush.bf16.msra.mxu3 %v5904_v62  ;;  %v2676_v8 = vsel %vm6492_vm7, %v5461_v48, %v2675_v0  ;;  %v5389_v62 = vld [vmem:[%s6245_s18 + $0x7c] sm:$0xf] }
  0xfe   : > { %v912_v30 = vpop.f32.mrf.mxu0  ;;  %v6728_v1 = vpop.f32.mrf.mxu3 }
  0xff   : > { %v949_v14 = vpop.f32.mrf.mxu2  ;;  %v6724_v63 = vadd.f32 %v1141_v50, %v912_v30  ;;  %v2121_v50 = vrot.slane %v2120_v21, 4 }
 0x100   : > { %v6726_v45 = vadd.f32 %v1178_v61, %v949_v14  ;;  %v1146_v22 = vpop.f32.mrf.mxu1  ;;  %v5200_v61 = vrot.slane %v1198_v41, 9  ;;  %v2338_v41 = vunpack.c.l.b16 %v2116_v37 }
 0x101   : > { %5427 = vmatmul.msk.bf16.gmra.mxu0 %vm824_vm0, %v2362_v20  ;;  %v2126_v43 = vsel %vm6273_vm3, %v2121_v50, %v2125_v23  ;;  %v2141_v20 = vshrl.u32 %v5386_v54, 16  ;;  %v5906_v50 = vld [vmem:[%s8049_s3 + $0x80] sm:$0xff] }
 0x102   : > { %8058 = vst [vmem:[#allocation2_spill] sm:$0xff] %v6726_v45  ;;  %v1294_v42 = vsel %vm6492_vm7, %v5200_v61, %v1293_v10  ;;  %v2339_v17 = vunpack.c.l.b16 %v2126_v43  ;;  %v2133_v10 = vrot.slane %v2131_v11, 5  ;;  %v2750_v61 = vunpack.c.l.b16 %v2676_v8  ;;  %4224 = vmatpush.bf16.msra.mxu0 %v5906_v50 }
 0x103   : > { %5488 = vmatmul.msk.bf16.gmra.mxu1 %vm824_vm0, %v2773_v7  ;;  %5352 = vmatmul.msk.bf16.gmra.mxu3 %vm824_vm0, %v5871_v33  ;;  %v1297_v7 = vsel %vm6492_vm7, %v1295_v25, %v1296_v49  ;;  %v2130_v33 = vrot.slane %v2128_v52, 4  ;;  %v1373_v23 = vunpack.c.l.b16 %v1294_v42  ;;  %v5872_v42 = vld [vmem:[%s6245_s18 + $0x6c] sm:$0xff] }
 0x104   : > { %5227 = vmatmul.msk.bf16.gmra.mxu2 %vm824_vm0, %v1397_v53  ;;  %v1374_v6 = vunpack.c.l.b16 %v1297_v7  ;;  %v2363_v49 = vpack.c.b16 %v2339_v17, %v2338_v41  ;;  %v5388_v41 = vld [vmem:[%s6245_s18 + $0x78] sm:$0xf]  ;;  %v2149_v17 = vrot.slane %v2147_v35, 5  ;;  %v2161_v35 = vshll.u32 %v5389_v62, 16 }
 0x105   : > { %v2134_v25 = vor.u32 %v2133_v10, %v2130_v33  ;;  %v5201_v33 = vrot.slane %v1199_v56, 9  ;;  %v6148_v10 = vld [vmem:[%s6245_s18 + $0x68] sm:$0x1] }
 0x106   : > { %v914_v55 = vpop.f32.mrf.mxu0  ;;  %v6761_v53 = vpop.f32.mrf.mxu3  ;;  %v1398_v11 = vpack.c.b16 %v1374_v6, %v1373_v23  ;;  %v2152_v23 = vshrl.u32 %v5388_v41, 16  ;;  %v2155_v6 = vshll.u32 %v5388_v41, 16 }
 0x107   : > { %v952_v30 = vpop.f32.mrf.mxu2  ;;  %v6754_v21 = vadd.f32 %v1143_v29, %v914_v55  ;;  %v2679_v29 = vsel %vm6492_vm7, %v2677_v5, %v2678_v47  ;;  %v2135_v7 = vrot.slane %v2134_v25, 4 }
 0x108   : > { %v6759_v14 = vadd.f32 %v6715_v28, %v952_v30  ;;  %v1148_v54 = vpop.f32.mrf.mxu1  ;;  %v2143_v28 = vrot.slane %v2141_v20, 4  ;;  %v2751_v0 = vunpack.c.l.b16 %v2679_v29  ;;  %v6147_v20 = vld [vmem:[%s6245_s18 + $0x64] sm:$0xf]  ;;  %v5446_v29 = vld [vmem:[%s6245_s18 + $0x78] sm:$0xe] }
 0x109   : > { %v1300_v30 = vrot.slane %v6147_v20, 5 }
 0x10a   : > { %8059 = vst [vmem:[#allocation3_spill] sm:$0xff] %v6759_v14  ;;  %v2144_v48 = vor.u32 %v2143_v28, %v2139_v46  ;;  %v2774_v43 = vpack.c.b16 %v2751_v0, %v2750_v61  ;;  %v1303_v28 = vrot.slane %v6148_v10, 5  ;;  %v5462_v61 = vrot.slane %v5446_v29, 9 }
 0x10b   : > { %v1302_v50 = vrot.slane %v1300_v30, 4 }
 0x10c   : > { %v2145_v8 = vrot.slane %v2144_v48, 4 }
 0x10d   : > { %v1304_v41 = vsel %vm6492_vm7, %v1302_v50, %v1303_v28 }
 0x10e   : > { %v917_v37 = vpop.f32.mrf.mxu0  ;;  %v1188_v55 = vpop.f32.mrf.mxu3  ;;  %v2150_v48 = vsel %vm6273_vm3, %v2145_v8, %v2149_v17  ;;  %v1376_v10 = vunpack.c.l.b16 %v1304_v41 }
 0x10f   : > { %v954_v5 = vpop.f32.mrf.mxu2  ;;  %v6774_v47 = vadd.f32 %v1146_v22, %v917_v37  ;;  %v2682_v22 = vrot.slane %v5389_v62, 5  ;;  %v2140_v37 = vsel %vm6273_vm3, %v2135_v7, %v2139_v46  ;;  %v2154_v46 = vrot.slane %v2152_v23, 4 }
 0x110   : > { %v6777_v52 = vadd.f32 %v6728_v1, %v954_v5  ;;  %v6782_v58 = vpop.f32.mrf.mxu1  ;;  %v5390_v1 = vld [vmem:[%s6245_s18 + $0x80] sm:$0x1]  ;;  %v2165_v5 = vshrl.u32 %v5389_v62, 16  ;;  %v2157_v7 = vrot.slane %v2155_v6, 5  ;;  %v2340_v62 = vunpack.c.l.b16 %v2140_v37 }
 0x111   : > { %5428 = vmatmul.msk.bf16.gmra.mxu0 %vm824_vm0, %v2363_v49  ;;  %v2684_v0 = vrot.slane %v2682_v22, 4  ;;  %v2685_v49 = vrot.slane %v5390_v1, 5  ;;  %v2341_v8 = vunpack.c.l.b16 %v2150_v48  ;;  %v2171_v48 = vshll.u32 %v5390_v1, 16  ;;  %v5873_v1 = vld [vmem:[%s6245_s18 + $0x78] sm:$0xff] }
 0x112   : > { %8060 = vst [vmem:[#allocation4_spill] sm:$0xff] %v6777_v52  ;;  %v2167_v17 = vrot.slane %v2165_v5, 4  ;;  %v2158_v23 = vor.u32 %v2157_v7, %v2154_v46  ;;  %v1200_v5 = vld [vmem:[%s6245_s18 + $0x6c] sm:$0xe] }
 0x113   : > { %5489 = vmatmul.msk.bf16.gmra.mxu1 %vm824_vm0, %v2774_v43  ;;  %5353 = vmatmul.msk.bf16.gmra.mxu3 %vm824_vm0, %v5872_v42  ;;  %v1301_v43 = vsel %vm6492_vm7, %v5201_v33, %v1300_v30  ;;  %v2686_v30 = vsel %vm6492_vm7, %v2684_v0, %v2685_v49  ;;  %v2364_v6 = vpack.c.b16 %v2341_v8, %v2340_v62  ;;  %v5447_v62 = vld [vmem:[%s6245_s18 + $0x84] sm:$0xe] }
 0x114   : > { %5228 = vmatmul.msk.bf16.gmra.mxu2 %vm824_vm0, %v1398_v11  ;;  %v1375_v33 = vunpack.c.l.b16 %v1301_v43  ;;  %v2753_v50 = vunpack.c.l.b16 %v2686_v30  ;;  %v6149_v43 = vld [vmem:[%s6245_s18 + $0x70] sm:$0xf]  ;;  %v2159_v46 = vrot.slane %v2158_v23, 4  ;;  %v2173_v30 = vrot.slane %v2171_v48, 5 }
 0x115   : > { %v1307_v41 = vrot.slane %v6149_v43, 5  ;;  %v5463_v23 = vrot.slane %v5447_v62, 9 }
 0x116   : > { %v919_v25 = vpop.f32.mrf.mxu0  ;;  %v6803_v42 = vpop.f32.mrf.mxu3 }
 0x117   : > { %v957_v11 = vpop.f32.mrf.mxu2  ;;  %v6796_v56 = vadd.f32 %v1148_v54, %v919_v25  ;;  %v2683_v54 = vsel %vm6492_vm7, %v5462_v61, %v2682_v22  ;;  %v1399_v61 = vpack.c.b16 %v1376_v10, %v1375_v33  ;;  %v5202_v33 = vrot.slane %v1200_v5, 9  ;;  %v6150_v10 = vld [vmem:[%s6245_s18 + $0x74] sm:$0x1] }
 0x118   : > { %v6801_v20 = vadd.f32 %v6761_v53, %v957_v11  ;;  %v6807_v29 = vpop.f32.mrf.mxu1  ;;  %v2163_v53 = vrot.slane %v2161_v35, 5  ;;  %v2752_v28 = vunpack.c.l.b16 %v2683_v54  ;;  %v5392_v11 = vld [vmem:[%s6245_s18 + $0x88] sm:$0xf] }
 0x119   : > { %v2689_v8 = vrot.slane %v5392_v11, 5 }
 0x11a   : > { %8061 = vst [vmem:[#allocation5_spill] sm:$0xff] %v6801_v20  ;;  %v2168_v37 = vor.u32 %v2167_v17, %v2163_v53  ;;  %v2775_v35 = vpack.c.b16 %v2753_v50, %v2752_v28  ;;  %v5393_v17 = vld [vmem:[%s6245_s18 + $0x8c] sm:$0x1]  ;;  %v1309_v28 = vrot.slane %v1307_v41, 4  ;;  %v2164_v50 = vsel %vm6273_vm3, %v2159_v46, %v2163_v53 }
 0x11b   : > { %v2692_v43 = vrot.slane %v5393_v17, 5  ;;  %v2189_v20 = vshrl.u32 %v5392_v11, 16  ;;  %v2690_v62 = vsel %vm6492_vm7, %v5463_v23, %v2689_v8 }
 0x11c   : > { %v2169_v54 = vrot.slane %v2168_v37, 4 }
 0x11e   : > { %v2441_v25 = vpop.f32.mrf.mxu0  ;;  %v6816_v49 = vpop.f32.mrf.mxu3  ;;  %v2174_v5 = vsel %vm6273_vm3, %v2169_v54, %v2173_v30 }
 0x11f   : > { %v959_v22 = vpop.f32.mrf.mxu2  ;;  %v2343_v54 = vunpack.c.l.b16 %v2174_v5 }
 0x120   : > { %v6814_v0 = vadd.f32 %v1188_v55, %v959_v22  ;;  %v6821_v7 = vpop.f32.mrf.mxu1  ;;  %v5391_v55 = vld [vmem:[%s6245_s18 + $0x84] sm:$0xf]  ;;  %v1310_v22 = vrot.slane %v6150_v10, 5  ;;  %v2185_v10 = vshll.u32 %v5392_v11, 16 }
 0x121   : > { %5429 = vmatmul.msk.bf16.gmra.mxu0 %vm824_vm0, %v2364_v6  ;;  %v2691_v6 = vrot.slane %v2689_v8, 4  ;;  %v2176_v37 = vshrl.u32 %v5391_v55, 16  ;;  %v2179_v48 = vshll.u32 %v5391_v55, 16 }
 0x122   : > { %8062 = vst [vmem:[#allocation6_spill] sm:$0xff] %v6814_v0  ;;  %v1311_v46 = vsel %vm6492_vm7, %v1309_v28, %v1310_v22  ;;  %v2754_v22 = vunpack.c.l.b16 %v2690_v62  ;;  %v5874_v62 = vld [vmem:[%s6245_s18 + $0x84] sm:$0xff] }
 0x123   : > { %5490 = vmatmul.msk.bf16.gmra.mxu1 %vm824_vm0, %v2775_v35  ;;  %5354 = vmatmul.msk.bf16.gmra.mxu3 %vm824_vm0, %v5873_v1  ;;  %v1308_v35 = vsel %vm6492_vm7, %v5202_v33, %v1307_v41  ;;  %v2342_v1 = vunpack.c.l.b16 %v2164_v50  ;;  %v2693_v11 = vsel %vm6492_vm7, %v2691_v6, %v2692_v43  ;;  %v2178_v30 = vrot.slane %v2176_v37, 4  ;;  %v5395_v37 = vld [vmem:[%s6245_s18 + $0x94] sm:$0xf] }
 0x124   : > { %5229 = vmatmul.msk.bf16.gmra.mxu2 %vm824_vm0, %v1399_v61  ;;  %v2181_v41 = vrot.slane %v2179_v48, 5  ;;  %v2187_v33 = vrot.slane %v2185_v10, 5  ;;  %v1377_v14 = vunpack.c.l.b16 %v1308_v35  ;;  %v1378_v45 = vunpack.c.l.b16 %v1311_v46  ;;  %v6151_v35 = vld [vmem:[%s6245_s18 + $0x7c] sm:$0xf] }
 0x125   : > { %v2755_v28 = vunpack.c.l.b16 %v2693_v11  ;;  %v2365_v50 = vpack.c.b16 %v2343_v54, %v2342_v1  ;;  %v2195_v43 = vshll.u32 %v5393_v17, 16  ;;  %v1314_v46 = vrot.slane %v6151_v35, 5  ;;  %v5394_v1 = vld [vmem:[%s6245_s18 + $0x90] sm:$0xf] }
 0x126   : > { %v2443_v0 = vpop.f32.mrf.mxu0  ;;  %v6838_v53 = vpop.f32.mrf.mxu3  ;;  %v2182_v23 = vor.u32 %v2181_v41, %v2178_v30  ;;  %v1400_v48 = vpack.c.b16 %v1378_v45, %v1377_v14  ;;  %v2696_v11 = vrot.slane %v5395_v37, 5  ;;  %v6867_v14 = vld [vmem:[%s6245_s18 + $0x98] sm:$0x1]  ;;  %v5448_v41 = vld [vmem:[%s6245_s18 + $0x90] sm:$0xe] }
 0x127   : > { %v1476_v61 = vpop.f32.mrf.mxu2  ;;  %v2197_v45 = vrot.slane %v2195_v43, 5  ;;  %v2699_v43 = vrot.slane %v6867_v14, 5 }
 0x128   : > { %v1556_v52 = vadd.f32 %v1476_v61, %v6532_v32  ;;  %v6844_v55 = vpop.f32.mrf.mxu1  ;;  %v2191_v61 = vrot.slane %v2189_v20, 4  ;;  %v2183_v54 = vrot.slane %v2182_v23, 4  ;;  %v5464_v23 = vrot.slane %v5448_v41, 9 }
 0x12a   : > { %v1855_v32 = vadd.f32 %v6803_v42, %v1556_v52  ;;  %v2192_v6 = vor.u32 %v2191_v61, %v2187_v33  ;;  %v2203_v61 = vshll.u32 %v5394_v1, 16 }
 0x12c   : > { %v2521_v8 = vadd.f32 %v2441_v25, %v1855_v32  ;;  %v2776_v25 = vpack.c.b16 %v2755_v28, %v2754_v22  ;;  %v2193_v30 = vrot.slane %v2192_v6, 4  ;;  %v2200_v32 = vshrl.u32 %v5394_v1, 16  ;;  %v6152_v22 = vld [vmem:[%s6245_s18 + $0x80] sm:$0x1] }
 0x12d   : > { %v1317_v28 = vrot.slane %v6152_v22, 5  ;;  %v2698_v6 = vrot.slane %v2696_v11, 4  ;;  %v2209_v1 = vshll.u32 %v5395_v37, 16 }
 0x12e   : > { %v6849_v5 = vpop.f32.mrf.mxu0  ;;  %v6853_v52 = vadd.f32 %v6782_v58, %v2521_v8  ;;  %v6856_v10 = vpop.f32.mrf.mxu3  ;;  %v1201_v58 = vld [vmem:[%s6245_s18 + $0x78] sm:$0xe]  ;;  %v2198_v35 = vsel %vm6273_vm3, %v2193_v30, %v2197_v45 }
 0x12f   : > { %v1478_v20 = vpop.f32.mrf.mxu2  ;;  %v5203_v8 = vrot.slane %v1201_v58, 9  ;;  %v2700_v45 = vsel %vm6492_vm7, %v2698_v6, %v2699_v43 }
 0x130   : > { %v1557_v42 = vadd.f32 %v1478_v20, %v6549_v2  ;;  %v6861_v17 = vpop.f32.mrf.mxu1 }
 0x131   : > { %5430 = vmatmul.msk.bf16.gmra.mxu0 %vm824_vm0, %v2365_v50  ;;  %v1316_v50 = vrot.slane %v1314_v46, 4 }
 0x132   : > { %v1856_v2 = vadd.f32 %v6816_v49, %v1557_v42  ;;  %v2188_v49 = vsel %vm6273_vm3, %v2183_v54, %v2187_v33  ;;  %v1315_v33 = vsel %vm6492_vm7, %v5203_v8, %v1314_v46 }
 0x133   : > { %5491 = vmatmul.msk.bf16.gmra.mxu1 %vm824_vm0, %v2776_v25  ;;  %5355 = vmatmul.msk.bf16.gmra.mxu3 %vm824_vm0, %v5874_v62  ;;  %v1318_v54 = vsel %vm6492_vm7, %v1316_v50, %v1317_v28  ;;  %v2344_v30 = vunpack.c.l.b16 %v2188_v49  ;;  %v1379_v46 = vunpack.c.l.b16 %v1315_v33  ;;  %v2757_v50 = vunpack.c.l.b16 %v2700_v45 }
 0x134   : > { %5230 = vmatmul.msk.bf16.gmra.mxu2 %vm824_vm0, %v1400_v48  ;;  %v2522_v20 = vadd.f32 %v2443_v0, %v1856_v2  ;;  %v2213_v48 = vshrl.u32 %v5395_v37, 16  ;;  %v2202_v0 = vrot.slane %v2200_v32, 4  ;;  %v2205_v2 = vrot.slane %v2203_v61, 5 }
 0x135   : > { %v2345_v37 = vunpack.c.l.b16 %v2198_v35  ;;  %v2211_v32 = vrot.slane %v2209_v1, 5  ;;  %v6153_v1 = vld [vmem:[%s6245_s18 + $0x88] sm:$0xf] }
 0x136   : > { %v2448_v42 = vpop.f32.mrf.mxu0  ;;  %v6880_v25 = vadd.f32 %v6807_v29, %v2522_v20  ;;  %v6883_v22 = vpop.f32.mrf.mxu3  ;;  %v2697_v29 = vsel %vm6492_vm7, %v5464_v23, %v2696_v11  ;;  %v2215_v61 = vrot.slane %v2213_v48, 4  ;;  %v2206_v8 = vor.u32 %v2205_v2, %v2202_v0 }
 0x137   : > { %v1481_v58 = vpop.f32.mrf.mxu2  ;;  %v1380_v20 = vunpack.c.l.b16 %v1318_v54  ;;  %v2756_v28 = vunpack.c.l.b16 %v2697_v29  ;;  %v2366_v35 = vpack.c.b16 %v2345_v37, %v2344_v30  ;;  %v2219_v23 = vshll.u32 %v6867_v14, 16  ;;  %v1202_v54 = vld [vmem:[%s6245_s18 + $0x84] sm:$0xe]  ;;  %v5875_v30 = vld [vmem:[%s6245_s18 + $0x90] sm:$0xff]  ;;  %v5397_v29 = vld [vmem:[%s6245_s18 + $0x9c] sm:$0xf] }
 0x138   : > { %v1558_v62 = vadd.f32 %v1481_v58, %v6562_v39  ;;  %v6889_v41 = vpop.f32.mrf.mxu1  ;;  %v2216_v11 = vor.u32 %v2215_v61, %v2211_v32  ;;  %v1321_v48 = vrot.slane %v6153_v1, 5  ;;  %v2207_v0 = vrot.slane %v2206_v8, 4  ;;  %v5399_v8 = vld [vmem:[%s6245_s18 + $0xa4] sm:$0x1] }
 0x139   : > { %v1401_v2 = vpack.c.b16 %v1380_v20, %v1379_v46  ;;  %v2777_v33 = vpack.c.b16 %v2757_v50, %v2756_v28  ;;  %v2221_v61 = vrot.slane %v2219_v23, 5  ;;  %v5204_v46 = vrot.slane %v1202_v54, 9 }
 0x13a   : > { %v1857_v39 = vadd.f32 %v6838_v53, %v1558_v62  ;;  %v5398_v53 = vld [vmem:[%s6245_s18 + $0xa0] sm:$0xf]  ;;  %v1323_v20 = vrot.slane %v1321_v48, 4  ;;  %v2212_v28 = vsel %vm6273_vm3, %v2207_v0, %v2211_v32 }
 0x13b   : > { %v2703_v37 = vrot.slane %v5398_v53, 5  ;;  %v2233_v23 = vshll.u32 %v5398_v53, 16 }
 0x13c   : > { %v2523_v49 = vadd.f32 %v6849_v5, %v1857_v39  ;;  %v2217_v39 = vrot.slane %v2216_v11, 4  ;;  %v2706_v11 = vrot.slane %v5399_v8, 5 }
 0x13e   : > { %v6897_v58 = vpop.f32.mrf.mxu0  ;;  %v6902_v6 = vadd.f32 %v6821_v7, %v2523_v49  ;;  %v6906_v62 = vpop.f32.mrf.mxu3  ;;  %v5449_v7 = vld [vmem:[%s6245_s18 + $0x9c] sm:$0xe]  ;;  %v6154_v49 = vld [vmem:[%s6245_s18 + $0x8c] sm:$0x1]  ;;  %v2222_v54 = vsel %vm6273_vm3, %v2217_v39, %v2221_v61  ;;  %v2235_v61 = vrot.slane %v2233_v23, 5 }
 0x13f   : > { %v1483_v43 = vpop.f32.mrf.mxu2  ;;  %v5465_v50 = vrot.slane %v5449_v7, 9  ;;  %v6155_v23 = vld [vmem:[%s6245_s18 + $0x94] sm:$0xf] }
 0x140   : > { %v1559_v5 = vadd.f32 %v1483_v43, %v6581_v15  ;;  %v6910_v14 = vpop.f32.mrf.mxu1  ;;  %v1324_v15 = vrot.slane %v6154_v49, 5  ;;  %v2227_v43 = vshll.u32 %v5397_v29, 16 }
 0x141   : > { %5431 = vmatmul.msk.bf16.gmra.mxu0 %vm824_vm0, %v2366_v35  ;;  %v2224_v35 = vshrl.u32 %v5397_v29, 16 }
 0x142   : > { %v1858_v45 = vadd.f32 %v6856_v10, %v1559_v5  ;;  %v2705_v10 = vrot.slane %v2703_v37, 4  ;;  %v2237_v5 = vshrl.u32 %v5398_v53, 16  ;;  %v2704_v53 = vsel %vm6492_vm7, %v5465_v50, %v2703_v37 }
 0x143   : > { %5492 = vmatmul.msk.bf16.gmra.mxu1 %vm824_vm0, %v2777_v33  ;;  %5356 = vmatmul.msk.bf16.gmra.mxu3 %vm824_vm0, %v5875_v30  ;;  %v2346_v33 = vunpack.c.l.b16 %v2212_v28  ;;  %v2226_v29 = vrot.slane %v2224_v35, 4  ;;  %v2758_v28 = vunpack.c.l.b16 %v2704_v53  ;;  %v2243_v50 = vshll.u32 %v5399_v8, 16 }
 0x144   : > { %5231 = vmatmul.msk.bf16.gmra.mxu2 %vm824_vm0, %v1401_v2  ;;  %v2524_v1 = vadd.f32 %v2448_v42, %v1858_v45  ;;  %v1322_v2 = vsel %vm6492_vm7, %v5204_v46, %v1321_v48  ;;  %v1325_v42 = vsel %vm6492_vm7, %v1323_v20, %v1324_v15  ;;  %v2229_v45 = vrot.slane %v2227_v43, 5 }
 0x145   : > { %v2707_v48 = vsel %vm6492_vm7, %v2705_v10, %v2706_v11  ;;  %v2239_v46 = vrot.slane %v2237_v5, 4  ;;  %v1382_v20 = vunpack.c.l.b16 %v1325_v42  ;;  %v1328_v5 = vrot.slane %v6155_v23, 5  ;;  %v5876_v42 = vld [vmem:[%s6245_s18 + $0x9c] sm:$0xff] }
 0x146   : > { %v2453_v49 = vpop.f32.mrf.mxu0  ;;  %v6926_v32 = vadd.f32 %v6844_v55, %v2524_v1  ;;  %v6933_v7 = vpop.f32.mrf.mxu3  ;;  %v2347_v55 = vunpack.c.l.b16 %v2222_v54  ;;  %v2759_v1 = vunpack.c.l.b16 %v2707_v48  ;;  %v2230_v37 = vor.u32 %v2229_v45, %v2226_v29  ;;  %v6957_v45 = vld [vmem:[%s6245_s18 + $0xb0] sm:$0x1] }
 0x147   : > { %v1486_v0 = vpop.f32.mrf.mxu2  ;;  %v2240_v54 = vor.u32 %v2239_v46, %v2235_v61  ;;  %v2245_v53 = vrot.slane %v2243_v50, 5  ;;  %v2713_v50 = vrot.slane %v6957_v45, 5 }
 0x148   : > { %8063 = vst [vmem:[#allocation7_spill] sm:$0xff] %v6926_v32  ;;  %v1560_v30 = vadd.f32 %v1486_v0, %v6594_v44  ;;  %v6937_v39 = vpop.f32.mrf.mxu1  ;;  %v1381_v44 = vunpack.c.l.b16 %v1322_v2  ;;  %v2367_v43 = vpack.c.b16 %v2347_v55, %v2346_v33  ;;  %v5401_v32 = vld [vmem:[%s6245_s18 + $0xac] sm:$0xf]  ;;  %v1203_v33 = vld [vmem:[%s6245_s18 + $0x90] sm:$0xe] }
 0x149   : > { %v2241_v29 = vrot.slane %v2240_v54, 4  ;;  %v5450_v55 = vld [vmem:[%s6245_s18 + $0xa8] sm:$0xe]  ;;  %v2710_v48 = vrot.slane %v5401_v32, 5 }
 0x14a   : > { %v1859_v15 = vadd.f32 %v6883_v22, %v1560_v30  ;;  %v1402_v11 = vpack.c.b16 %v1382_v20, %v1381_v44  ;;  %v2231_v30 = vrot.slane %v2230_v37, 4  ;;  %v5205_v20 = vrot.slane %v1203_v33, 9 }
 0x14b   : > { %v5466_v37 = vrot.slane %v5450_v55, 9 }
 0x14c   : > { %v2525_v35 = vadd.f32 %v6897_v58, %v1859_v15  ;;  %v2778_v58 = vpack.c.b16 %v2759_v1, %v2758_v28  ;;  %v5400_v15 = vld [vmem:[%s6245_s18 + $0xa8] sm:$0xf]  ;;  %v1330_v28 = vrot.slane %v1328_v5, 4  ;;  %v2236_v1 = vsel %vm6273_vm3, %v2231_v30, %v2235_v61 }
 0x14d   : > { %v2248_v54 = vshrl.u32 %v5400_v15, 16  ;;  %v1329_v61 = vsel %vm6492_vm7, %v5205_v20, %v1328_v5 }
 0x14e   : > { %v2456_v0 = vpop.f32.mrf.mxu0  ;;  %v6945_v10 = vadd.f32 %v6861_v17, %v2525_v35  ;;  %v6949_v8 = vpop.f32.mrf.mxu3  ;;  %v1383_v20 = vunpack.c.l.b16 %v1329_v61  ;;  %v1204_v61 = vld [vmem:[%s6245_s18 + $0x9c] sm:$0xe] }
 0x14f   : > { %v1488_v22 = vpop.f32.mrf.mxu2 }
 0x150   : > { %v1561_v2 = vadd.f32 %v1488_v22, %v6613_v26  ;;  %v6954_v17 = vpop.f32.mrf.mxu1  ;;  %v6156_v26 = vld [vmem:[%s6245_s18 + $0x98] sm:$0x1]  ;;  %v2251_v22 = vshll.u32 %v5400_v15, 16 }
 0x151   : > { %5432 = vmatmul.msk.bf16.gmra.mxu0 %vm824_vm0, %v2367_v43  ;;  %v1331_v44 = vrot.slane %v6156_v26, 5  ;;  %v2712_v43 = vrot.slane %v2710_v48, 4 }
 0x152   : > { %v1860_v46 = vadd.f32 %v6906_v62, %v1561_v2  ;;  %v2246_v62 = vsel %vm6273_vm3, %v2241_v29, %v2245_v53  ;;  %v2257_v2 = vshll.u32 %v5401_v32, 16  ;;  %v2348_v53 = vunpack.c.l.b16 %v2236_v1 }
 0x153   : > { %5493 = vmatmul.msk.bf16.gmra.mxu1 %vm824_vm0, %v2778_v58  ;;  %5357 = vmatmul.msk.bf16.gmra.mxu3 %vm824_vm0, %v5876_v42  ;;  %v1332_v42 = vsel %vm6492_vm7, %v1330_v28, %v1331_v44  ;;  %v2349_v29 = vunpack.c.l.b16 %v2246_v62  ;;  %v2253_v5 = vrot.slane %v2251_v22, 5 }
 0x154   : > { %5232 = vmatmul.msk.bf16.gmra.mxu2 %vm824_vm0, %v1402_v11  ;;  %v2526_v35 = vadd.f32 %v2453_v49, %v1860_v46  ;;  %v2261_v11 = vshrl.u32 %v5401_v32, 16  ;;  %v2711_v32 = vsel %vm6492_vm7, %v5466_v37, %v2710_v48  ;;  %v2250_v46 = vrot.slane %v2248_v54, 4  ;;  %v5404_v54 = vld [vmem:[%s6245_s18 + $0xb8] sm:$0xf] }
 0x155   : > { %v2259_v15 = vrot.slane %v2257_v2, 5  ;;  %v2760_v44 = vunpack.c.l.b16 %v2711_v32  ;;  %v2368_v62 = vpack.c.b16 %v2349_v29, %v2348_v53  ;;  %v5403_v53 = vld [vmem:[%s6245_s18 + $0xb4] sm:$0xf]  ;;  %v2717_v32 = vrot.slane %v5404_v54, 5 }
 0x156   : > { %v2458_v23 = vpop.f32.mrf.mxu0  ;;  %v6972_v58 = vadd.f32 %v6889_v41, %v2526_v35  ;;  %v6977_v30 = vpop.f32.mrf.mxu3  ;;  %v2714_v41 = vsel %vm6492_vm7, %v2712_v43, %v2713_v50  ;;  %v2263_v26 = vrot.slane %v2261_v11, 4  ;;  %v1384_v35 = vunpack.c.l.b16 %v1332_v42 }
 0x157   : > { %v1491_v33 = vpop.f32.mrf.mxu2  ;;  %v2761_v28 = vunpack.c.l.b16 %v2714_v41  ;;  %v2254_v48 = vor.u32 %v2253_v5, %v2250_v46  ;;  %v2267_v43 = vshll.u32 %v6957_v45, 16  ;;  %v5405_v5 = vld [vmem:[%s6245_s18 + $0xbc] sm:$0x1] }
 0x158   : > { %v1562_v49 = vadd.f32 %v1491_v33, %v6626_v59  ;;  %v6981_v55 = vpop.f32.mrf.mxu1  ;;  %v2264_v50 = vor.u32 %v2263_v26, %v2259_v15  ;;  %v1403_v11 = vpack.c.b16 %v1384_v35, %v1383_v20  ;;  %v6158_v26 = vld [vmem:[%s6245_s18 + $0xa4] sm:$0x1]  ;;  %v5206_v35 = vrot.slane %v1204_v61, 9 }
 0x159   : > { %v2779_v33 = vpack.c.b16 %v2761_v28, %v2760_v44  ;;  %v2255_v29 = vrot.slane %v2254_v48, 4  ;;  %v2269_v46 = vrot.slane %v2267_v43, 5  ;;  %v1338_v20 = vrot.slane %v6158_v26, 5 }
 0x15a   : > { %v1861_v59 = vadd.f32 %v6933_v7, %v1562_v49  ;;  %v6157_v49 = vld [vmem:[%s6245_s18 + $0xa0] sm:$0xf]  ;;  %v2265_v41 = vrot.slane %v2264_v50, 4  ;;  %v2272_v44 = vshrl.u32 %v5403_v53, 16  ;;  %v2275_v28 = vshll.u32 %v5403_v53, 16 }
 0x15b   : > { %v1335_v42 = vrot.slane %v6157_v49, 5  ;;  %v2719_v50 = vrot.slane %v2717_v32, 4  ;;  %v2720_v43 = vrot.slane %v5405_v5, 5  ;;  %v2260_v49 = vsel %vm6273_vm3, %v2255_v29, %v2259_v15 }
 0x15c   : > { %v2527_v1 = vadd.f32 %v2456_v0, %v1861_v59  ;;  %v5451_v59 = vld [vmem:[%s6245_s18 + $0xb4] sm:$0xe]  ;;  %v2270_v61 = vsel %vm6273_vm3, %v2265_v41, %v2269_v46  ;;  %v2277_v53 = vrot.slane %v2275_v28, 5  ;;  %v2291_v28 = vshll.u32 %v5405_v5, 16  ;;  %v1205_v5 = vld [vmem:[%s6245_s18 + $0xa8] sm:$0xe] }
 0x15d   : > { %v2351_v46 = vunpack.c.l.b16 %v2270_v61  ;;  %v2721_v26 = vsel %vm6492_vm7, %v2719_v50, %v2720_v43  ;;  %v6159_v61 = vld [vmem:[%s6245_s18 + $0xac] sm:$0xf] }
 0x15e   : > { %v6988_v37 = vpop.f32.mrf.mxu0  ;;  %v6993_v7 = vadd.f32 %v6910_v14, %v2527_v1  ;;  %v6996_v0 = vpop.f32.mrf.mxu3  ;;  %v5877_v14 = vld [vmem:[%s6245_s18 + $0xa8] sm:$0xff]  ;;  %v1337_v1 = vrot.slane %v1335_v42, 4 }
 0x15f   : > { %v1493_v22 = vpop.f32.mrf.mxu2 }
 0x160   : > { %v1563_v2 = vadd.f32 %v1493_v22, %v6645_v38  ;;  %v7002_v45 = vpop.f32.mrf.mxu1  ;;  %v2285_v22 = vshrl.u32 %v5404_v54, 16 }
 0x161   : > { %5433 = vmatmul.msk.bf16.gmra.mxu0 %vm824_vm0, %v2368_v62  ;;  %v2281_v62 = vshll.u32 %v5404_v54, 16  ;;  %v1336_v54 = vsel %vm6492_vm7, %v5206_v35, %v1335_v42 }
 0x162   : > { %v1862_v38 = vadd.f32 %v6949_v8, %v1563_v2  ;;  %v5467_v8 = vrot.slane %v5451_v59, 9  ;;  %v1339_v59 = vsel %vm6492_vm7, %v1337_v1, %v1338_v20  ;;  %v2287_v29 = vrot.slane %v2285_v22, 4 }
 0x163   : > { %5494 = vmatmul.msk.bf16.gmra.mxu1 %vm824_vm0, %v2779_v33  ;;  %5358 = vmatmul.msk.bf16.gmra.mxu3 %vm824_vm0, %v5877_v14  ;;  %v7026_v15 = vrot.slane %v2281_v62, 5  ;;  %v1385_v35 = vunpack.c.l.b16 %v1336_v54  ;;  %v1386_v20 = vunpack.c.l.b16 %v1339_v59  ;;  %v2763_v62 = vunpack.c.l.b16 %v2721_v26  ;;  %v5406_v26 = vld [vmem:[%s6245_s18 + $0xc0] sm:$0xf] }
 0x164   : > { %5233 = vmatmul.msk.bf16.gmra.mxu2 %vm824_vm0, %v1403_v11  ;;  %v2528_v48 = vadd.f32 %v2458_v23, %v1862_v38  ;;  %v2274_v23 = vrot.slane %v2272_v44, 4  ;;  %v2718_v42 = vsel %vm6492_vm7, %v5467_v8, %v2717_v32  ;;  %v5407_v32 = vld [vmem:[%s6245_s18 + $0xc4] sm:$0xf] }
 0x165   : > { %v2762_v1 = vunpack.c.l.b16 %v2718_v42  ;;  %v2288_v22 = vor.u32 %v2287_v29, %v7026_v15  ;;  %v1404_v43 = vpack.c.b16 %v1386_v20, %v1385_v35  ;;  %v7049_v29 = vld [vmem:[%s6245_s18 + $0xc8] sm:$0x1]  ;;  %v5878_v42 = vld [vmem:[%s6245_s18 + $0xb4] sm:$0xff] }
 0x166   : > { %v2463_v2 = vpop.f32.mrf.mxu0  ;;  %v7017_v11 = vadd.f32 %v6937_v39, %v2528_v48  ;;  %v7022_v38 = vpop.f32.mrf.mxu3  ;;  %v2350_v39 = vunpack.c.l.b16 %v2260_v49  ;;  %v2278_v44 = vor.u32 %v2277_v53, %v2274_v23  ;;  %v2293_v23 = vrot.slane %v2291_v28, 5 }
 0x167   : > { %v1496_v33 = vpop.f32.mrf.mxu2  ;;  %v2289_v59 = vrot.slane %v2288_v22, 4 }
 0x168   : > { %v1564_v14 = vadd.f32 %v1496_v33, %v6658_v51  ;;  %v7028_v41 = vpop.f32.mrf.mxu1  ;;  %v2369_v49 = vpack.c.b16 %v2351_v46, %v2350_v39  ;;  %v1342_v33 = vrot.slane %v6159_v61, 5  ;;  %v2279_v54 = vrot.slane %v2278_v44, 4 }
 0x169   : > { %v2724_v39 = vrot.slane %v5407_v32, 5  ;;  %v5207_v44 = vrot.slane %v1205_v5, 9  ;;  %v2294_v22 = vsel %vm6273_vm3, %v2289_v59, %v2293_v23  ;;  %v2305_v5 = vshll.u32 %v5407_v32, 16 }
 0x16a   : > { %v1863_v51 = vadd.f32 %v6977_v30, %v1564_v14  ;;  %v2780_v14 = vpack.c.b16 %v2763_v62, %v2762_v1  ;;  %v2284_v28 = vsel %vm6273_vm3, %v2279_v54, %v7026_v15  ;;  %v2727_v62 = vrot.slane %v7049_v29, 5  ;;  %v5621_v54 = vld [vmem:[%s6245_s18 + $0x18] sm:$0xf] }
 0x16b   : > { %v2309_v61 = vshrl.u32 %v5407_v32, 16  ;;  %v2352_v59 = vunpack.c.l.b16 %v2284_v28 }
 0x16c   : > { %v2529_v48 = vadd.f32 %v6988_v37, %v1863_v51  ;;  %v6160_v51 = vld [vmem:[%s6245_s18 + $0xb0] sm:$0x1] }
 0x16d   : > { %v1345_v35 = vrot.slane %v6160_v51, 5 }
 0x16e   : > { %v7038_v8 = vpop.f32.mrf.mxu0  ;;  %v7041_v50 = vadd.f32 %v6954_v17, %v2529_v48  ;;  %v7046_v53 = vpop.f32.mrf.mxu3  ;;  %v5452_v17 = vld [vmem:[%s6245_s18 + $0xc0] sm:$0xe]  ;;  %v2726_v48 = vrot.slane %v2724_v39, 4 }
 0x16f   : > { %v1498_v30 = vpop.f32.mrf.mxu2  ;;  %v5468_v1 = vrot.slane %v5452_v17, 9  ;;  %v7079_v17 = vld [vmem:[%s6245_s18 + $0x1c] sm:$0xf] }
 0x170   : > { %v1565_v37 = vadd.f32 %v1498_v30, %v6677_v27  ;;  %v7053_v46 = vpop.f32.mrf.mxu1  ;;  %v1344_v27 = vrot.slane %v1342_v33, 4  ;;  %v2299_v30 = vshll.u32 %v5406_v26, 16 }
 0x171   : > { %5434 = vmatmul.msk.bf16.gmra.mxu0 %vm824_vm0, %v2369_v49 }
 0x172   : > { %v1864_v20 = vadd.f32 %v6996_v0, %v1565_v37  ;;  %v2296_v0 = vshrl.u32 %v5406_v26, 16  ;;  %v1346_v23 = vsel %vm6492_vm7, %v1344_v27, %v1345_v35  ;;  %v2725_v26 = vsel %vm6492_vm7, %v5468_v1, %v2724_v39 }
 0x173   : > { %5495 = vmatmul.msk.bf16.gmra.mxu1 %vm824_vm0, %v2780_v14  ;;  %5359 = vmatmul.msk.bf16.gmra.mxu3 %vm824_vm0, %v5878_v42  ;;  %v1343_v14 = vsel %vm6492_vm7, %v5207_v44, %v1342_v33  ;;  %v2301_v33 = vrot.slane %v2299_v30, 5  ;;  %v7090_v44 = vrot.slane %v2305_v5, 5  ;;  %v2311_v35 = vrot.slane %v2309_v61, 4 }
 0x174   : > { %5234 = vmatmul.msk.bf16.gmra.mxu2 %vm824_vm0, %v1404_v43  ;;  %v2530_v49 = vadd.f32 %v2463_v2, %v1864_v20  ;;  %v2353_v2 = vunpack.c.l.b16 %v2294_v22  ;;  %v2298_v51 = vrot.slane %v2296_v0, 4  ;;  %v3311_v27 = vshrl.u32 %v5621_v54, 16 }
 0x175   : > { %v3314_v22 = vshll.u32 %v5621_v54, 16  ;;  %v1388_v39 = vunpack.c.l.b16 %v1346_v23  ;;  %v2312_v5 = vor.u32 %v2311_v35, %v7090_v44 }
 0x176   : > { %v7068_v15 = vpop.f32.mrf.mxu0  ;;  %v7072_v37 = vadd.f32 %v6981_v55, %v2530_v49  ;;  %v7082_v32 = vpop.f32.mrf.mxu3  ;;  %v2728_v55 = vsel %vm6492_vm7, %v2726_v48, %v2727_v62  ;;  %v3324_v49 = vshrl.u32 %v7079_v17, 16  ;;  %v2370_v1 = vpack.c.b16 %v2353_v2, %v2352_v59 }
 0x177   : > { %v1501_v43 = vpop.f32.mrf.mxu2  ;;  %v2764_v62 = vunpack.c.l.b16 %v2725_v26  ;;  %v2765_v48 = vunpack.c.l.b16 %v2728_v55  ;;  %v2302_v30 = vor.u32 %v2301_v33, %v2298_v51  ;;  %v3313_v61 = vrot.slane %v3311_v27, 4  ;;  %v6161_v26 = vld [vmem:[%s6245_s18 + $0xb8] sm:$0xf]  ;;  %v7107_v55 = vld [vmem:[%s6245_s18 + $0x20] sm:$0x1] }
 0x178   : > { %v1566_v42 = vadd.f32 %v1501_v43, %v6690_v18  ;;  %v7088_v20 = vpop.f32.mrf.mxu1  ;;  %v3320_v18 = vshll.u32 %v7079_v17, 16  ;;  %v1387_v43 = vunpack.c.l.b16 %v1343_v14  ;;  %v3326_v23 = vrot.slane %v3324_v49, 4  ;;  %v1206_v27 = vld [vmem:[%s6245_s18 + $0xb4] sm:$0xe] }
 0x179   : > { %v2781_v35 = vpack.c.b16 %v2765_v48, %v2764_v62  ;;  %v5208_v48 = vrot.slane %v1206_v27, 9 }
 0x17a   : > { %v1865_v28 = vadd.f32 %v7022_v38, %v1566_v42  ;;  %v2315_v38 = vshll.u32 %v7049_v29, 16  ;;  %v3316_v42 = vrot.slane %v3314_v22, 5  ;;  %v7100_v14 = vrot.slane %v3320_v18, 5 }
 0x17b   : > { %v1405_v29 = vpack.c.b16 %v1388_v39, %v1387_v43  ;;  %v2303_v22 = vrot.slane %v2302_v30, 4  ;;  %v2313_v18 = vrot.slane %v2312_v5, 4  ;;  %v3330_v43 = vshll.u32 %v7107_v55, 16  ;;  %v6162_v39 = vld [vmem:[%s6245_s18 + $0xbc] sm:$0x1] }
 0x17c   : > { %v2531_v0 = vadd.f32 %v7038_v8, %v1865_v28  ;;  %v1349_v8 = vrot.slane %v6161_v26, 5  ;;  %v2317_v49 = vrot.slane %v2315_v38, 5  ;;  %v3317_v26 = vor.u32 %v3316_v42, %v3313_v61  ;;  %v7132_v38 = vld [vmem:[%s6245_s18 + $0x28] sm:$0xf] }
 0x17d   : > { %v1352_v62 = vrot.slane %v6162_v39, 5 }
 0x17e   : > { %v7098_v54 = vpop.f32.mrf.mxu0  ;;  %v7103_v59 = vadd.f32 %v7002_v45, %v2531_v0  ;;  %v7110_v33 = vpop.f32.mrf.mxu3  ;;  %v5879_v45 = vld [vmem:[%s6245_s18 + $0xc0] sm:$0xff]  ;;  %v2318_v5 = vsel %vm6273_vm3, %v2313_v18, %v2317_v49  ;;  %v3318_v42 = vrot.slane %v3317_v26, 4  ;;  %v3344_v49 = vshll.u32 %v7132_v38, 16 }
 0x17f   : > { %v1503_v2 = vpop.f32.mrf.mxu2 }
 0x180   : > { %v1567_v51 = vadd.f32 %v1503_v2, %v6709_v57  ;;  %v7114_v28 = vpop.f32.mrf.mxu1  ;;  %v3327_v57 = vor.u32 %v3326_v23, %v7100_v14  ;;  %v1351_v2 = vrot.slane %v1349_v8, 4 }
 0x181   : > { %5435 = vmatmul.msk.bf16.gmra.mxu0 %vm824_vm0, %v2370_v1  ;;  %v5624_v1 = vld [vmem:[%s6245_s18 + $0x24] sm:$0xf] }
 0x182   : > { %v1866_v0 = vadd.f32 %v7046_v53, %v1567_v51  ;;  %v2308_v53 = vsel %vm6273_vm3, %v2303_v22, %v7090_v44  ;;  %v3328_v23 = vrot.slane %v3327_v57, 4  ;;  %v3332_v51 = vrot.slane %v3330_v43, 5 }
 0x183   : > { %5496 = vmatmul.msk.bf16.gmra.mxu1 %vm824_vm0, %v2781_v35  ;;  %5360 = vmatmul.msk.bf16.gmra.mxu3 %vm824_vm0, %v5879_v45  ;;  %v1350_v35 = vsel %vm6492_vm7, %v5208_v48, %v1349_v8  ;;  %v1353_v44 = vsel %vm6492_vm7, %v1351_v2, %v1352_v62  ;;  %v3335_v27 = vshrl.u32 %v5624_v1, 16  ;;  %v3338_v18 = vshll.u32 %v5624_v1, 16  ;;  %v5697_v1 = vld [vmem:[%s6245_s18 + $0x18] sm:$0xe] }
 0x184   : > { %5235 = vmatmul.msk.bf16.gmra.mxu2 %vm824_vm0, %v1405_v29  ;;  %v2532_v30 = vadd.f32 %v7068_v15, %v1866_v0  ;;  %v3348_v0 = vshrl.u32 %v7132_v38, 16  ;;  %v2354_v26 = vunpack.c.l.b16 %v2308_v53  ;;  %v2355_v57 = vunpack.c.l.b16 %v2318_v5 }
 0x185   : > { %v3333_v43 = vsel %vm6273_vm3, %v3328_v23, %v3332_v51  ;;  %v1389_v39 = vunpack.c.l.b16 %v1350_v35  ;;  %v1390_v62 = vunpack.c.l.b16 %v1353_v44  ;;  %v3994_v48 = vrot.slane %v7079_v17, 5  ;;  %v7167_v23 = vld [vmem:[%s6245_s18 + $0x2c] sm:$0x1] }
 0x186   : > { %v2473_v61 = vpop.f32.mrf.mxu0  ;;  %v7135_v29 = vadd.f32 %v7028_v41, %v2532_v30  ;;  %v7142_v22 = vpop.f32.mrf.mxu3  ;;  %v3337_v2 = vrot.slane %v3335_v27, 4  ;;  %v3340_v30 = vrot.slane %v3338_v18, 5  ;;  %v3346_v53 = vrot.slane %v3344_v49, 5 }
 0x187   : > { %v1506_v15 = vpop.f32.mrf.mxu2  ;;  %v1406_v44 = vpack.c.b16 %v1390_v62, %v1389_v39  ;;  %v5713_v27 = vrot.slane %v5697_v1, 9 }
 0x188   : > { %v1568_v45 = vadd.f32 %v1506_v15, %v6724_v63  ;;  %v7146_v41 = vpop.f32.mrf.mxu1  ;;  %v3323_v63 = vsel %vm6273_vm3, %v3318_v42, %v7100_v14  ;;  %v2371_v15 = vpack.c.b16 %v2355_v57, %v2354_v26  ;;  %v3700_v42 = vunpack.c.l.b16 %v3333_v43 }
 0x189   : > { %v3699_v14 = vunpack.c.l.b16 %v3323_v63  ;;  %v3341_v26 = vor.u32 %v3340_v30, %v3337_v2 }
 0x18a   : > { %v1867_v8 = vadd.f32 %v7082_v32, %v1568_v45  ;;  %v3350_v32 = vrot.slane %v3348_v0, 4  ;;  %v3996_v45 = vrot.slane %v3994_v48, 4  ;;  %v5908_v0 = vld [vmem:[%s7164_s29] sm:$0xff] }
 0x18b   : > { %v3731_v63 = vpack.c.b16 %v3700_v42, %v3699_v14  ;;  %v3342_v39 = vrot.slane %v3341_v26, 4 }
 0x18c   : > { %v2533_v5 = vadd.f32 %v7098_v54, %v1867_v8  ;;  %v3997_v54 = vrot.slane %v7107_v55, 5  ;;  %v3351_v57 = vor.u32 %v3350_v32, %v3346_v53  ;;  %v3354_v8 = vshll.u32 %v7167_v23, 16  ;;  %v5627_v32 = vld [vmem:[%s6245_s18 + $0x30] sm:$0xf] }
 0x18e   : > { %v2476_v51 = vpop.f32.mrf.mxu0  ;;  %v7170_v17 = vadd.f32 %v7053_v46, %v2533_v5  ;;  %v7174_v49 = vpop.f32.mrf.mxu3  ;;  %v3998_v55 = vsel %vm6492_vm7, %v3996_v45, %v3997_v54  ;;  %v3352_v62 = vrot.slane %v3351_v57, 4  ;;  %v3356_v2 = vrot.slane %v3354_v8, 5  ;;  %v7191_v5 = vld [vmem:[%s6245_s18 + $0x34] sm:$0xf] }
 0x18f   : > { %v1508_v35 = vpop.f32.mrf.mxu2  ;;  %v4110_v14 = vunpack.c.l.b16 %v3998_v55  ;;  %v3359_v45 = vshrl.u32 %v5627_v32, 16  ;;  %v3362_v54 = vshll.u32 %v5627_v32, 16 }
 0x190   : > { %v1569_v18 = vadd.f32 %v1508_v35, %v6754_v21  ;;  %v7179_v46 = vpop.f32.mrf.mxu1  ;;  %v3995_v21 = vsel %vm6492_vm7, %v5713_v27, %v3994_v48 }
 0x191   : > { %5436 = vmatmul.msk.bf16.gmra.mxu0 %vm824_vm0, %v2371_v15  ;;  %v4109_v15 = vunpack.c.l.b16 %v3995_v21  ;;  %v3364_v21 = vrot.slane %v3362_v54, 5 }
 0x192   : > { %v1868_v43 = vadd.f32 %v7110_v33, %v1569_v18  ;;  %v3372_v18 = vshrl.u32 %v7191_v5, 16 }
 0x193   : > { %5821 = vmatmul.msk.bf16.vlgmr.msra.gmra.mxu1 %vm4587_vm8, %v5908_v0  ;;  %5681 = vmatmul.msk.bf16.vlgmr.msra.gmra.mxu3 %vm824_vm0, %v3731_v63  ;;  %v5698_v63 = vld [vmem:[%s6245_s18 + $0x24] sm:$0xe] }
 0x194   : > { %5236 = vmatmul.msk.bf16.gmra.mxu2 %vm824_vm0, %v1406_v44  ;;  %v2534_v1 = vadd.f32 %v2473_v61, %v1868_v43  ;;  %v3347_v44 = vsel %vm6273_vm3, %v3342_v39, %v3346_v53  ;;  %v3357_v61 = vsel %vm6273_vm3, %v3352_v62, %v3356_v2  ;;  %v4001_v53 = vrot.slane %v7132_v38, 5  ;;  %v7209_v2 = vld [vmem:[%s6245_s18 + $0x38] sm:$0x1] }
 0x195   : > { %v3701_v26 = vunpack.c.l.b16 %v3347_v44  ;;  %v3702_v57 = vunpack.c.l.b16 %v3357_v61  ;;  %v3361_v43 = vrot.slane %v3359_v45, 4  ;;  %v3374_v39 = vrot.slane %v3372_v18, 4 }
 0x196   : > { %v2478_v30 = vpop.f32.mrf.mxu0  ;;  %v7194_v33 = vadd.f32 %v7088_v20, %v2534_v1  ;;  %v1815_v35 = vpop.f32.mrf.mxu3  ;;  %v3368_v20 = vshll.u32 %v7191_v5, 16  ;;  %v5714_v38 = vrot.slane %v5698_v63, 9  ;;  %v4004_v61 = vrot.slane %v7167_v23, 5 }
 0x197   : > { %v1511_v48 = vpop.f32.mrf.mxu2  ;;  %v3365_v45 = vor.u32 %v3364_v21, %v3361_v43  ;;  %v7235_v43 = vld [vmem:[%s6245_s18 + $0x40] sm:$0xf] }
 0x198   : > { %v1570_v42 = vadd.f32 %v1511_v48, %v6774_v47  ;;  %v7201_v27 = vpop.f32.mrf.mxu1  ;;  %v4141_v47 = vpack.c.b16 %v4110_v14, %v4109_v15  ;;  %v3370_v55 = vrot.slane %v3368_v20, 5  ;;  %v5886_v48 = vld [vmem:[%s6245_s18 + $0x18] sm:$0xff]  ;;  %v5909_v14 = vld [vmem:[%s7164_s29 + $0x8] sm:$0xff]  ;;  %v4002_v20 = vsel %vm6492_vm7, %v5714_v38, %v4001_v53 }
 0x199   : > { %v3392_v38 = vshll.u32 %v7235_v43, 16 }
 0x19a   : > { %v1869_v0 = vadd.f32 %v7142_v22, %v1570_v42  ;;  %v3732_v42 = vpack.c.b16 %v3702_v57, %v3701_v26  ;;  %v3375_v54 = vor.u32 %v3374_v39, %v3370_v55 }
 0x19c   : > { %v2535_v8 = vadd.f32 %v2476_v51, %v1869_v0  ;;  %v4003_v51 = vrot.slane %v4001_v53, 4  ;;  %v3366_v0 = vrot.slane %v3365_v45, 4 }
 0x19e   : > { %v2481_v62 = vpop.f32.mrf.mxu0  ;;  %v7212_v1 = vadd.f32 %v7114_v28, %v2535_v8  ;;  %v1817_v15 = vpop.f32.mrf.mxu3  ;;  %v3378_v28 = vshll.u32 %v7209_v2, 16  ;;  %v4005_v23 = vsel %vm6492_vm7, %v4003_v51, %v4004_v61  ;;  %v5630_v8 = vld [vmem:[%s6245_s18 + $0x3c] sm:$0xf] }
 0x19f   : > { %v1513_v22 = vpop.f32.mrf.mxu2  ;;  %v4112_v39 = vunpack.c.l.b16 %v4005_v23  ;;  %v3394_v23 = vrot.slane %v3392_v38, 5 }
 0x1a0   : > { %v1571_v32 = vadd.f32 %v1513_v22, %v6796_v56  ;;  %v7217_v44 = vpop.f32.mrf.mxu1  ;;  %v3380_v26 = vrot.slane %v3378_v28, 5  ;;  %v4008_v28 = vrot.slane %v7191_v5, 5 }
 0x1a1   : > { %5741 = vmatmul.msk.bf16.vlgmr.msra.gmra.mxu0 %vm824_vm0, %v4141_v47  ;;  %v3376_v47 = vrot.slane %v3375_v54, 4 }
 0x1a2   : > { %v1870_v56 = vadd.f32 %v7174_v49, %v1571_v32  ;;  %v3371_v32 = vsel %vm6273_vm3, %v3366_v0, %v3370_v55 }
 0x1a3   : > { %5822 = vmatmul.msk.bf16.gmra.mxu1 %vm4587_vm8, %v5909_v14  ;;  %5682 = vmatmul.msk.bf16.gmra.mxu3 %vm824_vm0, %v3732_v42  ;;  %v3383_v14 = vshrl.u32 %v5630_v8, 16  ;;  %v3386_v42 = vshll.u32 %v5630_v8, 16  ;;  %v3703_v45 = vunpack.c.l.b16 %v3371_v32  ;;  %v4010_v32 = vrot.slane %v4008_v28, 4 }
 0x1a4   : > { %5605 = vmatmul.msk.bf16.vlgmr.msra.gmra.mxu2 %vm824_vm0, %v5886_v48  ;;  %v2536_v18 = vadd.f32 %v2478_v30, %v1870_v56  ;;  %v4111_v30 = vunpack.c.l.b16 %v4002_v20  ;;  %v3381_v48 = vsel %vm6273_vm3, %v3376_v47, %v3380_v26  ;;  %v5699_v20 = vld [vmem:[%s6245_s18 + $0x30] sm:$0xe]  ;;  %v7252_v26 = vld [vmem:[%s6245_s18 + $0x44] sm:$0x1] }
 0x1a5   : > { %v3704_v54 = vunpack.c.l.b16 %v3381_v48  ;;  %v3385_v55 = vrot.slane %v3383_v14, 4 }
 0x1a6   : > { %v2483_v57 = vpop.f32.mrf.mxu0  ;;  %v7232_v49 = vadd.f32 %v7146_v41, %v2536_v18  ;;  %v1820_v53 = vpop.f32.mrf.mxu3  ;;  %v4142_v51 = vpack.c.b16 %v4112_v39, %v4111_v30  ;;  %v3388_v18 = vrot.slane %v3386_v42, 5  ;;  %v5715_v39 = vrot.slane %v5699_v20, 9  ;;  %v5633_v42 = vld [vmem:[%s6245_s18 + $0x48] sm:$0xf] }
 0x1a7   : > { %v1516_v63 = vpop.f32.mrf.mxu2  ;;  %v3733_v30 = vpack.c.b16 %v3704_v54, %v3703_v45 }
 0x1a8   : > { %v1572_v21 = vadd.f32 %v1516_v63, %v6553_v3  ;;  %v7238_v22 = vpop.f32.mrf.mxu1  ;;  %v3396_v3 = vshrl.u32 %v7235_v43, 16  ;;  %v3389_v14 = vor.u32 %v3388_v18, %v3385_v55 }
 0x1aa   : > { %v1871_v41 = vadd.f32 %v1815_v35, %v1572_v21  ;;  %v3398_v35 = vrot.slane %v3396_v3, 4  ;;  %v5910_v21 = vld [vmem:[%s7164_s29 + $0x10] sm:$0xff]  ;;  %v4009_v3 = vsel %vm6492_vm7, %v5715_v39, %v4008_v28  ;;  %v3410_v28 = vshll.u32 %v5633_v42, 16 }
 0x1ac   : > { %v2537_v61 = vadd.f32 %v2481_v62, %v1871_v41  ;;  %v5887_v62 = vld [vmem:[%s6245_s18 + $0x24] sm:$0xff]  ;;  %v3399_v41 = vor.u32 %v3398_v35, %v3394_v23 }
 0x1ae   : > { %v2486_v56 = vpop.f32.mrf.mxu0  ;;  %v7249_v0 = vadd.f32 %v7179_v46, %v2537_v61  ;;  %v7256_v63 = vpop.f32.mrf.mxu3  ;;  %v4011_v46 = vrot.slane %v7209_v2, 5  ;;  %v7273_v2 = vld [vmem:[%s6245_s18 + $0x4c] sm:$0xf]  ;;  %v3390_v61 = vrot.slane %v3389_v14, 4  ;;  %v3400_v45 = vrot.slane %v3399_v41, 4 }
 0x1af   : > { %v1518_v47 = vpop.f32.mrf.mxu2  ;;  %v3412_v14 = vrot.slane %v3410_v28, 5 }
 0x1b0   : > { %v1573_v8 = vadd.f32 %v1518_v47, %v6564_v40  ;;  %v7259_v5 = vpop.f32.mrf.mxu1  ;;  %v3402_v40 = vshll.u32 %v7252_v26, 16  ;;  %v3416_v47 = vshll.u32 %v7273_v2, 16 }
 0x1b1   : > { %5742 = vmatmul.msk.bf16.gmra.mxu0 %vm824_vm0, %v4142_v51  ;;  %v4012_v51 = vsel %vm6492_vm7, %v4010_v32, %v4011_v46 }
 0x1b2   : > { %v1872_v48 = vadd.f32 %v1817_v15, %v1573_v8  ;;  %v3404_v54 = vrot.slane %v3402_v40, 5  ;;  %v3420_v8 = vshrl.u32 %v7273_v2, 16  ;;  %v3418_v41 = vrot.slane %v3416_v47, 5  ;;  %v5911_v47 = vld [vmem:[%s7164_s29 + $0x18] sm:$0xff] }
 0x1b3   : > { %5823 = vmatmul.msk.bf16.gmra.mxu1 %vm4587_vm8, %v5910_v21  ;;  %5683 = vmatmul.msk.bf16.gmra.mxu3 %vm824_vm0, %v3733_v30  ;;  %v4113_v21 = vunpack.c.l.b16 %v4009_v3  ;;  %v4114_v30 = vunpack.c.l.b16 %v4012_v51 }
 0x1b4   : > { %5606 = vmatmul.msk.bf16.gmra.mxu2 %vm824_vm0, %v5887_v62  ;;  %v2538_v38 = vadd.f32 %v2483_v57, %v1872_v48  ;;  %v3407_v57 = vshrl.u32 %v5633_v42, 16  ;;  %v3405_v32 = vsel %vm6273_vm3, %v3400_v45, %v3404_v54  ;;  %v5700_v48 = vld [vmem:[%s6245_s18 + $0x3c] sm:$0xe]  ;;  %v3422_v40 = vrot.slane %v3420_v8, 4 }
 0x1b5   : > { %v3706_v51 = vunpack.c.l.b16 %v3405_v32  ;;  %v5716_v45 = vrot.slane %v5700_v48, 9  ;;  %v4018_v54 = vrot.slane %v7252_v26, 5 }
 0x1b6   : > { %v2488_v15 = vpop.f32.mrf.mxu0  ;;  %v7276_v55 = vadd.f32 %v7201_v27, %v2538_v38  ;;  %v7279_v35 = vpop.f32.mrf.mxu3  ;;  %v3395_v27 = vsel %vm6273_vm3, %v3390_v61, %v3394_v23  ;;  %v3409_v46 = vrot.slane %v3407_v57, 4  ;;  %v4143_v38 = vpack.c.b16 %v4114_v30, %v4113_v21 }
 0x1b7   : > { %v1521_v20 = vpop.f32.mrf.mxu2  ;;  %v3705_v3 = vunpack.c.l.b16 %v3395_v27  ;;  %v3423_v8 = vor.u32 %v3422_v40, %v3418_v41  ;;  %v5636_v40 = vld [vmem:[%s6245_s18 + $0x54] sm:$0xf] }
 0x1b8   : > { %v1574_v18 = vadd.f32 %v1521_v20, %v6585_v9  ;;  %v7283_v62 = vpop.f32.mrf.mxu1  ;;  %v4015_v9 = vrot.slane %v7235_v43, 5 }
 0x1b9   : > { %v3424_v32 = vrot.slane %v3423_v8, 4 }
 0x1ba   : > { %v1873_v39 = vadd.f32 %v1820_v53, %v1574_v18  ;;  %v7292_v53 = vld [vmem:[%s6245_s18 + $0x50] sm:$0x1]  ;;  %v4017_v43 = vrot.slane %v4015_v9, 4  ;;  %v4016_v26 = vsel %vm6492_vm7, %v5716_v45, %v4015_v9 }
 0x1bb   : > { %v5888_v18 = vld [vmem:[%s6245_s18 + $0x30] sm:$0xff]  ;;  %v3426_v21 = vshll.u32 %v7292_v53, 16 }
 0x1bc   : > { %v2539_v42 = vadd.f32 %v2486_v56, %v1873_v39  ;;  %v3413_v56 = vor.u32 %v3412_v14, %v3409_v46 }
 0x1bd   : > { %v3428_v46 = vrot.slane %v3426_v21, 5 }
 0x1be   : > { %v2491_v20 = vpop.f32.mrf.mxu0  ;;  %v7295_v23 = vadd.f32 %v7217_v44, %v2539_v42  ;;  %v1827_v28 = vpop.f32.mrf.mxu3  ;;  %v3734_v44 = vpack.c.b16 %v3706_v51, %v3705_v3  ;;  %v3414_v27 = vrot.slane %v3413_v56, 4  ;;  %v7315_v42 = vld [vmem:[%s6245_s18 + $0x58] sm:$0xf] }
 0x1bf   : > { %v1523_v61 = vpop.f32.mrf.mxu2 }
 0x1c0   : > { %v1575_v57 = vadd.f32 %v1523_v61, %v6596_v36  ;;  %v7302_v30 = vpop.f32.mrf.mxu1  ;;  %v4019_v36 = vsel %vm6492_vm7, %v4017_v43, %v4018_v54  ;;  %v3419_v45 = vsel %vm6273_vm3, %v3414_v27, %v3418_v41  ;;  %v3431_v54 = vshrl.u32 %v5636_v40, 16 }
 0x1c1   : > { %5743 = vmatmul.msk.bf16.gmra.mxu0 %vm824_vm0, %v4143_v38  ;;  %v4115_v38 = vunpack.c.l.b16 %v4016_v26  ;;  %v4116_v3 = vunpack.c.l.b16 %v4019_v36  ;;  %v3707_v56 = vunpack.c.l.b16 %v3419_v45  ;;  %v4022_v41 = vrot.slane %v7273_v2, 5 }
 0x1c2   : > { %v1874_v39 = vadd.f32 %v7256_v63, %v1575_v57  ;;  %v3434_v57 = vshll.u32 %v5636_v40, 16 }
 0x1c3   : > { %5824 = vmatmul.msk.bf16.gmra.mxu1 %vm4587_vm8, %v5911_v47  ;;  %5684 = vmatmul.msk.bf16.gmra.mxu3 %vm824_vm0, %v3734_v44  ;;  %v5701_v44 = vld [vmem:[%s6245_s18 + $0x48] sm:$0xe] }
 0x1c4   : > { %5607 = vmatmul.msk.bf16.gmra.mxu2 %vm824_vm0, %v5888_v18  ;;  %v2540_v48 = vadd.f32 %v2488_v15, %v1874_v39  ;;  %v3429_v15 = vsel %vm6273_vm3, %v3424_v32, %v3428_v46  ;;  %v3444_v18 = vshrl.u32 %v7315_v42, 16  ;;  %v3433_v39 = vrot.slane %v3431_v54, 4  ;;  %v7333_v46 = vld [vmem:[%s6245_s18 + $0x5c] sm:$0x1] }
 0x1c5   : > { %v3708_v8 = vunpack.c.l.b16 %v3429_v15  ;;  %v3436_v26 = vrot.slane %v3434_v57, 5  ;;  %v5717_v2 = vrot.slane %v5701_v44, 9  ;;  %v4025_v15 = vrot.slane %v7292_v53, 5 }
 0x1c6   : > { %v2493_v14 = vpop.f32.mrf.mxu0  ;;  %v7318_v63 = vadd.f32 %v7238_v22, %v2540_v48  ;;  %v1830_v61 = vpop.f32.mrf.mxu3  ;;  %v3440_v22 = vshll.u32 %v7315_v42, 16  ;;  %v3446_v27 = vrot.slane %v3444_v18, 4 }
 0x1c7   : > { %v1526_v9 = vpop.f32.mrf.mxu2  ;;  %v3437_v54 = vor.u32 %v3436_v26, %v3433_v39  ;;  %v7358_v39 = vld [vmem:[%s6245_s18 + $0x64] sm:$0xf] }
 0x1c8   : > { %v1576_v51 = vadd.f32 %v1526_v9, %v6617_v13  ;;  %v7325_v43 = vpop.f32.mrf.mxu1  ;;  %v4144_v13 = vpack.c.b16 %v4116_v3, %v4115_v38  ;;  %v3442_v36 = vrot.slane %v3440_v22, 5  ;;  %v5889_v9 = vld [vmem:[%s6245_s18 + $0x3c] sm:$0xff] }
 0x1c9   : > { %v5912_v3 = vld [vmem:[%s7164_s29 + $0x20] sm:$0xff]  ;;  %v3438_v53 = vrot.slane %v3437_v54, 4 }
 0x1ca   : > { %v1875_v47 = vadd.f32 %v7279_v35, %v1576_v51  ;;  %v3735_v51 = vpack.c.b16 %v3708_v8, %v3707_v56  ;;  %v3447_v57 = vor.u32 %v3446_v27, %v3442_v36 }
 0x1cc   : > { %v2541_v21 = vadd.f32 %v2491_v20, %v1875_v47  ;;  %v4024_v20 = vrot.slane %v4022_v41, 4 }
 0x1ce   : > { %v2496_v32 = vpop.f32.mrf.mxu0  ;;  %v7336_v48 = vadd.f32 %v7259_v5, %v2541_v21  ;;  %v1832_v38 = vpop.f32.mrf.mxu3  ;;  %v3450_v5 = vshll.u32 %v7333_v46, 16  ;;  %v4026_v47 = vsel %vm6492_vm7, %v4024_v20, %v4025_v15  ;;  %v5639_v21 = vld [vmem:[%s6245_s18 + $0x60] sm:$0xf] }
 0x1cf   : > { %v1528_v35 = vpop.f32.mrf.mxu2  ;;  %v4118_v27 = vunpack.c.l.b16 %v4026_v47 }
 0x1d0   : > { %v1577_v40 = vadd.f32 %v1528_v35, %v6628_v60  ;;  %v7341_v45 = vpop.f32.mrf.mxu1  ;;  %v4023_v60 = vsel %vm6492_vm7, %v5717_v2, %v4022_v41  ;;  %v3452_v56 = vrot.slane %v3450_v5, 5  ;;  %v3464_v2 = vshll.u32 %v7358_v39, 16 }
 0x1d1   : > { %5744 = vmatmul.msk.bf16.gmra.mxu0 %vm824_vm0, %v4144_v13  ;;  %v3448_v13 = vrot.slane %v3447_v57, 4  ;;  %v4029_v5 = vrot.slane %v7315_v42, 5 }
 0x1d2   : > { %v1876_v22 = vadd.f32 %v1827_v28, %v1577_v40  ;;  %v3443_v40 = vsel %vm6273_vm3, %v3438_v53, %v3442_v36  ;;  %v3466_v47 = vrot.slane %v3464_v2, 5 }
 0x1d3   : > { %5825 = vmatmul.msk.bf16.gmra.mxu1 %vm4587_vm8, %v5912_v3  ;;  %5685 = vmatmul.msk.bf16.gmra.mxu3 %vm824_vm0, %v3735_v51  ;;  %v3455_v3 = vshrl.u32 %v5639_v21, 16  ;;  %v3458_v51 = vshll.u32 %v5639_v21, 16  ;;  %v3709_v54 = vunpack.c.l.b16 %v3443_v40  ;;  %v4031_v40 = vrot.slane %v4029_v5, 4 }
 0x1d4   : > { %5608 = vmatmul.msk.bf16.gmra.mxu2 %vm824_vm0, %v5889_v9  ;;  %v2542_v18 = vadd.f32 %v2493_v14, %v1876_v22  ;;  %v4117_v14 = vunpack.c.l.b16 %v4023_v60  ;;  %v3453_v9 = vsel %vm6273_vm3, %v3448_v13, %v3452_v56  ;;  %v5702_v60 = vld [vmem:[%s6245_s18 + $0x54] sm:$0xe]  ;;  %v7375_v56 = vld [vmem:[%s6245_s18 + $0x68] sm:$0x1] }
 0x1d5   : > { %v3710_v57 = vunpack.c.l.b16 %v3453_v9  ;;  %v3457_v36 = vrot.slane %v3455_v3, 4 }
 0x1d6   : > { %v2498_v8 = vpop.f32.mrf.mxu0  ;;  %v7355_v28 = vadd.f32 %v7283_v62, %v2542_v18  ;;  %v1835_v41 = vpop.f32.mrf.mxu3  ;;  %v4145_v20 = vpack.c.b16 %v4118_v27, %v4117_v14  ;;  %v3460_v18 = vrot.slane %v3458_v51, 5  ;;  %v5718_v27 = vrot.slane %v5702_v60, 9  ;;  %v5642_v51 = vld [vmem:[%s6245_s18 + $0x6c] sm:$0xf] }
 0x1d7   : > { %v1531_v44 = vpop.f32.mrf.mxu2  ;;  %v3736_v14 = vpack.c.b16 %v3710_v57, %v3709_v54 }
 0x1d8   : > { %v1578_v26 = vadd.f32 %v1531_v44, %v6649_v16  ;;  %v7361_v35 = vpop.f32.mrf.mxu1  ;;  %v3468_v16 = vshrl.u32 %v7358_v39, 16  ;;  %v3461_v3 = vor.u32 %v3460_v18, %v3457_v36 }
 0x1da   : > { %v1877_v62 = vadd.f32 %v1830_v61, %v1578_v26  ;;  %v3470_v61 = vrot.slane %v3468_v16, 4  ;;  %v5913_v26 = vld [vmem:[%s7164_s29 + $0x28] sm:$0xff]  ;;  %v4030_v16 = vsel %vm6492_vm7, %v5718_v27, %v4029_v5  ;;  %v3482_v5 = vshll.u32 %v5642_v51, 16 }
 0x1dc   : > { %v2543_v15 = vadd.f32 %v2496_v32, %v1877_v62  ;;  %v5890_v32 = vld [vmem:[%s6245_s18 + $0x48] sm:$0xff]  ;;  %v3471_v62 = vor.u32 %v3470_v61, %v3466_v47 }
 0x1de   : > { %v2501_v22 = vpop.f32.mrf.mxu0  ;;  %v7372_v53 = vadd.f32 %v7302_v30, %v2543_v15  ;;  %v7379_v44 = vpop.f32.mrf.mxu3  ;;  %v4032_v30 = vrot.slane %v7333_v46, 5  ;;  %v7396_v46 = vld [vmem:[%s6245_s18 + $0x70] sm:$0xf]  ;;  %v3462_v15 = vrot.slane %v3461_v3, 4  ;;  %v3472_v54 = vrot.slane %v3471_v62, 4 }
 0x1df   : > { %v1533_v13 = vpop.f32.mrf.mxu2  ;;  %v3484_v3 = vrot.slane %v3482_v5, 5 }
 0x1e0   : > { %v1579_v21 = vadd.f32 %v1533_v13, %v6660_v19  ;;  %v7382_v42 = vpop.f32.mrf.mxu1  ;;  %v3474_v19 = vshll.u32 %v7375_v56, 16  ;;  %v3488_v13 = vshll.u32 %v7396_v46, 16 }
 0x1e1   : > { %5745 = vmatmul.msk.bf16.gmra.mxu0 %vm824_vm0, %v4145_v20  ;;  %v4033_v20 = vsel %vm6492_vm7, %v4031_v40, %v4032_v30 }
 0x1e2   : > { %v1878_v9 = vadd.f32 %v1832_v38, %v1579_v21  ;;  %v3476_v57 = vrot.slane %v3474_v19, 5  ;;  %v3492_v21 = vshrl.u32 %v7396_v46, 16  ;;  %v3490_v62 = vrot.slane %v3488_v13, 5  ;;  %v5914_v13 = vld [vmem:[%s7164_s29 + $0x30] sm:$0xff] }
 0x1e3   : > { %5826 = vmatmul.msk.bf16.gmra.mxu1 %vm4587_vm8, %v5913_v26  ;;  %5686 = vmatmul.msk.bf16.gmra.mxu3 %vm824_vm0, %v3736_v14  ;;  %v4119_v26 = vunpack.c.l.b16 %v4030_v16  ;;  %v4120_v14 = vunpack.c.l.b16 %v4033_v20 }
 0x1e4   : > { %5609 = vmatmul.msk.bf16.gmra.mxu2 %vm824_vm0, %v5890_v32  ;;  %v2544_v2 = vadd.f32 %v2498_v8, %v1878_v9  ;;  %v3479_v8 = vshrl.u32 %v5642_v51, 16  ;;  %v3477_v40 = vsel %vm6273_vm3, %v3472_v54, %v3476_v57  ;;  %v5703_v9 = vld [vmem:[%s6245_s18 + $0x60] sm:$0xe]  ;;  %v3494_v19 = vrot.slane %v3492_v21, 4 }
 0x1e5   : > { %v3712_v20 = vunpack.c.l.b16 %v3477_v40  ;;  %v5719_v54 = vrot.slane %v5703_v9, 9  ;;  %v4039_v57 = vrot.slane %v7375_v56, 5 }
 0x1e6   : > { %v2503_v38 = vpop.f32.mrf.mxu0  ;;  %v7399_v36 = vadd.f32 %v7325_v43, %v2544_v2  ;;  %v7402_v61 = vpop.f32.mrf.mxu3  ;;  %v3467_v43 = vsel %vm6273_vm3, %v3462_v15, %v3466_v47  ;;  %v3481_v30 = vrot.slane %v3479_v8, 4  ;;  %v4146_v2 = vpack.c.b16 %v4120_v14, %v4119_v26 }
 0x1e7   : > { %v1536_v60 = vpop.f32.mrf.mxu2  ;;  %v3711_v16 = vunpack.c.l.b16 %v3467_v43  ;;  %v3495_v21 = vor.u32 %v3494_v19, %v3490_v62  ;;  %v5645_v19 = vld [vmem:[%s6245_s18 + $0x78] sm:$0xf] }
 0x1e8   : > { %v1580_v18 = vadd.f32 %v1536_v60, %v6681_v34  ;;  %v7406_v32 = vpop.f32.mrf.mxu1  ;;  %v4036_v34 = vrot.slane %v7358_v39, 5 }
 0x1e9   : > { %v3496_v40 = vrot.slane %v3495_v21, 4 }
 0x1ea   : > { %v1879_v27 = vadd.f32 %v1835_v41, %v1580_v18  ;;  %v7415_v41 = vld [vmem:[%s6245_s18 + $0x74] sm:$0x1]  ;;  %v4038_v39 = vrot.slane %v4036_v34, 4  ;;  %v4037_v56 = vsel %vm6492_vm7, %v5719_v54, %v4036_v34 }
 0x1eb   : > { %v5891_v18 = vld [vmem:[%s6245_s18 + $0x54] sm:$0xff]  ;;  %v3498_v26 = vshll.u32 %v7415_v41, 16 }
 0x1ec   : > { %v2545_v51 = vadd.f32 %v2501_v22, %v1879_v27  ;;  %v3485_v22 = vor.u32 %v3484_v3, %v3481_v30 }
 0x1ed   : > { %v3500_v30 = vrot.slane %v3498_v26, 5 }
 0x1ee   : > { %v2506_v60 = vpop.f32.mrf.mxu0  ;;  %v7418_v47 = vadd.f32 %v7341_v45, %v2545_v51  ;;  %v1842_v5 = vpop.f32.mrf.mxu3  ;;  %v3737_v45 = vpack.c.b16 %v3712_v20, %v3711_v16  ;;  %v3486_v43 = vrot.slane %v3485_v22, 4  ;;  %v7438_v51 = vld [vmem:[%s6245_s18 + $0x7c] sm:$0xf] }
 0x1ef   : > { %v1538_v15 = vpop.f32.mrf.mxu2 }
 0x1f0   : > { %v1581_v8 = vadd.f32 %v1538_v15, %v6692_v12  ;;  %v7425_v14 = vpop.f32.mrf.mxu1  ;;  %v4040_v12 = vsel %vm6492_vm7, %v4038_v39, %v4039_v57  ;;  %v3491_v54 = vsel %vm6273_vm3, %v3486_v43, %v3490_v62  ;;  %v3503_v57 = vshrl.u32 %v5645_v19, 16 }
 0x1f1   : > { %5746 = vmatmul.msk.bf16.gmra.mxu0 %vm824_vm0, %v4146_v2  ;;  %v4121_v2 = vunpack.c.l.b16 %v4037_v56  ;;  %v4122_v16 = vunpack.c.l.b16 %v4040_v12  ;;  %v3713_v22 = vunpack.c.l.b16 %v3491_v54  ;;  %v4043_v62 = vrot.slane %v7396_v46, 5 }
 0x1f2   : > { %v1880_v27 = vadd.f32 %v7379_v44, %v1581_v8  ;;  %v3506_v8 = vshll.u32 %v5645_v19, 16  ;;  %v8066_v19 = vld [vmem:[#allocation2_spill] sm:$0xff] }
 0x1f3   : > { %5827 = vmatmul.msk.bf16.gmra.mxu1 %vm4587_vm8, %v5914_v13  ;;  %5687 = vmatmul.msk.bf16.gmra.mxu3 %vm824_vm0, %v3737_v45  ;;  %v5704_v45 = vld [vmem:[%s6245_s18 + $0x6c] sm:$0xe]  ;;  %v4045_v54 = vrot.slane %v4043_v62, 4 }
 0x1f4   : > { %5610 = vmatmul.msk.bf16.gmra.mxu2 %vm824_vm0, %v5891_v18  ;;  %v2546_v9 = vadd.f32 %v2503_v38, %v1880_v27  ;;  %v3501_v38 = vsel %vm6273_vm3, %v3496_v40, %v3500_v30  ;;  %v3516_v18 = vshrl.u32 %v7438_v51, 16  ;;  %v3505_v27 = vrot.slane %v3503_v57, 4  ;;  %v7456_v30 = vld [vmem:[%s6245_s18 + $0x80] sm:$0x1] }
 0x1f5   : > { %v3714_v21 = vunpack.c.l.b16 %v3501_v38  ;;  %v3508_v56 = vrot.slane %v3506_v8, 5  ;;  %v4046_v57 = vrot.slane %v7415_v41, 5 }
 0x1f6   : > { %v2508_v3 = vpop.f32.mrf.mxu0  ;;  %v7441_v44 = vadd.f32 %v7361_v35, %v2546_v9  ;;  %v1845_v15 = vpop.f32.mrf.mxu3  ;;  %v3512_v35 = vshll.u32 %v7438_v51, 16  ;;  %v3518_v43 = vrot.slane %v3516_v18, 4 }
 0x1f7   : > { %v1541_v34 = vpop.f32.mrf.mxu2  ;;  %v3738_v46 = vpack.c.b16 %v3714_v21, %v3713_v22  ;;  %v3509_v8 = vor.u32 %v3508_v56, %v3505_v27  ;;  %v4047_v41 = vsel %vm6492_vm7, %v4045_v54, %v4046_v57  ;;  %v5648_v27 = vld [vmem:[%s6245_s18 + $0x84] sm:$0xf] }
 0x1f8   : > { %8064 = vst [vmem:[#allocation8_spill] sm:$0xff] %v7441_v44  ;;  %v1582_v20 = vadd.f32 %v1541_v34, %v6713_v24  ;;  %v7448_v39 = vpop.f32.mrf.mxu1  ;;  %v4147_v24 = vpack.c.b16 %v4122_v16, %v4121_v2  ;;  %v3514_v12 = vrot.slane %v3512_v35, 5  ;;  %v5892_v2 = vld [vmem:[%s6245_s18 + $0x60] sm:$0xff]  ;;  %v3522_v35 = vshll.u32 %v7456_v30, 16 }
 0x1fa   : > { %v1881_v13 = vadd.f32 %v7402_v61, %v1582_v20  ;;  %v5915_v20 = vld [vmem:[%s7164_s29 + $0x38] sm:$0xff] }
 0x1fc   : > { %v2547_v26 = vadd.f32 %v2506_v60, %v1881_v13  ;;  %v5720_v60 = vrot.slane %v5704_v45, 9 }
 0x1fe   : > { %v2511_v40 = vpop.f32.mrf.mxu0  ;;  %v7459_v9 = vadd.f32 %v7382_v42, %v2547_v26  ;;  %v7463_v16 = vpop.f32.mrf.mxu3  ;;  %v3519_v42 = vor.u32 %v3518_v43, %v3514_v12  ;;  %v4044_v13 = vsel %vm6492_vm7, %v5720_v60, %v4043_v62  ;;  %v3524_v26 = vrot.slane %v3522_v35, 5  ;;  %v7483_v43 = vld [vmem:[%s6245_s18 + $0x88] sm:$0xf] }
 0x1ff   : > { %v1543_v61 = vpop.f32.mrf.mxu2  ;;  %v3530_v60 = vshll.u32 %v5648_v27, 16  ;;  %v3536_v57 = vshll.u32 %v7483_v43, 16 }
 0x200   : > { %8065 = vst [vmem:[#allocation9_spill] sm:$0xff] %v7459_v9  ;;  %v1583_v34 = vadd.f32 %v1543_v61, %v8066_v19  ;;  %v7466_v38 = vpop.f32.mrf.mxu1  ;;  %v3520_v21 = vrot.slane %v3519_v42, 4  ;;  %v8068_v61 = vld [vmem:[#allocation3_spill] sm:$0xff]  ;;  %v5925_v42 = vld [vmem:[%s7492_s9] sm:$0xff]  }
 0x201   : > { %5747 = vmatmul.msk.bf16.gmra.mxu0 %vm824_vm0, %v4147_v24  ;;  %v3510_v24 = vrot.slane %v3509_v8, 4  ;;  %v3540_v8 = vshrl.u32 %v7483_v43, 16 }
 0x202   : > { %v1882_v18 = vadd.f32 %v1842_v5, %v1583_v34  ;;  %v4124_v34 = vunpack.c.l.b16 %v4047_v41 }
 0x203   : > { %5828 = vmatmul.msk.bf16.gmra.mxu1 %vm4587_vm8, %v5915_v20  ;;  %5688 = vmatmul.msk.bf16.gmra.mxu3 %vm824_vm0, %v3738_v46  ;;  %v3525_v20 = vsel %vm6273_vm3, %v3520_v21, %v3524_v26  ;;  %v3527_v46 = vshrl.u32 %v5648_v27, 16  ;;  %v5926_v26 = vunpack.c.l.bf16 %v5925_v42  ;;  %v5705_v27 = vld [vmem:[%s6245_s18 + $0x78] sm:$0xe] }
 0x204   : > { %5611 = vmatmul.msk.bf16.gmra.mxu2 %vm824_vm0, %v5892_v2  ;;  %v2548_v22 = vadd.f32 %v2508_v3, %v1882_v18  ;;  %v4123_v3 = vunpack.c.l.b16 %v4044_v13  ;;  %v3716_v18 = vunpack.c.l.b16 %v3525_v20 }
 0x205   : > { %v3529_v41 = vrot.slane %v3527_v46, 4  ;;  %v5721_v46 = vrot.slane %v5705_v27, 9 }
 0x206   : > { %v2513_v45 = vpop.f32.mrf.mxu0  ;;  %v7480_v5 = vadd.f32 %v7406_v32, %v2548_v22  ;;  %v7486_v19 = vpop.f32.mrf.mxu3  ;;  %v3515_v32 = vsel %vm6273_vm3, %v3510_v24, %v3514_v12  ;;  %v4148_v22 = vpack.c.b16 %v4124_v34, %v4123_v3  ;;  %v4050_v12 = vrot.slane %v7438_v51, 5  ;;  %v5916_v51 = vld [vmem:[%s7164_s29 + $0x40] sm:$0xff] }
 0x207   : > { %v1546_v56 = vpop.f32.mrf.mxu2  ;;  %v3715_v35 = vunpack.c.l.b16 %v3515_v32  ;;  %v3532_v24 = vrot.slane %v3530_v60, 5  ;;  %v8070_v32 = vld [vmem:[#allocation4_spill] sm:$0xff] }
 0x208   : > { %8067 = vst [vmem:[#allocation2_spill] sm:$0xff] %v7480_v5  ;;  %v1584_v62 = vadd.f32 %v1546_v56, %v8068_v61  ;;  %v7494_v2 = vpop.f32.mrf.mxu1  ;;  %v3542_v56 = vrot.slane %v3540_v8, 4  ;;  %v7509_v5 = vld [vmem:[%s6245_s18 + $0x8c] sm:$0x1]  ;;  %v4052_v60 = vrot.slane %v4050_v12, 4 }
 0x209   : > { %v3739_v3 = vpack.c.b16 %v3716_v18, %v3715_v35  ;;  %v5651_v35 = vld [vmem:[%s6245_s18 + $0x90] sm:$0xf] }
 0x20a   : > { %v1883_v54 = vadd.f32 %v1845_v15, %v1584_v62  ;;  %v3538_v15 = vrot.slane %v3536_v57, 5  ;;  %v3533_v57 = vor.u32 %v3532_v24, %v3529_v41  ;;  %v7529_v41 = vld [vmem:[%s6245_s18 + $0x94] sm:$0xf] }
 0x20c   : > { %v2549_v13 = vadd.f32 %v2511_v40, %v1883_v54  ;;  %v5893_v40 = vld [vmem:[%s6245_s18 + $0x6c] sm:$0xff] }
 0x20e   : > { %v2516_v21 = vpop.f32.mrf.mxu0  ;;  %v7506_v61 = vadd.f32 %v7425_v14, %v2549_v13  ;;  %v7513_v54 = vpop.f32.mrf.mxu3  ;;  %v4053_v14 = vrot.slane %v7456_v30, 5  ;;  %v4051_v30 = vsel %vm6492_vm7, %v5721_v46, %v4050_v12  ;;  %v8072_v12 = vld [vmem:[#allocation5_spill] sm:$0xff]  ;;  %v3560_v46 = vshll.u32 %v7529_v41, 16 }
 0x20f   : > { %v1548_v62 = vpop.f32.mrf.mxu2 }
 0x210   : > { %8069 = vst [vmem:[#allocation3_spill] sm:$0xff] %v7506_v61  ;;  %v1585_v20 = vadd.f32 %v1548_v62, %v8070_v32  ;;  %v4649_v34 = vpop.f32.mrf.mxu1  ;;  %v3543_v61 = vor.u32 %v3542_v56, %v3538_v15  ;;  %v3546_v62 = vshll.u32 %v7509_v5, 16 }
 0x211   : > { %5748 = vmatmul.msk.bf16.gmra.mxu0 %vm824_vm0, %v4148_v22  ;;  %v4650_v13 = vadd.f32 %v5926_v26, %v4649_v34  ;;  %v5927_v22 = vunpack.c.h.bf16 %v5925_v42  ;;  %v3534_v26 = vrot.slane %v3533_v57, 4  ;;  %v3551_v42 = vshrl.u32 %v5651_v35, 16 }
 0x212   : > { %v1884_v8 = vadd.f32 %v7463_v16, %v1585_v20  ;;  %v4054_v16 = vsel %vm6492_vm7, %v4052_v60, %v4053_v14  ;;  %v3544_v27 = vrot.slane %v3543_v61, 4  ;;  %v3548_v56 = vrot.slane %v3546_v62, 5 }
 0x213   : > { %v4729_v32 = vsub.f32 0.0, %v4650_v13  ;;  %5829 = vmatmul.msk.bf16.gmra.mxu1 %vm4587_vm8, %v5916_v51  ;;  %5689 = vmatmul.msk.bf16.gmra.mxu3 %vm824_vm0, %v3739_v3  ;;  %v3554_v51 = vshll.u32 %v5651_v35, 16  ;;  %v3564_v60 = vshrl.u32 %v7529_v41, 16  ;;  %v4125_v14 = vunpack.c.l.b16 %v4051_v30  ;;  %v5706_v35 = vld [vmem:[%s6245_s18 + $0x84] sm:$0xe] }
 0x214   : > { %5612 = vmatmul.msk.bf16.gmra.mxu2 %vm824_vm0, %v5893_v40  ;;  %v2550_v18 = vadd.f32 %v2513_v45, %v1884_v8  ;;  %v4126_v57 = vunpack.c.l.b16 %v4054_v16  ;;  %v3539_v13 = vsel %vm6273_vm3, %v3534_v26, %v3538_v15  ;;  %v3549_v62 = vsel %vm6273_vm3, %v3544_v27, %v3548_v56 }
 0x215   : > { %v4761_v45 = vmul.f32 1.442695, %v4729_v32  ;;  %v7547_v32 = vld [vmem:[%s7492_s9 + $0x8] sm:$0xff]   ;;  %v7554_v30 = vrot.slane %v3560_v46, 5  ;;  %v3717_v15 = vunpack.c.l.b16 %v3539_v13  ;;  %v3718_v26 = vunpack.c.l.b16 %v3549_v62 }
 0x216   : > { %v7531_v24 = vpop.f32.mrf.mxu0  ;;  %v7534_v20 = vadd.f32 %v7448_v39, %v2550_v18  ;;  %v7537_v34 = vpop.f32.mrf.mxu3  ;;  %v4057_v18 = vrot.slane %v7483_v43, 5  ;;  %v4149_v16 = vpack.c.b16 %v4126_v57, %v4125_v14  ;;  %v4060_v46 = vrot.slane %v7509_v5, 5  ;;  %v5894_v57 = vld [vmem:[%s6245_s18 + $0x78] sm:$0xff] }
 0x217   : > { %v1551_v40 = vpop.f32.mrf.mxu2  ;;  %6018 = vpow2.f32 %v4761_v45  ;;  %v5930_v45 = vunpack.c.l.bf16 %v7547_v32 }
 0x218   : > { %8071 = vst [vmem:[#allocation4_spill] sm:$0xff] %v7534_v20  ;;  %v1586_v3 = vadd.f32 %v1551_v40, %v8072_v12  ;;  %v4651_v61 = vpop.f32.mrf.mxu1  ;;  %v3553_v40 = vrot.slane %v3551_v42, 4  ;;  %v3556_v12 = vrot.slane %v3554_v51, 5  ;;  %v7552_v20 = vld [vmem:[%s6245_s18 + $0x98] sm:$0x1]  ;;  %v4059_v51 = vrot.slane %v4057_v18, 4 }
 0x219   : > { %v4652_v8 = vadd.f32 %v5927_v22, %v4651_v61 }
 0x21a   : > { %v1885_v39 = vadd.f32 %v7486_v19, %v1586_v3  ;;  %v3566_v19 = vrot.slane %v3564_v60, 4  ;;  %v5722_v3 = vrot.slane %v5706_v35, 9  ;;  %v3557_v61 = vor.u32 %v3556_v12, %v3553_v40 }
 0x21b   : > { %v4730_v27 = vsub.f32 0.0, %v4652_v8  ;;  %v3570_v60 = vshll.u32 %v7552_v20, 16  ;;  %v5917_v8 = vld [vmem:[%s7164_s29 + $0x48] sm:$0xff]  ;;  %v3740_v35 = vpack.c.b16 %v3718_v26, %v3717_v15  ;;  %v4061_v12 = vsel %vm6492_vm7, %v4059_v51, %v4060_v46 }
 0x21c   : > { %v2551_v22 = vadd.f32 %v2516_v21, %v1885_v39  ;;  %v8074_v21 = vld [vmem:[#allocation6_spill] sm:$0xff]  ;;  %v3567_v13 = vor.u32 %v3566_v19, %v7554_v30  ;;  %v4058_v40 = vsel %vm6492_vm7, %v5722_v3, %v4057_v18  ;;  %v5931_v18 = vunpack.c.h.bf16 %v7547_v32 }
 0x21d   : > { %v6019_v62 = vpop.eup %6018  ;;  %v4127_v46 = vunpack.c.l.b16 %v4058_v40 }
 0x21e   : > { %v4226_v56 = vpop.f32.mrf.mxu0  ;;  %v7558_v43 = vadd.f32 %v7466_v38, %v2551_v22  ;;  %v7564_v39 = vpop.f32.mrf.mxu3  ;;  %v4763_v22 = vmul.f32 1.442695, %v4730_v27  ;;  %v4825_v19 = vadd.f32 1.0, %v6019_v62  ;;  %v3568_v15 = vrot.slane %v3567_v13, 4  ;;  %v5654_v27 = vld [vmem:[%s6245_s18 + $0x9c] sm:$0xf] }
 0x21f   : > { %v1553_v42 = vpop.f32.mrf.mxu2 }
 0x220   : > { %8073 = vst [vmem:[#allocation5_spill] sm:$0xff] %v7558_v43  ;;  %v1587_v14 = vadd.f32 %v1553_v42, %v8074_v21  ;;  %v4654_v38 = vpop.f32.mrf.mxu1  ;;  %v3558_v42 = vrot.slane %v3557_v61, 4  ;;  %v3572_v21 = vrot.slane %v3570_v60, 5  ;;  %6020 = vpow2.f32 %v4763_v22  ;;  %v7605_v22 = vld [vmem:[%s7492_s9 + $0x10] sm:$0xff]  }
 0x221   : > { %5749 = vmatmul.msk.bf16.gmra.mxu0 %vm824_vm0, %v4149_v16  ;;  %v4655_v5 = vadd.f32 %v5930_v45, %v4654_v38  ;;  %v7583_v45 = vld [vmem:[%s6245_s18 + $0xa0] sm:$0xf]  ;;  %v4128_v61 = vunpack.c.l.b16 %v4061_v12  ;;  %6022 = vrcp.f32 %v4825_v19  ;;  %v4064_v19 = vrot.slane %v7529_v41, 5 }
 0x222   : > { %v1886_v43 = vadd.f32 %v7513_v54, %v1587_v14  ;;  %v3573_v32 = vsel %vm6273_vm3, %v3568_v15, %v3572_v21  ;;  %v3584_v13 = vshll.u32 %v7583_v45, 16  ;;  %v3588_v62 = vshrl.u32 %v7583_v45, 16  ;;  %v5707_v21 = vld [vmem:[%s6245_s18 + $0x90] sm:$0xe] }
 0x223   : > { %v4731_v16 = vsub.f32 0.0, %v4655_v5  ;;  %5830 = vmatmul.msk.bf16.gmra.mxu1 %vm4587_vm8, %v5917_v8  ;;  %5690 = vmatmul.msk.bf16.gmra.mxu3 %vm824_vm0, %v3740_v35  ;;  %v3578_v8 = vshll.u32 %v5654_v27, 16  ;;  %v4150_v35 = vpack.c.b16 %v4128_v61, %v4127_v46  ;;  %v5934_v61 = vunpack.c.l.bf16 %v7605_v22 }
 0x224   : > { %5613 = vmatmul.msk.bf16.gmra.mxu2 %vm824_vm0, %v5894_v57  ;;  %v2552_v54 = vadd.f32 %v7531_v24, %v1886_v43  ;;  %v3563_v24 = vsel %vm6273_vm3, %v3558_v42, %v7554_v30  ;;  %v7602_v30 = vld [vmem:[%s8051_s5] ss:$0 sm:$0xff]  ;;  %v5723_v41 = vrot.slane %v5707_v21, 9 }
 0x225   : > { %v4765_v43 = vmul.f32 1.442695, %v4731_v16  ;;  %v3719_v5 = vunpack.c.l.b16 %v3563_v24  ;;  %v7610_v42 = vld [vmem:[%s8052_s6] ss:$0 sm:$0xff]  ;;  %v3580_v15 = vrot.slane %v3578_v8, 5 }
 0x226   : > { %v7578_v26 = vpop.f32.mrf.mxu0  ;;  %v7586_v3 = vadd.f32 %v7494_v2, %v2552_v54  ;;  %v7592_v14 = vpop.f32.mrf.mxu3  ;;  %v3575_v2 = vshrl.u32 %v5654_v27, 16  ;;  %v7614_v54 = vrot.slane %v3584_v13, 5  ;;  %v7621_v24 = vld [vmem:[%s6245_s18 + $0xa4] sm:$0x1]  ;;  %v5918_v13 = vld [vmem:[%s7164_s29 + $0x50] sm:$0xff] }
 0x227   : > { %v3150_v51 = vpop.f32.mrf.mxu2  ;;  %v6021_v40 = vpop.eup %6020  ;;  %6024 = vpow2.f32 %v4765_v43 }
 0x228   : > { %8075 = vst [vmem:[#allocation6_spill] sm:$0xff] %v7586_v3  ;;  %v3230_v60 = vadd.f32 %v3150_v51, %v6853_v52  ;;  %v4656_v57 = vpop.f32.mrf.mxu1  ;;  %v3577_v16 = vrot.slane %v3575_v2, 4  ;;  %v6023_v27 = vpop.eup %6022  ;;  %v4826_v43 = vadd.f32 1.0, %v6021_v40  ;;  %v5895_v2 = vld [vmem:[%s6245_s18 + $0x84] sm:$0xff] }
 0x229   : > { %v4657_v52 = vadd.f32 %v5931_v18, %v4656_v57  ;;  %v3590_v18 = vrot.slane %v3588_v62, 4  ;;  %v4066_v62 = vrot.slane %v4064_v19, 4 }
 0x22a   : > { %v3896_v38 = vadd.f32 %v7537_v34, %v3230_v60  ;;  %v3720_v34 = vunpack.c.l.b16 %v3573_v32  ;;  %v3581_v40 = vor.u32 %v3580_v15, %v3577_v16  ;;  %6026 = vrcp.f32 %v4826_v43  ;;  %v7649_v15 = vld [vmem:[%s6245_s18 + $0xac] sm:$0xf] }
 0x22b   : > { %v3591_v21 = vor.u32 %v3590_v18, %v7614_v54 }
 0x22c   : > { %v4306_v12 = vadd.f32 %v4226_v56, %v3896_v38  ;;  %v4732_v56 = vsub.f32 0.0, %v4657_v52  ;;  %v4067_v38 = vrot.slane %v7552_v20, 5  ;;  %v4065_v20 = vsel %vm6492_vm7, %v5723_v41, %v4064_v19 }
 0x22d   : > { %v6025_v3 = vpop.eup %6024 }
 0x22e   : > { %v4342_v51 = vmul.f32 %v7602_v30, %v4306_v12  ;;  %v7617_v46 = vpop.f32.mrf.mxu0  ;;  %v7626_v8 = vpop.f32.mrf.mxu3  ;;  %v3741_v12 = vpack.c.b16 %v3720_v34, %v3719_v5  ;;  %v4827_v18 = vadd.f32 1.0, %v6025_v3  ;;  %v3608_v3 = vshll.u32 %v7649_v15, 16 }
 0x22f   : > { %v3152_v60 = vpop.f32.mrf.mxu2 }
 0x230   : > { %v4378_v32 = vadd.f32 %v7610_v42, %v4342_v51  ;;  %v3231_v57 = vadd.f32 %v3152_v60, %v6880_v25  ;;  %v4659_v52 = vpop.f32.mrf.mxu1  ;;  %v3594_v51 = vshll.u32 %v7621_v24, 16  ;;  %v4767_v60 = vmul.f32 1.442695, %v4732_v56 }
 0x231   : > { %5750 = vmatmul.msk.bf16.gmra.mxu0 %vm824_vm0, %v4150_v35  ;;  %v4660_v44 = vadd.f32 %v5934_v61, %v4659_v52  ;;  %v5657_v35 = vld [vmem:[%s6245_s18 + $0xa8] sm:$0xf]  ;;  %v3592_v56 = vrot.slane %v3591_v21, 4 }
 0x232   : > { %v4889_v25 = vmul.f32 %v6023_v27, %v4378_v32  ;;  %v3897_v9 = vadd.f32 %v7564_v39, %v3231_v57  ;;  %v4068_v39 = vsel %vm6492_vm7, %v4066_v62, %v4067_v38  ;;  %v3582_v27 = vrot.slane %v3581_v40, 4 }
 0x233   : > { %v4733_v16 = vsub.f32 0.0, %v4660_v44  ;;  %5831 = vmatmul.msk.bf16.gmra.mxu1 %vm4587_vm8, %v5918_v13  ;;  %5691 = vmatmul.msk.bf16.gmra.mxu3 %vm824_vm0, %v3741_v12  ;;  %v3596_v19 = vrot.slane %v3594_v51, 5  ;;  %6028 = vpow2.f32 %v4767_v60  ;;  %v5935_v44 = vunpack.c.h.bf16 %v7605_v22  ;;  %v6027_v12 = vpop.eup %6026 }
 0x234   : > { %v4921_v5 = vpack.c.bf16 %v4889_v25, %v4889_v25  ;;  %v4307_v34 = vadd.f32 %v7578_v26, %v3897_v9  ;;  %5614 = vmatmul.msk.bf16.gmra.mxu2 %vm824_vm0, %v5895_v2  ;;  %v3599_v61 = vshrl.u32 %v5657_v35, 16  ;;  %v3602_v32 = vshll.u32 %v5657_v35, 16  ;;  %v5708_v35 = vld [vmem:[%s6245_s18 + $0x9c] sm:$0xe] }
 0x235   : > { %v4769_v43 = vmul.f32 1.442695, %v4733_v16  ;;  %v3612_v57 = vshrl.u32 %v7649_v15, 16  ;;  %v4129_v38 = vunpack.c.l.b16 %v4065_v20  ;;  %v4130_v52 = vunpack.c.l.b16 %v4068_v39 }
 0x236   : > { %4954 = vst.msk [vmem:[%s7638_s16] sm:$0xf] %vm4953_vm9, %v4921_v5  ;;  %v4343_v9 = vmul.f32 %v7602_v30, %v4307_v34  ;;  %v7655_v26 = vpop.f32.mrf.mxu0  ;;  %v7662_v62 = vpop.f32.mrf.mxu3  ;;  %6030 = vrcp.f32 %v4827_v18  ;;  %v3587_v40 = vsel %vm6273_vm3, %v3582_v27, %v7614_v54  ;;  %v3597_v21 = vsel %vm6273_vm3, %v3592_v56, %v3596_v19  ;;  %v7673_v5 = vld [vmem:[%s7492_s9 + $0x18] sm:$0xff]   ;;  %v7679_v19 = vld [vmem:[%s6245_s18 + $0xb0] sm:$0x1] }
 0x237   : > { %v3155_v41 = vpop.f32.mrf.mxu2  ;;  %v4071_v51 = vrot.slane %v7583_v45, 5  ;;  %v3601_v20 = vrot.slane %v3599_v61, 4  ;;  %6032 = vpow2.f32 %v4769_v43  ;;  %v3604_v34 = vrot.slane %v3602_v32, 5 }
 0x238   : > { %v4379_v2 = vadd.f32 %v7610_v42, %v4343_v9  ;;  %v3232_v13 = vadd.f32 %v3155_v41, %v6902_v6  ;;  %v4661_v22 = vpop.f32.mrf.mxu1  ;;  %v7675_v16 = vrot.slane %v3608_v3, 5  ;;  %v3614_v54 = vrot.slane %v3612_v57, 4 }
 0x239   : > { %v4662_v60 = vadd.f32 %v5935_v44, %v4661_v22  ;;  %v6029_v39 = vpop.eup %6028  ;;  %v4151_v45 = vpack.c.b16 %v4130_v52, %v4129_v38  ;;  %v3721_v56 = vunpack.c.l.b16 %v3587_v40  ;;  %v5724_v9 = vrot.slane %v5708_v35, 9  ;;  %v5896_v40 = vld [vmem:[%s6245_s18 + $0x90] sm:$0xff] }
 0x23a   : > { %v4890_v25 = vmul.f32 %v6027_v12, %v4379_v2  ;;  %v3898_v6 = vadd.f32 %v7592_v14, %v3232_v13  ;;  %v3722_v14 = vunpack.c.l.b16 %v3597_v21  ;;  %v4073_v44 = vrot.slane %v4071_v51, 4  ;;  %v8076_v12 = vld [vmem:[#allocation7_spill] sm:$0xff] }
 0x23b   : > { %v4074_v61 = vrot.slane %v7621_v24, 5  ;;  %v4734_v41 = vsub.f32 0.0, %v4662_v60  ;;  %v4828_v57 = vadd.f32 1.0, %v6029_v39  ;;  %v3605_v13 = vor.u32 %v3604_v34, %v3601_v20 }
 0x23c   : > { %v4922_v18 = vpack.c.bf16 %v4890_v25, %v4890_v25  ;;  %v4308_v27 = vadd.f32 %v7617_v46, %v3898_v6  ;;  %v5938_v46 = vunpack.c.l.bf16 %v7673_v5  ;;  %v6031_v3 = vpop.eup %6030  ;;  %v3615_v38 = vor.u32 %v3614_v54, %v7675_v16  ;;  %v5919_v25 = vld [vmem:[%s7164_s29 + $0x58] sm:$0xff] }
 0x23d   : > { %v3618_v52 = vshll.u32 %v7679_v19, 16  ;;  %v6033_v6 = vpop.eup %6032  ;;  %v3742_v35 = vpack.c.b16 %v3722_v14, %v3721_v56  ;;  %v4072_v20 = vsel %vm6492_vm7, %v5724_v9, %v4071_v51  ;;  %v4075_v34 = vsel %vm6492_vm7, %v4073_v44, %v4074_v61  ;;  %v5660_v61 = vld [vmem:[%s6245_s18 + $0xb4] sm:$0xf] }
 0x23e   : > { %4955 = vst.msk [vmem:[%s7638_s16 + $0x4] sm:$0xf] %vm4953_vm9, %v4922_v18  ;;  %v4344_v43 = vmul.f32 %v7602_v30, %v4308_v27  ;;  %v7685_v32 = vpop.f32.mrf.mxu0  ;;  %v7693_v21 = vpop.f32.mrf.mxu3  ;;  %v4771_v39 = vmul.f32 1.442695, %v4734_v41  ;;  %6034 = vrcp.f32 %v4828_v57  ;;  %v5939_v44 = vunpack.c.h.bf16 %v7673_v5  ;;  %v7714_v41 = vld [vmem:[%s6245_s18 + $0xb8] sm:$0xf] }
 0x23f   : > { %v3157_v2 = vpop.f32.mrf.mxu2 }
 0x240   : > { %v4380_v24 = vadd.f32 %v7610_v42, %v4344_v43  ;;  %v3233_v22 = vadd.f32 %v3157_v2, %v8076_v12  ;;  %v4664_v60 = vpop.f32.mrf.mxu1  ;;  %v3606_v43 = vrot.slane %v3605_v13, 4  ;;  %v3616_v2 = vrot.slane %v3615_v38, 4 }
 0x241   : > { %5751 = vmatmul.msk.bf16.gmra.mxu0 %vm824_vm0, %v4151_v45  ;;  %v4665_v27 = vadd.f32 %v5938_v46, %v4664_v60  ;;  %v3620_v45 = vrot.slane %v3618_v52, 5  ;;  %v4829_v12 = vadd.f32 1.0, %v6033_v6  ;;  %6036 = vpow2.f32 %v4771_v39  ;;  %v7729_v39 = vld [vmem:[%s7492_s9 + $0x20] sm:$0xff]  }
 0x242   : > { %v4891_v54 = vmul.f32 %v6031_v3, %v4380_v24  ;;  %v3899_v18 = vadd.f32 %v7626_v8, %v3233_v22  ;;  %v4131_v46 = vunpack.c.l.b16 %v4072_v20  ;;  %v4132_v3 = vunpack.c.l.b16 %v4075_v34 }
 0x243   : > { %v4735_v51 = vsub.f32 0.0, %v4665_v27  ;;  %5832 = vmatmul.msk.bf16.gmra.mxu1 %vm4587_vm8, %v5919_v25  ;;  %5692 = vmatmul.msk.bf16.gmra.mxu3 %vm824_vm0, %v3742_v35  ;;  %v3611_v57 = vsel %vm6273_vm3, %v3606_v43, %v7675_v16  ;;  %v3621_v13 = vsel %vm6273_vm3, %v3616_v2, %v3620_v45  ;;  %6038 = vrcp.f32 %v4829_v12  ;;  %v5709_v12 = vld [vmem:[%s6245_s18 + $0xa8] sm:$0xe] }
 0x244   : > { %v4923_v56 = vpack.c.bf16 %v4891_v54, %v4891_v54  ;;  %v4309_v14 = vadd.f32 %v7655_v26, %v3899_v18  ;;  %5615 = vmatmul.msk.bf16.gmra.mxu2 %vm824_vm0, %v5896_v40  ;;  %v6035_v22 = vpop.eup %6034  ;;  %v3623_v25 = vshrl.u32 %v5660_v61, 16  ;;  %v3626_v6 = vshll.u32 %v5660_v61, 16 }
 0x245   : > { %v4773_v52 = vmul.f32 1.442695, %v4735_v51  ;;  %v3632_v60 = vshll.u32 %v7714_v41, 16  ;;  %v3636_v16 = vshrl.u32 %v7714_v41, 16  ;;  %v4152_v54 = vpack.c.b16 %v4132_v3, %v4131_v46 }
 0x246   : > { %4956 = vst.msk [vmem:[%s7638_s16 + $0x8] sm:$0xf] %vm4953_vm9, %v4923_v56  ;;  %v4345_v8 = vmul.f32 %v7602_v30, %v4309_v14  ;;  %v7709_v9 = vpop.f32.mrf.mxu0  ;;  %v7723_v24 = vpop.f32.mrf.mxu3  ;;  %v4078_v18 = vrot.slane %v7649_v15, 5  ;;  %v3724_v45 = vunpack.c.l.b16 %v3621_v13  ;;  %v3625_v56 = vrot.slane %v3623_v25, 4 }
 0x247   : > { %v3160_v26 = vpop.f32.mrf.mxu2  ;;  %v6037_v27 = vpop.eup %6036  ;;  %6040 = vpow2.f32 %v4773_v52  ;;  %v3628_v14 = vrot.slane %v3626_v6, 5  ;;  %v3638_v51 = vrot.slane %v3636_v16, 4  ;;  %v5897_v52 = vld [vmem:[%s6245_s18 + $0x9c] sm:$0xff]  ;;  %v4081_v25 = vrot.slane %v7679_v19, 5 }
 0x248   : > { %v4381_v38 = vadd.f32 %v7610_v42, %v4345_v8  ;;  %v3234_v5 = vadd.f32 %v3160_v26, %v6945_v10  ;;  %v4666_v40 = vpop.f32.mrf.mxu1  ;;  %v3723_v10 = vunpack.c.l.b16 %v3611_v57  ;;  %v5942_v26 = vunpack.c.l.bf16 %v7729_v39 }
 0x249   : > { %v4667_v34 = vadd.f32 %v5939_v44, %v4666_v40  ;;  %v6039_v8 = vpop.eup %6038  ;;  %v4830_v46 = vadd.f32 1.0, %v6037_v27  ;;  %v5725_v57 = vrot.slane %v5709_v12, 9  ;;  %v4080_v40 = vrot.slane %v4078_v18, 4 }
 0x24a   : > { %v4892_v35 = vmul.f32 %v6035_v22, %v4381_v38  ;;  %v3900_v20 = vadd.f32 %v7662_v62, %v3234_v5  ;;  %v7734_v62 = vrot.slane %v3632_v60, 5  ;;  %v5920_v22 = vld [vmem:[%s7164_s29 + $0x60] sm:$0xff]  ;;  %v3743_v60 = vpack.c.b16 %v3724_v45, %v3723_v10 }
 0x24b   : > { %v4736_v44 = vsub.f32 0.0, %v4667_v34  ;;  %v3629_v16 = vor.u32 %v3628_v14, %v3625_v56  ;;  %6042 = vrcp.f32 %v4830_v46  ;;  %v4079_v19 = vsel %vm6492_vm7, %v5725_v57, %v4078_v18  ;;  %v7765_v14 = vld [vmem:[%s6245_s18 + $0xc4] sm:$0xf] }
 0x24c   : > { %v4924_v43 = vpack.c.bf16 %v4892_v35, %v4892_v35  ;;  %v4310_v2 = vadd.f32 %v7685_v32, %v3900_v20  ;;  %v7743_v32 = vld [vmem:[%s6245_s18 + $0xbc] sm:$0x1]  ;;  %v3639_v35 = vor.u32 %v3638_v51, %v7734_v62  ;;  %v4082_v56 = vsel %vm6492_vm7, %v4080_v40, %v4081_v25 }
 0x24d   : > { %v3642_v20 = vshll.u32 %v7743_v32, 16  ;;  %v6041_v34 = vpop.eup %6040  ;;  %v4775_v27 = vmul.f32 1.442695, %v4736_v44  ;;  %v3630_v51 = vrot.slane %v3629_v16, 4  ;;  %v5943_v44 = vunpack.c.h.bf16 %v7729_v39 }
 0x24e   : > { %4957 = vst.msk [vmem:[%s7638_s16 + $0xc] sm:$0xf] %vm4953_vm9, %v4924_v43  ;;  %v4346_v15 = vmul.f32 %v7602_v30, %v4310_v2  ;;  %v7739_v61 = vpop.f32.mrf.mxu0  ;;  %v7748_v5 = vpop.f32.mrf.mxu3  ;;  %v4133_v25 = vunpack.c.l.b16 %v4079_v19 }
 0x24f   : > { %v3162_v3 = vpop.f32.mrf.mxu2  ;;  %v3644_v18 = vrot.slane %v3642_v20, 5  ;;  %6044 = vpow2.f32 %v4775_v27  ;;  %v3635_v16 = vsel %vm6273_vm3, %v3630_v51, %v7734_v62  ;;  %v4085_v20 = vrot.slane %v7714_v41, 5  ;;  %v5710_v27 = vld [vmem:[%s6245_s18 + $0xb4] sm:$0xe] }
 0x250   : > { %v4382_v13 = vadd.f32 %v7610_v42, %v4346_v15  ;;  %v3235_v38 = vadd.f32 %v3162_v3, %v6972_v58  ;;  %v4669_v6 = vpop.f32.mrf.mxu1  ;;  %v5726_v51 = vrot.slane %v5710_v27, 9 }
 0x251   : > { %5752 = vmatmul.msk.bf16.gmra.mxu0 %vm824_vm0, %v4152_v54  ;;  %v4670_v2 = vadd.f32 %v5942_v26, %v4669_v6  ;;  %v5663_v54 = vld [vmem:[%s6245_s18 + $0xc0] sm:$0xf]  ;;  %v4134_v6 = vunpack.c.l.b16 %v4082_v56  ;;  %v3725_v56 = vunpack.c.l.b16 %v3635_v16 }
 0x252   : > { %v4893_v58 = vmul.f32 %v6039_v8, %v4382_v13  ;;  %v3901_v43 = vadd.f32 %v7693_v21, %v3235_v38  ;;  %v4831_v21 = vadd.f32 1.0, %v6041_v34  ;;  %v3640_v8 = vrot.slane %v3639_v35, 4 }
 0x253   : > { %v4737_v45 = vsub.f32 0.0, %v4670_v2  ;;  %5833 = vmatmul.msk.bf16.gmra.mxu1 %vm4587_vm8, %v5920_v22  ;;  %5693 = vmatmul.msk.bf16.gmra.mxu3 %vm824_vm0, %v3743_v60  ;;  %v3647_v26 = vshrl.u32 %v5663_v54, 16  ;;  %v3650_v57 = vshll.u32 %v5663_v54, 16  ;;  %v3656_v13 = vshll.u32 %v7765_v14, 16  ;;  %v6043_v60 = vpop.eup %6042  ;;  %v7789_v2 = vld [vmem:[%s7492_s9 + $0x28] sm:$0xff]  }
 0x254   : > { %v4925_v12 = vpack.c.bf16 %v4893_v58, %v4893_v58  ;;  %v4311_v10 = vadd.f32 %v7709_v9, %v3901_v43  ;;  %5616 = vmatmul.msk.bf16.gmra.mxu2 %vm824_vm0, %v5897_v52  ;;  %v3660_v38 = vshrl.u32 %v7765_v14, 16  ;;  %6046 = vrcp.f32 %v4831_v21  ;;  %v7795_v21 = vld [vmem:[%s6245_s18 + $0xc8] sm:$0x1] }
 0x255   : > { %v4777_v46 = vmul.f32 1.442695, %v4737_v45  ;;  %v3645_v35 = vsel %vm6273_vm3, %v3640_v8, %v3644_v18  ;;  %v3649_v43 = vrot.slane %v3647_v26, 4  ;;  %v3652_v19 = vrot.slane %v3650_v57, 5 }
 0x256   : > { %4958 = vst.msk [vmem:[%s7638_s16 + $0x10] sm:$0xf] %vm4953_vm9, %v4925_v12  ;;  %v4347_v9 = vmul.f32 %v7602_v30, %v4311_v10  ;;  %v7771_v15 = vpop.f32.mrf.mxu0  ;;  %v7778_v40 = vpop.f32.mrf.mxu3  ;;  %v7791_v54 = vrot.slane %v3656_v13, 5  ;;  %v3662_v62 = vrot.slane %v3660_v38, 4  ;;  %v4153_v41 = vpack.c.b16 %v4134_v6, %v4133_v25  ;;  %v5898_v25 = vld [vmem:[%s6245_s18 + $0xa8] sm:$0xff] }
 0x257   : > { %v3165_v3 = vpop.f32.mrf.mxu2  ;;  %6048 = vpow2.f32 %v4777_v46  ;;  %v6045_v12 = vpop.eup %6044  ;;  %v4087_v8 = vrot.slane %v4085_v20, 4  ;;  %v4088_v18 = vrot.slane %v7743_v32, 5  ;;  %v3653_v13 = vor.u32 %v3652_v19, %v3649_v43 }
 0x258   : > { %v4383_v52 = vadd.f32 %v7610_v42, %v4347_v9  ;;  %v3236_v22 = vadd.f32 %v3165_v3, %v6993_v7  ;;  %v4671_v39 = vpop.f32.mrf.mxu1  ;;  %v4832_v3 = vadd.f32 1.0, %v6045_v12  ;;  %v3663_v38 = vor.u32 %v3662_v62, %v7791_v54 }
 0x259   : > { %v4672_v58 = vadd.f32 %v5943_v44, %v4671_v39  ;;  %v3654_v19 = vrot.slane %v3653_v13, 4 }
 0x25a   : > { %v4894_v34 = vmul.f32 %v6043_v60, %v4383_v52  ;;  %v3902_v7 = vadd.f32 %v7723_v24, %v3236_v22  ;;  %v3726_v24 = vunpack.c.l.b16 %v3645_v35  ;;  %v6047_v46 = vpop.eup %6046  ;;  %v3666_v52 = vshll.u32 %v7795_v21, 16  ;;  %v5921_v60 = vld [vmem:[%s7164_s29 + $0x68] sm:$0xff] }
 0x25b   : > { %v4738_v44 = vsub.f32 0.0, %v4672_v58  ;;  %6050 = vrcp.f32 %v4832_v3  ;;  %v3664_v62 = vrot.slane %v3663_v38, 4 }
 0x25c   : > { %v4926_v10 = vpack.c.bf16 %v4894_v34, %v4894_v34  ;;  %v4312_v45 = vadd.f32 %v7739_v61, %v3902_v7  ;;  %v5946_v61 = vunpack.c.l.bf16 %v7789_v2  ;;  %v3744_v35 = vpack.c.b16 %v3726_v24, %v3725_v56 }
 0x25d   : > { %v6049_v39 = vpop.eup %6048  ;;  %v4086_v34 = vsel %vm6492_vm7, %v5726_v51, %v4085_v20  ;;  %v4089_v7 = vsel %vm6492_vm7, %v4087_v8, %v4088_v18  ;;  %v4779_v27 = vmul.f32 1.442695, %v4738_v44  ;;  %v3668_v12 = vrot.slane %v3666_v52, 5  ;;  %v5666_v51 = vld [vmem:[%s6245_s18 + $0xcc] sm:$0xf] }
 0x25e   : > { %4959 = vst.msk [vmem:[%s7638_s16 + $0x14] sm:$0xf] %vm4953_vm9, %v4926_v10  ;;  %v4348_v9 = vmul.f32 %v7602_v30, %v4312_v45  ;;  %v7801_v26 = vpop.f32.mrf.mxu0  ;;  %v7809_v6 = vpop.f32.mrf.mxu3  ;;  %v4833_v10 = vadd.f32 1.0, %v6049_v39  ;;  %v5947_v24 = vunpack.c.h.bf16 %v7789_v2  ;;  %v7830_v8 = vld [vmem:[%s6245_s18 + $0xd0] sm:$0xf]  ;;  %v4135_v18 = vunpack.c.l.b16 %v4086_v34 }
 0x25f   : > { %v3167_v57 = vpop.f32.mrf.mxu2  ;;  %6052 = vpow2.f32 %v4779_v27  ;;  %v3659_v44 = vsel %vm6273_vm3, %v3654_v19, %v7791_v54  ;;  %v3671_v52 = vshrl.u32 %v5666_v51, 16  ;;  %v3684_v54 = vshrl.u32 %v7830_v8, 16 }
 0x260   : > { %v4384_v32 = vadd.f32 %v7610_v42, %v4348_v9  ;;  %v3237_v22 = vadd.f32 %v3167_v57, %v7017_v11  ;;  %v4674_v16 = vpop.f32.mrf.mxu1  ;;  %v4136_v9 = vunpack.c.l.b16 %v4089_v7  ;;  %6054 = vrcp.f32 %v4833_v10 }
 0x261   : > { %5753 = vmatmul.msk.bf16.gmra.mxu0 %vm824_vm0, %v4153_v41  ;;  %v4675_v43 = vadd.f32 %v5946_v61, %v4674_v16  ;;  %v3669_v61 = vsel %vm6273_vm3, %v3664_v62, %v3668_v12  ;;  %v6051_v13 = vpop.eup %6050  ;;  %v4092_v34 = vrot.slane %v7765_v14, 5  ;;  %v3673_v19 = vrot.slane %v3671_v52, 4 }
 0x262   : > { %v4895_v58 = vmul.f32 %v6047_v46, %v4384_v32  ;;  %v3903_v11 = vadd.f32 %v7748_v5, %v3237_v22  ;;  %v3674_v32 = vshll.u32 %v5666_v51, 16  ;;  %v3680_v22 = vshll.u32 %v7830_v8, 16 }
 0x263   : > { %v4739_v20 = vsub.f32 0.0, %v4675_v43  ;;  %5834 = vmatmul.msk.bf16.gmra.mxu1 %vm4587_vm8, %v5921_v60  ;;  %5694 = vmatmul.msk.bf16.gmra.mxu3 %vm824_vm0, %v3744_v35  ;;  %v4154_v16 = vpack.c.b16 %v4136_v9, %v4135_v18  ;;  %v7845_v35 = vld [vmem:[%s7492_s9 + $0x30] sm:$0xff]   ;;  %v5711_v43 = vld [vmem:[%s6245_s18 + $0xc0] sm:$0xe]  ;;  %v3686_v12 = vrot.slane %v3684_v54, 4 }
 0x264   : > { %v4927_v45 = vpack.c.bf16 %v4895_v58, %v4895_v58  ;;  %v4313_v41 = vadd.f32 %v7771_v15, %v3903_v11  ;;  %5617 = vmatmul.msk.bf16.gmra.mxu2 %vm824_vm0, %v5898_v25  ;;  %v3728_v11 = vunpack.c.l.b16 %v3669_v61  ;;  %v3676_v62 = vrot.slane %v3674_v32, 5  ;;  %v5899_v9 = vld [vmem:[%s6245_s18 + $0xb4] sm:$0xff] }
 0x265   : > { %v4781_v3 = vmul.f32 1.442695, %v4739_v20  ;;  %v6053_v7 = vpop.eup %6052  ;;  %v5950_v20 = vunpack.c.l.bf16 %v7845_v35  ;;  %v5727_v51 = vrot.slane %v5711_v43, 9  ;;  %v5922_v61 = vld [vmem:[%s7164_s29 + $0x70] sm:$0xff] }
 0x266   : > { %4960 = vst.msk [vmem:[%s7638_s16 + $0x18] sm:$0xf] %vm4953_vm9, %v4927_v45  ;;  %v4349_v5 = vmul.f32 %v7602_v30, %v4313_v41  ;;  %v7825_v56 = vpop.f32.mrf.mxu0  ;;  %v7839_v57 = vpop.f32.mrf.mxu3 }
 0x267   : > { %v3170_v15 = vpop.f32.mrf.mxu2  ;;  %6056 = vpow2.f32 %v4781_v3  ;;  %v6055_v10 = vpop.eup %6054  ;;  %v4095_v3 = vrot.slane %v7795_v21, 5 }
 0x268   : > { %v4385_v46 = vadd.f32 %v7610_v42, %v4349_v5  ;;  %v3238_v2 = vadd.f32 %v3170_v15, %v7041_v50  ;;  %v4676_v38 = vpop.f32.mrf.mxu1  ;;  %v3727_v50 = vunpack.c.l.b16 %v3659_v44  ;;  %v7857_v5 = vld [vmem:[%s6245_s18 + $0xd4] sm:$0x1] }
 0x269   : > { %v4677_v39 = vadd.f32 %v5947_v24, %v4676_v38  ;;  %v3677_v38 = vor.u32 %v3676_v62, %v3673_v19  ;;  %v3690_v32 = vshll.u32 %v7857_v5, 16 }
 0x26a   : > { %v4896_v25 = vmul.f32 %v6051_v13, %v4385_v46  ;;  %v3904_v60 = vadd.f32 %v7778_v40, %v3238_v2  ;;  %v7850_v40 = vrot.slane %v3680_v22, 5  ;;  %v4094_v46 = vrot.slane %v4092_v34, 4 }
 0x26b   : > { %v4740_v45 = vsub.f32 0.0, %v4677_v39  ;;  %v3745_v13 = vpack.c.b16 %v3728_v11, %v3727_v50  ;;  %v5951_v50 = vunpack.c.h.bf16 %v7845_v35  ;;  %v3692_v19 = vrot.slane %v3690_v32, 5 }
 0x26c   : > { %v4928_v58 = vpack.c.bf16 %v4896_v25, %v4896_v25  ;;  %v4314_v27 = vadd.f32 %v7801_v26, %v3904_v60  ;;  %v4834_v26 = vadd.f32 1.0, %v6053_v7  ;;  %v3687_v52 = vor.u32 %v3686_v12, %v7850_v40 }
 0x26d   : > { %v6057_v22 = vpop.eup %6056 }
 0x26e   : > { %4961 = vst.msk [vmem:[%s7638_s16 + $0x1c] sm:$0xf] %vm4953_vm9, %v4928_v58  ;;  %v4350_v14 = vmul.f32 %v7602_v30, %v4314_v27  ;;  %v4251_v41 = vpop.f32.mrf.mxu0  ;;  %v7862_v44 = vpop.f32.mrf.mxu3  ;;  %6058 = vrcp.f32 %v4834_v26  ;;  %v4835_v7 = vadd.f32 1.0, %v6057_v22  ;;  %v4093_v58 = vsel %vm6492_vm7, %v5727_v51, %v4092_v34  ;;  %v5712_v22 = vld [vmem:[%s6245_s18 + $0xcc] sm:$0xe] }
 0x26f   : > { %v3172_v24 = vpop.f32.mrf.mxu2  ;;  %v3678_v27 = vrot.slane %v3677_v38, 4  ;;  %v3688_v43 = vrot.slane %v3687_v52, 4 }
 0x270   : > { %v4386_v15 = vadd.f32 %v7610_v42, %v4350_v14  ;;  %v3239_v18 = vadd.f32 %v3172_v24, %v7072_v37  ;;  %v4679_v2 = vpop.f32.mrf.mxu1  ;;  %v4783_v37 = vmul.f32 1.442695, %v4740_v45 }
 0x271   : > { %5754 = vmatmul.msk.bf16.gmra.mxu0 %vm824_vm0, %v4154_v16  ;;  %v4680_v60 = vadd.f32 %v5950_v20, %v4679_v2  ;;  %v4137_v20 = vunpack.c.l.b16 %v4093_v58  ;;  %v3683_v24 = vsel %vm6273_vm3, %v3678_v27, %v7850_v40  ;;  %v4099_v40 = vrot.slane %v7830_v8, 5 }
 0x272   : > { %v4897_v54 = vmul.f32 %v6055_v10, %v4386_v15  ;;  %v3905_v25 = vadd.f32 %v7809_v6, %v3239_v18  ;;  %v4096_v6 = vsel %vm6492_vm7, %v4094_v46, %v4095_v3  ;;  %6060 = vpow2.f32 %v4783_v37 }
 0x273   : > { %v4741_v16 = vsub.f32 0.0, %v4680_v60  ;;  %5835 = vmatmul.msk.bf16.gmra.mxu1 %vm4587_vm8, %v5922_v61  ;;  %5695 = vmatmul.msk.bf16.gmra.mxu3 %vm824_vm0, %v3745_v13  ;;  %6062 = vrcp.f32 %v4835_v7  ;;  %v4138_v26 = vunpack.c.l.b16 %v4096_v6  ;;  %v3729_v13 = vunpack.c.l.b16 %v3683_v24 }
 0x274   : > { %v4929_v39 = vpack.c.bf16 %v4897_v54, %v4897_v54  ;;  %v4315_v21 = vadd.f32 %v7825_v56, %v3905_v25  ;;  %5618 = vmatmul.msk.bf16.gmra.mxu2 %vm824_vm0, %v5899_v9  ;;  %v6059_v14 = vpop.eup %6058  ;;  %v5994_v9 = vld [vmem:[%s7492_s9 + $0x38] sm:$0xff]   ;;  %v5728_v7 = vrot.slane %v5712_v22, 9  ;;  %v4101_v58 = vrot.slane %v4099_v40, 4 }
 0x275   : > { %v4785_v12 = vmul.f32 1.442695, %v4741_v16  ;;  %v4155_v2 = vpack.c.b16 %v4138_v26, %v4137_v20  ;;  %v5954_v32 = vunpack.c.l.bf16 %v5994_v9  ;;  %v5923_v16 = vld [vmem:[%s7164_s29 + $0x78] sm:$0xff]  ;;  %v4102_v6 = vrot.slane %v7857_v5, 5 }
 0x276   : > { %4962 = vst.msk [vmem:[%s7638_s16 + $0x20] sm:$0xf] %vm4953_vm9, %v4929_v39  ;;  %v4351_v56 = vmul.f32 %v7602_v30, %v4315_v21  ;;  %v4253_v11 = vpop.f32.mrf.mxu0  ;;  %v7884_v34 = vpop.f32.mrf.mxu3  ;;  %v5900_v39 = vld [vmem:[%s6245_s18 + $0xc0] sm:$0xff] }
 0x277   : > { %v3175_v35 = vpop.f32.mrf.mxu2  ;;  %6064 = vpow2.f32 %v4785_v12 }
 0x278   : > { %v4387_v62 = vadd.f32 %v7610_v42, %v4351_v56  ;;  %v3240_v10 = vadd.f32 %v3175_v35, %v7103_v59  ;;  %v4681_v45 = vpop.f32.mrf.mxu1  ;;  %v3693_v59 = vsel %vm6273_vm3, %v3688_v43, %v3692_v19  ;;  %v6061_v61 = vpop.eup %6060 }
 0x279   : > { %v4682_v18 = vadd.f32 %v5951_v50, %v4681_v45  ;;  %v3730_v38 = vunpack.c.l.b16 %v3693_v59  ;;  %v6063_v54 = vpop.eup %6062  ;;  %v4836_v37 = vadd.f32 1.0, %v6061_v61 }
 0x27a   : > { %v4898_v51 = vmul.f32 %v6059_v14, %v4387_v62  ;;  %v3906_v15 = vadd.f32 %v7839_v57, %v3240_v10  ;;  %v5955_v14 = vunpack.c.h.bf16 %v5994_v9 }
 0x27b   : > { %v4742_v52 = vsub.f32 0.0, %v4682_v18  ;;  %v3746_v50 = vpack.c.b16 %v3730_v38, %v3729_v13  ;;  %6066 = vrcp.f32 %v4836_v37  ;;  %v5995_v13 = vld [vmem:[%s7492_s9 + $0x40] sm:$0xff]  }
 0x27c   : > { %v4930_v46 = vpack.c.bf16 %v4898_v51, %v4898_v51  ;;  %v4316_v3 = vadd.f32 %v4251_v41, %v3906_v15  ;;  %v5958_v22 = vunpack.c.l.bf16 %v5995_v13 }
 0x27d   : > { %v6065_v27 = vpop.eup %6064  ;;  %v4787_v43 = vmul.f32 1.442695, %v4742_v52 }
 0x27e   : > { %4963 = vst.msk [vmem:[%s7638_s16 + $0x24] sm:$0xf] %vm4953_vm9, %v4930_v46  ;;  %v4352_v57 = vmul.f32 %v7602_v30, %v4316_v3  ;;  %v4256_v31 = vpop.f32.mrf.mxu0  ;;  %v7901_v21 = vpop.f32.mrf.mxu3  ;;  %v4837_v10 = vadd.f32 1.0, %v6065_v27 }
 0x27f   : > { %v3177_v25 = vpop.f32.mrf.mxu2  ;;  %6068 = vpow2.f32 %v4787_v43 }
 0x280   : > { %v4388_v41 = vadd.f32 %v7610_v42, %v4352_v57  ;;  %v3241_v60 = vadd.f32 %v3177_v25, %v7135_v29  ;;  %v4684_v8 = vpop.f32.mrf.mxu1  ;;  %6070 = vrcp.f32 %v4837_v10 }
 0x281   : > { %5755 = vmatmul.msk.bf16.gmra.mxu0 %vm824_vm0, %v4155_v2  ;;  %v4685_v35 = vadd.f32 %v5954_v32, %v4684_v8  ;;  %v6067_v18 = vpop.eup %6066 }
 0x282   : > { %v4899_v56 = vmul.f32 %v6063_v54, %v4388_v41  ;;  %v3907_v19 = vadd.f32 %v7862_v44, %v3241_v60  ;;  %v4100_v44 = vsel %vm6492_vm7, %v5728_v7, %v4099_v40  ;;  %v5901_v60 = vld [vmem:[%s6245_s18 + $0xcc] sm:$0xff] }
 0x283   : > { %v4743_v12 = vsub.f32 0.0, %v4685_v35  ;;  %5836 = vmatmul.msk.bf16.gmra.mxu1 %vm4587_vm8, %v5923_v16  ;;  %5696 = vmatmul.msk.bf16.gmra.mxu3 %vm824_vm0, %v3746_v50  ;;  %v4139_v9 = vunpack.c.l.b16 %v4100_v44  ;;  %v5959_v35 = vunpack.c.h.bf16 %v5995_v13 }
 0x284   : > { %v4931_v29 = vpack.c.bf16 %v4899_v56, %v4899_v56  ;;  %v4317_v62 = vadd.f32 %v4253_v11, %v3907_v19  ;;  %5619 = vmatmul.msk.bf16.gmra.mxu2 %vm824_vm0, %v5900_v39  ;;  %v4103_v11 = vsel %vm6492_vm7, %v4101_v58, %v4102_v6 }
 0x285   : > { %v4789_v24 = vmul.f32 1.442695, %v4743_v12  ;;  %v4140_v61 = vunpack.c.l.b16 %v4103_v11  ;;  %v6069_v4 = vpop.eup %6068 }
 0x286   : > { %4964 = vst.msk [vmem:[%s7638_s16 + $0x28] sm:$0xf] %vm4953_vm9, %v4931_v29  ;;  %v4353_v5 = vmul.f32 %v7602_v30, %v4317_v62  ;;  %v4258_v45 = vpop.f32.mrf.mxu0  ;;  %v3851_v15 = vpop.f32.mrf.mxu3  ;;  %v4838_v37 = vadd.f32 1.0, %v6069_v4 }
 0x287   : > { %v3180_v20 = vpop.f32.mrf.mxu2  ;;  %6072 = vpow2.f32 %v4789_v24  ;;  %v4156_v57 = vpack.c.b16 %v4140_v61, %v4139_v9  ;;  %v6071_v54 = vpop.eup %6070 }
 0x288   : > { %v4389_v26 = vadd.f32 %v7610_v42, %v4353_v5  ;;  %v3242_v51 = vadd.f32 %v3180_v20, %v7170_v17  ;;  %v4686_v59 = vpop.f32.mrf.mxu1  ;;  %6074 = vrcp.f32 %v4838_v37  ;;  %v5996_v20 = vld [vmem:[%s7492_s9 + $0x48] sm:$0xff]  }
 0x289   : > { %v4687_v2 = vadd.f32 %v5955_v14, %v4686_v59  ;;  %v5962_v59 = vunpack.c.l.bf16 %v5996_v20 }
 0x28a   : > { %v4900_v46 = vmul.f32 %v6067_v18, %v4389_v26  ;;  %v3908_v3 = vadd.f32 %v7884_v34, %v3242_v51 }
 0x28b   : > { %v4744_v52 = vsub.f32 0.0, %v4687_v2 }
 0x28c   : > { %v4932_v38 = vpack.c.bf16 %v4900_v46, %v4900_v46  ;;  %v4318_v40 = vadd.f32 %v4256_v31, %v3908_v3  ;;  %v7947_v46 = vld [vmem:[%s8052_s6] ss:$0 sm:$0xff] }
 0x28d   : > { %v6073_v16 = vpop.eup %6072  ;;  %v4791_v50 = vmul.f32 1.442695, %v4744_v52 }
 0x28e   : > { %4965 = vst.msk [vmem:[%s7638_s16 + $0x2c] sm:$0xf] %vm4953_vm9, %v4932_v38  ;;  %v4354_v17 = vmul.f32 %v7602_v30, %v4318_v40  ;;  %v4261_v32 = vpop.f32.mrf.mxu0  ;;  %v3853_v39 = vpop.f32.mrf.mxu3  ;;  %v4839_v43 = vadd.f32 1.0, %v6073_v16 }
 0x28f   : > { %v3182_v25 = vpop.f32.mrf.mxu2  ;;  %6076 = vpow2.f32 %v4791_v50  ;;  %v6075_v14 = vpop.eup %6074 }
 0x290   : > { %v4390_v34 = vadd.f32 %v7610_v42, %v4354_v17  ;;  %v3243_v41 = vadd.f32 %v3182_v25, %v7194_v33  ;;  %v4689_v31 = vpop.f32.mrf.mxu1  ;;  %6078 = vrcp.f32 %v4839_v43 }
 0x291   : > { %5756 = vmatmul.msk.bf16.gmra.mxu0 %vm824_vm0, %v4156_v57  ;;  %v4690_v58 = vadd.f32 %v5958_v22, %v4689_v31 }
 0x292   : > { %v4901_v8 = vmul.f32 %v6071_v54, %v4390_v34  ;;  %v3909_v7 = vadd.f32 %v7901_v21, %v3243_v41 }
 0x293   : > { %v4745_v56 = vsub.f32 0.0, %v4690_v58 }
 0x294   : > { %v4933_v6 = vpack.c.bf16 %v4901_v8, %v4901_v8  ;;  %v4319_v27 = vadd.f32 %v4258_v45, %v3909_v7  ;;  %5620 = vmatmul.msk.bf16.gmra.mxu2 %vm824_vm0, %v5901_v60 }
 0x295   : > { %v4793_v62 = vmul.f32 1.442695, %v4745_v56  ;;  %v6077_v26 = vpop.eup %6076 }
 0x296   : > { %4966 = vst.msk [vmem:[%s7638_s16 + $0x30] sm:$0xf] %vm4953_vm9, %v4933_v6  ;;  %v4355_v33 = vmul.f32 %v7602_v30, %v4319_v27  ;;  %v4263_v19 = vpop.f32.mrf.mxu0  ;;  %v3856_v10 = vpop.f32.mrf.mxu3  ;;  %v5997_v27 = vld [vmem:[%s7492_s9 + $0x50] sm:$0xff]  }
 0x297   : > { %v3185_v29 = vpop.f32.mrf.mxu2  ;;  %6080 = vpow2.f32 %v4793_v62  ;;  %v6079_v9 = vpop.eup %6078 }
 0x298   : > { %v4391_v21 = vadd.f32 %v7610_v42, %v4355_v33  ;;  %v3244_v12 = vadd.f32 %v3185_v29, %v7212_v1  ;;  %v4691_v5 = vpop.f32.mrf.mxu1  ;;  %v7941_v42 = vld [vmem:[%s8051_s5] ss:$0 sm:$0xff] }
 0x299   : > { %v4692_v11 = vadd.f32 %v5959_v35, %v4691_v5 }
 0x29a   : > { %v4902_v45 = vmul.f32 %v6075_v14, %v4391_v21  ;;  %v3910_v44 = vadd.f32 %v3851_v15, %v3244_v12  ;;  %v4840_v15 = vadd.f32 1.0, %v6077_v26  ;;  %v5966_v21 = vunpack.c.l.bf16 %v5997_v27 }
 0x29b   : > { %v4746_v51 = vsub.f32 0.0, %v4692_v11 }
 0x29c   : > { %v4934_v24 = vpack.c.bf16 %v4902_v45, %v4902_v45  ;;  %v4320_v30 = vadd.f32 %v4261_v32, %v3910_v44  ;;  %6082 = vrcp.f32 %v4840_v15 }
 0x29d   : > { %v6081_v38 = vpop.eup %6080  ;;  %v4795_v57 = vmul.f32 1.442695, %v4746_v51 }
 0x29e   : > { %4967 = vst.msk [vmem:[%s7638_s16 + $0x34] sm:$0xf] %vm4953_vm9, %v4934_v24  ;;  %v4356_v1 = vmul.f32 %v7941_v42, %v4320_v30  ;;  %v4266_v18 = vpop.f32.mrf.mxu0  ;;  %v3858_v13 = vpop.f32.mrf.mxu3  ;;  %v4841_v37 = vadd.f32 1.0, %v6081_v38 }
 0x29f   : > { %v3187_v61 = vpop.f32.mrf.mxu2  ;;  %6084 = vpow2.f32 %v4795_v57 }
 0x2a0   : > { %v4392_v3 = vadd.f32 %v7947_v46, %v4356_v1  ;;  %v3245_v2 = vadd.f32 %v3187_v61, %v7232_v49  ;;  %v4694_v4 = vpop.f32.mrf.mxu1  ;;  %v5963_v49 = vunpack.c.h.bf16 %v5996_v20  ;;  %6086 = vrcp.f32 %v4841_v37 }
 0x2a1   : > { %v4695_v52 = vadd.f32 %v5962_v59, %v4694_v4 }
 0x2a2   : > { %v4903_v40 = vmul.f32 %v6079_v9, %v4392_v3  ;;  %v3911_v17 = vadd.f32 %v3853_v39, %v3245_v2  ;;  %v6083_v8 = vpop.eup %6082 }
 0x2a3   : > { %v4747_v54 = vsub.f32 0.0, %v4695_v52  ;;  %v5998_v52 = vld [vmem:[%s7492_s9 + $0x58] sm:$0xff]  }
 0x2a4   : > { %v4935_v32 = vpack.c.bf16 %v4903_v40, %v4903_v40  ;;  %v4321_v22 = vadd.f32 %v4263_v19, %v3911_v17 }
 0x2a5   : > { %v4797_v31 = vmul.f32 1.442695, %v4747_v54  ;;  %v6085_v56 = vpop.eup %6084 }
 0x2a6   : > { %4968 = vst.msk [vmem:[%s7638_s16 + $0x38] sm:$0xf] %vm4953_vm9, %v4935_v32  ;;  %v4357_v25 = vmul.f32 %v7941_v42, %v4321_v22  ;;  %v4268_v34 = vpop.f32.mrf.mxu0  ;;  %v3861_v16 = vpop.f32.mrf.mxu3  ;;  %v4842_v62 = vadd.f32 1.0, %v6085_v56 }
 0x2a7   : > { %v3190_v41 = vpop.f32.mrf.mxu2  ;;  %6088 = vpow2.f32 %v4797_v31 }
 0x2a8   : > { %v4393_v60 = vadd.f32 %v7947_v46, %v4357_v25  ;;  %v3246_v39 = vadd.f32 %v3190_v41, %v7249_v0  ;;  %v4696_v50 = vpop.f32.mrf.mxu1  ;;  %v6087_v0 = vpop.eup %6086  ;;  %6090 = vrcp.f32 %v4842_v62 }
 0x2a9   : > { %v4697_v6 = vadd.f32 %v5963_v49, %v4696_v50  ;;  %v5970_v49 = vunpack.c.l.bf16 %v5998_v52 }
 0x2aa   : > { %v4904_v7 = vmul.f32 %v6083_v8, %v4393_v60  ;;  %v3912_v58 = vadd.f32 %v3856_v10, %v3246_v39 }
 0x2ab   : > { %v4748_v35 = vsub.f32 0.0, %v4697_v6 }
 0x2ac   : > { %v4936_v43 = vpack.c.bf16 %v4904_v7, %v4904_v7  ;;  %v4322_v33 = vadd.f32 %v4266_v18, %v3912_v58 }
 0x2ad   : > { %v6089_v44 = vpop.eup %6088  ;;  %v4799_v20 = vmul.f32 1.442695, %v4748_v35 }
 0x2ae   : > { %4969 = vst.msk [vmem:[%s7638_s16 + $0x3c] sm:$0xf] %vm4953_vm9, %v4936_v43  ;;  %v4358_v19 = vmul.f32 %v7941_v42, %v4322_v33  ;;  %v4271_v29 = vpop.f32.mrf.mxu0  ;;  %v3863_v5 = vpop.f32.mrf.mxu3  ;;  %v4843_v18 = vadd.f32 1.0, %v6089_v44 }
 0x2af   : > { %v3192_v12 = vpop.f32.mrf.mxu2  ;;  %6092 = vpow2.f32 %v4799_v20  ;;  %v6091_v4 = vpop.eup %6090  ;;  %v5999_v20 = vld [vmem:[%s7492_s9 + $0x60] sm:$0xff]  }
 0x2b0   : > { %v4394_v14 = vadd.f32 %v7947_v46, %v4358_v19  ;;  %v3247_v10 = vadd.f32 %v3192_v12, %v7276_v55  ;;  %v4699_v45 = vpop.f32.mrf.mxu1  ;;  %v5967_v55 = vunpack.c.h.bf16 %v5997_v27  ;;  %6094 = vrcp.f32 %v4843_v18 }
 0x2b1   : > { %v4700_v24 = vadd.f32 %v5966_v21, %v4699_v45 }
 0x2b2   : > { %v4905_v11 = vmul.f32 %v6087_v0, %v4394_v14  ;;  %v3913_v26 = vadd.f32 %v3858_v13, %v3247_v10 }
 0x2b3   : > { %v4749_v51 = vsub.f32 0.0, %v4700_v24 }
 0x2b4   : > { %v4937_v30 = vpack.c.bf16 %v4905_v11, %v4905_v11  ;;  %v4323_v1 = vadd.f32 %v4268_v34, %v3913_v26 }
 0x2b5   : > { %v4801_v3 = vmul.f32 1.442695, %v4749_v51  ;;  %v6093_v32 = vpop.eup %6092 }
 0x2b6   : > { %4970 = vst.msk [vmem:[%s7638_s16 + $0x40] sm:$0xf] %vm4953_vm9, %v4937_v30  ;;  %v4359_v59 = vmul.f32 %v7941_v42, %v4323_v1  ;;  %v4273_v9 = vpop.f32.mrf.mxu0  ;;  %v3866_v13 = vpop.f32.mrf.mxu3  ;;  %v4844_v41 = vadd.f32 1.0, %v6093_v32 }
 0x2b7   : > { %v3195_v15 = vpop.f32.mrf.mxu2  ;;  %6096 = vpow2.f32 %v4801_v3 }
 0x2b8   : > { %v4395_v61 = vadd.f32 %v7947_v46, %v4359_v59  ;;  %v3248_v2 = vadd.f32 %v3195_v15, %v7295_v23  ;;  %v4701_v38 = vpop.f32.mrf.mxu1  ;;  %v6095_v23 = vpop.eup %6094  ;;  %6098 = vrcp.f32 %v4844_v41  ;;  %v5974_v59 = vunpack.c.l.bf16 %v5999_v20 }
 0x2b9   : > { %v4702_v17 = vadd.f32 %v5967_v55, %v4701_v38 }
 0x2ba   : > { %v4906_v40 = vmul.f32 %v6091_v4, %v4395_v61  ;;  %v3914_v57 = vadd.f32 %v3861_v16, %v3248_v2 }
 0x2bb   : > { %v4750_v25 = vsub.f32 0.0, %v4702_v17 }
 0x2bc   : > { %v4938_v22 = vpack.c.bf16 %v4906_v40, %v4906_v40  ;;  %v4324_v54 = vadd.f32 %v4271_v29, %v3914_v57 }
 0x2bd   : > { %v6097_v50 = vpop.eup %6096  ;;  %v4803_v58 = vmul.f32 1.442695, %v4750_v25 }
 0x2be   : > { %4971 = vst.msk [vmem:[%s7638_s16 + $0x44] sm:$0xf] %vm4953_vm9, %v4938_v22  ;;  %v4360_v37 = vmul.f32 %v7941_v42, %v4324_v54  ;;  %v4276_v34 = vpop.f32.mrf.mxu0  ;;  %v3868_v16 = vpop.f32.mrf.mxu3  ;;  %v4845_v19 = vadd.f32 1.0, %v6097_v50  ;;  %v6000_v50 = vld [vmem:[%s7492_s9 + $0x68] sm:$0xff]  }
 0x2bf   : > { %v3197_v60 = vpop.f32.mrf.mxu2  ;;  %6100 = vpow2.f32 %v4803_v58  ;;  %v6099_v10 = vpop.eup %6098 }
 0x2c0   : > { %v4396_v31 = vadd.f32 %v7947_v46, %v4360_v37  ;;  %v3249_v39 = vadd.f32 %v3197_v60, %v7318_v63  ;;  %v4704_v8 = vpop.f32.mrf.mxu1  ;;  %v5971_v63 = vunpack.c.h.bf16 %v5998_v52  ;;  %6102 = vrcp.f32 %v4845_v19 }
 0x2c1   : > { %v4705_v27 = vadd.f32 %v5970_v49, %v4704_v8 }
 0x2c2   : > { %v4907_v7 = vmul.f32 %v6095_v23, %v4396_v31  ;;  %v3915_v6 = vadd.f32 %v3863_v5, %v3249_v39 }
 0x2c3   : > { %v4751_v33 = vsub.f32 0.0, %v4705_v27 }
 0x2c4   : > { %v4939_v56 = vpack.c.bf16 %v4907_v7, %v4907_v7  ;;  %v4325_v43 = vadd.f32 %v4273_v9, %v3915_v6 }
 0x2c5   : > { %v4805_v62 = vmul.f32 1.442695, %v4751_v33  ;;  %v6101_v26 = vpop.eup %6100  ;;  %v5978_v33 = vunpack.c.l.bf16 %v6000_v50 }
 0x2c6   : > { %4972 = vst.msk [vmem:[%s7638_s16 + $0x48] sm:$0xf] %vm4953_vm9, %v4939_v56  ;;  %v4361_v35 = vmul.f32 %v7941_v42, %v4325_v43  ;;  %v4278_v29 = vpop.f32.mrf.mxu0  ;;  %v3871_v14 = vpop.f32.mrf.mxu3  ;;  %v4846_v9 = vadd.f32 1.0, %v6101_v26 }
 0x2c7   : > { %v3200_v21 = vpop.f32.mrf.mxu2  ;;  %6104 = vpow2.f32 %v4805_v62 }
 0x2c8   : > { %v4397_v0 = vadd.f32 %v7947_v46, %v4361_v35  ;;  %v3250_v12 = vadd.f32 %v3200_v21, %v7336_v48  ;;  %v4706_v5 = vpop.f32.mrf.mxu1  ;;  %v6103_v48 = vpop.eup %6102  ;;  %6106 = vrcp.f32 %v4846_v9 }
 0x2c9   : > { %v4707_v11 = vadd.f32 %v5971_v63, %v4706_v5 }
 0x2ca   : > { %v4908_v45 = vmul.f32 %v6099_v10, %v4397_v0  ;;  %v3916_v44 = vadd.f32 %v3866_v13, %v3250_v12 }
 0x2cb   : > { %v4752_v51 = vsub.f32 0.0, %v4707_v11 }
 0x2cc   : > { %v4940_v24 = vpack.c.bf16 %v4908_v45, %v4908_v45  ;;  %v4326_v30 = vadd.f32 %v4276_v34, %v3916_v44 }
 0x2cd   : > { %v6105_v13 = vpop.eup %6104  ;;  %v4807_v38 = vmul.f32 1.442695, %v4752_v51 }
 0x2ce   : > { %4973 = vst.msk [vmem:[%s7638_s16 + $0x4c] sm:$0xf] %vm4953_vm9, %v4940_v24  ;;  %v4362_v1 = vmul.f32 %v7941_v42, %v4326_v30  ;;  %v4281_v18 = vpop.f32.mrf.mxu0  ;;  %v3873_v2 = vpop.f32.mrf.mxu3  ;;  %v4847_v22 = vadd.f32 1.0, %v6105_v13  ;;  %v5979_v24 = vunpack.c.h.bf16 %v6000_v50 }
 0x2cf   : > { %v3202_v55 = vpop.f32.mrf.mxu2  ;;  %6108 = vpow2.f32 %v4807_v38  ;;  %v6107_v41 = vpop.eup %6106 }
 0x2d0   : > { %v4398_v15 = vadd.f32 %v7947_v46, %v4362_v1  ;;  %v3251_v61 = vadd.f32 %v3202_v55, %v7355_v28  ;;  %v4709_v3 = vpop.f32.mrf.mxu1  ;;  %v5975_v28 = vunpack.c.h.bf16 %v5999_v20  ;;  %6110 = vrcp.f32 %v4847_v22  ;;  %v8077_v22 = vld [vmem:[#allocation8_spill] sm:$0xff] }
 0x2d1   : > { %v4710_v57 = vadd.f32 %v5974_v59, %v4709_v3 }
 0x2d2   : > { %v4909_v4 = vmul.f32 %v6103_v48, %v4398_v15  ;;  %v3917_v40 = vadd.f32 %v3868_v16, %v3251_v61  ;;  %v6001_v61 = vld [vmem:[%s7492_s9 + $0x70] sm:$0xff]  }
 0x2d3   : > { %v4753_v32 = vsub.f32 0.0, %v4710_v57  ;;  %v5983_v50 = vunpack.c.h.bf16 %v6001_v61 }
 0x2d4   : > { %v4941_v17 = vpack.c.bf16 %v4909_v4, %v4909_v4  ;;  %v4327_v52 = vadd.f32 %v4278_v29, %v3917_v40  ;;  %v5982_v40 = vunpack.c.l.bf16 %v6001_v61 }
 0x2d5   : > { %v4809_v49 = vmul.f32 1.442695, %v4753_v32  ;;  %v6109_v7 = vpop.eup %6108 }
 0x2d6   : > { %4974 = vst.msk [vmem:[%s7638_s16 + $0x50] sm:$0xf] %vm4953_vm9, %v4941_v17  ;;  %v4363_v54 = vmul.f32 %v7941_v42, %v4327_v52  ;;  %v4283_v37 = vpop.f32.mrf.mxu0  ;;  %v3876_v8 = vpop.f32.mrf.mxu3  ;;  %v4848_v19 = vadd.f32 1.0, %v6109_v7 }
 0x2d7   : > { %v3205_v25 = vpop.f32.mrf.mxu2  ;;  %6112 = vpow2.f32 %v4809_v49 }
 0x2d8   : > { %v4399_v34 = vadd.f32 %v7947_v46, %v4363_v54  ;;  %v3252_v23 = vadd.f32 %v3205_v25, %v7372_v53  ;;  %v4711_v60 = vpop.f32.mrf.mxu1  ;;  %v6111_v53 = vpop.eup %6110  ;;  %6114 = vrcp.f32 %v4848_v19 }
 0x2d9   : > { %v4712_v16 = vadd.f32 %v5975_v28, %v4711_v60 }
 0x2da   : > { %v4910_v31 = vmul.f32 %v6107_v41, %v4399_v34  ;;  %v3918_v39 = vadd.f32 %v3871_v14, %v3252_v23 }
 0x2db   : > { %v4754_v56 = vsub.f32 0.0, %v4712_v16 }
 0x2dc   : > { %v4942_v58 = vpack.c.bf16 %v4910_v31, %v4910_v31  ;;  %v4328_v6 = vadd.f32 %v4281_v18, %v3918_v39 }
 0x2dd   : > { %v6113_v0 = vpop.eup %6112  ;;  %v4811_v12 = vmul.f32 1.442695, %v4754_v56 }
 0x2de   : > { %4975 = vst.msk [vmem:[%s7638_s16 + $0x54] sm:$0xf] %vm4953_vm9, %v4942_v58  ;;  %v4364_v27 = vmul.f32 %v7941_v42, %v4328_v6  ;;  %v4286_v43 = vpop.f32.mrf.mxu0  ;;  %v4849_v11 = vadd.f32 1.0, %v6113_v0  ;;  %v3878_v20 = vpop.f32.mrf.mxu3 }
 0x2df   : > { %v3207_v35 = vpop.f32.mrf.mxu2  ;;  %6116 = vpow2.f32 %v4811_v12  ;;  %v6115_v59 = vpop.eup %6114 }
 0x2e0   : > { %v4400_v29 = vadd.f32 %v7947_v46, %v4364_v27  ;;  %v3253_v63 = vadd.f32 %v3207_v35, %v7399_v36  ;;  %v4714_v21 = vpop.f32.mrf.mxu1  ;;  %6118 = vrcp.f32 %v4849_v11  ;;  %v8078_v27 = vld [vmem:[#allocation9_spill] sm:$0xff] }
 0x2e1   : > { %v4715_v10 = vadd.f32 %v5978_v33, %v4714_v21  ;;  %v6002_v21 = vld [vmem:[%s7492_s9 + $0x78] sm:$0xff]  }
 0x2e2   : > { %v4911_v62 = vmul.f32 %v6111_v53, %v4400_v29  ;;  %v3919_v14 = vadd.f32 %v3873_v2, %v3253_v63 }
 0x2e3   : > { %v4755_v44 = vsub.f32 0.0, %v4715_v10 }
 0x2e4   : > { %v4943_v5 = vpack.c.bf16 %v4911_v62, %v4911_v62  ;;  %v4329_v45 = vadd.f32 %v4283_v37, %v3919_v14 }
 0x2e5   : > { %v4813_v51 = vmul.f32 1.442695, %v4755_v44  ;;  %v6117_v3 = vpop.eup %6116 }
 0x2e6   : > { %4976 = vst.msk [vmem:[%s7638_s16 + $0x58] sm:$0xf] %vm4953_vm9, %v4943_v5  ;;  %v4365_v26 = vmul.f32 %v7941_v42, %v4329_v45  ;;  %v4288_v30 = vpop.f32.mrf.mxu0  ;;  %v6119_v57 = vpop.eup %6118  ;;  %v4850_v17 = vadd.f32 1.0, %v6117_v3  ;;  %v5986_v5 = vunpack.c.l.bf16 %v6002_v21 }
 0x2e7   : > { %v3210_v36 = vpop.f32.mrf.mxu2  ;;  %6120 = vpow2.f32 %v4813_v51  ;;  %v3881_v52 = vpop.f32.mrf.mxu3 }
 0x2e8   : > { %v4401_v1 = vadd.f32 %v7947_v46, %v4365_v26  ;;  %v3254_v18 = vadd.f32 %v3210_v36, %v7418_v47  ;;  %v4716_v48 = vpop.f32.mrf.mxu1  ;;  %6122 = vrcp.f32 %v4850_v17  ;;  %v8079_v26 = vld [vmem:[#allocation2_spill] sm:$0xff] }
 0x2e9   : > { %v4717_v15 = vadd.f32 %v5979_v24, %v4716_v48 }
 0x2ea   : > { %v4912_v9 = vmul.f32 %v6115_v59, %v4401_v1  ;;  %v3920_v55 = vadd.f32 %v3876_v8, %v3254_v18 }
 0x2eb   : > { %v4756_v38 = vsub.f32 0.0, %v4717_v15 }
 0x2ec   : > { %v4944_v2 = vpack.c.bf16 %v4912_v9, %v4912_v9  ;;  %v4330_v13 = vadd.f32 %v4286_v43, %v3920_v55 }
 0x2ed   : > { %v6121_v25 = vpop.eup %6120  ;;  %v4815_v49 = vmul.f32 1.442695, %v4756_v38 }
 0x2ee   : > { %4977 = vst.msk [vmem:[%s7638_s16 + $0x5c] sm:$0xf] %vm4953_vm9, %v4944_v2  ;;  %v4366_v4 = vmul.f32 %v7941_v42, %v4330_v13  ;;  %v4291_v37 = vpop.f32.mrf.mxu0  ;;  %v4851_v16 = vadd.f32 1.0, %v6121_v25  ;;  %v6123_v43 = vpop.eup %6122  ;;  %v5987_v13 = vunpack.c.h.bf16 %v6002_v21 }
 0x2ef   : > { %v3212_v47 = vpop.f32.mrf.mxu2  ;;  %6124 = vpow2.f32 %v4815_v49  ;;  %v3883_v33 = vpop.f32.mrf.mxu3 }
 0x2f0   : > { %v4402_v32 = vadd.f32 %v7947_v46, %v4366_v4  ;;  %v3255_v54 = vadd.f32 %v3212_v47, %v8077_v22  ;;  %v4719_v28 = vpop.f32.mrf.mxu1  ;;  %6126 = vrcp.f32 %v4851_v16 }
 0x2f1   : > { %v4720_v41 = vadd.f32 %v5982_v40, %v4719_v28 }
 0x2f2   : > { %v4913_v34 = vmul.f32 %v6119_v57, %v4402_v32  ;;  %v3921_v23 = vadd.f32 %v3878_v20, %v3255_v54  ;;  %v8080_v57 = vld [vmem:[#allocation3_spill] sm:$0xff] }
 0x2f3   : > { %v4757_v39 = vsub.f32 0.0, %v4720_v41 }
 0x2f4   : > { %v4945_v60 = vpack.c.bf16 %v4913_v34, %v4913_v34  ;;  %v4331_v31 = vadd.f32 %v4288_v30, %v3921_v23 }
 0x2f5   : > { %v4817_v6 = vmul.f32 1.442695, %v4757_v39  ;;  %v6125_v0 = vpop.eup %6124 }
 0x2f6   : > { %4978 = vst.msk [vmem:[%s7638_s16 + $0x60] sm:$0xf] %vm4953_vm9, %v4945_v60  ;;  %v4367_v8 = vmul.f32 %v7941_v42, %v4331_v31  ;;  %v4293_v63 = vpop.f32.mrf.mxu0  ;;  %v6127_v45 = vpop.eup %6126  ;;  %v4852_v44 = vadd.f32 1.0, %v6125_v0 }
 0x2f7   : > { %v3215_v7 = vpop.f32.mrf.mxu2  ;;  %6128 = vpow2.f32 %v4817_v6  ;;  %v3886_v48 = vpop.f32.mrf.mxu3 }
 0x2f8   : > { %v4403_v58 = vadd.f32 %v7947_v46, %v4367_v8  ;;  %v3256_v56 = vadd.f32 %v3215_v7, %v8078_v27  ;;  %v4721_v53 = vpop.f32.mrf.mxu1  ;;  %6130 = vrcp.f32 %v4852_v44  ;;  %v8081_v8 = vld [vmem:[#allocation4_spill] sm:$0xff] }
 0x2f9   : > { %v4722_v29 = vadd.f32 %v5983_v50, %v4721_v53 }
 0x2fa   : > { %v4914_v19 = vmul.f32 %v6123_v43, %v4403_v58  ;;  %v3922_v35 = vadd.f32 %v3881_v52, %v3256_v56 }
 0x2fb   : > { %v4758_v10 = vsub.f32 0.0, %v4722_v29 }
 0x2fc   : > { %v4946_v62 = vpack.c.bf16 %v4914_v19, %v4914_v19  ;;  %v4332_v12 = vadd.f32 %v4291_v37, %v3922_v35 }
 0x2fd   : > { %v6129_v30 = vpop.eup %6128  ;;  %v4819_v51 = vmul.f32 1.442695, %v4758_v10 }
 0x2fe   : > { %4979 = vst.msk [vmem:[%s7638_s16 + $0x64] sm:$0xf] %vm4953_vm9, %v4946_v62  ;;  %v4368_v14 = vmul.f32 %v7941_v42, %v4332_v12  ;;  %v4853_v61 = vadd.f32 1.0, %v6129_v30  ;;  %v4296_v3 = vpop.f32.mrf.mxu0  ;;  %v6131_v47 = vpop.eup %6130 }
 0x2ff   : > { %v3217_v11 = vpop.f32.mrf.mxu2  ;;  %6132 = vpow2.f32 %v4819_v51  ;;  %v3888_v34 = vpop.f32.mrf.mxu3 }
 0x300   : > { %v4404_v20 = vadd.f32 %v7947_v46, %v4368_v14  ;;  %v3257_v24 = vadd.f32 %v3217_v11, %v8079_v26  ;;  %v4724_v36 = vpop.f32.mrf.mxu1  ;;  %6134 = vrcp.f32 %v4853_v61 }
 0x301   : > { %v4725_v59 = vadd.f32 %v5986_v5, %v4724_v36  ;;  %v8083_v36 = vld [vmem:[#allocation6_spill] sm:$0xff] }
 0x302   : > { %v4915_v1 = vmul.f32 %v6127_v45, %v4404_v20  ;;  %v3923_v18 = vadd.f32 %v3883_v33, %v3257_v24 }
 0x303   : > { %v4759_v15 = vsub.f32 0.0, %v4725_v59 }
 0x304   : > { %v4947_v9 = vpack.c.bf16 %v4915_v1, %v4915_v1  ;;  %v4333_v55 = vadd.f32 %v4293_v63, %v3923_v18  ;;  %v8082_v63 = vld [vmem:[#allocation5_spill] sm:$0xff] }
 0x305   : > { %v4821_v40 = vmul.f32 1.442695, %v4759_v15  ;;  %v6133_v37 = vpop.eup %6132 }
 0x306   : > { %4980 = vst.msk [vmem:[%s7638_s16 + $0x68] sm:$0xf] %vm4953_vm9, %v4947_v9  ;;  %v4369_v2 = vmul.f32 %v7941_v42, %v4333_v55  ;;  %v6135_v41 = vpop.eup %6134  ;;  %v4854_v60 = vadd.f32 1.0, %v6133_v37  ;;  %v4298_v31 = vpop.f32.mrf.mxu0 }
 0x307   : > { %v3220_v4 = vpop.f32.mrf.mxu2  ;;  %6136 = vpow2.f32 %v4821_v40  ;;  %v3891_v19 = vpop.f32.mrf.mxu3 }
 0x308   : > { %v4405_v38 = vadd.f32 %v7947_v46, %v4369_v2  ;;  %v3258_v17 = vadd.f32 %v3220_v4, %v8080_v57  ;;  %v4726_v52 = vpop.f32.mrf.mxu1  ;;  %6138 = vrcp.f32 %v4854_v60 }
 0x309   : > { %v4727_v54 = vadd.f32 %v5987_v13, %v4726_v52 }
 0x30a   : > { %v4916_v32 = vmul.f32 %v6131_v47, %v4405_v38  ;;  %v3924_v22 = vadd.f32 %v3886_v48, %v3258_v17 }
 0x30b   : > { %v4760_v23 = vsub.f32 0.0, %v4727_v54 }
 0x30c   : > { %v4948_v28 = vpack.c.bf16 %v4916_v32, %v4916_v32  ;;  %v4334_v25 = vadd.f32 %v4296_v3, %v3924_v22 }
 0x30d   : > { %v6137_v7 = vpop.eup %6136  ;;  %v4823_v6 = vmul.f32 1.442695, %v4760_v23 }
 0x30e   : > { %4981 = vst.msk [vmem:[%s7638_s16 + $0x6c] sm:$0xf] %vm4953_vm9, %v4948_v28  ;;  %v4370_v49 = vmul.f32 %v7941_v42, %v4334_v25  ;;  %v4855_v33 = vadd.f32 1.0, %v6137_v7  ;;  %v6139_v0 = vpop.eup %6138  ;;  %v4301_v62 = vpop.f32.mrf.mxu0 }
 0x30f   : > { %v3222_v39 = vpop.f32.mrf.mxu2  ;;  %6140 = vpow2.f32 %v4823_v6  ;;  %v3893_v1 = vpop.f32.mrf.mxu3 }
 0x310   : > { %v4406_v16 = vadd.f32 %v7947_v46, %v4370_v49  ;;  %v3259_v50 = vadd.f32 %v3222_v39, %v8081_v8  ;;  %6142 = vrcp.f32 %v4855_v33 }
 0x312   : > { %v4917_v58 = vmul.f32 %v6135_v41, %v4406_v16  ;;  %v3925_v27 = vadd.f32 %v3888_v34, %v3259_v50 }
 0x314   : > { %v4949_v56 = vpack.c.bf16 %v4917_v58, %v4917_v58  ;;  %v4335_v43 = vadd.f32 %v4298_v31, %v3925_v27 }
 0x315   : > { %v6141_v10 = vpop.eup %6140 }
 0x316   : > { %4982 = vst.msk [vmem:[%s7638_s16 + $0x70] sm:$0xf] %vm4953_vm9, %v4949_v56  ;;  %v4371_v53 = vmul.f32 %v7941_v42, %v4335_v43  ;;  %v6143_v11 = vpop.eup %6142  ;;  %v4856_v20 = vadd.f32 1.0, %v6141_v10  ;;  %v4303_v59 = vpop.f32.mrf.mxu0 }
 0x317   : > { %v3225_v35 = vpop.f32.mrf.mxu2 }
 0x318   : > { %v4407_v29 = vadd.f32 %v7947_v46, %v4371_v53  ;;  %v3260_v21 = vadd.f32 %v3225_v35, %v8082_v63  ;;  %6144 = vrcp.f32 %v4856_v20 }
 0x31a   : > { %v4918_v12 = vmul.f32 %v6139_v0, %v4407_v29  ;;  %v3926_v14 = vadd.f32 %v3891_v19, %v3260_v21 }
 0x31c   : > { %v4950_v5 = vpack.c.bf16 %v4918_v12, %v4918_v12  ;;  %v4336_v45 = vadd.f32 %v4301_v62, %v3926_v14 }
 0x31e   : > { %4983 = vst.msk [vmem:[%s7638_s16 + $0x74] sm:$0xf] %vm4953_vm9, %v4950_v5  ;;  %v4372_v44 = vmul.f32 %v7941_v42, %v4336_v45  ;;  %v6145_v61 = vpop.eup %6144 }
 0x31f   : > { %v3227_v26 = vpop.f32.mrf.mxu2 }
 0x320   : > { %v4408_v24 = vadd.f32 %v7947_v46, %v4372_v44  ;;  %v3261_v30 = vadd.f32 %v3227_v26, %v8083_v36 }
 0x322   : > { %v4919_v51 = vmul.f32 %v6143_v11, %v4408_v24  ;;  %v3927_v18 = vadd.f32 %v3893_v1, %v3261_v30 }
 0x324   : > { %v4951_v48 = vpack.c.bf16 %v4919_v51, %v4919_v51  ;;  %v4337_v9 = vadd.f32 %v4303_v59, %v3927_v18 }
 0x326   : > { %4984 = vst.msk [vmem:[%s7638_s16 + $0x78] sm:$0xf] %vm4953_vm9, %v4951_v48  ;;  %v4373_v55 = vmul.f32 %v7941_v42, %v4337_v9 }
 0x328   : > { %v4409_v15 = vadd.f32 %v7947_v46, %v4373_v55 }
 0x32a   : > { %v4920_v3 = vmul.f32 %v6145_v61, %v4409_v15 }
 0x32c   : > { %v4952_v2 = vpack.c.bf16 %v4920_v3, %v4920_v3 }
 0x32e   : > { %4985 = vst.msk [vmem:[%s7638_s16 + $0x7c] sm:$0xf] %vm4953_vm9, %v4952_v2 }
 0x32f PF: > { %s17_s24 = sadd.s32 1, %s6171_s24  }
 0x330   : > { %p14_p4 = scmp.ge.s32.totalorder %s17_s24, 4  }
 0x332   :  { %16 = sbr.rel (!%p14_p4) target bundleno = 1 (0x1), region = 94 }

// kernel: scconv_forward.8
= control target key start
LH: loop header
LB: loop body
LE: loop exit
PB: predicated region body
PF: predicated region fallthrough
CT: control target
= control target key end

     0   :  { %s5235_s15 = smov 0   ;;  %s6730_s0 = inlined_call_operand.vmem [shape: bf16[2,18,18,32], index: 0, kind: input, shape index: {}]   ;;  %s6731_s1 = inlined_call_operand.vmem [shape: bf16[9,32,32], index: 1, kind: input, shape index: {}]   ;;  %s6732_s2 = inlined_call_operand.vmem [shape: f32[1,32], index: 2, kind: input, shape index: {}]   ;;  %s6733_s3 = inlined_call_operand.vmem [shape: f32[1,32], index: 3, kind: input, shape index: {}]   ;;  %s6734_s4 = inlined_call_operand.vmem [shape: f32[2,16,16,32], index: 4, kind: output, shape index: {}]  }
   0x1 LB: > { %s4376_s16 = sadd.s32 4294967295, %s5208_s15   ;;  %p4380_p0 = scmp.ge.s32.totalorder %s5208_s15, 1  ;;  %s5208_s15 = sphi %s5235_s15, %s14_s15  }
   0x2   : > { %p162_p1 = scmp.lt.s32.totalorder %s5208_s15, 3 }
   0x4   : > { %p163_p2 = pnand %p4380_p0, %p162_p1 }
   0x6   : > { %166 = sbr.rel (%p163_p2) target bundleno = 758 (0x2f6), region = 36 }
   0xb   : > { %v5086_v0 = vld [vmem:[%s6731_s1 + $0x18] sm:$0xff]  ;;  %p188_p3 = scmp.lt.s32.totalorder %s4376_s16, 1  ;;  %v5085_v1 = vld [vmem:[%s6731_s1 + $0x10] sm:$0xff]  ;;  %v5088_v2 = vld [vmem:[%s6731_s1 + $0x28] sm:$0xff]  ;;  %vm251_vm0 = vsmask.f32 3328 }
   0xc   : > { %5133 = vmatpush.bf16.msra.mxu1 %v5086_v0  ;;  %5134 = vmatpush.bf16.msra.mxu2 %v5086_v0  ;;  %v5106_v3 = vld [vmem:[%s6731_s1 + $0x38] sm:$0xff]  ;;  %v5084_v4 = vld [vmem:[%s6731_s1 + $0x8] sm:$0xff]  ;;  %vm252_vm1 = vsmask.f32 7440  ;;  %vm703_vm3 = vcmask 261120   ;;  %vm1118_vm4 = vcmask 1042432  }
   0xd   : > { %s6746_s16 = smov (!%p188_p3, %s4376_s16), 1  ;;  %5135 = vmatpush.bf16.msra.mxu3 %v5086_v0  ;;  %758 = vmatpush.bf16.msra.mxu0 %v5086_v0  ;;  %v5108_v5 = vld [vmem:[%s6731_s1 + $0x48] sm:$0xff]  ;;  %vm5279_vm2 = vmor %vm251_vm0, %vm252_vm1  ;;  %vm1119_vm5 = vcmask 1046532  }
   0xe   : > { %s5139_s21 = smul.u32 216, %s6746_s16  ;;  %vm5474_vm6 = vmor %vm1118_vm4, %vm1119_vm5  ;;  %s5066_s10 = sshll.u32 %s6746_s16, 8 }
   0xf   : > { %s6356_s14 = scalar_lea.vmem %s6734_s4, %s5066_s10 }
  0x10   : > { %5136 = vmatpush.bf16.msra.mxu1 %v5085_v1  ;;  %5137 = vmatpush.bf16.msra.mxu2 %v5085_v1  ;;  %s5267_s6 = scalar_lea.vmem %s6730_s0, %s5139_s21 }
  0x11   : > { %5138 = vmatpush.bf16.msra.mxu3 %v5085_v1  ;;  %759 = vmatpush.bf16.msra.mxu0 %v5085_v1  ;;  %v207_v6 = vld [vmem:[%s5267_s6 + $0x30] sm:$0xf]  ;;  %v208_v7 = vld [vmem:[%s5267_s6 + $0x34] sm:$0xf]  ;;  %v239_v8 = vld [vmem:[%s5267_s6 + $0x38] sm:$0x1] }
  0x12   : > { %v351_v9 = vshrl.u32 %v207_v6, 16  ;;  %v354_v10 = vshll.u32 %v207_v6, 16  ;;  %v360_v11 = vshll.u32 %v208_v7, 16  ;;  %v364_v12 = vshrl.u32 %v208_v7, 16  ;;  %v215_v13 = vld [vmem:[%s5267_s6 + $0x60] sm:$0xf] }
  0x13   : > { %v370_v14 = vshll.u32 %v239_v8, 16  ;;  %v216_v15 = vld [vmem:[%s5267_s6 + $0x64] sm:$0xf]  ;;  %v243_v16 = vld [vmem:[%s5267_s6 + $0x68] sm:$0x1]  ;;  %v447_v17 = vshrl.u32 %v215_v13, 16 }
  0x14   : > { %1352 = vmatpush.bf16.msrb.mxu2 %v5088_v2  ;;  %987 = vmatpush.bf16.msrb.mxu1 %v5084_v4  ;;  %v353_v18 = vrot.slane %v351_v9, 4  ;;  %v356_v19 = vrot.slane %v354_v10, 5  ;;  %v362_v20 = vrot.slane %v360_v11, 5  ;;  %v366_v21 = vrot.slane %v364_v12, 4  ;;  %v223_v22 = vld [vmem:[%s5267_s6 + $0x90] sm:$0xf] }
  0x15   : > { %1651 = vmatpush.bf16.msrb.mxu3 %v5106_v3  ;;  %2317 = vmatpush.bf16.msrb.mxu0 %v5108_v5  ;;  %v372_v23 = vrot.slane %v370_v14, 5  ;;  %v449_v24 = vrot.slane %v447_v17, 4  ;;  %v450_v25 = vshll.u32 %v215_v13, 16  ;;  %v456_v26 = vshll.u32 %v216_v15, 16  ;;  %v224_v31 = vld [vmem:[%s5267_s6 + $0x94] sm:$0xf] }
  0x16   : > { %v357_v27 = vor.u32 %v356_v19, %v353_v18  ;;  %v367_v28 = vor.u32 %v366_v21, %v362_v20  ;;  %v460_v29 = vshrl.u32 %v216_v15, 16  ;;  %v466_v30 = vshll.u32 %v243_v16, 16  ;;  %v247_v41 = vld [vmem:[%s5267_s6 + $0x98] sm:$0x1]  ;;  %v199_v57 = vld [vmem:[%s5267_s6] sm:$0xf] }
  0x17   : > { %v452_v33 = vrot.slane %v450_v25, 5  ;;  %v458_v34 = vrot.slane %v456_v26, 5  ;;  %v543_v35 = vshrl.u32 %v223_v22, 16  ;;  %v546_v43 = vshll.u32 %v223_v22, 16  ;;  %v5292_v61 = vld [vmem:[%s5267_s6 + $0x4] sm:$0xf] }
  0x18   : > { %v358_v36 = vrot.slane %v357_v27, 4  ;;  %v368_v37 = vrot.slane %v367_v28, 4  ;;  %v462_v38 = vrot.slane %v460_v29, 4  ;;  %v468_v39 = vrot.slane %v466_v30, 5  ;;  %v5295_v62 = vld [vmem:[%s5267_s6 + $0x8] sm:$0x1] }
  0x19   : > { %v453_v40 = vor.u32 %v452_v33, %v449_v24  ;;  %v545_v42 = vrot.slane %v543_v35, 4  ;;  %v552_v44 = vshll.u32 %v224_v31, 16  ;;  %v556_v48 = vshrl.u32 %v224_v31, 16  ;;  %v209_v15 = vld [vmem:[%s5267_s6 + $0x3c] sm:$0xf] }
  0x1a   : > { %v363_v45 = vsel %vm5279_vm2, %v358_v36, %v362_v20  ;;  %v373_v46 = vsel %vm5279_vm2, %v368_v37, %v372_v23  ;;  %v463_v47 = vor.u32 %v462_v38, %v458_v34  ;;  %v548_v52 = vrot.slane %v546_v43, 5  ;;  %v5307_v16 = vld [vmem:[%s5267_s6 + $0x40] sm:$0xf]  ;;  %v5312_v21 = vld [vmem:[%s5267_s6 + $0x44] sm:$0x1] }
  0x1b   : > { %v651_v49 = vunpack.c.l.b16 %v363_v45  ;;  %v652_v50 = vunpack.c.l.b16 %v373_v46  ;;  %v454_v51 = vrot.slane %v453_v40, 4  ;;  %v554_v54 = vrot.slane %v552_v44, 5  ;;  %v217_v29 = vld [vmem:[%s5267_s6 + $0x6c] sm:$0xf]  ;;  %v244_v43 = vld [vmem:[%s5267_s6 + $0x74] sm:$0x1] }
  0x1c   : > { %v464_v53 = vrot.slane %v463_v47, 4  ;;  %v558_v55 = vrot.slane %v556_v48, 4  ;;  %v562_v56 = vshll.u32 %v247_v41, 16  ;;  %v549_v60 = vor.u32 %v548_v52, %v545_v42 }
  0x1d   : > { %v679_v58 = vpack.c.b16 %v652_v50, %v651_v49  ;;  %v459_v59 = vsel %vm5279_vm2, %v454_v51, %v458_v34  ;;  %v255_v5 = vshrl.u32 %v199_v57, 16  ;;  %v258_v6 = vshll.u32 %v199_v57, 16  ;;  %v225_v57 = vld [vmem:[%s5267_s6 + $0x9c] sm:$0xf] }
  0x1e   : > { %v469_v63 = vsel %vm5279_vm2, %v464_v53, %v468_v39  ;;  %v659_v0 = vunpack.c.l.b16 %v459_v59  ;;  %v559_v1 = vor.u32 %v558_v55, %v554_v54  ;;  %v564_v2 = vrot.slane %v562_v56, 5  ;;  %v218_v39 = vld [vmem:[%s5267_s6 + $0x70] sm:$0xf] }
  0x1f   : > { %4400 = vmatmul.msk.bf16.vlgmr.msra.gmra.mxu1 %vm703_vm3, %v679_v58  ;;  %v660_v3 = vunpack.c.l.b16 %v469_v63  ;;  %v550_v4 = vrot.slane %v549_v60, 4  ;;  %v264_v8 = vshll.u32 %v5292_v61, 16  ;;  %v268_v9 = vshrl.u32 %v5292_v61, 16  ;;  %v226_v63 = vld [vmem:[%s5267_s6 + $0xa0] sm:$0xf] }
  0x20   : > { %v560_v7 = vrot.slane %v559_v1, 4  ;;  %v274_v10 = vshll.u32 %v5295_v62, 16  ;;  %v257_v13 = vrot.slane %v255_v5, 4  ;;  %v260_v14 = vrot.slane %v258_v6, 5 }
  0x21   : > { %v683_v11 = vpack.c.b16 %v660_v3, %v659_v0  ;;  %v555_v12 = vsel %vm5279_vm2, %v550_v4, %v554_v54  ;;  %v266_v19 = vrot.slane %v264_v8, 5  ;;  %v270_v20 = vrot.slane %v268_v9, 4  ;;  %v248_v4 = vld [vmem:[%s5267_s6 + $0xa4] sm:$0x1] }
  0x22   : > { %v565_v17 = vsel %vm5279_vm2, %v560_v7, %v564_v2  ;;  %v667_v18 = vunpack.c.l.b16 %v555_v12  ;;  %v261_v23 = vor.u32 %v260_v14, %v257_v13  ;;  %v276_v24 = vrot.slane %v274_v10, 5  ;;  %v201_v13 = vld [vmem:[%s5267_s6 + $0xc] sm:$0xf] }
  0x23   : > { %4404 = vmatmul.msk.bf16.vlgmr.msra.gmra.mxu2 %vm703_vm3, %v683_v11  ;;  %v668_v22 = vunpack.c.l.b16 %v565_v17  ;;  %v271_v25 = vor.u32 %v270_v20, %v266_v19  ;;  %v375_v26 = vshrl.u32 %v209_v15, 16  ;;  %v378_v27 = vshll.u32 %v209_v15, 16 }
  0x24   : > { %v384_v28 = vshll.u32 %v5307_v16, 16  ;;  %v262_v31 = vrot.slane %v261_v23, 4  ;;  %v388_v33 = vshrl.u32 %v5307_v16, 16  ;;  %v394_v34 = vshll.u32 %v5312_v21, 16 }
  0x25   : > { %v687_v30 = vpack.c.b16 %v668_v22, %v667_v18  ;;  %v272_v35 = vrot.slane %v271_v25, 4  ;;  %v377_v36 = vrot.slane %v375_v26, 4  ;;  %v380_v37 = vrot.slane %v378_v27, 5  ;;  %v5341_v25 = vld [vmem:[%s5267_s6 + $0x10] sm:$0xf] }
  0x26   : > { %v386_v38 = vrot.slane %v384_v28, 5  ;;  %v267_v40 = vsel %vm5279_vm2, %v262_v31, %v266_v19  ;;  %v390_v41 = vrot.slane %v388_v33, 4  ;;  %v396_v42 = vrot.slane %v394_v34, 5  ;;  %v5087_v19 = vld [vmem:[%s6731_s1 + $0x20] sm:$0xff] }
  0x27   : > { %4408 = vmatmul.msk.bf16.vlgmr.msra.gmra.mxu3 %vm703_vm3, %v687_v30  ;;  %v471_v44 = vshrl.u32 %v217_v29, 16  ;;  %v277_v45 = vsel %vm5279_vm2, %v272_v35, %v276_v24  ;;  %v643_v46 = vunpack.c.l.b16 %v267_v40  ;;  %v381_v47 = vor.u32 %v380_v37, %v377_v36  ;;  %1353 = vmatpush.bf16.msrb.mxu2 %v5087_v19  ;;  %v5352_v40 = vld [vmem:[%s5267_s6 + $0x4c] sm:$0xf] }
  0x28   : > { %v474_v48 = vshll.u32 %v217_v29, 16  ;;  %v644_v49 = vunpack.c.l.b16 %v277_v45  ;;  %v391_v50 = vor.u32 %v390_v41, %v386_v38  ;;  %v480_v52 = vshll.u32 %v218_v39, 16  ;;  %v5344_v29 = vld [vmem:[%s5267_s6 + $0x14] sm:$0x1] }
  0x29   : > { %v473_v51 = vrot.slane %v471_v44, 4  ;;  %v382_v53 = vrot.slane %v381_v47, 4  ;;  %v484_v55 = vshrl.u32 %v218_v39, 16  ;;  %v490_v56 = vshll.u32 %v244_v43, 16  ;;  %v211_v39 = vld [vmem:[%s5267_s6 + $0x48] sm:$0xf] }
  0x2a   : > { %v476_v54 = vrot.slane %v474_v48, 5  ;;  %v675_v58 = vpack.c.b16 %v644_v49, %v643_v46  ;;  %v392_v59 = vrot.slane %v391_v50, 4  ;;  %v482_v60 = vrot.slane %v480_v52, 5  ;;  %v5105_v45 = vld [vmem:[%s6731_s1 + $0x30] sm:$0xff]  ;;  %v5083_v46 = vld [vmem:[%s6731_s1] sm:$0xff] }
  0x2b   : > { %v387_v0 = vsel %vm5279_vm2, %v382_v53, %v386_v38  ;;  %v486_v2 = vrot.slane %v484_v55, 4  ;;  %v492_v3 = vrot.slane %v490_v56, 5  ;;  %v567_v7 = vshrl.u32 %v225_v57, 16  ;;  %v5368_v56 = vld [vmem:[%s5267_s6 + $0x50] sm:$0x1]  ;;  %1652 = vmatpush.bf16.msrb.mxu3 %v5105_v45  ;;  %988 = vmatpush.bf16.msrb.mxu1 %v5083_v46 }
  0x2c   : > { %v477_v1 = vor.u32 %v476_v54, %v473_v51  ;;  %4396 = vmatmul.msk.bf16.vlgmr.msra.gmra.mxu0 %vm703_vm3, %v675_v58  ;;  %v397_v5 = vsel %vm5279_vm2, %v392_v59, %v396_v42  ;;  %v653_v6 = vunpack.c.l.b16 %v387_v0  ;;  %v570_v8 = vshll.u32 %v225_v57, 16  ;;  %v5107_v51 = vld [vmem:[%s6731_s1 + $0x40] sm:$0xff] }
  0x2d   : > { %v654_v9 = vunpack.c.l.b16 %v397_v5  ;;  %v487_v11 = vor.u32 %v486_v2, %v482_v60  ;;  %v576_v12 = vshll.u32 %v226_v63, 16  ;;  %v569_v14 = vrot.slane %v567_v7, 4  ;;  %2318 = vmatpush.bf16.msrb.mxu0 %v5107_v51 }
  0x2e   : > { %v478_v10 = vrot.slane %v477_v1, 4  ;;  %v572_v15 = vrot.slane %v570_v8, 5  ;;  %v580_v17 = vshrl.u32 %v226_v63, 16  ;;  %v586_v18 = vshll.u32 %v248_v4, 16  ;;  %v220_v8 = vld [vmem:[%s5267_s6 + $0x7c] sm:$0xf] }
  0x2f   : > { %v680_v20 = vpack.c.b16 %v654_v9, %v653_v6  ;;  %v488_v23 = vrot.slane %v487_v11, 4  ;;  %v578_v24 = vrot.slane %v576_v12, 5  ;;  %v279_v33 = vshrl.u32 %v201_v13, 16 }
  0x30   : > { %v483_v22 = vsel %vm5279_vm2, %v478_v10, %v482_v60  ;;  %v573_v27 = vor.u32 %v572_v15, %v569_v14  ;;  %v582_v28 = vrot.slane %v580_v17, 4  ;;  %v588_v31 = vrot.slane %v586_v18, 5  ;;  %v245_v17 = vld [vmem:[%s5267_s6 + $0x80] sm:$0x1] }
  0x31   : > { %v661_v26 = vunpack.c.l.b16 %v483_v22  ;;  %4401 = vmatmul.msk.bf16.gmra.mxu1 %vm703_vm3, %v680_v20  ;;  %v493_v30 = vsel %vm5279_vm2, %v488_v23, %v492_v3  ;;  %v282_v34 = vshll.u32 %v201_v13, 16  ;;  %v288_v38 = vshll.u32 %v5341_v25, 16  ;;  %v219_v3 = vld [vmem:[%s5267_s6 + $0x78] sm:$0xf] }
  0x32   : > { %v662_v35 = vunpack.c.l.b16 %v493_v30  ;;  %v574_v36 = vrot.slane %v573_v27, 4  ;;  %v583_v37 = vor.u32 %v582_v28, %v578_v24  ;;  %v281_v41 = vrot.slane %v279_v33, 4 }
  0x33   : > { %v284_v42 = vrot.slane %v282_v34, 5  ;;  %v292_v43 = vshrl.u32 %v5341_v25, 16  ;;  %v298_v44 = vshll.u32 %v5344_v29, 16  ;;  %v290_v50 = vrot.slane %v288_v38, 5 }
  0x34   : > { %v684_v47 = vpack.c.b16 %v662_v35, %v661_v26  ;;  %v579_v48 = vsel %vm5279_vm2, %v574_v36, %v578_v24  ;;  %v584_v49 = vrot.slane %v583_v37, 4  ;;  %v399_v58 = vshrl.u32 %v211_v39, 16  ;;  %v227_v35 = vld [vmem:[%s5267_s6 + $0xa8] sm:$0xf] }
  0x35   : > { %v669_v52 = vunpack.c.l.b16 %v579_v48  ;;  %v285_v53 = vor.u32 %v284_v42, %v281_v41  ;;  %v294_v54 = vrot.slane %v292_v43, 4  ;;  %v300_v55 = vrot.slane %v298_v44, 5  ;;  %v249_v41 = vld [vmem:[%s5267_s6 + $0xb0] sm:$0x1] }
  0x36   : > { %4405 = vmatmul.msk.bf16.gmra.mxu2 %vm703_vm3, %v684_v47  ;;  %v589_v57 = vsel %vm5279_vm2, %v584_v49, %v588_v31  ;;  %v402_v59 = vshll.u32 %v211_v39, 16  ;;  %v408_v60 = vshll.u32 %v5352_v40, 16  ;;  %v412_v2 = vshrl.u32 %v5352_v40, 16  ;;  %v228_v39 = vld [vmem:[%s5267_s6 + $0xac] sm:$0xf] }
  0x37   : > { %v670_v63 = vunpack.c.l.b16 %v589_v57  ;;  %v286_v0 = vrot.slane %v285_v53, 4  ;;  %v295_v1 = vor.u32 %v294_v54, %v290_v50  ;;  %v401_v4 = vrot.slane %v399_v58, 4 }
  0x38   : > { %v404_v5 = vrot.slane %v402_v59, 5  ;;  %v410_v6 = vrot.slane %v408_v60, 5  ;;  %v418_v7 = vshll.u32 %v5368_v56, 16  ;;  %v414_v12 = vrot.slane %v412_v2, 4  ;;  %v203_v59 = vld [vmem:[%s5267_s6 + $0x18] sm:$0xf] }
  0x39   : > { %v688_v9 = vpack.c.b16 %v670_v63, %v669_v52  ;;  %v291_v10 = vsel %vm5279_vm2, %v286_v0, %v290_v50  ;;  %v296_v11 = vrot.slane %v295_v1, 4  ;;  %v495_v18 = vshrl.u32 %v219_v3, 16  ;;  %v5396_v1 = vld [vmem:[%s5267_s6 + $0x1c] sm:$0xf]  ;;  %v5399_v2 = vld [vmem:[%s5267_s6 + $0x20] sm:$0x1] }
  0x3a   : > { %v645_v13 = vunpack.c.l.b16 %v291_v10  ;;  %v405_v14 = vor.u32 %v404_v5, %v401_v4  ;;  %v420_v15 = vrot.slane %v418_v7, 5  ;;  %v415_v20 = vor.u32 %v414_v12, %v410_v6 }
  0x3b   : > { %4409 = vmatmul.msk.bf16.gmra.mxu3 %vm703_vm3, %v688_v9  ;;  %v301_v19 = vsel %vm5279_vm2, %v296_v11, %v300_v55  ;;  %v498_v22 = vshll.u32 %v219_v3, 16  ;;  %v504_v23 = vshll.u32 %v220_v8, 16  ;;  %v497_v27 = vrot.slane %v495_v18, 4 }
  0x3c   : > { %v646_v24 = vunpack.c.l.b16 %v301_v19  ;;  %v406_v26 = vrot.slane %v405_v14, 4  ;;  %v508_v28 = vshrl.u32 %v220_v8, 16  ;;  %v416_v30 = vrot.slane %v415_v20, 4 }
  0x3d   : > { %v500_v31 = vrot.slane %v498_v22, 5  ;;  %v506_v33 = vrot.slane %v504_v23, 5  ;;  %v514_v34 = vshll.u32 %v245_v17, 16  ;;  %v591_v48 = vshrl.u32 %v227_v35, 16  ;;  %v5409_v22 = vld [vmem:[%s5267_s6 + $0x58] sm:$0xf] }
  0x3e   : > { %v676_v36 = vpack.c.b16 %v646_v24, %v645_v13  ;;  %v411_v37 = vsel %vm5279_vm2, %v406_v26, %v410_v6  ;;  %v510_v38 = vrot.slane %v508_v28, 4  ;;  %v421_v42 = vsel %vm5279_vm2, %v416_v30, %v420_v15  ;;  %v213_v15 = vld [vmem:[%s5267_s6 + $0x54] sm:$0xf]  ;;  %v5414_v28 = vld [vmem:[%s5267_s6 + $0x5c] sm:$0x1] }
  0x3f   : > { %v655_v43 = vunpack.c.l.b16 %v411_v37  ;;  %v501_v44 = vor.u32 %v500_v31, %v497_v27  ;;  %v516_v45 = vrot.slane %v514_v34, 5  ;;  %v656_v46 = vunpack.c.l.b16 %v421_v42 }
  0x40   : > { %4397 = vmatmul.msk.bf16.gmra.mxu0 %vm703_vm3, %v676_v36  ;;  %v511_v47 = vor.u32 %v510_v38, %v506_v33  ;;  %v594_v49 = vshll.u32 %v227_v35, 16  ;;  %v600_v51 = vshll.u32 %v228_v39, 16  ;;  %v604_v52 = vshrl.u32 %v228_v39, 16  ;;  %v221_v39 = vld [vmem:[%s5267_s6 + $0x84] sm:$0xf] }
  0x41   : > { %v502_v50 = vrot.slane %v501_v44, 4  ;;  %v610_v53 = vshll.u32 %v249_v41, 16  ;;  %v681_v54 = vpack.c.b16 %v656_v46, %v655_v43  ;;  %v593_v57 = vrot.slane %v591_v48, 4 }
  0x42   : > { %v512_v55 = vrot.slane %v511_v47, 4  ;;  %v596_v58 = vrot.slane %v594_v49, 5  ;;  %v602_v63 = vrot.slane %v600_v51, 5  ;;  %v606_v0 = vrot.slane %v604_v52, 4  ;;  %v222_v49 = vld [vmem:[%s5267_s6 + $0x88] sm:$0xf] }
  0x43   : > { %v507_v60 = vsel %vm5279_vm2, %v502_v50, %v506_v33  ;;  %4402 = vmatmul.msk.bf16.gmra.mxu1 %vm703_vm3, %v681_v54  ;;  %v612_v6 = vrot.slane %v610_v53, 5  ;;  %v303_v9 = vshrl.u32 %v203_v59, 16  ;;  %v306_v10 = vshll.u32 %v203_v59, 16  ;;  %v246_v53 = vld [vmem:[%s5267_s6 + $0x8c] sm:$0x1] }
  0x44   : > { %v517_v3 = vsel %vm5279_vm2, %v512_v55, %v516_v45  ;;  %v663_v4 = vunpack.c.l.b16 %v507_v60  ;;  %v597_v5 = vor.u32 %v596_v58, %v593_v57  ;;  %v607_v8 = vor.u32 %v606_v0, %v602_v63 }
  0x45   : > { %v664_v7 = vunpack.c.l.b16 %v517_v3  ;;  %v312_v12 = vshll.u32 %v5396_v1, 16  ;;  %v316_v13 = vshrl.u32 %v5396_v1, 16  ;;  %v322_v14 = vshll.u32 %v5399_v2, 16 }
  0x46   : > { %v598_v11 = vrot.slane %v597_v5, 4  ;;  %v608_v18 = vrot.slane %v607_v8, 4  ;;  %v305_v19 = vrot.slane %v303_v9, 4  ;;  %v308_v20 = vrot.slane %v306_v10, 5  ;;  %v229_v8 = vld [vmem:[%s5267_s6 + $0xb4] sm:$0xf] }
  0x47   : > { %v685_v17 = vpack.c.b16 %v664_v7, %v663_v4  ;;  %v314_v24 = vrot.slane %v312_v12, 5  ;;  %v318_v26 = vrot.slane %v316_v13, 4  ;;  %v324_v27 = vrot.slane %v322_v14, 5  ;;  %v230_v12 = vld [vmem:[%s5267_s6 + $0xb8] sm:$0xf] }
  0x48   : > { %v603_v23 = vsel %vm5279_vm2, %v598_v11, %v602_v63  ;;  %v613_v30 = vsel %vm5279_vm2, %v608_v18, %v612_v6  ;;  %v309_v33 = vor.u32 %v308_v20, %v305_v19  ;;  %v423_v34 = vshrl.u32 %v213_v15, 16  ;;  %v250_v18 = vld [vmem:[%s5267_s6 + $0xbc] sm:$0x1]  ;;  %v5128_v19 = vld [vmem:[%s6731_s1 + $0x68] sm:$0xff] }
  0x49   : > { %4406 = vmatmul.msk.bf16.gmra.mxu2 %vm703_vm3, %v685_v17  ;;  %v671_v31 = vunpack.c.l.b16 %v603_v23  ;;  %v672_v35 = vunpack.c.l.b16 %v613_v30  ;;  %v319_v36 = vor.u32 %v318_v26, %v314_v24  ;;  %v426_v37 = vshll.u32 %v213_v15, 16 }
  0x4a   : > { %v432_v38 = vshll.u32 %v5409_v22, 16  ;;  %v310_v41 = vrot.slane %v309_v33, 4  ;;  %v425_v42 = vrot.slane %v423_v34, 4  ;;  %v436_v43 = vshrl.u32 %v5409_v22, 16  ;;  %3026 = vmatpush.bf16.msra.mxu2 %v5128_v19 }
  0x4b   : > { %v442_v44 = vshll.u32 %v5414_v28, 16  ;;  %v689_v45 = vpack.c.b16 %v672_v35, %v671_v31  ;;  %v320_v46 = vrot.slane %v319_v36, 4  ;;  %v428_v47 = vrot.slane %v426_v37, 5 }
  0x4c   : > { %v434_v48 = vrot.slane %v432_v38, 5  ;;  %v315_v50 = vsel %vm5279_vm2, %v310_v41, %v314_v24  ;;  %v438_v51 = vrot.slane %v436_v43, 4  ;;  %v519_v54 = vshrl.u32 %v221_v39, 16  ;;  %v205_v38 = vld [vmem:[%s5267_s6 + $0x24] sm:$0xf] }
  0x4d   : > { %v444_v52 = vrot.slane %v442_v44, 5  ;;  %4410 = vmatmul.msk.bf16.gmra.mxu3 %vm703_vm3, %v689_v45  ;;  %v325_v55 = vsel %vm5279_vm2, %v320_v46, %v324_v27  ;;  %v647_v57 = vunpack.c.l.b16 %v315_v50  ;;  %v429_v58 = vor.u32 %v428_v47, %v425_v42  ;;  %v5445_v44 = vld [vmem:[%s5267_s6 + $0x28] sm:$0xf]  ;;  %v5448_v45 = vld [vmem:[%s5267_s6 + $0x2c] sm:$0x1]  ;;  %v5130_v50 = vld [vmem:[%s6731_s1 + $0x78] sm:$0xff] }
  0x4e   : > { %v522_v59 = vshll.u32 %v221_v39, 16  ;;  %v648_v60 = vunpack.c.l.b16 %v325_v55  ;;  %v439_v63 = vor.u32 %v438_v51, %v434_v48  ;;  %v521_v0 = vrot.slane %v519_v54, 4  ;;  %v5110_v51 = vld [vmem:[%s6731_s1 + $0x58] sm:$0xff]  ;;  %3692 = vmatpush.bf16.msra.mxu3 %v5130_v50 }
  0x4f   : > { %v528_v3 = vshll.u32 %v222_v49, 16  ;;  %v430_v4 = vrot.slane %v429_v58, 4  ;;  %v532_v6 = vshrl.u32 %v222_v49, 16  ;;  %v538_v7 = vshll.u32 %v246_v53, 16  ;;  %2727 = vmatpush.bf16.msra.mxu1 %v5110_v51 }
  0x50   : > { %v524_v5 = vrot.slane %v522_v59, 5  ;;  %v677_v9 = vpack.c.b16 %v648_v60, %v647_v57  ;;  %v440_v10 = vrot.slane %v439_v63, 4  ;;  %v615_v24 = vshrl.u32 %v229_v8, 16 }
  0x51   : > { %v530_v11 = vrot.slane %v528_v3, 5  ;;  %v435_v13 = vsel %vm5279_vm2, %v430_v4, %v434_v48  ;;  %v534_v15 = vrot.slane %v532_v6, 4  ;;  %v540_v17 = vrot.slane %v538_v7, 5  ;;  %v1070_v6 = vld [vmem:[%s5267_s6] sm:$0xe] }
  0x52   : > { %v525_v14 = vor.u32 %v524_v5, %v521_v0  ;;  %4398 = vmatmul.msk.bf16.gmra.mxu0 %vm703_vm3, %v677_v9  ;;  %v445_v20 = vsel %vm5279_vm2, %v440_v10, %v444_v52  ;;  %v657_v23 = vunpack.c.l.b16 %v435_v13  ;;  %v618_v26 = vshll.u32 %v229_v8, 16  ;;  %v5132_v52 = vld [vmem:[%s6731_s1 + $0x88] sm:$0xff] }
  0x53   : > { %v658_v27 = vunpack.c.l.b16 %v445_v20  ;;  %v535_v31 = vor.u32 %v534_v15, %v530_v11  ;;  %v624_v33 = vshll.u32 %v230_v12, 16  ;;  %v617_v34 = vrot.slane %v615_v24, 4  ;;  %4102 = vmatpush.bf16.msra.mxu0 %v5132_v52  ;;  %v4668_v15 = vld [vmem:[%s5267_s6 + $0xc] sm:$0xf] }
  0x54   : > { %v526_v30 = vrot.slane %v525_v14, 4  ;;  %v620_v35 = vrot.slane %v618_v26, 5  ;;  %v628_v36 = vshrl.u32 %v230_v12, 16  ;;  %v634_v37 = vshll.u32 %v250_v18, 16 }
  0x55   : > { %v682_v39 = vpack.c.b16 %v658_v27, %v657_v23  ;;  %v536_v42 = vrot.slane %v535_v31, 4  ;;  %v626_v43 = vrot.slane %v624_v33, 5  ;;  %v1126_v46 = vrot.slane %v5295_v62, 5  ;;  %v4671_v62 = vld [vmem:[%s5267_s6 + $0x18] sm:$0xf] }
  0x56   : > { %v531_v41 = vsel %vm5279_vm2, %v526_v30, %v530_v11  ;;  %v621_v48 = vor.u32 %v620_v35, %v617_v34  ;;  %v630_v49 = vrot.slane %v628_v36, 4  ;;  %v636_v54 = vrot.slane %v634_v37, 5 }
  0x57   : > { %v665_v47 = vunpack.c.l.b16 %v531_v41  ;;  %4403 = vmatmul.msk.bf16.gmra.mxu1 %vm703_vm3, %v682_v39  ;;  %v541_v53 = vsel %vm5279_vm2, %v536_v42, %v540_v17  ;;  %v327_v55 = vshrl.u32 %v205_v38, 16  ;;  %v330_v57 = vshll.u32 %v205_v38, 16  ;;  %v4669_v17 = vld [vmem:[%s5267_s6 + $0x10] sm:$0xf] }
  0x58   : > { %v666_v58 = vunpack.c.l.b16 %v541_v53  ;;  %v622_v59 = vrot.slane %v621_v48, 4  ;;  %v631_v60 = vor.u32 %v630_v49, %v626_v43  ;;  %v336_v63 = vshll.u32 %v5445_v44, 16  ;;  %v5067_v53 = vld [vmem:[%s5267_s6] sm:$0xff] }
  0x59   : > { %v329_v0 = vrot.slane %v327_v55, 4  ;;  %v332_v3 = vrot.slane %v330_v57, 5  ;;  %v340_v4 = vshrl.u32 %v5445_v44, 16  ;;  %v346_v5 = vshll.u32 %v5448_v45, 16 }
  0x5a   : > { %v686_v7 = vpack.c.b16 %v666_v58, %v665_v47  ;;  %v627_v8 = vsel %vm5279_vm2, %v622_v59, %v626_v43  ;;  %v632_v9 = vrot.slane %v631_v60, 4  ;;  %v338_v10 = vrot.slane %v336_v63, 5  ;;  %v4670_v43 = vld [vmem:[%s5267_s6 + $0x14] sm:$0x1] }
  0x5b   : > { %v673_v11 = vunpack.c.l.b16 %v627_v8  ;;  %v333_v12 = vor.u32 %v332_v3, %v329_v0  ;;  %v342_v13 = vrot.slane %v340_v4, 4  ;;  %v348_v14 = vrot.slane %v346_v5, 5  ;;  %v4672_v4 = vld [vmem:[%s5267_s6 + $0x1c] sm:$0xf]  ;;  %v1071_v5 = vld [vmem:[%s5267_s6 + $0xc] sm:$0xe] }
  0x5c   : > { %4407 = vmatmul.msk.bf16.gmra.mxu2 %vm703_vm3, %v686_v7  ;;  %v637_v18 = vsel %vm5279_vm2, %v632_v9, %v636_v54  ;;  %v4500_v19 = vrot.slane %v1070_v6, 9  ;;  %v1123_v27 = vrot.slane %v5292_v61, 5  ;;  %v1815_v30 = vshrl.u32 %v4668_v15, 16 }
  0x5d   : > { %v674_v20 = vunpack.c.l.b16 %v637_v18  ;;  %v334_v23 = vrot.slane %v333_v12, 4  ;;  %v343_v24 = vor.u32 %v342_v13, %v338_v10  ;;  %v1818_v31 = vshll.u32 %v4668_v15, 16  ;;  %v5089_v12 = vld [vmem:[%s5267_s6 + $0xc] sm:$0xff] }
  0x5e   : > { %v1824_v33 = vshll.u32 %v4669_v17, 16  ;;  %v1828_v34 = vshrl.u32 %v4669_v17, 16  ;;  %v1124_v38 = vsel %vm5474_vm6, %v4500_v19, %v1123_v27  ;;  %v1125_v41 = vrot.slane %v1123_v27, 4 }
  0x5f   : > { %v690_v35 = vpack.c.b16 %v674_v20, %v673_v11  ;;  %v339_v36 = vsel %vm5279_vm2, %v334_v23, %v338_v10  ;;  %v344_v37 = vrot.slane %v343_v24, 4  ;;  %v1238_v42 = vunpack.c.l.b16 %v1124_v38  ;;  %v4673_v24 = vld [vmem:[%s5267_s6 + $0x20] sm:$0x1] }
  0x60   : > { %v649_v39 = vunpack.c.l.b16 %v339_v36  ;;  %v1817_v47 = vrot.slane %v1815_v30, 4  ;;  %v1820_v48 = vrot.slane %v1818_v31, 5  ;;  %v1826_v49 = vrot.slane %v1824_v33, 5  ;;  %v5068_v33 = vld [vmem:[%s5267_s6 + $0xc] sm:$0xff] }
  0x61   : > { %4411 = vmatmul.msk.bf16.gmra.mxu3 %vm703_vm3, %v690_v35  ;;  %v349_v61 = vsel %vm5279_vm2, %v344_v37, %v348_v14  ;;  %v1830_v50 = vrot.slane %v1828_v34, 4  ;;  %v1127_v52 = vsel %vm5474_vm6, %v1125_v41, %v1126_v46  ;;  %v1834_v58 = vshll.u32 %v4670_v43, 16  ;;  %v4675_v43 = vld [vmem:[%s5267_s6 + $0x28] sm:$0xf] }
  0x62   : > { %v650_v51 = vunpack.c.l.b16 %v349_v61  ;;  %v1239_v54 = vunpack.c.l.b16 %v1127_v52  ;;  %v1821_v55 = vor.u32 %v1820_v48, %v1817_v47  ;;  %v1130_v46 = vrot.slane %v5341_v25, 5  ;;  %v1072_v61 = vld [vmem:[%s5267_s6 + $0x18] sm:$0xe] }
  0x63   : > { %v1831_v57 = vor.u32 %v1830_v50, %v1826_v49  ;;  %v1836_v3 = vrot.slane %v1834_v58, 5  ;;  %v1839_v6 = vshrl.u32 %v4671_v62, 16  ;;  %v1842_v7 = vshll.u32 %v4671_v62, 16 }
  0x64   : > { %v678_v59 = vpack.c.b16 %v650_v51, %v649_v39  ;;  %v1270_v60 = vpack.c.b16 %v1239_v54, %v1238_v42  ;;  %v1822_v63 = vrot.slane %v1821_v55, 4  ;;  %v1848_v10 = vshll.u32 %v4672_v4, 16  ;;  %v4674_v39 = vld [vmem:[%s5267_s6 + $0x24] sm:$0xf] }
  0x65   : > { %v1832_v0 = vrot.slane %v1831_v57, 4  ;;  %v1852_v11 = vshrl.u32 %v4672_v4, 16  ;;  %v4501_v13 = vrot.slane %v1071_v5, 9  ;;  %v1132_v14 = vrot.slane %v1130_v46, 4  ;;  %v5090_v57 = vld [vmem:[%s5267_s6 + $0x18] sm:$0xff] }
  0x66   : > { %4399 = vmatmul.msk.bf16.gmra.mxu0 %vm703_vm3, %v678_v59  ;;  %v1827_v8 = vsel %vm5279_vm2, %v1822_v63, %v1826_v49  ;;  %v1133_v25 = vrot.slane %v5344_v29, 5  ;;  %v1841_v18 = vrot.slane %v1839_v6, 4  ;;  %v1844_v19 = vrot.slane %v1842_v7, 5  ;;  %v4676_v4 = vld [vmem:[%s5267_s6 + $0x2c] sm:$0x1] }
  0x67   : > { %4484 = vmatmul.msk.bf16.vlgmr.msrb.gmra.mxu1 %vm703_vm3, %v5067_v53  ;;  %v1837_v9 = vsel %vm5279_vm2, %v1832_v0, %v1836_v3  ;;  %v2203_v15 = vunpack.c.l.b16 %v1827_v8  ;;  %v1850_v20 = vrot.slane %v1848_v10, 5  ;;  %v1854_v23 = vrot.slane %v1852_v11, 4 }
  0x68   : > { %v2204_v17 = vunpack.c.l.b16 %v1837_v9  ;;  %v1131_v27 = vsel %vm5474_vm6, %v4501_v13, %v1130_v46  ;;  %v1134_v30 = vsel %vm5474_vm6, %v1132_v14, %v1133_v25  ;;  %v1845_v29 = vor.u32 %v1844_v19, %v1841_v18  ;;  %v5069_v9 = vld [vmem:[%s5267_s6 + $0x18] sm:$0xff] }
  0x69   : > { %v1855_v34 = vor.u32 %v1854_v23, %v1850_v20  ;;  %v1858_v35 = vshll.u32 %v4673_v24, 16  ;;  %v1240_v36 = vunpack.c.l.b16 %v1131_v27  ;;  %v1241_v37 = vunpack.c.l.b16 %v1134_v30  ;;  %v1073_v23 = vld [vmem:[%s5267_s6 + $0x24] sm:$0xe] }
  0x6a   : > { %v2235_v31 = vpack.c.b16 %v2204_v17, %v2203_v15  ;;  %v1846_v38 = vrot.slane %v1845_v29, 4  ;;  %v1137_v48 = vrot.slane %v5396_v1, 5  ;;  %v1863_v49 = vshrl.u32 %v4674_v39, 16  ;;  %v4677_v15 = vld [vmem:[%s5267_s6 + $0x30] sm:$0xf]  ;;  %v5091_v29 = vld [vmem:[%s5267_s6 + $0x24] sm:$0xff] }
  0x6b   : > { %v1856_v41 = vrot.slane %v1855_v34, 4  ;;  %v1860_v42 = vrot.slane %v1858_v35, 5  ;;  %v1271_v47 = vpack.c.b16 %v1241_v37, %v1240_v36  ;;  %v1866_v51 = vshll.u32 %v4674_v39, 16  ;;  %v4678_v17 = vld [vmem:[%s5267_s6 + $0x34] sm:$0xf] }
  0x6c   : > { %4528 = vmatmul.msk.bf16.vlgmr.msrb.gmra.mxu2 %vm703_vm3, %v1270_v60  ;;  %v1851_v50 = vsel %vm5279_vm2, %v1846_v38, %v1850_v20  ;;  %v1872_v52 = vshll.u32 %v4675_v43, 16  ;;  %v1876_v53 = vshrl.u32 %v4675_v43, 16  ;;  %v4502_v55 = vrot.slane %v1072_v61, 9 }
  0x6d   : > { %v1861_v54 = vsel %vm5279_vm2, %v1856_v41, %v1860_v42  ;;  %v2205_v58 = vunpack.c.l.b16 %v1851_v50  ;;  %v1139_v59 = vrot.slane %v1137_v48, 4  ;;  %v1140_v1 = vrot.slane %v5399_v2, 5  ;;  %v4679_v42 = vld [vmem:[%s5267_s6 + $0x38] sm:$0x1] }
  0x6e   : > { %v1865_v60 = vrot.slane %v1863_v49, 4  ;;  %v2206_v63 = vunpack.c.l.b16 %v1861_v54  ;;  %v1868_v0 = vrot.slane %v1866_v51, 5  ;;  %v1874_v3 = vrot.slane %v1872_v52, 5  ;;  %v4681_v54 = vld [vmem:[%s5267_s6 + $0x40] sm:$0xf] }
  0x6f   : > { %v1878_v62 = vrot.slane %v1876_v53, 4  ;;  %v1138_v46 = vsel %vm5474_vm6, %v4502_v55, %v1137_v48  ;;  %v1141_v5 = vsel %vm5474_vm6, %v1139_v59, %v1140_v1  ;;  %v1882_v2 = vshll.u32 %v4676_v4, 16  ;;  %v4680_v53 = vld [vmem:[%s5267_s6 + $0x3c] sm:$0xf]  ;;  %v5150_v1 = vld [vmem:[%s5267_s6 + $0x34] sm:$0xf] }
  0x70   : > { %v2236_v6 = vpack.c.b16 %v2206_v63, %v2205_v58  ;;  %v1869_v7 = vor.u32 %v1868_v0, %v1865_v60  ;;  %v1242_v10 = vunpack.c.l.b16 %v1138_v46  ;;  %v1243_v11 = vunpack.c.l.b16 %v1141_v5  ;;  %v1074_v63 = vld [vmem:[%s5267_s6 + $0x30] sm:$0xe] }
  0x71   : > { %4652 = vmatmul.msk.bf16.vlgmr.msrb.gmra.mxu3 %vm703_vm3, %v5089_v12  ;;  %v1879_v8 = vor.u32 %v1878_v62, %v1874_v3  ;;  %v1884_v14 = vrot.slane %v1882_v2, 5  ;;  %v1144_v18 = vrot.slane %v5445_v44, 5  ;;  %v1887_v24 = vshrl.u32 %v4677_v15, 16  ;;  %v5151_v2 = vld [vmem:[%s5267_s6 + $0x38] sm:$0x1] }
  0x72   : > { %v1870_v12 = vrot.slane %v1869_v7, 4  ;;  %v1272_v25 = vpack.c.b16 %v1243_v11, %v1242_v10  ;;  %v1890_v27 = vshll.u32 %v4677_v15, 16  ;;  %v1896_v30 = vshll.u32 %v4678_v17, 16  ;;  %v5092_v10 = vld [vmem:[%s5267_s6 + $0x30] sm:$0xff] }
  0x73   : > { %v1880_v13 = vrot.slane %v1879_v8, 4  ;;  %v1146_v34 = vrot.slane %v1144_v18, 4  ;;  %v1147_v44 = vrot.slane %v5448_v45, 5  ;;  %v1889_v37 = vrot.slane %v1887_v24, 4  ;;  %v5070_v45 = vld [vmem:[%s5267_s6 + $0x24] sm:$0xff] }
  0x74   : > { %v1875_v19 = vsel %vm5279_vm2, %v1870_v12, %v1874_v3  ;;  %v1892_v38 = vrot.slane %v1890_v27, 5  ;;  %v1898_v39 = vrot.slane %v1896_v30, 5  ;;  %v1906_v50 = vshll.u32 %v4679_v42, 16  ;;  %v5071_v30 = vld [vmem:[%s5267_s6 + $0x30] sm:$0xff] }
  0x75   : > { %v1885_v20 = vsel %vm5279_vm2, %v1880_v13, %v1884_v14  ;;  %v2207_v35 = vunpack.c.l.b16 %v1875_v19  ;;  %v1151_v60 = vrot.slane %v5150_v1, 5  ;;  %v1911_v0 = vshrl.u32 %v4680_v53, 16 }
  0x76   : > { %4728 = vmatmul.msk.bf16.vlgmr.msrb.gmra.mxu0 %vm703_vm3, %v2235_v31  ;;  %v1900_v31 = vshrl.u32 %v4678_v17, 16  ;;  %v2208_v36 = vunpack.c.l.b16 %v1885_v20  ;;  %v1893_v48 = vor.u32 %v1892_v38, %v1889_v37  ;;  %v1908_v58 = vrot.slane %v1906_v50, 5  ;;  %v4682_v17 = vld [vmem:[%s5267_s6 + $0x44] sm:$0x1]  ;;  %v4683_v37 = vld [vmem:[%s5267_s6 + $0x48] sm:$0xf] }
  0x77   : > { %4485 = vmatmul.msk.bf16.gmra.mxu1 %vm703_vm3, %v5068_v33  ;;  %v4503_v33 = vrot.slane %v1073_v23, 9  ;;  %v1914_v3 = vshll.u32 %v4680_v53, 16  ;;  %v1920_v62 = vshll.u32 %v4681_v54, 16  ;;  %v1924_v4 = vshrl.u32 %v4681_v54, 16  ;;  %v4684_v38 = vld [vmem:[%s5267_s6 + $0x4c] sm:$0xf] }
  0x78   : > { %v1902_v41 = vrot.slane %v1900_v31, 4  ;;  %v2237_v61 = vpack.c.b16 %v2208_v36, %v2207_v35  ;;  %v1894_v55 = vrot.slane %v1893_v48, 4  ;;  %v4504_v7 = vrot.slane %v1074_v63, 9  ;;  %v5093_v53 = vld [vmem:[%s5267_s6 + $0x3c] sm:$0xff] }
  0x79   : > { %v1145_v43 = vsel %vm5474_vm6, %v4503_v33, %v1144_v18  ;;  %v1153_v8 = vrot.slane %v1151_v60, 4  ;;  %v1913_v11 = vrot.slane %v1911_v0, 4  ;;  %v1916_v12 = vrot.slane %v1914_v3, 5  ;;  %v4685_v3 = vld [vmem:[%s5267_s6 + $0x50] sm:$0x1] }
  0x7a   : > { %v1903_v49 = vor.u32 %v1902_v41, %v1898_v39  ;;  %v1244_v51 = vunpack.c.l.b16 %v1145_v43  ;;  %v1899_v5 = vsel %vm5279_vm2, %v1894_v55, %v1898_v39  ;;  %v1922_v13 = vrot.slane %v1920_v62, 5 }
  0x7b   : > { %v1926_v14 = vrot.slane %v1924_v4, 4  ;;  %v1152_v18 = vsel %vm5474_vm6, %v4504_v7, %v1151_v60  ;;  %v1917_v20 = vor.u32 %v1916_v12, %v1913_v11  ;;  %v1930_v24 = vshll.u32 %v4682_v17, 16 }
  0x7c   : > { %4529 = vmatmul.msk.bf16.gmra.mxu2 %vm703_vm3, %v1271_v47  ;;  %v1148_v47 = vsel %vm5474_vm6, %v1146_v34, %v1147_v44  ;;  %v1935_v48 = vshrl.u32 %v4683_v37, 16  ;;  %v1944_v50 = vshll.u32 %v4684_v38, 16 }
  0x7d   : > { %v1245_v52 = vunpack.c.l.b16 %v1148_v47  ;;  %v1927_v23 = vor.u32 %v1926_v14, %v1922_v13  ;;  %v1918_v44 = vrot.slane %v1917_v20, 4  ;;  %v1932_v36 = vrot.slane %v1930_v24, 5 }
  0x7e   : > { %v1946_v63 = vrot.slane %v1944_v50, 5  ;;  %v1165_v20 = vrot.slane %v5352_v40, 5 }
  0x7f   : > { %v1273_v59 = vpack.c.b16 %v1245_v52, %v1244_v51  ;;  %v1928_v35 = vrot.slane %v1927_v23, 4  ;;  %v1923_v42 = vsel %vm5279_vm2, %v1918_v44, %v1922_v13  ;;  %v1948_v51 = vshrl.u32 %v4684_v38, 16 }
  0x80   : > { %v2211_v52 = vunpack.c.l.b16 %v1923_v42  ;;  %v1167_v38 = vrot.slane %v1165_v20, 4 }
  0x81   : > { %4653 = vmatmul.msk.bf16.gmra.mxu3 %vm703_vm3, %v5090_v57  ;;  %v1904_v57 = vrot.slane %v1903_v49, 4  ;;  %v1933_v43 = vsel %vm5279_vm2, %v1928_v35, %v1932_v36  ;;  %v1938_v49 = vshll.u32 %v4683_v37, 16  ;;  %v1950_v0 = vrot.slane %v1948_v51, 4  ;;  %v5094_v36 = vld [vmem:[%s5267_s6 + $0x48] sm:$0xff]  ;;  %v4688_v51 = vld [vmem:[%s5267_s6 + $0x5c] sm:$0x1] }
  0x82   : > { %v2212_v54 = vunpack.c.l.b16 %v1933_v43 }
  0x83   : > { %v1940_v60 = vrot.slane %v1938_v49, 5  ;;  %v1951_v7 = vor.u32 %v1950_v0, %v1946_v63 }
  0x85   : > { %v1952_v13 = vrot.slane %v1951_v7, 4 }
  0x86   : > { %4729 = vmatmul.msk.bf16.gmra.mxu0 %vm703_vm3, %v2236_v6  ;;  %v1909_v6 = vsel %vm5279_vm2, %v1904_v57, %v1908_v58 }
  0x87   : > { %4486 = vmatmul.msk.bf16.gmra.mxu1 %vm703_vm3, %v5069_v9  ;;  %v1154_v9 = vrot.slane %v5151_v2, 5  ;;  %v2210_v15 = vunpack.c.l.b16 %v1909_v6 }
  0x89   : > { %v1155_v19 = vsel %vm5474_vm6, %v1153_v8, %v1154_v9  ;;  %v1954_v8 = vshll.u32 %v4685_v3, 16  ;;  %v5072_v9 = vld [vmem:[%s5267_s6 + $0x3c] sm:$0xff] }
  0x8a   : > { %v1247_v33 = vunpack.c.l.b16 %v1155_v19  ;;  %v4687_v19 = vld [vmem:[%s5267_s6 + $0x58] sm:$0xf]  ;;  %v4689_v3 = vld [vmem:[%s5267_s6 + $0x60] sm:$0xf] }
  0x8b   : > { %v1956_v14 = vrot.slane %v1954_v8, 5  ;;  %v1972_v44 = vshrl.u32 %v4687_v19, 16 }
  0x8c   : > { %4530 = vmatmul.msk.bf16.gmra.mxu2 %vm703_vm3, %v1272_v25  ;;  %v2209_v25 = vunpack.c.l.b16 %v1899_v5  ;;  %v2239_v5 = vpack.c.b16 %v2212_v54, %v2211_v52 }
  0x8d   : > { %v1957_v24 = vsel %vm5279_vm2, %v1952_v13, %v1956_v14  ;;  %v1974_v49 = vrot.slane %v1972_v44, 4 }
  0x8e   : > { %v2238_v27 = vpack.c.b16 %v2210_v15, %v2209_v25  ;;  %v2214_v43 = vunpack.c.l.b16 %v1957_v24 }
  0x91   : > { %4654 = vmatmul.msk.bf16.gmra.mxu3 %vm703_vm3, %v5091_v29  ;;  %v1246_v29 = vunpack.c.l.b16 %v1152_v18  ;;  %v4686_v18 = vld [vmem:[%s5267_s6 + $0x54] sm:$0xf] }
  0x93   : > { %v1274_v41 = vpack.c.b16 %v1247_v33, %v1246_v29  ;;  %v1962_v29 = vshll.u32 %v4686_v18, 16  ;;  %v1968_v33 = vshll.u32 %v4687_v19, 16 }
  0x96   : > { %4730 = vmatmul.msk.bf16.gmra.mxu0 %vm703_vm3, %v2237_v61  ;;  %v1158_v61 = vrot.slane %v5307_v16, 5  ;;  %v1937_v16 = vrot.slane %v1935_v48, 4  ;;  %v1970_v48 = vrot.slane %v1968_v33, 5  ;;  %v1175_v33 = vrot.slane %v5414_v28, 5 }
  0x97   : > { %4487 = vmatmul.msk.bf16.gmra.mxu1 %vm703_vm3, %v5070_v45  ;;  %v1075_v45 = vld [vmem:[%s5267_s6 + $0x3c] sm:$0xe] }
  0x98   : > { %v4505_v57 = vrot.slane %v1075_v45, 9  ;;  %v1160_v58 = vrot.slane %v1158_v61, 4  ;;  %v1964_v45 = vrot.slane %v1962_v29, 5 }
  0x9a   : > { %v1159_v62 = vsel %vm5474_vm6, %v4505_v57, %v1158_v61  ;;  %v5073_v57 = vld [vmem:[%s5267_s6 + $0x48] sm:$0xff] }
  0x9c   : > { %v5558_v46 = vpop.f32.mrf.mxu1  ;;  %4531 = vmatmul.msk.bf16.gmra.mxu2 %vm703_vm3, %v1273_v59  ;;  %v1161_v59 = vrot.slane %v5312_v21, 5  ;;  %v1941_v21 = vor.u32 %v1940_v60, %v1937_v16  ;;  %v1978_v16 = vshll.u32 %v4688_v51, 16  ;;  %v5074_v51 = vld [vmem:[%s5267_s6 + $0x54] sm:$0xff] }
  0x9e   : > { %v1162_v4 = vsel %vm5474_vm6, %v1160_v58, %v1161_v59  ;;  %v1942_v12 = vrot.slane %v1941_v21, 4  ;;  %v1975_v59 = vor.u32 %v1974_v49, %v1970_v48  ;;  %v1980_v7 = vrot.slane %v1978_v16, 5 }
  0x9f   : > { %v1249_v11 = vunpack.c.l.b16 %v1162_v4 }
  0xa0   : > { %v1947_v23 = vsel %vm5279_vm2, %v1942_v12, %v1946_v63  ;;  %v1976_v21 = vrot.slane %v1975_v59, 4  ;;  %v1172_v12 = vrot.slane %v5409_v22, 5 }
  0xa1   : > { %4655 = vmatmul.msk.bf16.gmra.mxu3 %vm703_vm3, %v5092_v10  ;;  %v1248_v10 = vunpack.c.l.b16 %v1159_v62  ;;  %v2213_v42 = vunpack.c.l.b16 %v1947_v23  ;;  %v4690_v62 = vld [vmem:[%s5267_s6 + $0x64] sm:$0xf] }
  0xa2   : > { %v1996_v13 = vshrl.u32 %v4690_v62, 16  ;;  %v1981_v19 = vsel %vm5279_vm2, %v1976_v21, %v1980_v7  ;;  %v1174_v29 = vrot.slane %v1172_v12, 4 }
  0xa3   : > { %v1275_v15 = vpack.c.b16 %v1249_v11, %v1248_v10  ;;  %v2240_v54 = vpack.c.b16 %v2214_v43, %v2213_v42  ;;  %v1986_v10 = vshll.u32 %v4689_v3, 16  ;;  %v1992_v11 = vshll.u32 %v4690_v62, 16  ;;  %v4692_v62 = vld [vmem:[%s5267_s6 + $0x6c] sm:$0xf] }
  0xa4   : > { %v5574_v31 = vpop.f32.mrf.mxu1  ;;  %v1998_v44 = vrot.slane %v1996_v13, 4  ;;  %v1078_v13 = vld [vmem:[%s5267_s6 + $0x60] sm:$0xe] }
  0xa5   : > { %v1988_v24 = vrot.slane %v1986_v10, 5  ;;  %v5152_v10 = vld [vmem:[%s5267_s6 + $0x64] sm:$0xf] }
  0xa6   : > { %v5576_v34 = vpop.f32.mrf.mxu2  ;;  %4731 = vmatmul.msk.bf16.gmra.mxu0 %vm703_vm3, %v2238_v27  ;;  %v1076_v27 = vld [vmem:[%s5267_s6 + $0x48] sm:$0xe] }
  0xa7   : > { %4488 = vmatmul.msk.bf16.gmra.mxu1 %vm703_vm3, %v5071_v30  ;;  %v1959_v30 = vshrl.u32 %v4686_v18, 16  ;;  %v4506_v40 = vrot.slane %v1076_v27, 9  ;;  %v1994_v27 = vrot.slane %v1992_v11, 5  ;;  %v1179_v11 = vrot.slane %v5152_v10, 5 }
  0xa9   : > { %v5582_v39 = vpop.f32.mrf.mxu0  ;;  %v1961_v61 = vrot.slane %v1959_v30, 4  ;;  %v5095_v30 = vld [vmem:[%s5267_s6 + $0x54] sm:$0xff] }
  0xaa   : > { %v5588_v47 = vpop.f32.mrf.mxu3 }
  0xab   : > { %v1965_v58 = vor.u32 %v1964_v45, %v1961_v61  ;;  %v1176_v45 = vsel %vm5474_vm6, %v1174_v29, %v1175_v33  ;;  %v5096_v29 = vld [vmem:[%s5267_s6 + $0x60] sm:$0xff] }
  0xac   : > { %4532 = vmatmul.msk.bf16.gmra.mxu2 %vm703_vm3, %v1274_v41  ;;  %v1168_v41 = vrot.slane %v5368_v56, 5 }
  0xae   : > { %v5594_v55 = vpop.f32.mrf.mxu1  ;;  %v5597_v1 = vpop.f32.mrf.mxu2  ;;  %v1169_v56 = vsel %vm5474_vm6, %v1167_v38, %v1168_v41  ;;  %v4691_v38 = vld [vmem:[%s5267_s6 + $0x68] sm:$0x1] }
  0xaf   : > { %v1251_v63 = vunpack.c.l.b16 %v1169_v56  ;;  %v2002_v49 = vshll.u32 %v4691_v38, 16 }
  0xb1   : > { %4656 = vmatmul.msk.bf16.gmra.mxu3 %vm703_vm3, %v5093_v53  ;;  %v5605_v6 = vpop.f32.mrf.mxu0  ;;  %v1166_v53 = vsel %vm5474_vm6, %v4506_v40, %v1165_v20  ;;  %v2216_v40 = vunpack.c.l.b16 %v1981_v19 }
  0xb2   : > { %v5607_v2 = vpop.f32.mrf.mxu3  ;;  %v1250_v60 = vunpack.c.l.b16 %v1166_v53  ;;  %v5127_v53 = vld [vmem:[%s6731_s1 + $0x60] sm:$0xff] }
  0xb3   : > { %3027 = vmatpush.bf16.msra.mxu2 %v5127_v53 }
  0xb4   : > { %v1276_v8 = vpack.c.b16 %v1251_v63, %v1250_v60  ;;  %v2004_v60 = vrot.slane %v2002_v49, 5  ;;  %v5129_v63 = vld [vmem:[%s6731_s1 + $0x70] sm:$0xff] }
  0xb5   : > { %3693 = vmatpush.bf16.msra.mxu3 %v5129_v63  ;;  %v4694_v49 = vld [vmem:[%s5267_s6 + $0x74] sm:$0x1] }
  0xb6   : > { %4732 = vmatmul.msk.bf16.gmra.mxu0 %vm703_vm3, %v2239_v5  ;;  %v5611_v25 = vpop.f32.mrf.mxu1  ;;  %v1966_v5 = vrot.slane %v1965_v58, 4 }
  0xb7   : > { %4489 = vmatmul.msk.bf16.gmra.mxu1 %vm703_vm3, %v5072_v9  ;;  %v1983_v9 = vshrl.u32 %v4689_v3, 16  ;;  %v5109_v3 = vld [vmem:[%s6731_s1 + $0x50] sm:$0xff] }
  0xb8   : > { %v1971_v18 = vsel %vm5279_vm2, %v1966_v5, %v1970_v48  ;;  %v1999_v48 = vor.u32 %v1998_v44, %v1994_v27  ;;  %v4693_v5 = vld [vmem:[%s5267_s6 + $0x70] sm:$0xf]  ;;  %2728 = vmatpush.bf16.msra.mxu1 %v5109_v3 }
  0xb9   : > { %v5614_v17 = vpop.f32.mrf.mxu2  ;;  %v1985_v23 = vrot.slane %v1983_v9, 4  ;;  %v2016_v19 = vshll.u32 %v4693_v5, 16 }
  0xba   : > { %v2000_v16 = vrot.slane %v1999_v48, 4 }
  0xbb   : > { %v1989_v43 = vor.u32 %v1988_v24, %v1985_v23  ;;  %v2020_v23 = vshrl.u32 %v4693_v5, 16  ;;  %v5131_v24 = vld [vmem:[%s6731_s1 + $0x80] sm:$0xff] }
  0xbc   : > { %4533 = vmatmul.msk.bf16.gmra.mxu2 %vm703_vm3, %v1275_v15  ;;  %v1077_v15 = vld [vmem:[%s5267_s6 + $0x54] sm:$0xe]  ;;  %v2005_v9 = vsel %vm5279_vm2, %v2000_v16, %v2004_v60  ;;  %4103 = vmatpush.bf16.msra.mxu0 %v5131_v24  ;;  %v5075_v60 = vld [vmem:[%s5267_s6 + $0x60] sm:$0xff] }
  0xbd   : > { %v5624_v35 = vpop.f32.mrf.mxu0  ;;  %v4507_v22 = vrot.slane %v1077_v15, 9  ;;  %v1990_v59 = vrot.slane %v1989_v43, 4  ;;  %v2007_v15 = vshrl.u32 %v4692_v62, 16  ;;  %v2218_v44 = vunpack.c.l.b16 %v2005_v9 }
  0xbe   : > { %v5628_v37 = vpop.f32.mrf.mxu3 }
  0xbf   : > { %v1173_v61 = vsel %vm5474_vm6, %v4507_v22, %v1172_v12  ;;  %v2009_v38 = vrot.slane %v2007_v15, 4  ;;  %v4695_v15 = vld [vmem:[%s5267_s6 + $0x78] sm:$0xf] }
  0xc0   : > { %v5631_v50 = vpop.f32.mrf.mxu1 }
  0xc1   : > { %4657 = vmatmul.msk.bf16.gmra.mxu3 %vm703_vm3, %v5094_v36  ;;  %v5635_v52 = vpop.f32.mrf.mxu2  ;;  %v2215_v36 = vunpack.c.l.b16 %v1971_v18  ;;  %v2010_v18 = vshll.u32 %v4692_v62, 16 }
  0xc3   : > { %v2241_v28 = vpack.c.b16 %v2216_v40, %v2215_v36  ;;  %v4508_v36 = vrot.slane %v1078_v13, 9  ;;  %v1181_v40 = vrot.slane %v1179_v11, 4  ;;  %v2012_v43 = vrot.slane %v2010_v18, 5  ;;  %v4696_v18 = vld [vmem:[%s5267_s6 + $0x7c] sm:$0xf] }
  0xc5   : > { %v5642_v0 = vpop.f32.mrf.mxu0 }
  0xc6   : > { %4733 = vmatmul.msk.bf16.gmra.mxu0 %vm703_vm3, %v2240_v54  ;;  %v5647_v4 = vpop.f32.mrf.mxu3  ;;  %v1252_v54 = vunpack.c.l.b16 %v1173_v61  ;;  %v2018_v61 = vrot.slane %v2016_v19, 5  ;;  %v5154_v19 = vld [vmem:[%s5267_s6 + $0x70] sm:$0xf] }
  0xc7   : > { %4490 = vmatmul.msk.bf16.gmra.mxu1 %vm703_vm3, %v5073_v57  ;;  %v1253_v57 = vunpack.c.l.b16 %v1176_v45  ;;  %v2022_v45 = vrot.slane %v2020_v23, 4  ;;  %v1186_v23 = vrot.slane %v5154_v19, 5 }
  0xc8   : > { %v5651_v14 = vpop.f32.mrf.mxu1 }
  0xc9   : > { %v1277_v21 = vpack.c.b16 %v1253_v57, %v1252_v54  ;;  %v2013_v54 = vor.u32 %v2012_v43, %v2009_v38  ;;  %v2023_v57 = vor.u32 %v2022_v45, %v2018_v61  ;;  %v5155_v43 = vld [vmem:[%s5267_s6 + $0x74] sm:$0x1] }
  0xca   : > { %v1189_v45 = vrot.slane %v5155_v43, 5 }
  0xcb   : > { %v2024_v9 = vrot.slane %v2023_v57, 4 }
  0xcc   : > { %v5658_v20 = vpop.f32.mrf.mxu2  ;;  %4534 = vmatmul.msk.bf16.gmra.mxu2 %vm703_vm3, %v1276_v8  ;;  %v1995_v8 = vsel %vm5279_vm2, %v1990_v59, %v1994_v27  ;;  %v2026_v59 = vshll.u32 %v4694_v49, 16  ;;  %v5097_v49 = vld [vmem:[%s5267_s6 + $0x6c] sm:$0xff] }
  0xcd   : > { %v2217_v33 = vunpack.c.l.b16 %v1995_v8  ;;  %v2014_v8 = vrot.slane %v2013_v54, 4 }
  0xce   : > { %v2028_v10 = vrot.slane %v2026_v59, 5 }
  0xcf   : > { %v5664_v41 = vpop.f32.mrf.mxu0  ;;  %v2242_v53 = vpack.c.b16 %v2218_v44, %v2217_v33  ;;  %v2019_v24 = vsel %vm5279_vm2, %v2014_v8, %v2018_v61  ;;  %v2034_v33 = vshll.u32 %v4695_v15, 16  ;;  %v2040_v44 = vshll.u32 %v4696_v18, 16  ;;  %v4697_v8 = vld [vmem:[%s5267_s6 + $0x80] sm:$0x1] }
  0xd0   : > { %v5666_v42 = vpop.f32.mrf.mxu3 }
  0xd1   : > { %4658 = vmatmul.msk.bf16.gmra.mxu3 %vm703_vm3, %v5095_v30  ;;  %v5153_v30 = vld [vmem:[%s5267_s6 + $0x68] sm:$0x1] }
  0xd2   : > { %v1182_v22 = vrot.slane %v5153_v30, 5  ;;  %v1079_v30 = vld [vmem:[%s5267_s6 + $0x6c] sm:$0xe] }
  0xd4   : > { %v5677_v56 = vpop.f32.mrf.mxu1  ;;  %v5679_v58 = vpop.f32.mrf.mxu2 }
  0xd6   : > { %4734 = vmatmul.msk.bf16.gmra.mxu0 %vm703_vm3, %v2241_v28  ;;  %v1180_v28 = vsel %vm5474_vm6, %v4508_v36, %v1179_v11  ;;  %v2044_v36 = vshrl.u32 %v4696_v18, 16 }
  0xd7   : > { %4491 = vmatmul.msk.bf16.gmra.mxu1 %vm703_vm3, %v5074_v51  ;;  %v5691_v7 = vpop.f32.mrf.mxu0  ;;  %v1183_v51 = vsel %vm5474_vm6, %v1181_v40, %v1182_v22  ;;  %v1254_v62 = vunpack.c.l.b16 %v1180_v28  ;;  %v4509_v28 = vrot.slane %v1079_v30, 9 }
  0xd8   : > { %v5698_v12 = vpop.f32.mrf.mxu3  ;;  %v1255_v5 = vunpack.c.l.b16 %v1183_v51  ;;  %v1188_v51 = vrot.slane %v1186_v23, 4 }
  0xda   : > { %v1278_v13 = vpack.c.b16 %v1255_v5, %v1254_v62  ;;  %v2046_v62 = vrot.slane %v2044_v36, 4 }
  0xdc   : > { %4535 = vmatmul.msk.bf16.gmra.mxu2 %vm703_vm3, %v1277_v21  ;;  %v5706_v27 = vpop.f32.mrf.mxu1 }
  0xdf   : > { %v5709_v48 = vpop.f32.mrf.mxu2 }
  0xe1   : > { %4659 = vmatmul.msk.bf16.gmra.mxu3 %vm703_vm3, %v5096_v29  ;;  %v2031_v29 = vshrl.u32 %v4695_v15, 16  ;;  %v5076_v15 = vld [vmem:[%s5267_s6 + $0x6c] sm:$0xff] }
  0xe3   : > { %v5717_v16 = vpop.f32.mrf.mxu0  ;;  %v2033_v59 = vrot.slane %v2031_v29, 4 }
  0xe4   : > { %v5720_v63 = vpop.f32.mrf.mxu3  ;;  %v990_v3 = vpop.f32.mrf.mxu1 }
  0xe5   : > { %v991_v21 = vadd.f32 %v990_v3, %v5582_v39  ;;  %v2029_v39 = vsel %vm5279_vm2, %v2024_v9, %v2028_v10  ;;  %v2042_v3 = vrot.slane %v2040_v44, 5  ;;  %v1187_v9 = vsel %vm5474_vm6, %v4509_v28, %v1186_v23 }
  0xe6   : > { %4735 = vmatmul.msk.bf16.gmra.mxu0 %vm703_vm3, %v2242_v53  ;;  %v2219_v53 = vunpack.c.l.b16 %v2019_v24  ;;  %v2220_v54 = vunpack.c.l.b16 %v2029_v39  ;;  %v2050_v24 = vshll.u32 %v4697_v8, 16 }
  0xe7   : > { %v5724_v11 = vpop.f32.mrf.mxu2  ;;  %4492 = vmatmul.msk.bf16.gmra.mxu1 %vm703_vm3, %v5075_v60  ;;  %v2036_v60 = vrot.slane %v2034_v33, 5  ;;  %v2047_v19 = vor.u32 %v2046_v62, %v2042_v3 }
  0xe8   : > { %v2243_v10 = vpack.c.b16 %v2220_v54, %v2219_v53  ;;  %v2052_v43 = vrot.slane %v2050_v24, 5  ;;  %v4699_v53 = vld [vmem:[%s5267_s6 + $0x88] sm:$0xf]  ;;  %v5156_v54 = vld [vmem:[%s5267_s6 + $0x7c] sm:$0xf] }
  0xe9   : > { %v2037_v18 = vor.u32 %v2036_v60, %v2033_v59  ;;  %v1080_v59 = vld [vmem:[%s5267_s6 + $0x78] sm:$0xe] }
  0xeb   : > { %v5735_v22 = vpop.f32.mrf.mxu0  ;;  %v2038_v36 = vrot.slane %v2037_v18, 4 }
  0xec   : > { %v5737_v40 = vpop.f32.mrf.mxu3  ;;  %4536 = vmatmul.msk.bf16.gmra.mxu2 %vm703_vm3, %v1278_v13  ;;  %v992_v38 = vpop.f32.mrf.mxu1 }
  0xed   : > { %v993_v61 = vadd.f32 %v992_v38, %v5605_v6  ;;  %v1190_v6 = vsel %vm5474_vm6, %v1188_v51, %v1189_v45  ;;  %v2048_v38 = vrot.slane %v2047_v19, 4  ;;  %v4698_v45 = vld [vmem:[%s5267_s6 + $0x84] sm:$0xf]  ;;  %v5098_v19 = vld [vmem:[%s5267_s6 + $0x78] sm:$0xff] }
  0xee   : > { %v1257_v29 = vunpack.c.l.b16 %v1190_v6  ;;  %v2058_v60 = vshll.u32 %v4698_v45, 16  ;;  %v2068_v6 = vshrl.u32 %v4699_v53, 16 }
  0xef   : > { %v1355_v57 = vpop.f32.mrf.mxu2  ;;  %v2053_v8 = vsel %vm5279_vm2, %v2048_v38, %v2052_v43 }
  0xf0   : > { %v1435_v5 = vadd.f32 %v1355_v57, %v991_v21  ;;  %v1256_v21 = vunpack.c.l.b16 %v1187_v9  ;;  %v1193_v57 = vrot.slane %v5156_v54, 5  ;;  %v2064_v9 = vshll.u32 %v4699_v53, 16 }
  0xf1   : > { %4660 = vmatmul.msk.bf16.gmra.mxu3 %vm703_vm3, %v5097_v49  ;;  %v2070_v38 = vrot.slane %v2068_v6, 4 }
  0xf2   : > { %v1279_v51 = vpack.c.b16 %v1257_v29, %v1256_v21 }
  0xf3   : > { %v2320_v13 = vpop.f32.mrf.mxu0 }
  0xf4   : > { %v1654_v39 = vpop.f32.mrf.mxu3  ;;  %v995_v30 = vpop.f32.mrf.mxu1 }
  0xf5   : > { %v1734_v33 = vadd.f32 %v1654_v39, %v1435_v5  ;;  %v996_v23 = vadd.f32 %v995_v30, %v5624_v35  ;;  %v2055_v35 = vshrl.u32 %v4698_v45, 16  ;;  %v2043_v5 = vsel %vm5279_vm2, %v2038_v36, %v2042_v3 }
  0xf6   : > { %4736 = vmatmul.msk.bf16.gmra.mxu0 %vm703_vm3, %v2243_v10  ;;  %v5157_v10 = vld [vmem:[%s5267_s6 + $0x80] sm:$0x1]  ;;  %v4510_v39 = vrot.slane %v1080_v59, 9  ;;  %v1195_v30 = vrot.slane %v1193_v57, 4  ;;  %v2221_v21 = vunpack.c.l.b16 %v2043_v5  ;;  %v2222_v3 = vunpack.c.l.b16 %v2053_v8 }
  0xf7   : > { %v1357_v44 = vpop.f32.mrf.mxu2  ;;  %4493 = vmatmul.msk.bf16.gmra.mxu1 %vm703_vm3, %v5076_v15  ;;  %v5754_v49 = vadd.f32 %v2320_v13, %v1734_v33  ;;  %v1196_v13 = vrot.slane %v5157_v10, 5  ;;  %v2057_v29 = vrot.slane %v2055_v35, 4  ;;  %v2060_v33 = vrot.slane %v2058_v60, 5  ;;  %v5077_v35 = vld [vmem:[%s5267_s6 + $0x78] sm:$0xff] }
  0xf8   : > { %v1436_v28 = vadd.f32 %v1357_v44, %v993_v61  ;;  %v2066_v36 = vrot.slane %v2064_v9, 5  ;;  %v2244_v53 = vpack.c.b16 %v2222_v3, %v2221_v21  ;;  %v4702_v21 = vld [vmem:[%s5267_s6 + $0x94] sm:$0xf]  ;;  %v5158_v3 = vld [vmem:[%s5267_s6 + $0x88] sm:$0xf] }
  0xf9   : > { %v2061_v54 = vor.u32 %v2060_v33, %v2057_v29  ;;  %v1200_v29 = vrot.slane %v5158_v3, 5  ;;  %v1081_v33 = vld [vmem:[%s5267_s6 + $0x84] sm:$0xe] }
  0xfa   : > { %v2071_v60 = vor.u32 %v2070_v38, %v2066_v36 }
  0xfb   : > { %v2322_v62 = vpop.f32.mrf.mxu0  ;;  %v2062_v10 = vrot.slane %v2061_v54, 4 }
  0xfc   : > { %v1656_v61 = vpop.f32.mrf.mxu3  ;;  %4537 = vmatmul.msk.bf16.gmra.mxu2 %vm703_vm3, %v1279_v51  ;;  %v997_v15 = vpop.f32.mrf.mxu1  ;;  %v4700_v51 = vld [vmem:[%s5267_s6 + $0x8c] sm:$0x1] }
  0xfd   : > { %v1735_v18 = vadd.f32 %v1656_v61, %v1436_v28  ;;  %v998_v24 = vadd.f32 %v997_v15, %v5642_v0  ;;  %v1194_v28 = vsel %vm5474_vm6, %v4510_v39, %v1193_v57  ;;  %v1197_v0 = vsel %vm5474_vm6, %v1195_v30, %v1196_v13 }
  0xfe   : > { %v2074_v5 = vshll.u32 %v4700_v51, 16  ;;  %v1259_v9 = vunpack.c.l.b16 %v1197_v0  ;;  %v2072_v61 = vrot.slane %v2071_v60, 4  ;;  %v2092_v0 = vshrl.u32 %v4702_v21, 16  ;;  %v5099_v60 = vld [vmem:[%s5267_s6 + $0x84] sm:$0xff] }
  0xff   : > { %v1360_v44 = vpop.f32.mrf.mxu2  ;;  %v5767_v43 = vadd.f32 %v2322_v62, %v1735_v18  ;;  %v4701_v18 = vld [vmem:[%s5267_s6 + $0x90] sm:$0xf] }
 0x100   : > { %v1437_v45 = vadd.f32 %v1360_v44, %v996_v23  ;;  %v1258_v23 = vunpack.c.l.b16 %v1194_v28  ;;  %v2076_v15 = vrot.slane %v2074_v5, 5  ;;  %v2079_v44 = vshrl.u32 %v4701_v18, 16 }
 0x101   : > { %4661 = vmatmul.msk.bf16.gmra.mxu3 %vm703_vm3, %v5098_v19  ;;  %v2082_v51 = vshll.u32 %v4701_v18, 16  ;;  %v2088_v28 = vshll.u32 %v4702_v21, 16  ;;  %v4511_v5 = vrot.slane %v1081_v33, 9 }
 0x102   : > { %v1280_v30 = vpack.c.b16 %v1259_v9, %v1258_v23  ;;  %v2081_v9 = vrot.slane %v2079_v44, 4 }
 0x103   : > { %v2325_v59 = vpop.f32.mrf.mxu0 }
 0x104   : > { %v1659_v8 = vpop.f32.mrf.mxu3  ;;  %v1000_v62 = vpop.f32.mrf.mxu1 }
 0x105   : > { %v1736_v6 = vadd.f32 %v1659_v8, %v1437_v45  ;;  %v1001_v57 = vadd.f32 %v1000_v62, %v5664_v41  ;;  %v2067_v41 = vsel %vm5279_vm2, %v2062_v10, %v2066_v36  ;;  %v2077_v45 = vsel %vm5279_vm2, %v2072_v61, %v2076_v15 }
 0x106   : > { %4737 = vmatmul.msk.bf16.gmra.mxu0 %vm703_vm3, %v2244_v53  ;;  %v5159_v53 = vld [vmem:[%s5267_s6 + $0x8c] sm:$0x1]  ;;  %v1202_v8 = vrot.slane %v1200_v29, 4  ;;  %v2223_v62 = vunpack.c.l.b16 %v2067_v41  ;;  %v2224_v23 = vunpack.c.l.b16 %v2077_v45  ;;  %v2084_v10 = vrot.slane %v2082_v51, 5  ;;  %v5078_v41 = vld [vmem:[%s5267_s6 + $0x84] sm:$0xff] }
 0x107   : > { %v1362_v13 = vpop.f32.mrf.mxu2  ;;  %4494 = vmatmul.msk.bf16.gmra.mxu1 %vm703_vm3, %v5077_v35  ;;  %v5780_v19 = vadd.f32 %v2325_v59, %v1736_v6  ;;  %v1203_v54 = vrot.slane %v5159_v53, 5  ;;  %v2094_v61 = vrot.slane %v2092_v0, 4 }
 0x108   : > { %v1438_v39 = vadd.f32 %v1362_v13, %v998_v24  ;;  %v2090_v13 = vrot.slane %v2088_v28, 5  ;;  %v2245_v21 = vpack.c.b16 %v2224_v23, %v2223_v62  ;;  %v2085_v33 = vor.u32 %v2084_v10, %v2081_v9  ;;  %v4705_v62 = vld [vmem:[%s5267_s6 + $0xa0] sm:$0xf]  ;;  %v5160_v23 = vld [vmem:[%s5267_s6 + $0x94] sm:$0xf] }
 0x109   : > { %v1207_v9 = vrot.slane %v5160_v23, 5 }
 0x10a   : > { %v2095_v44 = vor.u32 %v2094_v61, %v2090_v13 }
 0x10b   : > { %v2327_v38 = vpop.f32.mrf.mxu0 }
 0x10c   : > { %v1661_v24 = vpop.f32.mrf.mxu3  ;;  %4538 = vmatmul.msk.bf16.gmra.mxu2 %vm703_vm3, %v1280_v30  ;;  %v1002_v59 = vpop.f32.mrf.mxu1  ;;  %v4703_v30 = vld [vmem:[%s5267_s6 + $0x98] sm:$0x1] }
 0x10d   : > { %v1737_v35 = vadd.f32 %v1661_v24, %v1438_v39  ;;  %v1003_v36 = vadd.f32 %v1002_v59, %v5691_v7  ;;  %v1201_v39 = vsel %vm5474_vm6, %v4511_v5, %v1200_v29  ;;  %v1204_v7 = vsel %vm5474_vm6, %v1202_v8, %v1203_v54 }
 0x10e   : > { %v2098_v45 = vshll.u32 %v4703_v30, 16  ;;  %v1261_v28 = vunpack.c.l.b16 %v1204_v7  ;;  %v2086_v54 = vrot.slane %v2085_v33, 4  ;;  %v2096_v24 = vrot.slane %v2095_v44, 4  ;;  %v5100_v44 = vld [vmem:[%s5267_s6 + $0x90] sm:$0xff] }
 0x10f   : > { %v1365_v6 = vpop.f32.mrf.mxu2  ;;  %v5793_v15 = vadd.f32 %v2327_v38, %v1737_v35  ;;  %v4704_v35 = vld [vmem:[%s5267_s6 + $0x9c] sm:$0xf]  ;;  %v2116_v7 = vshrl.u32 %v4705_v62, 16 }
 0x110   : > { %v1439_v18 = vadd.f32 %v1365_v6, %v1001_v57  ;;  %v1260_v57 = vunpack.c.l.b16 %v1201_v39  ;;  %v2100_v59 = vrot.slane %v2098_v45, 5  ;;  %v1082_v6 = vld [vmem:[%s5267_s6 + $0x90] sm:$0xe]  ;;  %v2106_v10 = vshll.u32 %v4704_v35, 16 }
 0x111   : > { %4662 = vmatmul.msk.bf16.gmra.mxu3 %vm703_vm3, %v5099_v60  ;;  %v2112_v39 = vshll.u32 %v4705_v62, 16 }
 0x112   : > { %v1281_v8 = vpack.c.b16 %v1261_v28, %v1260_v57  ;;  %v2101_v30 = vsel %vm5279_vm2, %v2096_v24, %v2100_v59  ;;  %v2118_v24 = vrot.slane %v2116_v7, 4 }
 0x113   : > { %v2330_v3 = vpop.f32.mrf.mxu0 }
 0x114   : > { %v1664_v51 = vpop.f32.mrf.mxu3  ;;  %v1005_v38 = vpop.f32.mrf.mxu1 }
 0x115   : > { %v1738_v0 = vadd.f32 %v1664_v51, %v1439_v18  ;;  %v1006_v29 = vadd.f32 %v1005_v38, %v5717_v16  ;;  %v2103_v16 = vshrl.u32 %v4704_v35, 16  ;;  %v2091_v18 = vsel %vm5279_vm2, %v2086_v54, %v2090_v13 }
 0x116   : > { %4738 = vmatmul.msk.bf16.gmra.mxu0 %vm703_vm3, %v2245_v21  ;;  %v5161_v21 = vld [vmem:[%s5267_s6 + $0x98] sm:$0x1]  ;;  %v4512_v51 = vrot.slane %v1082_v6, 9  ;;  %v1209_v38 = vrot.slane %v1207_v9, 4  ;;  %v2225_v57 = vunpack.c.l.b16 %v2091_v18  ;;  %v2226_v13 = vunpack.c.l.b16 %v2101_v30 }
 0x117   : > { %v1367_v53 = vpop.f32.mrf.mxu2  ;;  %4495 = vmatmul.msk.bf16.gmra.mxu1 %vm703_vm3, %v5078_v41  ;;  %v5806_v60 = vadd.f32 %v2330_v3, %v1738_v0  ;;  %v1210_v3 = vrot.slane %v5161_v21, 5  ;;  %v2105_v28 = vrot.slane %v2103_v16, 4  ;;  %v2108_v0 = vrot.slane %v2106_v10, 5  ;;  %v5079_v16 = vld [vmem:[%s5267_s6 + $0x90] sm:$0xff] }
 0x118   : > { %v1440_v5 = vadd.f32 %v1367_v53, %v1003_v36  ;;  %v2114_v54 = vrot.slane %v2112_v39, 5  ;;  %v2246_v62 = vpack.c.b16 %v2226_v13, %v2225_v57  ;;  %v4708_v13 = vld [vmem:[%s5267_s6 + $0xac] sm:$0xf] }
 0x119   : > { %v2109_v23 = vor.u32 %v2108_v0, %v2105_v28  ;;  %v1083_v28 = vld [vmem:[%s5267_s6 + $0x9c] sm:$0xe] }
 0x11a   : > { %v2119_v10 = vor.u32 %v2118_v24, %v2114_v54 }
 0x11b   : > { %v2332_v61 = vpop.f32.mrf.mxu0 }
 0x11c   : > { %v1666_v36 = vpop.f32.mrf.mxu3  ;;  %4539 = vmatmul.msk.bf16.gmra.mxu2 %vm703_vm3, %v1281_v8  ;;  %v1007_v41 = vpop.f32.mrf.mxu1  ;;  %v4706_v8 = vld [vmem:[%s5267_s6 + $0xa4] sm:$0x1] }
 0x11d   : > { %v1739_v33 = vadd.f32 %v1666_v36, %v1440_v5  ;;  %v1008_v45 = vadd.f32 %v1007_v41, %v5735_v22  ;;  %v1208_v5 = vsel %vm5474_vm6, %v4512_v51, %v1207_v9  ;;  %v1211_v22 = vsel %vm5474_vm6, %v1209_v38, %v1210_v3  ;;  %v4707_v41 = vld [vmem:[%s5267_s6 + $0xa8] sm:$0xf]  ;;  %v5162_v38 = vld [vmem:[%s5267_s6 + $0xa0] sm:$0xf] }
 0x11e   : > { %v2122_v18 = vshll.u32 %v4706_v8, 16  ;;  %v1263_v39 = vunpack.c.l.b16 %v1211_v22  ;;  %v2110_v9 = vrot.slane %v2109_v23, 4  ;;  %v2120_v3 = vrot.slane %v2119_v10, 4 }
 0x11f   : > { %v1370_v53 = vpop.f32.mrf.mxu2  ;;  %v5819_v59 = vadd.f32 %v2332_v61, %v1739_v33  ;;  %v1214_v57 = vrot.slane %v5162_v38, 5  ;;  %v2130_v24 = vshll.u32 %v4707_v41, 16  ;;  %v2140_v22 = vshrl.u32 %v4708_v13, 16 }
 0x120   : > { %v1441_v35 = vadd.f32 %v1370_v53, %v1006_v29  ;;  %v1262_v29 = vunpack.c.l.b16 %v1208_v5  ;;  %v2124_v36 = vrot.slane %v2122_v18, 5  ;;  %v2115_v0 = vsel %vm5279_vm2, %v2110_v9, %v2114_v54 }
 0x121   : > { %4663 = vmatmul.msk.bf16.gmra.mxu3 %vm703_vm3, %v5100_v44  ;;  %v2127_v53 = vshrl.u32 %v4707_v41, 16  ;;  %v2136_v5 = vshll.u32 %v4708_v13, 16  ;;  %v1216_v10 = vrot.slane %v1214_v57, 4  ;;  %v2227_v54 = vunpack.c.l.b16 %v2115_v0  ;;  %v4709_v13 = vld [vmem:[%s5267_s6 + $0xb0] sm:$0x1]  ;;  %v5080_v0 = vld [vmem:[%s5267_s6 + $0x9c] sm:$0xff] }
 0x122   : > { %v1282_v51 = vpack.c.b16 %v1263_v39, %v1262_v29  ;;  %v2125_v8 = vsel %vm5279_vm2, %v2120_v3, %v2124_v36  ;;  %v2132_v9 = vrot.slane %v2130_v24, 5  ;;  %v2142_v36 = vrot.slane %v2140_v22, 4 }
 0x123   : > { %v2335_v6 = vpop.f32.mrf.mxu0  ;;  %v2228_v39 = vunpack.c.l.b16 %v2125_v8  ;;  %v2138_v3 = vrot.slane %v2136_v5, 5  ;;  %v2146_v8 = vshll.u32 %v4709_v13, 16 }
 0x124   : > { %v1669_v61 = vpop.f32.mrf.mxu3  ;;  %v1010_v30 = vpop.f32.mrf.mxu1 }
 0x125   : > { %v1740_v7 = vadd.f32 %v1669_v61, %v1441_v35  ;;  %v5101_v61 = vld [vmem:[%s5267_s6 + $0x9c] sm:$0xff]  ;;  %v1011_v29 = vadd.f32 %v1010_v30, %v5558_v46  ;;  %v2247_v46 = vpack.c.b16 %v2228_v39, %v2227_v54  ;;  %v2148_v54 = vrot.slane %v2146_v8, 5 }
 0x126   : > { %4739 = vmatmul.msk.bf16.gmra.mxu0 %vm703_vm3, %v2246_v62  ;;  %v5163_v62 = vld [vmem:[%s5267_s6 + $0xa4] sm:$0x1] }
 0x127   : > { %v1372_v21 = vpop.f32.mrf.mxu2  ;;  %4496 = vmatmul.msk.bf16.gmra.mxu1 %vm703_vm3, %v5079_v16  ;;  %v5831_v33 = vadd.f32 %v2335_v6, %v1740_v7  ;;  %v1217_v23 = vrot.slane %v5163_v62, 5  ;;  %v4513_v16 = vrot.slane %v1083_v28, 9  ;;  %v2129_v7 = vrot.slane %v2127_v53, 4 }
 0x128   : > { %v1442_v44 = vadd.f32 %v1372_v21, %v1008_v45 }
 0x129   : > { %v2133_v30 = vor.u32 %v2132_v9, %v2129_v7 }
 0x12b   : > { %v2337_v35 = vpop.f32.mrf.mxu0 }
 0x12c   : > { %v1671_v45 = vpop.f32.mrf.mxu3  ;;  %4540 = vmatmul.msk.bf16.gmra.mxu2 %vm703_vm3, %v1282_v51  ;;  %v1012_v6 = vpop.f32.mrf.mxu1  ;;  %v1215_v51 = vsel %vm5474_vm6, %v4513_v16, %v1214_v57  ;;  %v4710_v57 = vld [vmem:[%s5267_s6 + $0xb4] sm:$0xf]  ;;  %v2134_v16 = vrot.slane %v2133_v30, 4 }
 0x12d   : > { %v1741_v18 = vadd.f32 %v1671_v45, %v1442_v44  ;;  %v1218_v44 = vsel %vm5474_vm6, %v1216_v10, %v1217_v23  ;;  %v1264_v53 = vunpack.c.l.b16 %v1215_v51  ;;  %v4711_v45 = vld [vmem:[%s5267_s6 + $0xb8] sm:$0xf]  ;;  %v1013_v23 = vadd.f32 %v1012_v6, %v5574_v31 }
 0x12e   : > { %v1265_v24 = vunpack.c.l.b16 %v1218_v44  ;;  %v2151_v7 = vshrl.u32 %v4710_v57, 16  ;;  %v2154_v9 = vshll.u32 %v4710_v57, 16  ;;  %v2164_v51 = vshrl.u32 %v4711_v45, 16  ;;  %v1084_v44 = vld [vmem:[%s5267_s6 + $0xa8] sm:$0xe] }
 0x12f   : > { %v1375_v21 = vpop.f32.mrf.mxu2  ;;  %v5844_v41 = vadd.f32 %v2337_v35, %v1741_v18  ;;  %v2143_v35 = vor.u32 %v2142_v36, %v2138_v3  ;;  %v5164_v36 = vld [vmem:[%s5267_s6 + $0xac] sm:$0xf]  ;;  %v2139_v6 = vsel %vm5279_vm2, %v2134_v16, %v2138_v3 }
 0x130   : > { %v1443_v38 = vadd.f32 %v1375_v21, %v1011_v29  ;;  %v1283_v18 = vpack.c.b16 %v1265_v24, %v1264_v53  ;;  %v2160_v21 = vshll.u32 %v4711_v45, 16  ;;  %v2153_v53 = vrot.slane %v2151_v7, 4 }
 0x131   : > { %4664 = vmatmul.msk.bf16.gmra.mxu3 %vm703_vm3, %v5101_v61  ;;  %v2144_v61 = vrot.slane %v2143_v35, 4  ;;  %v2156_v24 = vrot.slane %v2154_v9, 5  ;;  %v2166_v45 = vrot.slane %v2164_v51, 4  ;;  %v5081_v51 = vld [vmem:[%s5267_s6 + $0xa8] sm:$0xff] }
 0x132   : > { %v2162_v35 = vrot.slane %v2160_v21, 5 }
 0x133   : > { %v2340_v28 = vpop.f32.mrf.mxu0  ;;  %v2149_v13 = vsel %vm5279_vm2, %v2144_v61, %v2148_v54 }
 0x134   : > { %v1674_v5 = vpop.f32.mrf.mxu3  ;;  %v1015_v22 = vpop.f32.mrf.mxu1  ;;  %v2230_v16 = vunpack.c.l.b16 %v2149_v13  ;;  %v2167_v9 = vor.u32 %v2166_v45, %v2162_v35 }
 0x135   : > { %v1742_v62 = vadd.f32 %v1674_v5, %v1443_v38  ;;  %v1221_v38 = vrot.slane %v5164_v36, 5  ;;  %v5102_v5 = vld [vmem:[%s5267_s6 + $0xa8] sm:$0xff]  ;;  %v1016_v3 = vadd.f32 %v1015_v22, %v5594_v55 }
 0x136   : > { %4740 = vmatmul.msk.bf16.gmra.mxu0 %vm703_vm3, %v2247_v46  ;;  %v5165_v46 = vld [vmem:[%s5267_s6 + $0xb0] sm:$0x1] }
 0x137   : > { %v1377_v10 = vpop.f32.mrf.mxu2  ;;  %4497 = vmatmul.msk.bf16.gmra.mxu1 %vm703_vm3, %v5080_v0  ;;  %v5858_v29 = vadd.f32 %v2340_v28, %v1742_v62  ;;  %v1224_v30 = vrot.slane %v5165_v46, 5  ;;  %v4514_v62 = vrot.slane %v1084_v44, 9  ;;  %v1223_v57 = vrot.slane %v1221_v38, 4 }
 0x138   : > { %v1444_v39 = vadd.f32 %v1377_v10, %v1013_v23  ;;  %v2229_v23 = vunpack.c.l.b16 %v2139_v6  ;;  %v4712_v10 = vld [vmem:[%s5267_s6 + $0xbc] sm:$0x1] }
 0x139   : > { %v1225_v7 = vsel %vm5474_vm6, %v1223_v57, %v1224_v30  ;;  %v2170_v55 = vshll.u32 %v4712_v10, 16  ;;  %v4714_v57 = vld [vmem:[%s5267_s6 + $0xc4] sm:$0xf] }
 0x13a   : > { %v2248_v22 = vpack.c.b16 %v2230_v16, %v2229_v23  ;;  %v1267_v13 = vunpack.c.l.b16 %v1225_v7  ;;  %v1085_v23 = vld [vmem:[%s5267_s6 + $0xb4] sm:$0xe]  ;;  %v5167_v16 = vld [vmem:[%s5267_s6 + $0xb8] sm:$0xf]  ;;  %v2188_v7 = vshrl.u32 %v4714_v57, 16 }
 0x13b   : > { %v2342_v31 = vpop.f32.mrf.mxu0  ;;  %v1228_v10 = vrot.slane %v5167_v16, 5 }
 0x13c   : > { %v1676_v28 = vpop.f32.mrf.mxu3  ;;  %4541 = vmatmul.msk.bf16.gmra.mxu2 %vm703_vm3, %v1283_v18  ;;  %v1017_v0 = vpop.f32.mrf.mxu1  ;;  %v2157_v18 = vor.u32 %v2156_v24, %v2153_v53  ;;  %v2172_v53 = vrot.slane %v2170_v55, 5  ;;  %v4713_v24 = vld [vmem:[%s5267_s6 + $0xc0] sm:$0xf]  ;;  %v5168_v55 = vld [vmem:[%s5267_s6 + $0x14] sm:$0x1] }
 0x13d   : > { %v1743_v8 = vadd.f32 %v1676_v28, %v1444_v39  ;;  %v1222_v39 = vsel %vm5474_vm6, %v4514_v62, %v1221_v38  ;;  %v2168_v38 = vrot.slane %v2167_v9, 4  ;;  %v1018_v30 = vadd.f32 %v1017_v0, %v5611_v25 }
 0x13e   : > { %v1266_v6 = vunpack.c.l.b16 %v1222_v39  ;;  %v2158_v28 = vrot.slane %v2157_v18, 4  ;;  %v2175_v0 = vshrl.u32 %v4713_v24, 16  ;;  %v2178_v18 = vshll.u32 %v4713_v24, 16  ;;  %v5103_v24 = vld [vmem:[%s5267_s6 + $0xb4] sm:$0xff] }
 0x13f   : > { %v1380_v61 = vpop.f32.mrf.mxu2  ;;  %v5871_v54 = vadd.f32 %v2342_v31, %v1743_v8  ;;  %v5166_v8 = vld [vmem:[%s5267_s6 + $0x10] sm:$0xf]  ;;  %v2173_v25 = vsel %vm5279_vm2, %v2168_v38, %v2172_v53  ;;  %v2184_v39 = vshll.u32 %v4714_v57, 16  ;;  %v1230_v38 = vrot.slane %v1228_v10, 4  ;;  %v4744_v53 = vld [vmem:[%s5267_s6 + $0xc] sm:$0xe] }
 0x140   : > { %v1445_v36 = vadd.f32 %v1380_v61, %v1016_v3  ;;  %v1284_v3 = vpack.c.b16 %v1267_v13, %v1266_v6  ;;  %v5169_v6 = vld [vmem:[%s5267_s6 + $0xbc] sm:$0x1]  ;;  %v4760_v57 = vrot.slane %v4744_v53, 9 }
 0x141   : > { %4665 = vmatmul.msk.bf16.gmra.mxu3 %vm703_vm3, %v5102_v5  ;;  %v2498_v5 = vrot.slane %v5166_v8, 5  ;;  %v2177_v8 = vrot.slane %v2175_v0, 4 }
 0x143   : > { %v2345_v21 = vpop.f32.mrf.mxu0  ;;  %v2500_v9 = vrot.slane %v2498_v5, 4 }
 0x144   : > { %v1679_v44 = vpop.f32.mrf.mxu3  ;;  %v1020_v31 = vpop.f32.mrf.mxu1 }
 0x145   : > { %v1744_v46 = vadd.f32 %v1679_v44, %v1445_v36  ;;  %v2163_v36 = vsel %vm5279_vm2, %v2158_v28, %v2162_v35  ;;  %v4515_v44 = vrot.slane %v1085_v23, 9  ;;  %v1021_v16 = vadd.f32 %v1020_v31, %v5631_v50 }
 0x146   : > { %4741 = vmatmul.msk.bf16.gmra.mxu0 %vm703_vm3, %v2248_v22  ;;  %v2501_v22 = vrot.slane %v5168_v55, 5  ;;  %v2231_v35 = vunpack.c.l.b16 %v2163_v36  ;;  %v2186_v23 = vrot.slane %v2184_v39, 5  ;;  %v2190_v55 = vrot.slane %v2188_v7, 4  ;;  %v4715_v36 = vld [vmem:[%s5267_s6 + $0xc8] sm:$0x1] }
 0x147   : > { %v1382_v62 = vpop.f32.mrf.mxu2  ;;  %4498 = vmatmul.msk.bf16.gmra.mxu1 %vm703_vm3, %v5081_v51  ;;  %v5887_v61 = vadd.f32 %v2345_v21, %v1744_v46  ;;  %v1231_v21 = vrot.slane %v5169_v6, 5  ;;  %v2232_v46 = vunpack.c.l.b16 %v2173_v25  ;;  %v2499_v25 = vsel %vm5474_vm6, %v4760_v57, %v2498_v5  ;;  %v4928_v39 = vld [vmem:[%s5267_s6 + $0x18] sm:$0xf] }
 0x148   : > { %v1446_v45 = vadd.f32 %v1382_v62, %v1018_v30  ;;  %v2180_v62 = vrot.slane %v2178_v18, 5  ;;  %v2613_v50 = vunpack.c.l.b16 %v2499_v25  ;;  %v2194_v53 = vshll.u32 %v4715_v36, 16 }
 0x149   : > { %v1232_v18 = vsel %vm5474_vm6, %v1230_v38, %v1231_v21  ;;  %v2249_v7 = vpack.c.b16 %v2232_v46, %v2231_v35  ;;  %v3190_v21 = vshrl.u32 %v4928_v39, 16  ;;  %v3193_v38 = vshll.u32 %v4928_v39, 16 }
 0x14b   : > { %v2347_v51 = vpop.f32.mrf.mxu0  ;;  %v3192_v36 = vrot.slane %v3190_v21, 4 }
 0x14c   : > { %v1681_v13 = vpop.f32.mrf.mxu3  ;;  %4542 = vmatmul.msk.bf16.gmra.mxu2 %vm703_vm3, %v1284_v3  ;;  %v1022_v28 = vpop.f32.mrf.mxu1  ;;  %v1229_v3 = vsel %vm5474_vm6, %v4515_v44, %v1228_v10  ;;  %v5911_v10 = vld [vmem:[%s5267_s6 + $0x1c] sm:$0xf]  ;;  %v2191_v44 = vor.u32 %v2190_v55, %v2186_v23 }
 0x14d   : > { %v1745_v30 = vadd.f32 %v1681_v13, %v1446_v45  ;;  %v2502_v45 = vsel %vm5474_vm6, %v2500_v9, %v2501_v22  ;;  %v2181_v13 = vor.u32 %v2180_v62, %v2177_v8  ;;  %v5082_v22 = vld [vmem:[%s5267_s6 + $0xb4] sm:$0xff]  ;;  %v3203_v35 = vshrl.u32 %v5911_v10, 16 }
 0x14e   : > { %v2614_v31 = vunpack.c.l.b16 %v2502_v45  ;;  %v1023_v8 = vadd.f32 %v1022_v28, %v5651_v14 }
 0x14f   : > { %v1385_v6 = vpop.f32.mrf.mxu2  ;;  %v5915_v57 = vadd.f32 %v2347_v51, %v1745_v30  ;;  %v2182_v51 = vrot.slane %v2181_v13, 4  ;;  %v2192_v30 = vrot.slane %v2191_v44, 4  ;;  %v3205_v39 = vrot.slane %v3203_v35, 4 }
 0x150   : > { %v1447_v0 = vadd.f32 %v1385_v6, %v1021_v16  ;;  %v5913_v5 = vpack.c.b16 %v2614_v31, %v2613_v50  ;;  %v1268_v16 = vunpack.c.l.b16 %v1229_v3  ;;  %v1269_v6 = vunpack.c.l.b16 %v1232_v18 }
 0x151   : > { %4666 = vmatmul.msk.bf16.gmra.mxu3 %vm703_vm3, %v5103_v24  ;;  %6739 = vst [vmem:[#allocation2_spill] sm:$0xff] %v5915_v57  ;;  %v3199_v24 = vshll.u32 %v5911_v10, 16  ;;  %v2196_v3 = vrot.slane %v2194_v53, 5  ;;  %v3195_v18 = vrot.slane %v3193_v38, 5  ;;  %v2187_v14 = vsel %vm5279_vm2, %v2182_v51, %v2186_v23  ;;  %v5004_v51 = vld [vmem:[%s5267_s6 + $0x18] sm:$0xe] }
 0x152   : > { %v1285_v55 = vpack.c.b16 %v1269_v6, %v1268_v16  ;;  %v5104_v6 = vld [vmem:[%s5267_s6 + $0xc0] sm:$0xff]  ;;  %v2233_v23 = vunpack.c.l.b16 %v2187_v14 }
 0x153   : > { %v2350_v9 = vpop.f32.mrf.mxu0  ;;  %v3201_v31 = vrot.slane %v3199_v24, 5  ;;  %v2197_v28 = vsel %vm5279_vm2, %v2192_v30, %v2196_v3  ;;  %v3196_v53 = vor.u32 %v3195_v18, %v3192_v36  ;;  %v4931_v30 = vld [vmem:[%s5267_s6 + $0x24] sm:$0xf]  ;;  %v5941_v3 = vld [vmem:[%s5267_s6 + $0x28] sm:$0xf] }
 0x154   : > { %v1684_v25 = vpop.f32.mrf.mxu3  ;;  %v1025_v45 = vpop.f32.mrf.mxu1  ;;  %v2234_v38 = vunpack.c.l.b16 %v2197_v28 }
 0x155   : > { %v1746_v46 = vadd.f32 %v1684_v25, %v1447_v0  ;;  %v5926_v0 = vld [vmem:[%s5267_s6 + $0x20] sm:$0x1]  ;;  %v1026_v21 = vadd.f32 %v1025_v45, %v5677_v56  ;;  %v3197_v35 = vrot.slane %v3196_v53, 4  ;;  %v5170_v45 = vld [vmem:[%s5267_s6 + $0x1c] sm:$0xf] }
 0x156   : > { %4742 = vmatmul.msk.bf16.gmra.mxu0 %vm703_vm3, %v2249_v7  ;;  %v2505_v18 = vrot.slane %v5170_v45, 5  ;;  %v4745_v53 = vld [vmem:[%s5267_s6 + $0x18] sm:$0xe] }
 0x157   : > { %v1387_v62 = vpop.f32.mrf.mxu2  ;;  %4499 = vmatmul.msk.bf16.gmra.mxu1 %vm703_vm3, %v5082_v22  ;;  %v5923_v57 = vadd.f32 %v2350_v9, %v1746_v46  ;;  %v3206_v22 = vor.u32 %v3205_v39, %v3201_v31  ;;  %v3209_v9 = vshll.u32 %v5926_v0, 16  ;;  %v3202_v14 = vsel %vm5279_vm2, %v3197_v35, %v3201_v31 }
 0x158   : > { %v1448_v50 = vadd.f32 %v1387_v62, %v1023_v8  ;;  %v2250_v62 = vpack.c.b16 %v2234_v38, %v2233_v23  ;;  %v3876_v31 = vrot.slane %v5926_v0, 5  ;;  %v5171_v23 = vld [vmem:[%s5267_s6 + $0x20] sm:$0x1]  ;;  %v4761_v35 = vrot.slane %v4745_v53, 9 }
 0x159   : > { %v3207_v46 = vrot.slane %v3206_v22, 4  ;;  %v3211_v8 = vrot.slane %v3209_v9, 5  ;;  %v3214_v22 = vshrl.u32 %v4931_v30, 16  ;;  %v3217_v9 = vshll.u32 %v4931_v30, 16 }
 0x15a   : > { %v2508_v38 = vrot.slane %v5171_v23, 5  ;;  %v2506_v53 = vsel %vm5474_vm6, %v4761_v35, %v2505_v18  ;;  %v4934_v35 = vld [vmem:[%s5267_s6 + $0x30] sm:$0xf] }
 0x15b   : > { %v2352_v7 = vpop.f32.mrf.mxu0  ;;  %v3212_v28 = vsel %vm5279_vm2, %v3207_v46, %v3211_v8  ;;  %v2507_v46 = vrot.slane %v2505_v18, 4  ;;  %v3219_v0 = vrot.slane %v3217_v9, 5 }
 0x15c   : > { %v1686_v13 = vpop.f32.mrf.mxu3  ;;  %4543 = vmatmul.msk.bf16.gmra.mxu2 %vm703_vm3, %v1285_v55  ;;  %v1027_v44 = vpop.f32.mrf.mxu1  ;;  %v3873_v55 = vrot.slane %v5911_v10, 5  ;;  %v3579_v30 = vunpack.c.l.b16 %v3212_v28 }
 0x15d   : > { %v1747_v16 = vadd.f32 %v1686_v13, %v1448_v50  ;;  %v5020_v13 = vrot.slane %v5004_v51, 9  ;;  %v5111_v51 = vld [vmem:[%s5267_s6 + $0x18] sm:$0xff]  ;;  %v2509_v28 = vsel %vm5474_vm6, %v2507_v46, %v2508_v38  ;;  %v5981_v46 = vld [vmem:[%s5267_s6 + $0x34] sm:$0xf] }
 0x15f   : > { %v1390_v25 = vpop.f32.mrf.mxu2  ;;  %v5943_v36 = vadd.f32 %v2352_v7, %v1747_v16  ;;  %v3223_v7 = vshll.u32 %v5941_v3, 16  ;;  %v3227_v16 = vshrl.u32 %v5941_v3, 16 }
 0x160   : > { %v1449_v24 = vadd.f32 %v1390_v25, %v1026_v21  ;;  %v3875_v21 = vrot.slane %v3873_v55, 4 }
 0x161   : > { %4667 = vmatmul.msk.bf16.gmra.mxu3 %vm703_vm3, %v5104_v6  ;;  %v1028_v6 = vadd.f32 %v1027_v44, %v5706_v27  ;;  %v3216_v44 = vrot.slane %v3214_v22, 4  ;;  %v5964_v45 = vrot.slane %v3223_v7, 5 }
 0x163   : > { %v2355_v56 = vpop.f32.mrf.mxu0  ;;  %v3220_v7 = vor.u32 %v3219_v0, %v3216_v44  ;;  %v5005_v44 = vld [vmem:[%s5267_s6 + $0x24] sm:$0xe] }
 0x164   : > { %v1689_v50 = vpop.f32.mrf.mxu3  ;;  %v1030_v39 = vpop.f32.mrf.mxu1 }
 0x165   : > { %v1748_v10 = vadd.f32 %v1689_v50, %v1449_v24  ;;  %v3578_v24 = vunpack.c.l.b16 %v3202_v14  ;;  %v3229_v50 = vrot.slane %v3227_v16, 4  ;;  %v1031_v18 = vadd.f32 %v1030_v39, %v5576_v34 }
 0x166   : > { %4743 = vmatmul.msk.bf16.gmra.mxu0 %vm703_vm3, %v2250_v62  ;;  %v3874_v62 = vsel %vm5474_vm6, %v5020_v13, %v3873_v55  ;;  %v3880_v34 = vrot.slane %v5941_v3, 5 }
 0x167   : > { %v1392_v25 = vpop.f32.mrf.mxu2  ;;  %4788 = vmatmul.msk.bf16.vlgmr.msra.gmra.mxu1 %vm703_vm3, %v5913_v5  ;;  %v5962_v27 = vadd.f32 %v2355_v56, %v1748_v10  ;;  %v3877_v5 = vsel %vm5474_vm6, %v3875_v21, %v3876_v31  ;;  %v3610_v56 = vpack.c.b16 %v3579_v30, %v3578_v24  ;;  %v3988_v13 = vunpack.c.l.b16 %v3874_v62 }
 0x168   : > { %v1450_v8 = vadd.f32 %v1392_v25, %v1028_v6  ;;  %v5973_v6 = vld [vmem:[%s5267_s6 + $0x2c] sm:$0x1]  ;;  %v3989_v9 = vunpack.c.l.b16 %v3877_v5  ;;  %v3230_v16 = vor.u32 %v3229_v50, %v5964_v45  ;;  %v2615_v21 = vunpack.c.l.b16 %v2506_v53 }
 0x169   : > { %v2616_v31 = vunpack.c.l.b16 %v2509_v28  ;;  %v3233_v23 = vshll.u32 %v5973_v6, 16  ;;  %v3238_v50 = vshrl.u32 %v4934_v35, 16  ;;  %v3241_v5 = vshll.u32 %v4934_v35, 16 }
 0x16a   : > { %v4020_v24 = vpack.c.b16 %v3989_v9, %v3988_v13  ;;  %v3247_v53 = vshll.u32 %v5981_v46, 16  ;;  %v3251_v28 = vshrl.u32 %v5981_v46, 16  ;;  %v5172_v13 = vld [vmem:[%s5267_s6 + $0x28] sm:$0xf]  ;;  %v3883_v3 = vrot.slane %v5973_v6, 5 }
 0x16b   : > { %v2357_v14 = vpop.f32.mrf.mxu0  ;;  %v2646_v30 = vpack.c.b16 %v2616_v31, %v2615_v21  ;;  %v3235_v62 = vrot.slane %v3233_v23, 5  ;;  %v2512_v9 = vrot.slane %v5172_v13, 5  ;;  %v5021_v21 = vrot.slane %v5005_v44, 9  ;;  %v5112_v13 = vld [vmem:[%s5267_s6 + $0x24] sm:$0xff] }
 0x16c   : > { %v1691_v55 = vpop.f32.mrf.mxu3  ;;  %4912 = vmatmul.msk.bf16.vlgmr.msra.gmra.mxu2 %vm703_vm3, %v5111_v51  ;;  %v1032_v22 = vpop.f32.mrf.mxu1  ;;  %v3231_v51 = vrot.slane %v3230_v16, 4  ;;  %v3243_v44 = vrot.slane %v3241_v5, 5  ;;  %v6002_v6 = vrot.slane %v3247_v53, 5 }
 0x16d   : > { %v1749_v10 = vadd.f32 %v1691_v55, %v1450_v8  ;;  %v3221_v8 = vrot.slane %v3220_v7, 4  ;;  %v5173_v7 = vld [vmem:[%s5267_s6 + $0x2c] sm:$0x1] }
 0x16e   : > { %v2515_v16 = vrot.slane %v5173_v7, 5  ;;  %v3236_v23 = vsel %vm5279_vm2, %v3231_v51, %v3235_v62  ;;  %v3881_v62 = vsel %vm5474_vm6, %v5021_v21, %v3880_v34 }
 0x16f   : > { %v1395_v38 = vpop.f32.mrf.mxu2  ;;  %v5986_v39 = vadd.f32 %v2357_v14, %v1749_v10  ;;  %v4746_v14 = vld [vmem:[%s5267_s6 + $0x24] sm:$0xe]  ;;  %v1033_v10 = vadd.f32 %v1032_v22, %v5597_v1  ;;  %v3226_v31 = vsel %vm5279_vm2, %v3221_v8, %v5964_v45  ;;  %v2514_v22 = vrot.slane %v2512_v9, 4 }
 0x170   : > { %v1451_v25 = vadd.f32 %v1395_v38, %v1031_v18  ;;  %v3882_v38 = vrot.slane %v3880_v34, 4  ;;  %v4762_v1 = vrot.slane %v4746_v14, 9  ;;  %v3580_v45 = vunpack.c.l.b16 %v3226_v31 }
 0x171   : > { %4988 = vmatmul.msk.bf16.vlgmr.msra.gmra.mxu3 %vm703_vm3, %v3610_v56  ;;  %6740 = vst [vmem:[#allocation3_spill] sm:$0xff] %v5986_v39  ;;  %v3581_v8 = vunpack.c.l.b16 %v3236_v23  ;;  %v6008_v39 = vld [vmem:[%s5267_s6 + $0x38] sm:$0x1] }
 0x172   : > { %v3257_v34 = vshll.u32 %v6008_v39, 16 }
 0x173   : > { %v2360_v0 = vpop.f32.mrf.mxu0  ;;  %v3611_v14 = vpack.c.b16 %v3581_v8, %v3580_v45  ;;  %v5174_v8 = vld [vmem:[%s5267_s6 + $0x34] sm:$0xf] }
 0x174   : > { %v1694_v55 = vpop.f32.mrf.mxu3  ;;  %v1035_v56 = vpop.f32.mrf.mxu1 }
 0x175   : > { %v1750_v18 = vadd.f32 %v1694_v55, %v1451_v25  ;;  %v3240_v25 = vrot.slane %v3238_v50, 4  ;;  %v3253_v55 = vrot.slane %v3251_v28, 4  ;;  %v2516_v28 = vsel %vm5474_vm6, %v2514_v22, %v2515_v16  ;;  %v6027_v22 = vld [vmem:[%s5267_s6 + $0x40] sm:$0xf] }
 0x176   : > { %5048 = vmatmul.msk.bf16.vlgmr.msra.gmra.mxu0 %vm703_vm3, %v4020_v24 }
 0x177   : > { %v1397_v35 = vpop.f32.mrf.mxu2  ;;  %4789 = vmatmul.msk.bf16.gmra.mxu1 %vm703_vm3, %v2646_v30  ;;  %v6005_v7 = vadd.f32 %v2360_v0, %v1750_v18  ;;  %v3884_v30 = vsel %vm5474_vm6, %v3882_v38, %v3883_v3  ;;  %v3244_v50 = vor.u32 %v3243_v44, %v3240_v25  ;;  %v2513_v0 = vsel %vm5474_vm6, %v4762_v1, %v2512_v9 }
 0x178   : > { %v1452_v24 = vadd.f32 %v1397_v35, %v1033_v10  ;;  %v3254_v18 = vor.u32 %v3253_v55, %v6002_v6  ;;  %v1036_v3 = vadd.f32 %v1035_v56, %v5614_v17  ;;  %v3990_v10 = vunpack.c.l.b16 %v3881_v62  ;;  %v5006_v55 = vld [vmem:[%s5267_s6 + $0x30] sm:$0xe] }
 0x179   : > { %v3991_v31 = vunpack.c.l.b16 %v3884_v30  ;;  %v2617_v38 = vunpack.c.l.b16 %v2513_v0  ;;  %v2618_v9 = vunpack.c.l.b16 %v2516_v28  ;;  %v3245_v25 = vrot.slane %v3244_v50, 4 }
 0x17a   : > { %v3255_v16 = vrot.slane %v3254_v18, 4  ;;  %v3259_v44 = vrot.slane %v3257_v34, 5  ;;  %v3887_v1 = vrot.slane %v5981_v46, 5  ;;  %v2519_v62 = vrot.slane %v5174_v8, 5  ;;  %v4747_v46 = vld [vmem:[%s5267_s6 + $0x30] sm:$0xe] }
 0x17b   : > { %v2362_v51 = vpop.f32.mrf.mxu0  ;;  %v2647_v45 = vpack.c.b16 %v2618_v9, %v2617_v38  ;;  %v5022_v28 = vrot.slane %v5006_v55, 9 }
 0x17c   : > { %v1696_v5 = vpop.f32.mrf.mxu3  ;;  %4913 = vmatmul.msk.bf16.gmra.mxu2 %vm703_vm3, %v5112_v13  ;;  %v1037_v53 = vpop.f32.mrf.mxu1  ;;  %v4937_v13 = vld [vmem:[%s5267_s6 + $0x3c] sm:$0xf]  ;;  %v3260_v0 = vsel %vm5279_vm2, %v3255_v16, %v3259_v44  ;;  %v5113_v44 = vld [vmem:[%s5267_s6 + $0x30] sm:$0xff] }
 0x17d   : > { %v1751_v21 = vadd.f32 %v1696_v5, %v1452_v24  ;;  %v4021_v24 = vpack.c.b16 %v3991_v31, %v3990_v10  ;;  %v3250_v5 = vsel %vm5279_vm2, %v3245_v25, %v6002_v6  ;;  %v3262_v18 = vshrl.u32 %v4937_v13, 16  ;;  %v5175_v31 = vld [vmem:[%s5267_s6 + $0x38] sm:$0x1] }
 0x17e   : > { %v3889_v10 = vrot.slane %v3887_v1, 4  ;;  %v3890_v6 = vrot.slane %v6008_v39, 5  ;;  %v3582_v9 = vunpack.c.l.b16 %v3250_v5  ;;  %v2521_v25 = vrot.slane %v2519_v62, 4 }
 0x17f   : > { %v1400_v23 = vpop.f32.mrf.mxu2  ;;  %v6029_v17 = vadd.f32 %v2362_v51, %v1751_v21  ;;  %v3265_v51 = vshll.u32 %v4937_v13, 16  ;;  %v3271_v21 = vshll.u32 %v6027_v22, 16  ;;  %v3583_v55 = vunpack.c.l.b16 %v3260_v0 }
 0x180   : > { %v1453_v35 = vadd.f32 %v1400_v23, %v1036_v3  ;;  %v1038_v3 = vadd.f32 %v1037_v53, %v5635_v52  ;;  %v2522_v23 = vrot.slane %v5175_v31, 5  ;;  %v3888_v13 = vsel %vm5474_vm6, %v5022_v28, %v3887_v1 }
 0x181   : > { %4989 = vmatmul.msk.bf16.gmra.mxu3 %vm703_vm3, %v3611_v14  ;;  %v3275_v14 = vshrl.u32 %v6027_v22, 16  ;;  %v3264_v52 = vrot.slane %v3262_v18, 4  ;;  %v3267_v53 = vrot.slane %v3265_v51, 5  ;;  %v6050_v39 = vrot.slane %v3271_v21, 5 }
 0x182   : > { %v2523_v0 = vsel %vm5474_vm6, %v2521_v25, %v2522_v23  ;;  %v3992_v28 = vunpack.c.l.b16 %v3888_v13  ;;  %v5007_v13 = vld [vmem:[%s5267_s6 + $0x3c] sm:$0xe] }
 0x183   : > { %v2365_v56 = vpop.f32.mrf.mxu0  ;;  %v3277_v8 = vrot.slane %v3275_v14, 4  ;;  %v3268_v21 = vor.u32 %v3267_v53, %v3264_v52 }
 0x184   : > { %v1699_v30 = vpop.f32.mrf.mxu3  ;;  %v1040_v50 = vpop.f32.mrf.mxu1 }
 0x185   : > { %v1752_v34 = vadd.f32 %v1699_v30, %v1453_v35  ;;  %v4763_v35 = vrot.slane %v4747_v46, 9  ;;  %v6059_v46 = vld [vmem:[%s5267_s6 + $0x44] sm:$0x1]  ;;  %v3278_v14 = vor.u32 %v3277_v8, %v6050_v39  ;;  %v3269_v25 = vrot.slane %v3268_v21, 4 }
 0x186   : > { %5049 = vmatmul.msk.bf16.gmra.mxu0 %vm703_vm3, %v4021_v24 }
 0x187   : > { %v1402_v38 = vpop.f32.mrf.mxu2  ;;  %4790 = vmatmul.msk.bf16.gmra.mxu1 %vm703_vm3, %v2647_v45  ;;  %v6048_v24 = vadd.f32 %v2365_v56, %v1752_v34  ;;  %v3891_v45 = vsel %vm5474_vm6, %v3889_v10, %v3890_v6  ;;  %v2520_v5 = vsel %vm5474_vm6, %v4763_v35, %v2519_v62  ;;  %v3612_v56 = vpack.c.b16 %v3583_v55, %v3582_v9  ;;  %v6067_v35 = vld [vmem:[%s5267_s6 + $0x4c] sm:$0xf] }
 0x188   : > { %v1454_v16 = vadd.f32 %v1402_v38, %v1038_v3  ;;  %v3993_v51 = vunpack.c.l.b16 %v3891_v45  ;;  %v1041_v62 = vadd.f32 %v1040_v50, %v5658_v20  ;;  %v2619_v3 = vunpack.c.l.b16 %v2520_v5  ;;  %v4940_v38 = vld [vmem:[%s5267_s6 + $0x48] sm:$0xf] }
 0x189   : > { %v2620_v10 = vunpack.c.l.b16 %v2523_v0  ;;  %v3281_v6 = vshll.u32 %v6059_v46, 16  ;;  %v3894_v20 = vrot.slane %v6027_v22, 5  ;;  %v3286_v53 = vshrl.u32 %v4940_v38, 16 }
 0x18a   : > { %v4022_v9 = vpack.c.b16 %v3993_v51, %v3992_v28  ;;  %v3289_v8 = vshll.u32 %v4940_v38, 16  ;;  %v3295_v45 = vshll.u32 %v6067_v35, 16  ;;  %v3299_v5 = vshrl.u32 %v6067_v35, 16  ;;  %v5177_v51 = vld [vmem:[%s5267_s6 + $0x44] sm:$0x1] }
 0x18b   : > { %v2367_v30 = vpop.f32.mrf.mxu0  ;;  %v3283_v55 = vrot.slane %v3281_v6, 5  ;;  %v2529_v21 = vrot.slane %v5177_v51, 5  ;;  %v3897_v22 = vrot.slane %v6059_v46, 5  ;;  %v3896_v6 = vrot.slane %v3894_v20, 4  ;;  %v6094_v51 = vld [vmem:[%s5267_s6 + $0x50] sm:$0x1] }
 0x18c   : > { %v1701_v1 = vpop.f32.mrf.mxu3  ;;  %4914 = vmatmul.msk.bf16.gmra.mxu2 %vm703_vm3, %v5113_v44  ;;  %v1042_v18 = vpop.f32.mrf.mxu1  ;;  %v2648_v44 = vpack.c.b16 %v2620_v10, %v2619_v3  ;;  %v3274_v3 = vsel %vm5279_vm2, %v3269_v25, %v6050_v39  ;;  %v3291_v38 = vrot.slane %v3289_v8, 5  ;;  %v6088_v46 = vrot.slane %v3295_v45, 5 }
 0x18d   : > { %v1753_v34 = vadd.f32 %v1701_v1, %v1454_v16  ;;  %v3279_v16 = vrot.slane %v3278_v14, 4  ;;  %v3584_v39 = vunpack.c.l.b16 %v3274_v3 }
 0x18f   : > { %v1405_v31 = vpop.f32.mrf.mxu2  ;;  %v6072_v50 = vadd.f32 %v2367_v30, %v1753_v34  ;;  %v4748_v30 = vld [vmem:[%s5267_s6 + $0x3c] sm:$0xe]  ;;  %v1043_v34 = vadd.f32 %v1042_v18, %v5679_v58  ;;  %v3284_v10 = vsel %vm5279_vm2, %v3279_v16, %v3283_v55 }
 0x190   : > { %v1455_v23 = vadd.f32 %v1405_v31, %v1041_v62  ;;  %v5023_v62 = vrot.slane %v5007_v13, 9  ;;  %v3301_v13 = vrot.slane %v3299_v5, 4  ;;  %v4764_v58 = vrot.slane %v4748_v30, 9 }
 0x191   : > { %4990 = vmatmul.msk.bf16.gmra.mxu3 %vm703_vm3, %v3612_v56  ;;  %v5176_v56 = vld [vmem:[%s5267_s6 + $0x40] sm:$0xf]  ;;  %v3585_v25 = vunpack.c.l.b16 %v3284_v10 }
 0x192   : > { %v2526_v28 = vrot.slane %v5176_v56, 5  ;;  %v3895_v55 = vsel %vm5474_vm6, %v5023_v62, %v3894_v20  ;;  %v3305_v20 = vshll.u32 %v6094_v51, 16 }
 0x193   : > { %v2370_v52 = vpop.f32.mrf.mxu0  ;;  %v3613_v30 = vpack.c.b16 %v3585_v25, %v3584_v39  ;;  %v5178_v25 = vld [vmem:[%s5267_s6 + $0x4c] sm:$0xf] }
 0x194   : > { %v1704_v0 = vpop.f32.mrf.mxu3  ;;  %v1045_v1 = vpop.f32.mrf.mxu1  ;;  %v2528_v18 = vrot.slane %v2526_v28, 4 }
 0x195   : > { %v1754_v14 = vadd.f32 %v1704_v0, %v1455_v23  ;;  %v3288_v23 = vrot.slane %v3286_v53, 4  ;;  %v5114_v0 = vld [vmem:[%s5267_s6 + $0x3c] sm:$0xff] }
 0x196   : > { %5050 = vmatmul.msk.bf16.gmra.mxu0 %vm703_vm3, %v4022_v9  ;;  %v2530_v5 = vsel %vm5474_vm6, %v2528_v18, %v2529_v21  ;;  %v6113_v18 = vld [vmem:[%s5267_s6 + $0x58] sm:$0xf] }
 0x197   : > { %v1407_v31 = vpop.f32.mrf.mxu2  ;;  %4791 = vmatmul.msk.bf16.gmra.mxu1 %vm703_vm3, %v2648_v44  ;;  %v6091_v56 = vadd.f32 %v2370_v52, %v1754_v14  ;;  %v3898_v44 = vsel %vm5474_vm6, %v3896_v6, %v3897_v22  ;;  %v3292_v53 = vor.u32 %v3291_v38, %v3288_v23  ;;  %v2527_v52 = vsel %vm5474_vm6, %v4764_v58, %v2526_v28 }
 0x198   : > { %v1456_v9 = vadd.f32 %v1407_v31, %v1043_v34  ;;  %v3302_v14 = vor.u32 %v3301_v13, %v6088_v46  ;;  %v1046_v22 = vadd.f32 %v1045_v1, %v5709_v48  ;;  %v3994_v34 = vunpack.c.l.b16 %v3895_v55  ;;  %v5008_v13 = vld [vmem:[%s5267_s6 + $0x48] sm:$0xe] }
 0x199   : > { %v3995_v3 = vunpack.c.l.b16 %v3898_v44  ;;  %v2621_v6 = vunpack.c.l.b16 %v2527_v52  ;;  %v2622_v28 = vunpack.c.l.b16 %v2530_v5  ;;  %v3293_v23 = vrot.slane %v3292_v53, 4 }
 0x19a   : > { %v3303_v21 = vrot.slane %v3302_v14, 4  ;;  %v3307_v38 = vrot.slane %v3305_v20, 5  ;;  %v3901_v58 = vrot.slane %v6067_v35, 5  ;;  %v2533_v55 = vrot.slane %v5178_v25, 5  ;;  %v4749_v35 = vld [vmem:[%s5267_s6 + $0x48] sm:$0xe] }
 0x19b   : > { %v2372_v16 = vpop.f32.mrf.mxu0  ;;  %v2649_v39 = vpack.c.b16 %v2622_v28, %v2621_v6  ;;  %v5024_v5 = vrot.slane %v5008_v13, 9 }
 0x19c   : > { %v1706_v8 = vpop.f32.mrf.mxu3  ;;  %4915 = vmatmul.msk.bf16.gmra.mxu2 %vm703_vm3, %v5114_v0  ;;  %v1047_v45 = vpop.f32.mrf.mxu1  ;;  %v4943_v0 = vld [vmem:[%s5267_s6 + $0x54] sm:$0xf]  ;;  %v3308_v52 = vsel %vm5279_vm2, %v3303_v21, %v3307_v38  ;;  %v5115_v38 = vld [vmem:[%s5267_s6 + $0x48] sm:$0xff] }
 0x19d   : > { %v1755_v62 = vadd.f32 %v1706_v8, %v1456_v9  ;;  %v4023_v9 = vpack.c.b16 %v3995_v3, %v3994_v34  ;;  %v3298_v8 = vsel %vm5279_vm2, %v3293_v23, %v6088_v46  ;;  %v3310_v14 = vshrl.u32 %v4943_v0, 16  ;;  %v5179_v3 = vld [vmem:[%s5267_s6 + $0x50] sm:$0x1] }
 0x19e   : > { %v3903_v34 = vrot.slane %v3901_v58, 4  ;;  %v3904_v46 = vrot.slane %v6094_v51, 5  ;;  %v3586_v28 = vunpack.c.l.b16 %v3298_v8  ;;  %v2535_v23 = vrot.slane %v2533_v55, 4 }
 0x19f   : > { %v1410_v10 = vpop.f32.mrf.mxu2  ;;  %v6115_v48 = vadd.f32 %v2372_v16, %v1755_v62  ;;  %v3313_v16 = vshll.u32 %v4943_v0, 16  ;;  %v3319_v62 = vshll.u32 %v6113_v18, 16  ;;  %v3587_v13 = vunpack.c.l.b16 %v3308_v52 }
 0x1a0   : > { %v1457_v31 = vadd.f32 %v1410_v10, %v1046_v22  ;;  %v1048_v22 = vadd.f32 %v1047_v45, %v5724_v11  ;;  %v2536_v10 = vrot.slane %v5179_v3, 5  ;;  %v3902_v0 = vsel %vm5474_vm6, %v5024_v5, %v3901_v58 }
 0x1a1   : > { %4991 = vmatmul.msk.bf16.gmra.mxu3 %vm703_vm3, %v3613_v30  ;;  %v3323_v30 = vshrl.u32 %v6113_v18, 16  ;;  %v3312_v11 = vrot.slane %v3310_v14, 4  ;;  %v3315_v45 = vrot.slane %v3313_v16, 5  ;;  %v6136_v51 = vrot.slane %v3319_v62, 5 }
 0x1a2   : > { %v2537_v52 = vsel %vm5474_vm6, %v2535_v23, %v2536_v10  ;;  %v3996_v5 = vunpack.c.l.b16 %v3902_v0  ;;  %v5009_v0 = vld [vmem:[%s5267_s6 + $0x54] sm:$0xe] }
 0x1a3   : > { %v2375_v1 = vpop.f32.mrf.mxu0  ;;  %v3325_v25 = vrot.slane %v3323_v30, 4  ;;  %v3316_v62 = vor.u32 %v3315_v45, %v3312_v11 }
 0x1a4   : > { %v1709_v44 = vpop.f32.mrf.mxu3  ;;  %v1050_v53 = vpop.f32.mrf.mxu1 }
 0x1a5   : > { %v1756_v20 = vadd.f32 %v1709_v44, %v1457_v31  ;;  %v4765_v31 = vrot.slane %v4749_v35, 9  ;;  %v6145_v35 = vld [vmem:[%s5267_s6 + $0x5c] sm:$0x1]  ;;  %v3326_v30 = vor.u32 %v3325_v25, %v6136_v51  ;;  %v3317_v23 = vrot.slane %v3316_v62, 4 }
 0x1a6   : > { %5051 = vmatmul.msk.bf16.gmra.mxu0 %vm703_vm3, %v4023_v9 }
 0x1a7   : > { %v1412_v6 = vpop.f32.mrf.mxu2  ;;  %4792 = vmatmul.msk.bf16.gmra.mxu1 %vm703_vm3, %v2649_v39  ;;  %v6134_v9 = vadd.f32 %v2375_v1, %v1756_v20  ;;  %v3905_v39 = vsel %vm5474_vm6, %v3903_v34, %v3904_v46  ;;  %v2534_v8 = vsel %vm5474_vm6, %v4765_v31, %v2533_v55  ;;  %v3614_v1 = vpack.c.b16 %v3587_v13, %v3586_v28  ;;  %v6153_v31 = vld [vmem:[%s5267_s6 + $0x64] sm:$0xf] }
 0x1a8   : > { %v1458_v21 = vadd.f32 %v1412_v6, %v1048_v22  ;;  %v3997_v16 = vunpack.c.l.b16 %v3905_v39  ;;  %v1051_v55 = vadd.f32 %v1050_v53, %v5588_v47  ;;  %v2623_v22 = vunpack.c.l.b16 %v2534_v8  ;;  %v4946_v6 = vld [vmem:[%s5267_s6 + $0x60] sm:$0xf] }
 0x1a9   : > { %v2624_v34 = vunpack.c.l.b16 %v2537_v52  ;;  %v3329_v46 = vshll.u32 %v6145_v35, 16  ;;  %v3908_v47 = vrot.slane %v6113_v18, 5  ;;  %v3334_v45 = vshrl.u32 %v4946_v6, 16 }
 0x1aa   : > { %v4024_v28 = vpack.c.b16 %v3997_v16, %v3996_v5  ;;  %v3337_v25 = vshll.u32 %v4946_v6, 16  ;;  %v3343_v39 = vshll.u32 %v6153_v31, 16  ;;  %v3347_v8 = vshrl.u32 %v6153_v31, 16  ;;  %v5181_v16 = vld [vmem:[%s5267_s6 + $0x5c] sm:$0x1] }
 0x1ab   : > { %v2377_v44 = vpop.f32.mrf.mxu0  ;;  %v3331_v13 = vrot.slane %v3329_v46, 5  ;;  %v2543_v62 = vrot.slane %v5181_v16, 5  ;;  %v3911_v18 = vrot.slane %v6145_v35, 5  ;;  %v3910_v46 = vrot.slane %v3908_v47, 4 }
 0x1ac   : > { %v1711_v58 = vpop.f32.mrf.mxu3  ;;  %4916 = vmatmul.msk.bf16.gmra.mxu2 %vm703_vm3, %v5115_v38  ;;  %v1052_v14 = vpop.f32.mrf.mxu1  ;;  %v2650_v38 = vpack.c.b16 %v2624_v34, %v2623_v22  ;;  %v3322_v22 = vsel %vm5279_vm2, %v3317_v23, %v6136_v51  ;;  %v3339_v6 = vrot.slane %v3337_v25, 5  ;;  %v3345_v35 = vrot.slane %v3343_v39, 5  ;;  %v6178_v23 = vld [vmem:[%s5267_s6 + $0x68] sm:$0x1] }
 0x1ad   : > { %v1757_v20 = vadd.f32 %v1711_v58, %v1458_v21  ;;  %v3327_v21 = vrot.slane %v3326_v30, 4  ;;  %v3588_v16 = vunpack.c.l.b16 %v3322_v22 }
 0x1af   : > { %v1415_v3 = vpop.f32.mrf.mxu2  ;;  %v6158_v53 = vadd.f32 %v2377_v44, %v1757_v20  ;;  %v4750_v44 = vld [vmem:[%s5267_s6 + $0x54] sm:$0xe]  ;;  %v1053_v20 = vadd.f32 %v1052_v14, %v5607_v2  ;;  %v3332_v34 = vsel %vm5279_vm2, %v3327_v21, %v3331_v13 }
 0x1b0   : > { %v1459_v10 = vadd.f32 %v1415_v3, %v1051_v55  ;;  %v5025_v55 = vrot.slane %v5009_v0, 9  ;;  %v3349_v0 = vrot.slane %v3347_v8, 4  ;;  %v3589_v51 = vunpack.c.l.b16 %v3332_v34 }
 0x1b1   : > { %4992 = vmatmul.msk.bf16.gmra.mxu3 %vm703_vm3, %v3614_v1  ;;  %6741 = vst [vmem:[#allocation4_spill] sm:$0xff] %v6158_v53  ;;  %v5180_v1 = vld [vmem:[%s5267_s6 + $0x58] sm:$0xf] }
 0x1b2   : > { %v2540_v5 = vrot.slane %v5180_v1, 5  ;;  %v4766_v1 = vrot.slane %v4750_v44, 9  ;;  %v3909_v21 = vsel %vm5474_vm6, %v5025_v55, %v3908_v47  ;;  %v3350_v8 = vor.u32 %v3349_v0, %v3345_v35 }
 0x1b3   : > { %v2380_v11 = vpop.f32.mrf.mxu0  ;;  %v3615_v55 = vpack.c.b16 %v3589_v51, %v3588_v16  ;;  %v3998_v44 = vunpack.c.l.b16 %v3909_v21 }
 0x1b4   : > { %v1714_v52 = vpop.f32.mrf.mxu3  ;;  %v1055_v58 = vpop.f32.mrf.mxu1  ;;  %v2542_v2 = vrot.slane %v2540_v5, 4 }
 0x1b5   : > { %v1758_v30 = vadd.f32 %v1714_v52, %v1459_v10  ;;  %v3336_v10 = vrot.slane %v3334_v45, 4 }
 0x1b6   : > { %5052 = vmatmul.msk.bf16.gmra.mxu0 %vm703_vm3, %v4024_v28  ;;  %v5116_v28 = vld [vmem:[%s5267_s6 + $0x54] sm:$0xff]  ;;  %v2544_v39 = vsel %vm5474_vm6, %v2542_v2, %v2543_v62  ;;  %v3915_v2 = vrot.slane %v6153_v31, 5  ;;  %v5183_v31 = vld [vmem:[%s5267_s6 + $0x68] sm:$0x1] }
 0x1b7   : > { %v1417_v3 = vpop.f32.mrf.mxu2  ;;  %4793 = vmatmul.msk.bf16.gmra.mxu1 %vm703_vm3, %v2650_v38  ;;  %v6175_v14 = vadd.f32 %v2380_v11, %v1758_v30  ;;  %v3912_v38 = vsel %vm5474_vm6, %v3910_v46, %v3911_v18  ;;  %v3340_v13 = vor.u32 %v3339_v6, %v3336_v10  ;;  %v2541_v11 = vsel %vm5474_vm6, %v4766_v1, %v2540_v5  ;;  %v4949_v6 = vld [vmem:[%s5267_s6 + $0x6c] sm:$0xf]  ;;  %v5010_v1 = vld [vmem:[%s5267_s6 + $0x60] sm:$0xe] }
 0x1b8   : > { %v1460_v52 = vadd.f32 %v1417_v3, %v1053_v20  ;;  %v3353_v30 = vshll.u32 %v6178_v23, 16  ;;  %v1056_v18 = vadd.f32 %v1055_v58, %v5628_v37  ;;  %v3999_v20 = vunpack.c.l.b16 %v3912_v38 }
 0x1b9   : > { %v2625_v34 = vunpack.c.l.b16 %v2541_v11  ;;  %v2626_v46 = vunpack.c.l.b16 %v2544_v39  ;;  %v3341_v5 = vrot.slane %v3340_v13, 4  ;;  %v3351_v10 = vrot.slane %v3350_v8, 4  ;;  %v5182_v13 = vld [vmem:[%s5267_s6 + $0x64] sm:$0xf] }
 0x1ba   : > { %v3355_v62 = vrot.slane %v3353_v30, 5  ;;  %v4025_v0 = vpack.c.b16 %v3999_v20, %v3998_v44  ;;  %v3358_v11 = vshrl.u32 %v4949_v6, 16  ;;  %v3361_v8 = vshll.u32 %v4949_v6, 16 }
 0x1bb   : > { %v2382_v53 = vpop.f32.mrf.mxu0  ;;  %v2651_v58 = vpack.c.b16 %v2626_v46, %v2625_v34  ;;  %v3346_v21 = vsel %vm5279_vm2, %v3341_v5, %v3345_v35  ;;  %v3917_v34 = vrot.slane %v3915_v2, 4  ;;  %v3918_v46 = vrot.slane %v6178_v23, 5  ;;  %v5117_v5 = vld [vmem:[%s5267_s6 + $0x60] sm:$0xff] }
 0x1bc   : > { %v1716_v45 = vpop.f32.mrf.mxu3  ;;  %4917 = vmatmul.msk.bf16.gmra.mxu2 %vm703_vm3, %v5116_v28  ;;  %v1057_v25 = vpop.f32.mrf.mxu1  ;;  %v3356_v38 = vsel %vm5279_vm2, %v3351_v10, %v3355_v62  ;;  %v3590_v20 = vunpack.c.l.b16 %v3346_v21 }
 0x1bd   : > { %v1759_v47 = vadd.f32 %v1716_v45, %v1460_v52  ;;  %v6194_v52 = vld [vmem:[%s5267_s6 + $0x70] sm:$0xf]  ;;  %v2547_v45 = vrot.slane %v5182_v13, 5  ;;  %v1058_v35 = vadd.f32 %v1057_v25, %v5647_v4  ;;  %v6219_v25 = vld [vmem:[%s5267_s6 + $0x74] sm:$0x1]  ;;  %v3919_v23 = vsel %vm5474_vm6, %v3917_v34, %v3918_v46 }
 0x1be   : > { %v3367_v30 = vshll.u32 %v6194_v52, 16 }
 0x1bf   : > { %v1420_v22 = vpop.f32.mrf.mxu2  ;;  %v6196_v28 = vadd.f32 %v2382_v53, %v1759_v47  ;;  %v4751_v53 = vld [vmem:[%s5267_s6 + $0x60] sm:$0xe]  ;;  %v3371_v47 = vshrl.u32 %v6194_v52, 16  ;;  %v2549_v62 = vrot.slane %v2547_v45, 4 }
 0x1c0   : > { %v1461_v3 = vadd.f32 %v1420_v22, %v1056_v18  ;;  %v5026_v18 = vrot.slane %v5010_v1, 9  ;;  %v3591_v22 = vunpack.c.l.b16 %v3356_v38  ;;  %v4767_v10 = vrot.slane %v4751_v53, 9 }
 0x1c1   : > { %4993 = vmatmul.msk.bf16.gmra.mxu3 %vm703_vm3, %v3615_v55  ;;  %v2550_v55 = vrot.slane %v5183_v31, 5  ;;  %v6216_v13 = vrot.slane %v3367_v30, 5  ;;  %v3373_v4 = vrot.slane %v3371_v47, 4  ;;  %v3377_v30 = vshll.u32 %v6219_v25, 16 }
 0x1c3   : > { %v2385_v37 = vpop.f32.mrf.mxu0  ;;  %v3379_v46 = vrot.slane %v3377_v30, 5 }
 0x1c4   : > { %v1719_v16 = vpop.f32.mrf.mxu3  ;;  %v1060_v51 = vpop.f32.mrf.mxu1 }
 0x1c5   : > { %v1760_v39 = vadd.f32 %v1719_v16, %v1461_v3  ;;  %v3360_v16 = vrot.slane %v3358_v11, 4  ;;  %v2548_v11 = vsel %vm5474_vm6, %v4767_v10, %v2547_v45  ;;  %v1061_v47 = vadd.f32 %v1060_v51, %v5666_v42  ;;  %v4952_v45 = vld [vmem:[%s5267_s6 + $0x78] sm:$0xf] }
 0x1c6   : > { %5053 = vmatmul.msk.bf16.gmra.mxu0 %vm703_vm3, %v4025_v0  ;;  %v3363_v0 = vrot.slane %v3361_v8, 5  ;;  %v3922_v10 = vrot.slane %v6194_v52, 5 }
 0x1c7   : > { %v1422_v44 = vpop.f32.mrf.mxu2  ;;  %4794 = vmatmul.msk.bf16.gmra.mxu1 %vm703_vm3, %v2651_v58  ;;  %v6214_v6 = vadd.f32 %v2385_v37, %v1760_v39  ;;  %v3916_v58 = vsel %vm5474_vm6, %v5026_v18, %v3915_v2  ;;  %v3616_v37 = vpack.c.b16 %v3591_v22, %v3590_v20  ;;  %v2551_v39 = vsel %vm5474_vm6, %v2549_v62, %v2550_v55 }
 0x1c8   : > { %v1462_v3 = vadd.f32 %v1422_v44, %v1058_v35  ;;  %v3364_v8 = vor.u32 %v3363_v0, %v3360_v16  ;;  %v3374_v2 = vor.u32 %v3373_v4, %v6216_v13  ;;  %v4000_v31 = vunpack.c.l.b16 %v3916_v58  ;;  %v6240_v16 = vld [vmem:[%s5267_s6 + $0x7c] sm:$0xf] }
 0x1c9   : > { %v4001_v35 = vunpack.c.l.b16 %v3919_v23  ;;  %v2627_v44 = vunpack.c.l.b16 %v2548_v11  ;;  %v2628_v20 = vunpack.c.l.b16 %v2551_v39  ;;  %v3382_v0 = vshrl.u32 %v4952_v45, 16  ;;  %v5184_v11 = vld [vmem:[%s5267_s6 + $0x70] sm:$0xf] }
 0x1ca   : > { %v3365_v55 = vrot.slane %v3364_v8, 4  ;;  %v3375_v34 = vrot.slane %v3374_v2, 4  ;;  %v3385_v4 = vshll.u32 %v4952_v45, 16  ;;  %v2554_v39 = vrot.slane %v5184_v11, 5 }
 0x1cb   : > { %v2387_v1 = vpop.f32.mrf.mxu0  ;;  %v2652_v62 = vpack.c.b16 %v2628_v20, %v2627_v44  ;;  %v3924_v30 = vrot.slane %v3922_v10, 4 }
 0x1cc   : > { %v1721_v21 = vpop.f32.mrf.mxu3  ;;  %4918 = vmatmul.msk.bf16.gmra.mxu2 %vm703_vm3, %v5117_v5  ;;  %v1062_v38 = vpop.f32.mrf.mxu1  ;;  %v4026_v5 = vpack.c.b16 %v4001_v35, %v4000_v31  ;;  %v3370_v52 = vsel %vm5279_vm2, %v3365_v55, %v6216_v13  ;;  %v3395_v31 = vshrl.u32 %v6240_v16, 16  ;;  %v3384_v13 = vrot.slane %v3382_v0, 4  ;;  %v6264_v0 = vld [vmem:[%s5267_s6 + $0x80] sm:$0x1] }
 0x1cd   : > { %v1761_v53 = vadd.f32 %v1721_v21, %v1462_v3  ;;  %v5011_v3 = vld [vmem:[%s5267_s6 + $0x6c] sm:$0xe]  ;;  %v1063_v2 = vadd.f32 %v1062_v38, %v5698_v12  ;;  %v3387_v44 = vrot.slane %v3385_v4, 5  ;;  %v2556_v45 = vrot.slane %v2554_v39, 4 }
 0x1ce   : > { %v5027_v21 = vrot.slane %v5011_v3, 9  ;;  %v3592_v12 = vunpack.c.l.b16 %v3370_v52 }
 0x1cf   : > { %v1425_v18 = vpop.f32.mrf.mxu2  ;;  %v6237_v42 = vadd.f32 %v2387_v1, %v1761_v53  ;;  %v3380_v1 = vsel %vm5279_vm2, %v3375_v34, %v3379_v46  ;;  %v3925_v53 = vrot.slane %v6219_v25, 5  ;;  %v5185_v25 = vld [vmem:[%s5267_s6 + $0x74] sm:$0x1]  ;;  %v3388_v4 = vor.u32 %v3387_v44, %v3384_v13  ;;  %v5012_v44 = vld [vmem:[%s5267_s6 + $0x78] sm:$0xe] }
 0x1d0   : > { %v1463_v22 = vadd.f32 %v1425_v18, %v1061_v47  ;;  %v3391_v47 = vshll.u32 %v6240_v16, 16  ;;  %v2557_v55 = vrot.slane %v5185_v25, 5  ;;  %v3593_v38 = vunpack.c.l.b16 %v3380_v1  ;;  %v6278_v25 = vld [vmem:[%s5267_s6 + $0x88] sm:$0xf] }
 0x1d1   : > { %4994 = vmatmul.msk.bf16.gmra.mxu3 %vm703_vm3, %v3616_v37  ;;  %v4752_v37 = vld [vmem:[%s5267_s6 + $0x6c] sm:$0xe]  ;;  %v3923_v46 = vsel %vm5474_vm6, %v5027_v21, %v3922_v10  ;;  %v3926_v3 = vsel %vm5474_vm6, %v3924_v30, %v3925_v53  ;;  %v3401_v30 = vshll.u32 %v6264_v0, 16  ;;  %v3389_v13 = vrot.slane %v3388_v4, 4 }
 0x1d2   : > { %v4768_v18 = vrot.slane %v4752_v37, 9  ;;  %v2558_v10 = vsel %vm5474_vm6, %v2556_v45, %v2557_v55  ;;  %v4002_v52 = vunpack.c.l.b16 %v3923_v46  ;;  %v4003_v1 = vunpack.c.l.b16 %v3926_v3 }
 0x1d3   : > { %v2390_v51 = vpop.f32.mrf.mxu0 }
 0x1d4   : > { %v1724_v58 = vpop.f32.mrf.mxu3  ;;  %v1065_v23 = vpop.f32.mrf.mxu1  ;;  %v2555_v11 = vsel %vm5474_vm6, %v4768_v18, %v2554_v39  ;;  %v4955_v39 = vld [vmem:[%s5267_s6 + $0x84] sm:$0xf]  ;;  %v4027_v18 = vpack.c.b16 %v4003_v1, %v4002_v52 }
 0x1d5   : > { %v1762_v8 = vadd.f32 %v1724_v58, %v1463_v22  ;;  %v5118_v22 = vld [vmem:[%s5267_s6 + $0x6c] sm:$0xff]  ;;  %v1066_v53 = vadd.f32 %v1065_v23, %v5720_v63  ;;  %v3403_v63 = vrot.slane %v3401_v30, 5  ;;  %v5028_v23 = vrot.slane %v5012_v44, 9  ;;  %v5119_v44 = vld [vmem:[%s5267_s6 + $0x78] sm:$0xff] }
 0x1d6   : > { %5054 = vmatmul.msk.bf16.gmra.mxu0 %vm703_vm3, %v4026_v5  ;;  %v3393_v5 = vrot.slane %v3391_v47, 5  ;;  %v3406_v3 = vshrl.u32 %v4955_v39, 16 }
 0x1d7   : > { %v1427_v35 = vpop.f32.mrf.mxu2  ;;  %4795 = vmatmul.msk.bf16.gmra.mxu1 %vm703_vm3, %v2652_v62  ;;  %v6257_v34 = vadd.f32 %v2390_v51, %v1762_v8  ;;  %v3397_v62 = vrot.slane %v3395_v31, 4  ;;  %v3617_v8 = vpack.c.b16 %v3593_v38, %v3592_v12  ;;  %v2629_v31 = vunpack.c.l.b16 %v2555_v11 }
 0x1d8   : > { %v1464_v20 = vadd.f32 %v1427_v35, %v1063_v2  ;;  %v2630_v35 = vunpack.c.l.b16 %v2558_v10  ;;  %v3394_v46 = vsel %vm5279_vm2, %v3389_v13, %v3393_v5  ;;  %v3932_v11 = vrot.slane %v6264_v0, 5  ;;  %v4753_v10 = vld [vmem:[%s5267_s6 + $0x78] sm:$0xe] }
 0x1d9   : > { %v3398_v2 = vor.u32 %v3397_v62, %v3393_v5  ;;  %v3409_v62 = vshll.u32 %v4955_v39, 16  ;;  %v5187_v39 = vld [vmem:[%s5267_s6 + $0x80] sm:$0x1] }
 0x1da   : > { %v2653_v38 = vpack.c.b16 %v2630_v35, %v2629_v31  ;;  %v3408_v31 = vrot.slane %v3406_v3, 4 }
 0x1db   : > { %v2392_v58 = vpop.f32.mrf.mxu0  ;;  %v3399_v45 = vrot.slane %v3398_v2, 4  ;;  %v3594_v2 = vunpack.c.l.b16 %v3394_v46  ;;  %v3411_v35 = vrot.slane %v3409_v62, 5  ;;  %v4957_v46 = vld [vmem:[%s5267_s6 + $0x8c] sm:$0x1] }
 0x1dc   : > { %v1726_v37 = vpop.f32.mrf.mxu3  ;;  %4919 = vmatmul.msk.bf16.gmra.mxu2 %vm703_vm3, %v5118_v22  ;;  %v1067_v51 = vpop.f32.mrf.mxu1 }
 0x1dd   : > { %v1763_v21 = vadd.f32 %v1726_v37, %v1464_v20  ;;  %v3929_v20 = vrot.slane %v6240_v16, 5  ;;  %v5186_v16 = vld [vmem:[%s5267_s6 + $0x7c] sm:$0xf]  ;;  %v1068_v5 = vadd.f32 %v1067_v51, %v5737_v40 }
 0x1df   : > { %v1430_v47 = vpop.f32.mrf.mxu2  ;;  %v6280_v55 = vadd.f32 %v2392_v58, %v1763_v21  ;;  %v3931_v1 = vrot.slane %v3929_v20, 4  ;;  %v3415_v58 = vshll.u32 %v6278_v25, 16  ;;  %v3419_v21 = vshrl.u32 %v6278_v25, 16 }
 0x1e0   : > { %v1465_v22 = vadd.f32 %v1430_v47, %v1066_v53  ;;  %v3404_v53 = vsel %vm5279_vm2, %v3399_v45, %v3403_v63  ;;  %v3930_v30 = vsel %vm5474_vm6, %v5028_v23, %v3929_v20  ;;  %v4769_v47 = vrot.slane %v4753_v10, 9 }
 0x1e1   : > { %4995 = vmatmul.msk.bf16.gmra.mxu3 %vm703_vm3, %v3617_v8  ;;  %v2561_v8 = vrot.slane %v5186_v16, 5  ;;  %v3595_v51 = vunpack.c.l.b16 %v3404_v53  ;;  %v3933_v45 = vsel %vm5474_vm6, %v3931_v1, %v3932_v11  ;;  %v6302_v63 = vrot.slane %v3415_v58, 5 }
 0x1e2   : > { %v4004_v23 = vunpack.c.l.b16 %v3930_v30  ;;  %v4005_v62 = vunpack.c.l.b16 %v3933_v45  ;;  %v3412_v10 = vor.u32 %v3411_v35, %v3408_v31  ;;  %v3425_v58 = vshll.u32 %v4957_v46, 16  ;;  %v6316_v45 = vld [vmem:[%s5267_s6 + $0x94] sm:$0xf] }
 0x1e3   : > { %v2395_v12 = vpop.f32.mrf.mxu0 }
 0x1e4   : > { %v1729_v4 = vpop.f32.mrf.mxu3  ;;  %v2730_v37 = vpop.f32.mrf.mxu1  ;;  %v3427_v35 = vrot.slane %v3425_v58, 5 }
 0x1e5   : > { %v1764_v52 = vadd.f32 %v1729_v4, %v1465_v22  ;;  %v2563_v22 = vrot.slane %v2561_v8, 4  ;;  %v2810_v53 = vadd.f32 %v2730_v37, %v5754_v49 }
 0x1e6   : > { %5055 = vmatmul.msk.bf16.gmra.mxu0 %vm703_vm3, %v4027_v18  ;;  %v2564_v18 = vrot.slane %v5187_v39, 5  ;;  %v4958_v39 = vld [vmem:[%s5267_s6 + $0x90] sm:$0xf] }
 0x1e7   : > { %v1432_v0 = vpop.f32.mrf.mxu2  ;;  %4796 = vmatmul.msk.bf16.gmra.mxu1 %vm703_vm3, %v2653_v38  ;;  %v6298_v40 = vadd.f32 %v2395_v12, %v1764_v52  ;;  %v3421_v38 = vrot.slane %v3419_v21, 4  ;;  %v2562_v12 = vsel %vm5474_vm6, %v4769_v47, %v2561_v8  ;;  %v3618_v52 = vpack.c.b16 %v3595_v51, %v3594_v2  ;;  %v5013_v21 = vld [vmem:[%s5267_s6 + $0x84] sm:$0xe] }
 0x1e8   : > { %v1466_v13 = vadd.f32 %v1432_v0, %v1068_v5  ;;  %v2565_v11 = vsel %vm5474_vm6, %v2563_v22, %v2564_v18  ;;  %v3936_v5 = vrot.slane %v6278_v25, 5  ;;  %v2631_v30 = vunpack.c.l.b16 %v2562_v12  ;;  %v5188_v12 = vld [vmem:[%s5267_s6 + $0x88] sm:$0xf] }
 0x1e9   : > { %v3422_v1 = vor.u32 %v3421_v38, %v6302_v63  ;;  %v4028_v8 = vpack.c.b16 %v4005_v62, %v4004_v23  ;;  %v3413_v47 = vrot.slane %v3412_v10, 4  ;;  %v3939_v25 = vrot.slane %v4957_v46, 5  ;;  %v6327_v46 = vld [vmem:[%s6732_s2] ss:$0 sm:$0xff] }
 0x1ea   : > { %v3938_v22 = vrot.slane %v3936_v5, 4  ;;  %v3430_v18 = vshrl.u32 %v4958_v39, 16  ;;  %v3433_v38 = vshll.u32 %v4958_v39, 16  ;;  %v3439_v23 = vshll.u32 %v6316_v45, 16 }
 0x1eb   : > { %v2397_v20 = vpop.f32.mrf.mxu0  ;;  %v3423_v31 = vrot.slane %v3422_v1, 4  ;;  %v3443_v10 = vshrl.u32 %v6316_v45, 16 }
 0x1ec   : > { %v1731_v3 = vpop.f32.mrf.mxu3  ;;  %4920 = vmatmul.msk.bf16.gmra.mxu2 %vm703_vm3, %v5119_v44  ;;  %v2732_v4 = vpop.f32.mrf.mxu1  ;;  %v2632_v44 = vunpack.c.l.b16 %v2565_v11  ;;  %v2568_v11 = vrot.slane %v5188_v12, 5  ;;  %v3435_v39 = vrot.slane %v3433_v38, 5 }
 0x1ed   : > { %v1765_v16 = vadd.f32 %v1731_v3, %v1466_v13  ;;  %v5029_v13 = vrot.slane %v5013_v21, 9  ;;  %v3428_v1 = vsel %vm5279_vm2, %v3423_v31, %v3427_v35  ;;  %v3940_v21 = vsel %vm5474_vm6, %v3938_v22, %v3939_v25  ;;  %v5189_v31 = vld [vmem:[%s5267_s6 + $0x8c] sm:$0x1] }
 0x1ee   : > { %v2654_v51 = vpack.c.b16 %v2632_v44, %v2631_v30  ;;  %v2811_v30 = vadd.f32 %v2732_v4, %v5767_v43  ;;  %v2571_v35 = vrot.slane %v5189_v31, 5  ;;  %v6359_v43 = vld [vmem:[%s5267_s6 + $0x98] sm:$0x1] }
 0x1ef   : > { %v3029_v0 = vpop.f32.mrf.mxu2  ;;  %v6319_v49 = vadd.f32 %v2397_v20, %v1765_v16  ;;  %v3418_v20 = vsel %vm5279_vm2, %v3413_v47, %v6302_v63  ;;  %v4754_v16 = vld [vmem:[%s5267_s6 + $0x84] sm:$0xe]  ;;  %v3937_v58 = vsel %vm5474_vm6, %v5029_v13, %v3936_v5  ;;  %v6344_v63 = vld [vmem:[%s6733_s3] ss:$0 sm:$0xff]  ;;  %v3445_v13 = vrot.slane %v3443_v10, 4 }
 0x1f0   : > { %v3109_v2 = vadd.f32 %v3029_v0, %v2810_v53  ;;  %v3432_v53 = vrot.slane %v3430_v18, 4  ;;  %v5120_v5 = vld [vmem:[%s5267_s6 + $0x84] sm:$0xff]  ;;  %v4770_v47 = vrot.slane %v4754_v16, 9  ;;  %v3596_v18 = vunpack.c.l.b16 %v3418_v20 }
 0x1f1   : > { %4996 = vmatmul.msk.bf16.gmra.mxu3 %vm703_vm3, %v3618_v52  ;;  %v4006_v38 = vunpack.c.l.b16 %v3937_v58 }
 0x1f2   : > { %v2569_v10 = vsel %vm5474_vm6, %v4770_v47, %v2568_v11  ;;  %v3436_v20 = vor.u32 %v3435_v39, %v3432_v53  ;;  %v6374_v47 = vld [vmem:[%s5267_s6 + $0xa0] sm:$0xf] }
 0x1f3   : > { %v4105_v37 = vpop.f32.mrf.mxu0 }
 0x1f4   : > { %v3695_v3 = vpop.f32.mrf.mxu3  ;;  %v2735_v62 = vpop.f32.mrf.mxu1  ;;  %v3437_v53 = vrot.slane %v3436_v20, 4  ;;  %v3946_v20 = vrot.slane %v6359_v43, 5 }
 0x1f5   : > { %v3775_v52 = vadd.f32 %v3695_v3, %v3109_v2  ;;  %v2570_v2 = vrot.slane %v2568_v11, 4  ;;  %v4961_v11 = vld [vmem:[%s5267_s6 + $0x9c] sm:$0xf] }
 0x1f6   : > { %5056 = vmatmul.msk.bf16.gmra.mxu0 %vm703_vm3, %v4028_v8  ;;  %v6348_v8 = vrot.slane %v3439_v23, 5  ;;  %v4007_v23 = vunpack.c.l.b16 %v3940_v21  ;;  %v3449_v21 = vshll.u32 %v6359_v43, 16 }
 0x1f7   : > { %v4185_v0 = vadd.f32 %v4105_v37, %v3775_v52  ;;  %v3031_v44 = vpop.f32.mrf.mxu2  ;;  %4797 = vmatmul.msk.bf16.gmra.mxu1 %vm703_vm3, %v2654_v51  ;;  %v3597_v37 = vunpack.c.l.b16 %v3428_v1  ;;  %v2572_v52 = vsel %vm5474_vm6, %v2570_v2, %v2571_v35 }
 0x1f8   : > { %v3110_v25 = vadd.f32 %v3031_v44, %v2811_v30  ;;  %v3446_v16 = vor.u32 %v3445_v13, %v6348_v8  ;;  %v2812_v30 = vadd.f32 %v2735_v62, %v5780_v19  ;;  %v2634_v31 = vunpack.c.l.b16 %v2572_v52 }
 0x1f9   : > { %v4221_v22 = vmul.f32 %v6327_v46, %v4185_v0  ;;  %v3619_v58 = vpack.c.b16 %v3597_v37, %v3596_v18  ;;  %v4029_v2 = vpack.c.b16 %v4007_v23, %v4006_v38  ;;  %v3943_v19 = vrot.slane %v6316_v45, 5 }
 0x1fa   : > { %v3447_v39 = vrot.slane %v3446_v16, 4  ;;  %v3454_v62 = vshrl.u32 %v4961_v11, 16  ;;  %v3457_v18 = vshll.u32 %v4961_v11, 16  ;;  %v3463_v37 = vshll.u32 %v6374_v47, 16  ;;  %v5190_v16 = vld [vmem:[%s5267_s6 + $0x94] sm:$0xf] }
 0x1fb   : > { %v4257_v4 = vadd.f32 %v6344_v63, %v4221_v22  ;;  %v4107_v51 = vpop.f32.mrf.mxu0  ;;  %v3451_v22 = vrot.slane %v3449_v21, 5 }
 0x1fc   : > { %v3697_v3 = vpop.f32.mrf.mxu3  ;;  %4921 = vmatmul.msk.bf16.gmra.mxu2 %vm703_vm3, %v5120_v5  ;;  %v2737_v12 = vpop.f32.mrf.mxu1  ;;  %v2633_v5 = vunpack.c.l.b16 %v2569_v10  ;;  %v3456_v43 = vrot.slane %v3454_v62, 4 }
 0x1fd   : > { %4289 = vst.msk [vmem:[%s6356_s14] sm:$0xff] %vm703_vm3, %v4257_v4  ;;  %v3776_v1 = vadd.f32 %v3697_v3, %v3110_v25  ;;  %v5014_v25 = vld [vmem:[%s5267_s6 + $0x90] sm:$0xe]  ;;  %v3467_v4 = vshrl.u32 %v6374_v47, 16  ;;  %v3452_v21 = vsel %vm5279_vm2, %v3447_v39, %v3451_v22 }
 0x1fe   : > { %v2655_v23 = vpack.c.b16 %v2634_v31, %v2633_v5  ;;  %v5030_v52 = vrot.slane %v5014_v25, 9  ;;  %v6394_v5 = vrot.slane %v3463_v37, 5 }
 0x1ff   : > { %v4186_v0 = vadd.f32 %v4107_v51, %v3776_v1  ;;  %v3034_v44 = vpop.f32.mrf.mxu2  ;;  %v2575_v1 = vrot.slane %v5190_v16, 5  ;;  %v3469_v31 = vrot.slane %v3467_v4, 4 }
 0x200   : > { %v3111_v13 = vadd.f32 %v3034_v44, %v2812_v30  ;;  %v4755_v30 = vld [vmem:[%s5267_s6 + $0x90] sm:$0xe]  ;;  %v3459_v44 = vrot.slane %v3457_v18, 5  ;;  %v3599_v18 = vunpack.c.l.b16 %v3452_v21  ;;  %v3944_v37 = vsel %vm5474_vm6, %v5030_v52, %v3943_v19 }
 0x201   : > { %v4222_v35 = vmul.f32 %v6327_v46, %v4186_v0  ;;  %4997 = vmatmul.msk.bf16.gmra.mxu3 %vm703_vm3, %v3619_v58  ;;  %v3442_v58 = vsel %vm5279_vm2, %v3437_v53, %v6348_v8  ;;  %v3945_v0 = vrot.slane %v3943_v19, 4  ;;  %v6399_v8 = vld [vmem:[%s5267_s6 + $0xa4] sm:$0x1]  ;;  %v5121_v53 = vld [vmem:[%s5267_s6 + $0x90] sm:$0xff]  ;;  %v4771_v22 = vrot.slane %v4755_v30, 9 }
 0x202   : > { %v3598_v39 = vunpack.c.l.b16 %v3442_v58  ;;  %v2577_v25 = vrot.slane %v2575_v1, 4  ;;  %v3470_v4 = vor.u32 %v3469_v31, %v6394_v5 }
 0x203   : > { %v4258_v51 = vadd.f32 %v6344_v63, %v4222_v35  ;;  %v4110_v38 = vpop.f32.mrf.mxu0  ;;  %v2813_v35 = vadd.f32 %v2737_v12, %v5793_v15  ;;  %v3947_v15 = vsel %vm5474_vm6, %v3945_v0, %v3946_v20  ;;  %v3460_v12 = vor.u32 %v3459_v44, %v3456_v43 }
 0x204   : > { %v3700_v3 = vpop.f32.mrf.mxu3  ;;  %v2740_v10 = vpop.f32.mrf.mxu1  ;;  %v2576_v21 = vsel %vm5474_vm6, %v4771_v22, %v2575_v1  ;;  %v3620_v20 = vpack.c.b16 %v3599_v18, %v3598_v39  ;;  %v4008_v0 = vunpack.c.l.b16 %v3944_v37  ;;  %v4009_v30 = vunpack.c.l.b16 %v3947_v15  ;;  %v6430_v18 = vld [vmem:[%s5267_s6 + $0xac] sm:$0xf] }
 0x205   : > { %4290 = vst.msk [vmem:[%s6356_s14 + $0x8] sm:$0xff] %vm703_vm3, %v4258_v51  ;;  %v3777_v45 = vadd.f32 %v3700_v3, %v3111_v13  ;;  %v5191_v51 = vld [vmem:[%s5267_s6 + $0x98] sm:$0x1]  ;;  %v3461_v43 = vrot.slane %v3460_v12, 4  ;;  %v3471_v44 = vrot.slane %v3470_v4, 4  ;;  %v2814_v1 = vadd.f32 %v2740_v10, %v5806_v60 }
 0x206   : > { %5057 = vmatmul.msk.bf16.gmra.mxu0 %vm703_vm3, %v4029_v2  ;;  %v2578_v3 = vrot.slane %v5191_v51, 5  ;;  %v4964_v51 = vld [vmem:[%s5267_s6 + $0xa8] sm:$0xf]  ;;  %v4030_v39 = vpack.c.b16 %v4009_v30, %v4008_v0  ;;  %v3953_v4 = vrot.slane %v6399_v8, 5  ;;  %v3491_v0 = vshrl.u32 %v6430_v18, 16 }
 0x207   : > { %v4187_v11 = vadd.f32 %v4110_v38, %v3777_v45  ;;  %v3036_v13 = vpop.f32.mrf.mxu2  ;;  %4798 = vmatmul.msk.bf16.gmra.mxu1 %vm703_vm3, %v2655_v23  ;;  %v3473_v38 = vshll.u32 %v6399_v8, 16 }
 0x208   : > { %v3112_v62 = vadd.f32 %v3036_v13, %v2813_v35  ;;  %v2579_v19 = vsel %vm5474_vm6, %v2577_v25, %v2578_v3  ;;  %v5015_v25 = vld [vmem:[%s5267_s6 + $0x9c] sm:$0xe] }
 0x209   : > { %v4223_v2 = vmul.f32 %v6327_v46, %v4187_v11  ;;  %v3475_v31 = vrot.slane %v3473_v38, 5  ;;  %v3950_v11 = vrot.slane %v6374_v47, 5  ;;  %v2636_v22 = vunpack.c.l.b16 %v2579_v19 }
 0x20a   : > { %v3466_v47 = vsel %vm5279_vm2, %v3461_v43, %v6394_v5  ;;  %v5031_v10 = vrot.slane %v5015_v25, 9  ;;  %v3478_v38 = vshrl.u32 %v4964_v51, 16  ;;  %v3481_v5 = vshll.u32 %v4964_v51, 16  ;;  %v5193_v51 = vld [vmem:[%s5267_s6 + $0xa4] sm:$0x1] }
 0x20b   : > { %v4259_v23 = vadd.f32 %v6344_v63, %v4223_v2  ;;  %v4112_v16 = vpop.f32.mrf.mxu0  ;;  %v3476_v60 = vsel %vm5279_vm2, %v3471_v44, %v3475_v31  ;;  %v3600_v30 = vunpack.c.l.b16 %v3466_v47 }
 0x20c   : > { %v3702_v45 = vpop.f32.mrf.mxu3  ;;  %4922 = vmatmul.msk.bf16.gmra.mxu2 %vm703_vm3, %v5121_v53  ;;  %v2742_v58 = vpop.f32.mrf.mxu1  ;;  %v2635_v53 = vunpack.c.l.b16 %v2576_v21  ;;  %v3601_v8 = vunpack.c.l.b16 %v3476_v60  ;;  %v3951_v43 = vsel %vm5474_vm6, %v5031_v10, %v3950_v11 }
 0x20d   : > { %4291 = vst.msk [vmem:[%s6356_s14 + $0x10] sm:$0xff] %vm703_vm3, %v4259_v23  ;;  %v3778_v52 = vadd.f32 %v3702_v45, %v3112_v62  ;;  %v3952_v62 = vrot.slane %v3950_v11, 4  ;;  %v5192_v45 = vld [vmem:[%s5267_s6 + $0xa0] sm:$0xf]  ;;  %v2815_v31 = vadd.f32 %v2742_v58, %v5819_v59  ;;  %v3493_v59 = vrot.slane %v3491_v0, 4 }
 0x20e   : > { %v2656_v12 = vpack.c.b16 %v2636_v22, %v2635_v53  ;;  %v2582_v21 = vrot.slane %v5192_v45, 5  ;;  %v5122_v53 = vld [vmem:[%s5267_s6 + $0x9c] sm:$0xff]  ;;  %v6453_v58 = vld [vmem:[%s5267_s6 + $0xb0] sm:$0x1] }
 0x20f   : > { %v4188_v35 = vadd.f32 %v4112_v16, %v3778_v52  ;;  %v3039_v13 = vpop.f32.mrf.mxu2  ;;  %v4756_v52 = vld [vmem:[%s5267_s6 + $0x9c] sm:$0xe] }
 0x210   : > { %v3113_v2 = vadd.f32 %v3039_v13, %v2814_v1  ;;  %v3954_v1 = vsel %vm5474_vm6, %v3952_v62, %v3953_v4  ;;  %v3480_v13 = vrot.slane %v3478_v38, 4  ;;  %v4772_v22 = vrot.slane %v4756_v52, 9 }
 0x211   : > { %v4224_v3 = vmul.f32 %v6327_v46, %v4188_v35  ;;  %4998 = vmatmul.msk.bf16.gmra.mxu3 %vm703_vm3, %v3620_v20  ;;  %v3487_v20 = vshll.u32 %v6430_v18, 16  ;;  %v2584_v25 = vrot.slane %v2582_v21, 4  ;;  %v4010_v62 = vunpack.c.l.b16 %v3951_v43 }
 0x212   : > { %v2583_v4 = vsel %vm5474_vm6, %v4772_v22, %v2582_v21  ;;  %v3497_v52 = vshll.u32 %v6453_v58, 16  ;;  %v4967_v21 = vld [vmem:[%s5267_s6 + $0xb4] sm:$0xf] }
 0x213   : > { %v4260_v37 = vadd.f32 %v6344_v63, %v4224_v3  ;;  %v4115_v15 = vpop.f32.mrf.mxu0  ;;  %v2585_v3 = vrot.slane %v5193_v51, 5  ;;  %v6450_v47 = vrot.slane %v3487_v20, 5  ;;  %v3502_v51 = vshrl.u32 %v4967_v21, 16 }
 0x214   : > { %v3705_v23 = vpop.f32.mrf.mxu3  ;;  %v2745_v16 = vpop.f32.mrf.mxu1  ;;  %v3499_v22 = vrot.slane %v3497_v52, 5 }
 0x215   : > { %4292 = vst.msk [vmem:[%s6356_s14 + $0x18] sm:$0xff] %vm703_vm3, %v4260_v37  ;;  %v3779_v19 = vadd.f32 %v3705_v23, %v3113_v2  ;;  %v2586_v38 = vsel %vm5474_vm6, %v2584_v25, %v2585_v3  ;;  %v2816_v0 = vadd.f32 %v2745_v16, %v5831_v33  ;;  %v5016_v25 = vld [vmem:[%s5267_s6 + $0xa8] sm:$0xe]  ;;  %v3505_v33 = vshll.u32 %v4967_v21, 16 }
 0x216   : > { %5058 = vmatmul.msk.bf16.gmra.mxu0 %vm703_vm3, %v4030_v39  ;;  %v3483_v39 = vrot.slane %v3481_v5, 5  ;;  %v3621_v5 = vpack.c.b16 %v3601_v8, %v3600_v30  ;;  %v5123_v21 = vld [vmem:[%s5267_s6 + $0xa8] sm:$0xff] }
 0x217   : > { %v4189_v44 = vadd.f32 %v4115_v15, %v3779_v19  ;;  %v3041_v35 = vpop.f32.mrf.mxu2  ;;  %4799 = vmatmul.msk.bf16.gmra.mxu1 %vm703_vm3, %v2656_v12  ;;  %v4011_v15 = vunpack.c.l.b16 %v3954_v1  ;;  %v3494_v19 = vor.u32 %v3493_v59, %v6450_v47  ;;  %v3957_v59 = vrot.slane %v6430_v18, 5 }
 0x218   : > { %v3114_v2 = vadd.f32 %v3041_v35, %v2815_v31  ;;  %v3484_v23 = vor.u32 %v3483_v39, %v3480_v13  ;;  %v2638_v31 = vunpack.c.l.b16 %v2586_v38  ;;  %v6468_v35 = vld [vmem:[%s5267_s6 + $0xb8] sm:$0xf]  ;;  %v3504_v18 = vrot.slane %v3502_v51, 4 }
 0x219   : > { %v4225_v11 = vmul.f32 %v6327_v46, %v4189_v44  ;;  %v2637_v44 = vunpack.c.l.b16 %v2583_v4  ;;  %v4031_v1 = vpack.c.b16 %v4011_v15, %v4010_v62  ;;  %v3495_v8 = vrot.slane %v3494_v19, 4  ;;  %v5194_v62 = vld [vmem:[%s5267_s6 + $0xac] sm:$0xf] }
 0x21a   : > { %v3485_v13 = vrot.slane %v3484_v23, 4  ;;  %v3511_v16 = vshll.u32 %v6468_v35, 16  ;;  %v3515_v3 = vshrl.u32 %v6468_v35, 16  ;;  %v5032_v23 = vrot.slane %v5016_v25, 9 }
 0x21b   : > { %v4261_v60 = vadd.f32 %v6344_v63, %v4225_v11  ;;  %v4117_v10 = vpop.f32.mrf.mxu0  ;;  %v3500_v38 = vsel %vm5279_vm2, %v3495_v8, %v3499_v22 }
 0x21c   : > { %v3707_v37 = vpop.f32.mrf.mxu3  ;;  %4923 = vmatmul.msk.bf16.gmra.mxu2 %vm703_vm3, %v5122_v53  ;;  %v2747_v12 = vpop.f32.mrf.mxu1  ;;  %v3490_v4 = vsel %vm5279_vm2, %v3485_v13, %v6450_v47  ;;  %v6487_v19 = vrot.slane %v3511_v16, 5  ;;  %v3517_v52 = vrot.slane %v3515_v3, 4  ;;  %v3959_v47 = vrot.slane %v3957_v59, 4 }
 0x21d   : > { %4293 = vst.msk [vmem:[%s6356_s14 + $0x20] sm:$0xff] %vm703_vm3, %v4261_v60  ;;  %v3780_v45 = vadd.f32 %v3707_v37, %v3114_v2  ;;  %v2657_v2 = vpack.c.b16 %v2638_v31, %v2637_v44  ;;  %v2589_v37 = vrot.slane %v5194_v62, 5  ;;  %v3960_v44 = vrot.slane %v6453_v58, 5  ;;  %v6493_v31 = vld [vmem:[%s5267_s6 + $0xbc] sm:$0x1] }
 0x21e   : > { %v3602_v25 = vunpack.c.l.b16 %v3490_v4  ;;  %v3603_v51 = vunpack.c.l.b16 %v3500_v38  ;;  %v3521_v58 = vshll.u32 %v6493_v31, 16 }
 0x21f   : > { %v4190_v20 = vadd.f32 %v4117_v10, %v3780_v45  ;;  %v3044_v43 = vpop.f32.mrf.mxu2  ;;  %v4757_v45 = vld [vmem:[%s5267_s6 + $0xa8] sm:$0xe] }
 0x220   : > { %v3115_v30 = vadd.f32 %v3044_v43, %v2816_v0  ;;  %v2817_v0 = vadd.f32 %v2747_v12, %v5844_v41  ;;  %v4773_v13 = vrot.slane %v4757_v45, 9  ;;  %v3958_v41 = vsel %vm5474_vm6, %v5032_v23, %v3957_v59 }
 0x221   : > { %v4226_v53 = vmul.f32 %v6327_v46, %v4190_v20  ;;  %4999 = vmatmul.msk.bf16.gmra.mxu3 %vm703_vm3, %v3621_v5  ;;  %v3507_v5 = vrot.slane %v3505_v33, 5  ;;  %v3518_v33 = vor.u32 %v3517_v52, %v6487_v19  ;;  %v4012_v4 = vunpack.c.l.b16 %v3958_v41 }
 0x223   : > { %v4262_v39 = vadd.f32 %v6344_v63, %v4226_v53  ;;  %v4120_v11 = vpop.f32.mrf.mxu0  ;;  %v2591_v53 = vrot.slane %v2589_v37, 4  ;;  %v3508_v12 = vor.u32 %v3507_v5, %v3504_v18  ;;  %v3519_v45 = vrot.slane %v3518_v33, 4 }
 0x224   : > { %v3710_v60 = vpop.f32.mrf.mxu3  ;;  %v2750_v10 = vpop.f32.mrf.mxu1  ;;  %v3523_v18 = vrot.slane %v3521_v58, 5 }
 0x225   : > { %4294 = vst.msk [vmem:[%s6356_s14 + $0x28] sm:$0xff] %vm703_vm3, %v4262_v39  ;;  %v3781_v15 = vadd.f32 %v3710_v60, %v3115_v30  ;;  %v3961_v39 = vsel %vm5474_vm6, %v3959_v47, %v3960_v44  ;;  %v2590_v60 = vsel %vm5474_vm6, %v4773_v13, %v2589_v37  ;;  %v3509_v23 = vrot.slane %v3508_v12, 4  ;;  %v5196_v12 = vld [vmem:[%s5267_s6 + $0xb8] sm:$0xf] }
 0x226   : > { %5059 = vmatmul.msk.bf16.gmra.mxu0 %vm703_vm3, %v4031_v1  ;;  %v5195_v1 = vld [vmem:[%s5267_s6 + $0xb0] sm:$0x1]  ;;  %v4013_v38 = vunpack.c.l.b16 %v3961_v39  ;;  %v2818_v52 = vadd.f32 %v2750_v10, %v5858_v29  ;;  %v3964_v29 = vrot.slane %v6468_v35, 5  ;;  %v6521_v10 = vld [vmem:[%s5267_s6 + $0xc4] sm:$0xf]  ;;  %v2596_v33 = vrot.slane %v5196_v12, 5 }
 0x227   : > { %v4191_v20 = vadd.f32 %v4120_v11, %v3781_v15  ;;  %v3046_v43 = vpop.f32.mrf.mxu2  ;;  %4800 = vmatmul.msk.bf16.gmra.mxu1 %vm703_vm3, %v2657_v2  ;;  %v2592_v30 = vrot.slane %v5195_v1, 5  ;;  %v3622_v15 = vpack.c.b16 %v3603_v51, %v3602_v25  ;;  %v3514_v13 = vsel %vm5279_vm2, %v3509_v23, %v6487_v19  ;;  %v4758_v19 = vld [vmem:[%s5267_s6 + $0xb4] sm:$0xe] }
 0x228   : > { %v3116_v22 = vadd.f32 %v3046_v43, %v2817_v0  ;;  %v2639_v0 = vunpack.c.l.b16 %v2590_v60  ;;  %v4970_v43 = vld [vmem:[%s5267_s6 + $0xc0] sm:$0xf]  ;;  %v3604_v39 = vunpack.c.l.b16 %v3514_v13 }
 0x229   : > { %v4227_v8 = vmul.f32 %v6327_v46, %v4191_v20  ;;  %v2593_v59 = vsel %vm5474_vm6, %v2591_v53, %v2592_v30  ;;  %v3526_v25 = vshrl.u32 %v4970_v43, 16  ;;  %v3529_v58 = vshll.u32 %v4970_v43, 16 }
 0x22a   : > { %v2640_v37 = vunpack.c.l.b16 %v2593_v59  ;;  %v3966_v59 = vrot.slane %v3964_v29, 4 }
 0x22b   : > { %v4263_v16 = vadd.f32 %v6344_v63, %v4227_v8  ;;  %v4122_v3 = vpop.f32.mrf.mxu0  ;;  %v3524_v8 = vsel %vm5279_vm2, %v3519_v45, %v3523_v18  ;;  %v3528_v23 = vrot.slane %v3526_v25, 4  ;;  %v5124_v45 = vld [vmem:[%s5267_s6 + $0xb4] sm:$0xff]  ;;  %v4774_v18 = vrot.slane %v4758_v19, 9 }
 0x22c   : > { %v3712_v11 = vpop.f32.mrf.mxu3  ;;  %4924 = vmatmul.msk.bf16.gmra.mxu2 %vm703_vm3, %v5123_v21  ;;  %v2752_v2 = vpop.f32.mrf.mxu1  ;;  %v4032_v21 = vpack.c.b16 %v4013_v38, %v4012_v4  ;;  %v2658_v30 = vpack.c.b16 %v2640_v37, %v2639_v0  ;;  %v3967_v38 = vrot.slane %v6493_v31, 5  ;;  %v3531_v0 = vrot.slane %v3529_v58, 5 }
 0x22d   : > { %4295 = vst.msk [vmem:[%s6356_s14 + $0x30] sm:$0xff] %vm703_vm3, %v4263_v16  ;;  %v3782_v62 = vadd.f32 %v3712_v11, %v3116_v22  ;;  %v5017_v22 = vld [vmem:[%s5267_s6 + $0xb4] sm:$0xe]  ;;  %v3535_v16 = vshll.u32 %v6521_v10, 16  ;;  %v3605_v11 = vunpack.c.l.b16 %v3524_v8 }
 0x22e   : > { %v5033_v60 = vrot.slane %v5017_v22, 9  ;;  %v3968_v13 = vsel %vm5474_vm6, %v3966_v59, %v3967_v38  ;;  %v3532_v22 = vor.u32 %v3531_v0, %v3528_v23  ;;  %v5018_v38 = vld [vmem:[%s5267_s6 + $0xc0] sm:$0xe]  ;;  %v5198_v0 = vld [vmem:[%s5267_s6 + $0xc4] sm:$0xf] }
 0x22f   : > { %v4192_v5 = vadd.f32 %v4122_v3, %v3782_v62  ;;  %v3049_v20 = vpop.f32.mrf.mxu2  ;;  %v3539_v3 = vshrl.u32 %v6521_v10, 16 }
 0x230   : > { %v3117_v44 = vadd.f32 %v3049_v20, %v2818_v52  ;;  %v5197_v52 = vld [vmem:[%s5267_s6 + $0xbc] sm:$0x1]  ;;  %v3965_v31 = vsel %vm5474_vm6, %v5033_v60, %v3964_v29  ;;  %v3533_v59 = vrot.slane %v3532_v22, 4  ;;  %v6742_v22 = vld [vmem:[#allocation2_spill] sm:$0xff] }
 0x231   : > { %v4228_v47 = vmul.f32 %v6327_v46, %v4192_v5  ;;  %5000 = vmatmul.msk.bf16.gmra.mxu3 %vm703_vm3, %v3622_v15  ;;  %v2819_v15 = vadd.f32 %v2752_v2, %v5871_v54  ;;  %v2598_v5 = vrot.slane %v2596_v33, 4  ;;  %v2599_v20 = vrot.slane %v5197_v52, 5 }
 0x232   : > { %v4014_v58 = vunpack.c.l.b16 %v3965_v31  ;;  %v4759_v31 = vld [vmem:[%s5267_s6 + $0xc0] sm:$0xe] }
 0x233   : > { %v4264_v53 = vadd.f32 %v6344_v63, %v4228_v47  ;;  %v4125_v1 = vpop.f32.mrf.mxu0  ;;  %v3537_v47 = vrot.slane %v3535_v16, 5  ;;  %v2600_v8 = vsel %vm5474_vm6, %v2598_v5, %v2599_v20  ;;  %v6564_v5 = vld [vmem:[%s5267_s6 + $0xd0] sm:$0xf] }
 0x234   : > { %v3715_v51 = vpop.f32.mrf.mxu3  ;;  %v2755_v41 = vpop.f32.mrf.mxu1  ;;  %v2642_v60 = vunpack.c.l.b16 %v2600_v8 }
 0x235   : > { %4296 = vst.msk [vmem:[%s6356_s14 + $0x38] sm:$0xff] %vm703_vm3, %v4264_v53  ;;  %v3783_v35 = vadd.f32 %v3715_v51, %v3117_v44  ;;  %v3541_v44 = vrot.slane %v3539_v3, 4  ;;  %v3623_v51 = vpack.c.b16 %v3605_v11, %v3604_v39  ;;  %v2820_v16 = vadd.f32 %v2755_v41, %v5887_v61 }
 0x236   : > { %5060 = vmatmul.msk.bf16.gmra.mxu0 %vm703_vm3, %v4032_v21  ;;  %v6541_v21 = vld [vmem:[%s5267_s6 + $0xc8] sm:$0x1] }
 0x237   : > { %v4193_v62 = vadd.f32 %v4125_v1, %v3783_v35  ;;  %v3051_v4 = vpop.f32.mrf.mxu2  ;;  %4801 = vmatmul.msk.bf16.gmra.mxu1 %vm703_vm3, %v2658_v30  ;;  %v2597_v30 = vsel %vm5474_vm6, %v4774_v18, %v2596_v33  ;;  %v3542_v12 = vor.u32 %v3541_v44, %v3537_v47  ;;  %v3545_v29 = vshll.u32 %v6541_v21, 16  ;;  %v4973_v18 = vld [vmem:[%s5267_s6 + $0xcc] sm:$0xf] }
 0x238   : > { %v3118_v43 = vadd.f32 %v3051_v4, %v2819_v15  ;;  %v4015_v35 = vunpack.c.l.b16 %v3968_v13  ;;  %v2641_v33 = vunpack.c.l.b16 %v2597_v30  ;;  %v3538_v44 = vsel %vm5279_vm2, %v3533_v59, %v3537_v47 }
 0x239   : > { %v4229_v37 = vmul.f32 %v6327_v46, %v4193_v62  ;;  %v3543_v11 = vrot.slane %v3542_v12, 4  ;;  %v3547_v15 = vrot.slane %v3545_v29, 5  ;;  %v3553_v13 = vshll.u32 %v4973_v18, 16  ;;  %v5125_v29 = vld [vmem:[%s5267_s6 + $0xc0] sm:$0xff] }
 0x23a   : > { %v4033_v4 = vpack.c.b16 %v4015_v35, %v4014_v58  ;;  %v2659_v23 = vpack.c.b16 %v2642_v60, %v2641_v33  ;;  %v3563_v30 = vshrl.u32 %v6564_v5, 16  ;;  %v3974_v12 = vrot.slane %v6541_v21, 5 }
 0x23b   : > { %v4265_v54 = vadd.f32 %v6344_v63, %v4229_v37  ;;  %v4127_v2 = vpop.f32.mrf.mxu0  ;;  %v2603_v37 = vrot.slane %v5198_v0, 5  ;;  %v3606_v58 = vunpack.c.l.b16 %v3538_v44  ;;  %v4775_v35 = vrot.slane %v4759_v31, 9 }
 0x23c   : > { %v3717_v53 = vpop.f32.mrf.mxu3  ;;  %4925 = vmatmul.msk.bf16.gmra.mxu2 %vm703_vm3, %v5124_v45  ;;  %v2757_v1 = vpop.f32.mrf.mxu1  ;;  %v3971_v45 = vrot.slane %v6521_v10, 5  ;;  %v3550_v10 = vshrl.u32 %v4973_v18, 16 }
 0x23d   : > { %4297 = vst.msk [vmem:[%s6356_s14 + $0x40] sm:$0xff] %vm703_vm3, %v4265_v54  ;;  %v3784_v25 = vadd.f32 %v3717_v53, %v3118_v43  ;;  %v3548_v54 = vsel %vm5279_vm2, %v3543_v11, %v3547_v15  ;;  %v3559_v53 = vshll.u32 %v6564_v5, 16  ;;  %v3565_v15 = vrot.slane %v3563_v30, 4 }
 0x23e   : > { %v3973_v47 = vrot.slane %v3971_v45, 4  ;;  %v3607_v59 = vunpack.c.l.b16 %v3548_v54  ;;  %v2604_v18 = vsel %vm5474_vm6, %v4775_v35, %v2603_v37 }
 0x23f   : > { %v4194_v19 = vadd.f32 %v4127_v2, %v3784_v25  ;;  %v3054_v3 = vpop.f32.mrf.mxu2  ;;  %v5034_v2 = vrot.slane %v5018_v38, 9  ;;  %v2821_v25 = vadd.f32 %v2757_v1, %v6742_v22  ;;  %v3561_v11 = vrot.slane %v3559_v53, 5 }
 0x240   : > { %v3119_v39 = vadd.f32 %v3054_v3, %v2820_v16  ;;  %v5199_v16 = vld [vmem:[%s5267_s6 + $0xc8] sm:$0x1]  ;;  %v3975_v38 = vsel %vm5474_vm6, %v3973_v47, %v3974_v12  ;;  %v3624_v0 = vpack.c.b16 %v3607_v59, %v3606_v58  ;;  %v2643_v30 = vunpack.c.l.b16 %v2604_v18 }
 0x241   : > { %v4230_v62 = vmul.f32 %v6327_v46, %v4194_v19  ;;  %5001 = vmatmul.msk.bf16.gmra.mxu3 %vm703_vm3, %v3623_v51  ;;  %v2605_v19 = vrot.slane %v2603_v37, 4  ;;  %v2606_v3 = vrot.slane %v5199_v16, 5  ;;  %v3972_v1 = vsel %vm5474_vm6, %v5034_v2, %v3971_v45 }
 0x242   : > { %v4017_v44 = vunpack.c.l.b16 %v3975_v38  ;;  %v3566_v2 = vor.u32 %v3565_v15, %v3561_v11 }
 0x243   : > { %v4266_v61 = vadd.f32 %v6344_v63, %v4230_v62  ;;  %v4130_v41 = vpop.f32.mrf.mxu0  ;;  %v3552_v62 = vrot.slane %v3550_v10, 4  ;;  %v2607_v45 = vsel %vm5474_vm6, %v2605_v19, %v2606_v3  ;;  %v5019_v19 = vld [vmem:[%s5267_s6 + $0xcc] sm:$0xe] }
 0x244   : > { %v3720_v52 = vpop.f32.mrf.mxu3  ;;  %v2760_v20 = vpop.f32.mrf.mxu1  ;;  %v2644_v37 = vunpack.c.l.b16 %v2607_v45  ;;  %v3567_v47 = vrot.slane %v3566_v2, 4  ;;  %v5035_v59 = vrot.slane %v5019_v19, 9 }
 0x245   : > { %4298 = vst.msk [vmem:[%s6356_s14 + $0x48] sm:$0xff] %vm703_vm3, %v4266_v61  ;;  %v3785_v43 = vadd.f32 %v3720_v52, %v3119_v39  ;;  %v3555_v39 = vrot.slane %v3553_v13, 5  ;;  %v4975_v61 = vld [vmem:[%s5267_s6 + $0xd4] sm:$0x1]  ;;  %v2822_v13 = vadd.f32 %v2760_v20, %v5923_v57  ;;  %v3978_v57 = vrot.slane %v6564_v5, 5 }
 0x246   : > { %5061 = vmatmul.msk.bf16.gmra.mxu0 %vm703_vm3, %v4033_v4  ;;  %v3569_v31 = vshll.u32 %v4975_v61, 16  ;;  %v2660_v35 = vpack.c.b16 %v2644_v37, %v2643_v30  ;;  %v3981_v15 = vrot.slane %v4975_v61, 5 }
 0x247   : > { %v4195_v8 = vadd.f32 %v4130_v41, %v3785_v43  ;;  %v3056_v51 = vpop.f32.mrf.mxu2  ;;  %4802 = vmatmul.msk.bf16.gmra.mxu1 %vm703_vm3, %v2659_v23  ;;  %v4016_v43 = vunpack.c.l.b16 %v3972_v1  ;;  %v3556_v54 = vor.u32 %v3555_v39, %v3552_v62  ;;  %v3980_v5 = vrot.slane %v3978_v57, 4 }
 0x248   : > { %v3120_v60 = vadd.f32 %v3056_v51, %v2821_v25  ;;  %v3571_v12 = vrot.slane %v3569_v31, 5  ;;  %v3979_v45 = vsel %vm5474_vm6, %v5035_v59, %v3978_v57 }
 0x249   : > { %v4231_v33 = vmul.f32 %v6327_v46, %v4195_v8  ;;  %v4034_v25 = vpack.c.b16 %v4017_v44, %v4016_v43  ;;  %v3557_v51 = vrot.slane %v3556_v54, 4  ;;  %v4018_v43 = vunpack.c.l.b16 %v3979_v45 }
 0x24b   : > { %v4267_v21 = vadd.f32 %v6344_v63, %v4231_v33  ;;  %v4132_v4 = vpop.f32.mrf.mxu0  ;;  %v3562_v33 = vsel %vm5279_vm2, %v3557_v51, %v3561_v11 }
 0x24c   : > { %v3722_v41 = vpop.f32.mrf.mxu3  ;;  %4926 = vmatmul.msk.bf16.gmra.mxu2 %vm703_vm3, %v5125_v29  ;;  %v2762_v23 = vpop.f32.mrf.mxu1 }
 0x24d   : > { %4299 = vst.msk [vmem:[%s6356_s14 + $0x50] sm:$0xff] %vm703_vm3, %v4267_v21  ;;  %v3786_v52 = vadd.f32 %v3722_v41, %v3120_v60  ;;  %v3572_v60 = vsel %vm5279_vm2, %v3567_v47, %v3571_v12  ;;  %v2823_v62 = vadd.f32 %v2762_v23, %v5943_v36  ;;  %v5126_v21 = vld [vmem:[%s5267_s6 + $0xcc] sm:$0xff]  ;;  %v3608_v41 = vunpack.c.l.b16 %v3562_v33 }
 0x24e   : > { %v3609_v18 = vunpack.c.l.b16 %v3572_v60  ;;  %v3982_v36 = vsel %vm5474_vm6, %v3980_v5, %v3981_v15 }
 0x24f   : > { %v4196_v10 = vadd.f32 %v4132_v4, %v3786_v52  ;;  %v3059_v53 = vpop.f32.mrf.mxu2  ;;  %v4019_v44 = vunpack.c.l.b16 %v3982_v36 }
 0x250   : > { %v3121_v22 = vadd.f32 %v3059_v53, %v2822_v13 }
 0x251   : > { %v4232_v8 = vmul.f32 %v6327_v46, %v4196_v10  ;;  %5002 = vmatmul.msk.bf16.gmra.mxu3 %vm703_vm3, %v3624_v0  ;;  %v3625_v0 = vpack.c.b16 %v3609_v18, %v3608_v41  ;;  %v4035_v13 = vpack.c.b16 %v4019_v44, %v4018_v43 }
 0x253   : > { %v4268_v29 = vadd.f32 %v6344_v63, %v4232_v8  ;;  %v4135_v58 = vpop.f32.mrf.mxu0 }
 0x254   : > { %v3725_v20 = vpop.f32.mrf.mxu3  ;;  %v2765_v16 = vpop.f32.mrf.mxu1 }
 0x255   : > { %4300 = vst.msk [vmem:[%s6356_s14 + $0x58] sm:$0xff] %vm703_vm3, %v4268_v29  ;;  %v3787_v3 = vadd.f32 %v3725_v20, %v3121_v22  ;;  %v2824_v2 = vadd.f32 %v2765_v16, %v5962_v27  ;;  %v6743_v27 = vld [vmem:[#allocation3_spill] sm:$0xff] }
 0x256   : > { %5062 = vmatmul.msk.bf16.gmra.mxu0 %vm703_vm3, %v4034_v25 }
 0x257   : > { %v4197_v1 = vadd.f32 %v4135_v58, %v3787_v3  ;;  %v3061_v39 = vpop.f32.mrf.mxu2  ;;  %4803 = vmatmul.msk.bf16.gmra.mxu1 %vm703_vm3, %v2660_v35 }
 0x258   : > { %v3122_v38 = vadd.f32 %v3061_v39, %v2823_v62 }
 0x259   : > { %v4233_v4 = vmul.f32 %v6327_v46, %v4197_v1 }
 0x25b   : > { %v4269_v11 = vadd.f32 %v6344_v63, %v4233_v4  ;;  %v4137_v32 = vpop.f32.mrf.mxu0 }
 0x25c   : > { %v3727_v23 = vpop.f32.mrf.mxu3  ;;  %4927 = vmatmul.msk.bf16.gmra.mxu2 %vm703_vm3, %v5126_v21  ;;  %v2767_v52 = vpop.f32.mrf.mxu1 }
 0x25d   : > { %4301 = vst.msk [vmem:[%s6356_s14 + $0x60] sm:$0xff] %vm703_vm3, %v4269_v11  ;;  %v3788_v61 = vadd.f32 %v3727_v23, %v3122_v38  ;;  %v2825_v51 = vadd.f32 %v2767_v52, %v6743_v27 }
 0x25f   : > { %v4198_v54 = vadd.f32 %v4137_v32, %v3788_v61  ;;  %v3064_v31 = vpop.f32.mrf.mxu2 }
 0x260   : > { %v3123_v26 = vadd.f32 %v3064_v31, %v2824_v2 }
 0x261   : > { %v4234_v10 = vmul.f32 %v6327_v46, %v4198_v54  ;;  %5003 = vmatmul.msk.bf16.gmra.mxu3 %vm703_vm3, %v3625_v0 }
 0x263   : > { %v4270_v53 = vadd.f32 %v6344_v63, %v4234_v10  ;;  %v4140_v30 = vpop.f32.mrf.mxu0 }
 0x264   : > { %v3730_v37 = vpop.f32.mrf.mxu3  ;;  %v2770_v8 = vpop.f32.mrf.mxu1 }
 0x265   : > { %4302 = vst.msk [vmem:[%s6356_s14 + $0x68] sm:$0xff] %vm703_vm3, %v4270_v53  ;;  %v3789_v22 = vadd.f32 %v3730_v37, %v3123_v26  ;;  %v2826_v3 = vadd.f32 %v2770_v8, %v6005_v7 }
 0x266   : > { %5063 = vmatmul.msk.bf16.gmra.mxu0 %vm703_vm3, %v4035_v13 }
 0x267   : > { %v4199_v25 = vadd.f32 %v4140_v30, %v3789_v22  ;;  %v3066_v47 = vpop.f32.mrf.mxu2 }
 0x268   : > { %v3124_v29 = vadd.f32 %v3066_v47, %v2825_v51 }
 0x269   : > { %v4235_v12 = vmul.f32 %v6327_v46, %v4199_v25 }
 0x26b   : > { %v4271_v58 = vadd.f32 %v6344_v63, %v4235_v12  ;;  %v4142_v35 = vpop.f32.mrf.mxu0 }
 0x26c   : > { %v3732_v19 = vpop.f32.mrf.mxu3  ;;  %v2772_v57 = vpop.f32.mrf.mxu1 }
 0x26d   : > { %4303 = vst.msk [vmem:[%s6356_s14 + $0x70] sm:$0xff] %vm703_vm3, %v4271_v58  ;;  %v3790_v20 = vadd.f32 %v3732_v19, %v3124_v29  ;;  %v2827_v4 = vadd.f32 %v2772_v57, %v6029_v17 }
 0x26f   : > { %v4200_v16 = vadd.f32 %v4142_v35, %v3790_v20  ;;  %v3069_v33 = vpop.f32.mrf.mxu2 }
 0x270   : > { %v3125_v59 = vadd.f32 %v3069_v33, %v2826_v3 }
 0x271   : > { %v4236_v60 = vmul.f32 %v6327_v46, %v4200_v16 }
 0x273   : > { %v4272_v1 = vadd.f32 %v6344_v63, %v4236_v60  ;;  %v4145_v62 = vpop.f32.mrf.mxu0 }
 0x274   : > { %v3735_v39 = vpop.f32.mrf.mxu3  ;;  %v2775_v5 = vpop.f32.mrf.mxu1 }
 0x275   : > { %4304 = vst.msk [vmem:[%s6356_s14 + $0x78] sm:$0xff] %vm703_vm3, %v4272_v1  ;;  %v3791_v15 = vadd.f32 %v3735_v39, %v3125_v59  ;;  %v2828_v52 = vadd.f32 %v2775_v5, %v6048_v24 }
 0x277   : > { %v4201_v21 = vadd.f32 %v4145_v62, %v3791_v15  ;;  %v3071_v38 = vpop.f32.mrf.mxu2 }
 0x278   : > { %v3126_v7 = vadd.f32 %v3071_v38, %v2827_v4  ;;  %v6673_v38 = vld [vmem:[%s6733_s3] ss:$0 sm:$0xff] }
 0x279   : > { %v4237_v41 = vmul.f32 %v6327_v46, %v4201_v21 }
 0x27b   : > { %v4273_v18 = vadd.f32 %v6344_v63, %v4237_v41  ;;  %v4147_v11 = vpop.f32.mrf.mxu0 }
 0x27c   : > { %v3737_v32 = vpop.f32.mrf.mxu3  ;;  %v2777_v45 = vpop.f32.mrf.mxu1 }
 0x27d   : > { %4305 = vst.msk [vmem:[%s6356_s14 + $0x80] sm:$0xff] %vm703_vm3, %v4273_v18  ;;  %v3792_v36 = vadd.f32 %v3737_v32, %v3126_v7  ;;  %v2829_v26 = vadd.f32 %v2777_v45, %v6072_v50 }
 0x27f   : > { %v4202_v23 = vadd.f32 %v4147_v11, %v3792_v36  ;;  %v3074_v61 = vpop.f32.mrf.mxu2 }
 0x280   : > { %v3127_v17 = vadd.f32 %v3074_v61, %v2828_v52 }
 0x281   : > { %v4238_v0 = vmul.f32 %v6327_v46, %v4202_v23 }
 0x283   : > { %v4274_v43 = vadd.f32 %v6344_v63, %v4238_v0  ;;  %v4150_v44 = vpop.f32.mrf.mxu0 }
 0x284   : > { %v3740_v54 = vpop.f32.mrf.mxu3  ;;  %v2780_v2 = vpop.f32.mrf.mxu1 }
 0x285   : > { %4306 = vst.msk [vmem:[%s6356_s14 + $0x88] sm:$0xff] %vm703_vm3, %v4274_v43  ;;  %v3793_v31 = vadd.f32 %v3740_v54, %v3127_v17  ;;  %v2830_v51 = vadd.f32 %v2780_v2, %v6091_v56  ;;  %v6662_v56 = vld [vmem:[%s6732_s2] ss:$0 sm:$0xff] }
 0x287   : > { %v4203_v10 = vadd.f32 %v4150_v44, %v3793_v31  ;;  %v3076_v13 = vpop.f32.mrf.mxu2 }
 0x288   : > { %v3128_v24 = vadd.f32 %v3076_v13, %v2829_v26 }
 0x289   : > { %v4239_v53 = vmul.f32 %v6327_v46, %v4203_v10 }
 0x28b   : > { %v4275_v30 = vadd.f32 %v6344_v63, %v4239_v53  ;;  %v4152_v37 = vpop.f32.mrf.mxu0 }
 0x28c   : > { %v3742_v8 = vpop.f32.mrf.mxu3  ;;  %v2782_v22 = vpop.f32.mrf.mxu1 }
 0x28d   : > { %4307 = vst.msk [vmem:[%s6356_s14 + $0x90] sm:$0xff] %vm703_vm3, %v4275_v30  ;;  %v3794_v25 = vadd.f32 %v3742_v8, %v3128_v24  ;;  %v2831_v16 = vadd.f32 %v2782_v22, %v6115_v48 }
 0x28f   : > { %v4204_v27 = vadd.f32 %v4152_v37, %v3794_v25  ;;  %v3079_v47 = vpop.f32.mrf.mxu2 }
 0x290   : > { %v3129_v50 = vadd.f32 %v3079_v47, %v2830_v51 }
 0x291   : > { %v4240_v12 = vmul.f32 %v6327_v46, %v4204_v27 }
 0x293   : > { %v4276_v29 = vadd.f32 %v6344_v63, %v4240_v12  ;;  %v4155_v58 = vpop.f32.mrf.mxu0 }
 0x294   : > { %v3745_v35 = vpop.f32.mrf.mxu3  ;;  %v2785_v19 = vpop.f32.mrf.mxu1 }
 0x295   : > { %4308 = vst.msk [vmem:[%s6356_s14 + $0x98] sm:$0xff] %vm703_vm3, %v4276_v29  ;;  %v3795_v57 = vadd.f32 %v3745_v35, %v3129_v50  ;;  %v2832_v48 = vadd.f32 %v2785_v19, %v6134_v9  ;;  %v6744_v9 = vld [vmem:[#allocation4_spill] sm:$0xff] }
 0x297   : > { %v4205_v20 = vadd.f32 %v4155_v58, %v3795_v57  ;;  %v3081_v3 = vpop.f32.mrf.mxu2 }
 0x298   : > { %v3130_v33 = vadd.f32 %v3081_v3, %v2831_v16 }
 0x299   : > { %v4241_v46 = vmul.f32 %v6662_v56, %v4205_v20 }
 0x29b   : > { %v4277_v60 = vadd.f32 %v6344_v63, %v4241_v46  ;;  %v4157_v59 = vpop.f32.mrf.mxu0 }
 0x29c   : > { %v3747_v1 = vpop.f32.mrf.mxu3  ;;  %v2787_v62 = vpop.f32.mrf.mxu1 }
 0x29d   : > { %4309 = vst.msk [vmem:[%s6356_s14 + $0xa0] sm:$0xff] %vm703_vm3, %v4277_v60  ;;  %v3796_v39 = vadd.f32 %v3747_v1, %v3130_v33  ;;  %v2833_v45 = vadd.f32 %v2787_v62, %v6744_v9 }
 0x29f   : > { %v4206_v5 = vadd.f32 %v4157_v59, %v3796_v39  ;;  %v3084_v15 = vpop.f32.mrf.mxu2 }
 0x2a0   : > { %v3131_v4 = vadd.f32 %v3084_v15, %v2832_v48 }
 0x2a1   : > { %v4242_v21 = vmul.f32 %v6662_v56, %v4206_v5 }
 0x2a3   : > { %v4278_v63 = vadd.f32 %v6673_v38, %v4242_v21  ;;  %v4160_v41 = vpop.f32.mrf.mxu0 }
 0x2a4   : > { %v3750_v7 = vpop.f32.mrf.mxu3  ;;  %v2790_v18 = vpop.f32.mrf.mxu1 }
 0x2a5   : > { %4310 = vst.msk [vmem:[%s6356_s14 + $0xa8] sm:$0xff] %vm703_vm3, %v4278_v63  ;;  %v3797_v11 = vadd.f32 %v3750_v7, %v3131_v4  ;;  %v2834_v2 = vadd.f32 %v2790_v18, %v6175_v14 }
 0x2a7   : > { %v4207_v32 = vadd.f32 %v4160_v41, %v3797_v11  ;;  %v3086_v36 = vpop.f32.mrf.mxu2 }
 0x2a8   : > { %v3132_v52 = vadd.f32 %v3086_v36, %v2833_v45 }
 0x2a9   : > { %v4243_v23 = vmul.f32 %v6662_v56, %v4207_v32 }
 0x2ab   : > { %v4279_v61 = vadd.f32 %v6673_v38, %v4243_v23  ;;  %v4162_v0 = vpop.f32.mrf.mxu0 }
 0x2ac   : > { %v3752_v17 = vpop.f32.mrf.mxu3  ;;  %v2792_v43 = vpop.f32.mrf.mxu1 }
 0x2ad   : > { %4311 = vst.msk [vmem:[%s6356_s14 + $0xb0] sm:$0xff] %vm703_vm3, %v4279_v61  ;;  %v3798_v44 = vadd.f32 %v3752_v17, %v3132_v52  ;;  %v2835_v22 = vadd.f32 %v2792_v43, %v6196_v28 }
 0x2af   : > { %v4208_v54 = vadd.f32 %v4162_v0, %v3798_v44  ;;  %v3089_v31 = vpop.f32.mrf.mxu2 }
 0x2b0   : > { %v3133_v26 = vadd.f32 %v3089_v31, %v2834_v2 }
 0x2b1   : > { %v4244_v10 = vmul.f32 %v6662_v56, %v4208_v54 }
 0x2b3   : > { %v4280_v13 = vadd.f32 %v6673_v38, %v4244_v10  ;;  %v4165_v53 = vpop.f32.mrf.mxu0 }
 0x2b4   : > { %v3755_v24 = vpop.f32.mrf.mxu3  ;;  %v2795_v30 = vpop.f32.mrf.mxu1 }
 0x2b5   : > { %4312 = vst.msk [vmem:[%s6356_s14 + $0xb8] sm:$0xff] %vm703_vm3, %v4280_v13  ;;  %v3799_v37 = vadd.f32 %v3755_v24, %v3133_v26  ;;  %v2836_v35 = vadd.f32 %v2795_v30, %v6214_v6 }
 0x2b7   : > { %v4209_v8 = vadd.f32 %v4165_v53, %v3799_v37  ;;  %v3091_v25 = vpop.f32.mrf.mxu2 }
 0x2b8   : > { %v3134_v14 = vadd.f32 %v3091_v25, %v2835_v22 }
 0x2b9   : > { %v4245_v27 = vmul.f32 %v6662_v56, %v4209_v8 }
 0x2bb   : > { %v4281_v51 = vadd.f32 %v6673_v38, %v4245_v27  ;;  %v4167_v47 = vpop.f32.mrf.mxu0 }
 0x2bc   : > { %v3757_v12 = vpop.f32.mrf.mxu3  ;;  %v2797_v50 = vpop.f32.mrf.mxu1 }
 0x2bd   : > { %4313 = vst.msk [vmem:[%s6356_s14 + $0xc0] sm:$0xff] %vm703_vm3, %v4281_v51  ;;  %v3800_v29 = vadd.f32 %v3757_v12, %v3134_v14  ;;  %v2837_v59 = vadd.f32 %v2797_v50, %v6237_v42 }
 0x2bf   : > { %v4210_v58 = vadd.f32 %v4167_v47, %v3800_v29  ;;  %v3094_v19 = vpop.f32.mrf.mxu2 }
 0x2c0   : > { %v3135_v28 = vadd.f32 %v3094_v19, %v2836_v35 }
 0x2c1   : > { %v4246_v57 = vmul.f32 %v6662_v56, %v4210_v58 }
 0x2c3   : > { %v4282_v20 = vadd.f32 %v6673_v38, %v4246_v57  ;;  %v4170_v16 = vpop.f32.mrf.mxu0 }
 0x2c4   : > { %v3760_v3 = vpop.f32.mrf.mxu3  ;;  %v2800_v33 = vpop.f32.mrf.mxu1 }
 0x2c5   : > { %4314 = vst.msk [vmem:[%s6356_s14 + $0xc8] sm:$0xff] %vm703_vm3, %v4282_v20  ;;  %v3801_v46 = vadd.f32 %v3760_v3, %v3135_v28  ;;  %v2838_v4 = vadd.f32 %v2800_v33, %v6257_v34 }
 0x2c7   : > { %v4211_v60 = vadd.f32 %v4170_v16, %v3801_v46  ;;  %v3096_v1 = vpop.f32.mrf.mxu2 }
 0x2c8   : > { %v3136_v6 = vadd.f32 %v3096_v1, %v2837_v59 }
 0x2c9   : > { %v4247_v62 = vmul.f32 %v6662_v56, %v4211_v60 }
 0x2cb   : > { %v4283_v39 = vadd.f32 %v6673_v38, %v4247_v62  ;;  %v4172_v5 = vpop.f32.mrf.mxu0 }
 0x2cc   : > { %v3762_v48 = vpop.f32.mrf.mxu3  ;;  %v2802_v41 = vpop.f32.mrf.mxu1 }
 0x2cd   : > { %4315 = vst.msk [vmem:[%s6356_s14 + $0xd0] sm:$0xff] %vm703_vm3, %v4283_v39  ;;  %v3802_v15 = vadd.f32 %v3762_v48, %v3136_v6  ;;  %v2839_v36 = vadd.f32 %v2802_v41, %v6280_v55 }
 0x2cf   : > { %v4212_v21 = vadd.f32 %v4172_v5, %v3802_v15  ;;  %v3099_v63 = vpop.f32.mrf.mxu2 }
 0x2d0   : > { %v3137_v42 = vadd.f32 %v3099_v63, %v2838_v4 }
 0x2d1   : > { %v4248_v7 = vmul.f32 %v6662_v56, %v4212_v21 }
 0x2d3   : > { %v4284_v18 = vadd.f32 %v6673_v38, %v4248_v7  ;;  %v4175_v11 = vpop.f32.mrf.mxu0 }
 0x2d4   : > { %v3765_v32 = vpop.f32.mrf.mxu3  ;;  %v2805_v61 = vpop.f32.mrf.mxu1 }
 0x2d5   : > { %4316 = vst.msk [vmem:[%s6356_s14 + $0xd8] sm:$0xff] %vm703_vm3, %v4284_v18  ;;  %v3803_v9 = vadd.f32 %v3765_v32, %v3137_v42  ;;  %v2840_v2 = vadd.f32 %v2805_v61, %v6298_v40 }
 0x2d7   : > { %v4213_v45 = vadd.f32 %v4175_v11, %v3803_v9  ;;  %v3101_v23 = vpop.f32.mrf.mxu2 }
 0x2d8   : > { %v3138_v34 = vadd.f32 %v3101_v23, %v2839_v36 }
 0x2d9   : > { %v4249_v52 = vmul.f32 %v6662_v56, %v4213_v45 }
 0x2db   : > { %v4285_v0 = vadd.f32 %v6673_v38, %v4249_v52  ;;  %v4177_v17 = vpop.f32.mrf.mxu0 }
 0x2dc   : > { %v3767_v43 = vpop.f32.mrf.mxu3  ;;  %v2807_v13 = vpop.f32.mrf.mxu1 }
 0x2dd   : > { %4317 = vst.msk [vmem:[%s6356_s14 + $0xe0] sm:$0xff] %vm703_vm3, %v4285_v0  ;;  %v3804_v44 = vadd.f32 %v3767_v43, %v3138_v34  ;;  %v2841_v8 = vadd.f32 %v2807_v13, %v6319_v49 }
 0x2df   : > { %v4214_v54 = vadd.f32 %v4177_v17, %v3804_v44  ;;  %v3104_v31 = vpop.f32.mrf.mxu2 }
 0x2e0   : > { %v3139_v10 = vadd.f32 %v3104_v31, %v2840_v2 }
 0x2e1   : > { %v4250_v55 = vmul.f32 %v6662_v56, %v4214_v54 }
 0x2e3   : > { %v4286_v26 = vadd.f32 %v6673_v38, %v4250_v55  ;;  %v4180_v53 = vpop.f32.mrf.mxu0 }
 0x2e4   : > { %v3770_v24 = vpop.f32.mrf.mxu3 }
 0x2e5   : > { %4318 = vst.msk [vmem:[%s6356_s14 + $0xe8] sm:$0xff] %vm703_vm3, %v4286_v26  ;;  %v3805_v30 = vadd.f32 %v3770_v24, %v3139_v10 }
 0x2e7   : > { %v4215_v37 = vadd.f32 %v4180_v53, %v3805_v30  ;;  %v3106_v22 = vpop.f32.mrf.mxu2 }
 0x2e8   : > { %v3140_v25 = vadd.f32 %v3106_v22, %v2841_v8 }
 0x2e9   : > { %v4251_v40 = vmul.f32 %v6662_v56, %v4215_v37 }
 0x2eb   : > { %v4287_v27 = vadd.f32 %v6673_v38, %v4251_v40  ;;  %v4182_v47 = vpop.f32.mrf.mxu0 }
 0x2ec   : > { %v3772_v14 = vpop.f32.mrf.mxu3 }
 0x2ed   : > { %4319 = vst.msk [vmem:[%s6356_s14 + $0xf0] sm:$0xff] %vm703_vm3, %v4287_v27  ;;  %v3806_v51 = vadd.f32 %v3772_v14, %v3140_v25 }
 0x2ef   : > { %v4216_v12 = vadd.f32 %v4182_v47, %v3806_v51 }
 0x2f1   : > { %v4252_v50 = vmul.f32 %v6662_v56, %v4216_v12 }
 0x2f3   : > { %v4288_v29 = vadd.f32 %v6673_v38, %v4252_v50 }
 0x2f5   : > { %4320 = vst.msk [vmem:[%s6356_s14 + $0xf8] sm:$0xff] %vm703_vm3, %v4288_v29 }
 0x2f6 PF: > { %s14_s15 = sadd.s32 1, %s5208_s15  }
 0x2f7   : > { %p11_p4 = scmp.ge.s32.totalorder %s14_s15, 4  }
 0x2f9   :  { %13 = sbr.rel (!%p11_p4) target bundleno = 1 (0x1), region = 76 }

</bundles_post_ra>
